<compile_context>
chip_gen: v7x
topology: tpu7x:2x2x1
jax: 0.10.0
libtpu: 0.0.40
codegen_flags: <defaults>
</compile_context>

<pallas_src>
import numpy as np
import jax
import jax.numpy as jnp
from jax.experimental import pallas as pl
from jax.experimental.pallas import tpu as pltpu

# ----------------------------- hyperparameters (small) -----------------------------
D_Q_IN, D_K_IN, D_V_IN = 32, 40, 20
D_QK, D_V, NUM_HEADS = 16, 3, 12          # num_heads * d_v == 36 (pano affinity width)
D_OUT = 64
B, D2, P = 1, 36, 24                      # B * D2 == 36 rows, P attended positions per row
N = B * D2
F_DIM = NUM_HEADS * D_QK                  # 192
G_DIM = NUM_HEADS * D_V                   # 36
SCALE = 1.0 / (D_QK ** 0.5)
LN_EPS = 1e-6


# ----------------------------- pano affinity constant ------------------------------
def get_pano_affinity():
    pano_a = np.eye(36, dtype=np.float64)
    for view_id in range(0, 12):
        pano_a[view_id, view_id + 12] = 1
        if view_id == 0:
            pano_a[view_id, 11] = 1
            pano_a[view_id, 11 + 12] = 1
        else:
            pano_a[view_id, view_id - 1] = 1
            pano_a[view_id, view_id - 1 + 12] = 1
        if view_id == 11:
            pano_a[view_id, 0] = 1
            pano_a[view_id, 0 + 12] = 1
        else:
            pano_a[view_id, view_id + 1] = 1
            pano_a[view_id, view_id + 1 + 12] = 1
    for view_id in range(12, 24):
        pano_a[view_id, view_id + 12] = 1
        pano_a[view_id, view_id - 12] = 1
        if view_id == 12:
            pano_a[view_id, 23] = 1
            pano_a[view_id, 23 + 12] = 1
            pano_a[view_id, 23 - 12] = 1
        else:
            pano_a[view_id, view_id - 1] = 1
            pano_a[view_id, view_id - 1 + 12] = 1
            pano_a[view_id, view_id - 1 - 12] = 1
        if view_id == 23:
            pano_a[view_id, 12] = 1
            pano_a[view_id, 12 + 12] = 1
            pano_a[view_id, 12 - 12] = 1
        else:
            pano_a[view_id, view_id + 1] = 1
            pano_a[view_id, view_id + 1 + 12] = 1
            pano_a[view_id, view_id + 1 - 12] = 1
    for view_id in range(24, 36):
        pano_a[view_id, view_id - 12] = 1
        if view_id == 24:
            pano_a[view_id, 35] = 1
            pano_a[view_id, 35 - 12] = 1
        else:
            pano_a[view_id, view_id - 1] = 1
            pano_a[view_id, view_id - 1 - 12] = 1
        if view_id == 35:
            pano_a[view_id, 24] = 1
            pano_a[view_id, 24 - 12] = 1
        else:
            pano_a[view_id, view_id + 1] = 1
            pano_a[view_id, view_id + 1 - 12] = 1
    assert np.sum(pano_a - pano_a.T) == 0
    # cv.GaussianBlur(pano_a, (3,3), 0): separable [0.25, 0.5, 0.25] kernel (reflect border).
    k = np.array([0.25, 0.5, 0.25], dtype=np.float64)
    pad = np.pad(pano_a, 1, mode="reflect")
    tmp = pad[:, :-2] * k[0] + pad[:, 1:-1] * k[1] + pad[:, 2:] * k[2]
    pano_a = tmp[:-2, :] * k[0] + tmp[1:-1, :] * k[1] + tmp[2:, :] * k[2]
    pano_a[np.eye(36, dtype=int) == 1] = 1
    return pano_a


def build_pano_constant():
    pa = get_pano_affinity().astype(np.float32)
    pa[pa == 1] = 0.95
    pa[pa == 0] = 0.05
    return pa


# ------------------------ host-side constant 0/1 matrices ---------------------------
def build_selector_constants(n_rows, n_pos):
    # head_sum:  (F, H)   head_sum[f, h] = 1 iff feature f belongs to head h
    head_sum = (np.arange(F_DIM)[:, None] // D_QK ==
                np.arange(NUM_HEADS)[None, :]).astype(np.float32)
    # expand:    (H, G)   expand[h, g] = 1 iff value lane g belongs to head h
    expand = (np.arange(NUM_HEADS)[:, None] ==
              np.arange(G_DIM)[None, :] // D_V).astype(np.float32)
    # rep:       (N*P, N) rep[n*P+p, n] = 1   (row replication: query row -> its P key rows)
    rows = np.arange(n_rows * n_pos)
    rep = (rows[:, None] // n_pos == np.arange(n_rows)[None, :]).astype(np.float32)
    # seg:       (N, N*P) seg = rep.T          (segment sum over the P positions of a row)
    seg = np.ascontiguousarray(rep.T)
    return (jnp.asarray(head_sum), jnp.asarray(expand),
            jnp.asarray(rep), jnp.asarray(seg))


# --------------------------------- Pallas kernel ------------------------------------
def pano_attention_kernel(q_ref, k_ref, v_ref, wq_ref, wk_ref, wv_ref, wf_ref,
                          hs_ref, ex_ref, rep_ref, seg_ref, pano_ref,
                          gamma_ref, beta_ref, o_ref):
    """Fused PanoAttention forward, single invocation, all 2-D ops.

    N = B*D2 rows, P attended positions per row, H heads; k/v rows ordered r = n*P + p.
    Group-structured ops (query replication, per-row softmax denominator, sum over P)
    are expressed as matmuls with constant 0/1 matrices, so the kernel needs no
    reshapes/transposes — only MXU matmuls, element-wise VPU math and lane reductions.
    """
    f32, bf16 = jnp.float32, jnp.bfloat16

    # Projections (bias-free): bf16 operands, f32 accumulation on the MXU.
    qp = jnp.dot(q_ref[...].astype(bf16), wq_ref[...], preferred_element_type=f32)  # (N, F)
    kp = jnp.dot(k_ref[...].astype(bf16), wk_ref[...], preferred_element_type=f32)  # (N*P, F)
    vp = jnp.dot(v_ref[...].astype(bf16), wv_ref[...], preferred_element_type=f32)  # (N*P, G)

    # Replicate each query row across its P key rows (MXU), then per-head Q.K energies
    # via the 0/1 head-sum selector matmul.
    qp_rep = jnp.dot(rep_ref[...], qp, preferred_element_type=f32)                  # (N*P, F)
    energy = jnp.dot(kp * qp_rep, hs_ref[...], preferred_element_type=f32) * SCALE  # (N*P, H)

    # Softmax over the P positions of each row (reference: softmax over P).
    # NOTE: a per-head global max is used for exp stabilisation; softmax is shift-invariant
    # per (row, head) group, so this equals the per-group-max form up to float rounding.
    m = jnp.max(energy, axis=0, keepdims=True)                                      # (1, H)
    e = jnp.exp(energy - m)                                                         # (N*P, H)
    den = jnp.dot(rep_ref[...],
                  jnp.dot(seg_ref[...], e, preferred_element_type=f32),
                  preferred_element_type=f32)                                       # (N*P, H)
    attn = e / den                                                                  # (N*P, H)

    # attended_V[n, g] = sum_p attn[n*P+p, g // d_v] * vp[n*P+p, g]
    attn_g = jnp.dot(attn, ex_ref[...], preferred_element_type=f32)                 # (N*P, G)
    att = jnp.dot(seg_ref[...], attn_g * vp, preferred_element_type=f32)            # (N, G)

    # Pano-affinity element-wise weighting + final linear + LayerNorm (vector math in f32).
    att = att * pano_ref[...]
    out = jnp.dot(att.astype(bf16), wf_ref[...], preferred_element_type=f32)        # (N, D_OUT)
    mu = jnp.mean(out, axis=-1, keepdims=True)
    var = jnp.mean(jnp.square(out - mu), axis=-1, keepdims=True)
    out = (out - mu) * jax.lax.rsqrt(var + LN_EPS)
    o_ref[...] = (out * gamma_ref[...] + beta_ref[...]).astype(o_ref.dtype)


def pano_attention_forward(Q, K, V, params, knowledge=None,
                           teacher_action_view_ids=None, mask=None):
    del knowledge, teacher_action_view_ids, mask  # unused by the reference forward
    Bq, D2q, _ = Q.shape
    _, Pk, _, _ = K.shape
    Nn = Bq * D2q

    pano = params["pano"]
    if pano.shape != (Nn, G_DIM):
        raise ValueError(
            "PanoAttention requires B*D2 == 36 == num_heads*d_v for the pano broadcast; "
            f"got rows={Nn}, num_heads*d_v={G_DIM}, pano={pano.shape}")

    # Glue (mirrors K.permute(0,2,1,3) of the reference). This tiny (~200 KB) transpose
    # copy is deliberately kept outside the kernel: the P-major source layout would force
    # non-sublane-aligned relayouts in-kernel that cost more than this one XLA copy.
    q2 = Q.reshape(Nn, D_Q_IN)
    k_flat = jnp.transpose(K, (0, 2, 1, 3)).reshape(Nn * Pk, D_K_IN)
    v_flat = jnp.transpose(V, (0, 2, 1, 3)).reshape(Nn * Pk, D_V_IN)

    # Weights pre-transposed to (in, out); bf16 operands, f32 MXU accumulation in-kernel.
    wqT = params["Wq"].T.astype(jnp.bfloat16)
    wkT = params["Wk"].T.astype(jnp.bfloat16)
    wvT = params["Wv"].T.astype(jnp.bfloat16)
    wfT = params["Wf"].T.astype(jnp.bfloat16)

    head_sum, expand, rep, seg = build_selector_constants(Nn, Pk)
    gamma = params["gamma"].reshape(1, D_OUT)
    beta = params["beta"].reshape(1, D_OUT)

    def full2d(shape):
        return pl.BlockSpec(shape, lambda i: (0, 0))

    out = pl.pallas_call(
        pano_attention_kernel,
        out_shape=jax.ShapeDtypeStruct((Nn, D_OUT), jnp.float32),
        grid=(1,),
        in_specs=[
            full2d((Nn, D_Q_IN)),            # q
            full2d((Nn * Pk, D_K_IN)),       # k (row = n*P + p)
            full2d((Nn * Pk, D_V_IN)),       # v
            full2d((D_Q_IN, F_DIM)),         # Wq^T (bf16)
            full2d((D_K_IN, F_DIM)),         # Wk^T (bf16)
            full2d((D_V_IN, G_DIM)),         # Wv^T (bf16)
            full2d((G_DIM, D_OUT)),          # Wf^T (bf16)
            full2d((F_DIM, NUM_HEADS)),      # head-sum selector
            full2d((NUM_HEADS, G_DIM)),      # head-expand selector
            full2d((Nn * Pk, Nn)),           # row replication
            full2d((Nn, Nn * Pk)),           # segment sum
            full2d((Nn, G_DIM)),             # pano affinity
            full2d((1, D_OUT)),              # gamma
            full2d((1, D_OUT)),              # beta
        ],
        out_specs=full2d((Nn, D_OUT)),       # single lane-dense (36, 64) store
        compiler_params=pltpu.CompilerParams(
            dimension_semantics=("arbitrary",),
            vmem_limit_bytes=32 * 1024 * 1024),
    )(q2, k_flat, v_flat, wqT, wkT, wvT, wfT,
      head_sum, expand, rep, seg, pano, gamma, beta)

    return out.reshape(Bq, D2q, D_OUT)


# ------------------------------- numpy reference -------------------------------------
def reference_forward_np(Q, K, V, Wq, Wk, Wv, Wf, gamma, beta, pano):
    Bq, D2q, _ = Q.shape
    _, Pk, _, _ = K.shape
    Nn = Bq * D2q
    q2 = Q.reshape(Nn, D_Q_IN)
    k3 = np.transpose(K, (0, 2, 1, 3)).reshape(Nn, Pk, D_K_IN)
    v3 = np.transpose(V, (0, 2, 1, 3)).reshape(Nn, Pk, D_V_IN)
    qp = q2 @ Wq.T
    kp = k3 @ Wk.T
    vp = v3 @ Wv.T
    qh = qp.reshape(Nn, NUM_HEADS, D_QK)
    kh = kp.reshape(Nn, Pk, NUM_HEADS, D_QK)
    vh = vp.reshape(Nn, Pk, NUM_HEADS, D_V)
    energy = np.einsum("nhd,nphd->nhp", qh, kh) * SCALE
    energy = energy - energy.max(axis=-1, keepdims=True)
    e = np.exp(energy)
    attn = e / e.sum(axis=-1, keepdims=True)
    att = np.einsum("nhp,nphe->nhe", attn, vh).reshape(Nn, NUM_HEADS * D_V)
    att = att * pano
    out = att @ Wf.T
    mu = out.mean(-1, keepdims=True)
    var = ((out - mu) ** 2).mean(-1, keepdims=True)
    out = (out - mu) / np.sqrt(var + LN_EPS) * gamma + beta
    return out.reshape(Bq, D2q, D_OUT)


# ------------------------------------- main -------------------------------------------
if __name__ == "__main__":
    key = jax.random.PRNGKey(0)
    ks = jax.random.split(key, 7)

    # deterministic synthetic parameters (torch Linear layout: (out_features, in_features))
    Wq = jax.random.normal(ks[0], (NUM_HEADS * D_QK, D_Q_IN), jnp.float32) / np.sqrt(D_Q_IN)
    Wk = jax.random.normal(ks[1], (NUM_HEADS * D_QK, D_K_IN), jnp.float32) / np.sqrt(D_K_IN)
    Wv = jax.random.normal(ks[2], (NUM_HEADS * D_V, D_V_IN), jnp.float32) / np.sqrt(D_V_IN)
    Wf = jax.random.normal(ks[3], (D_OUT, NUM_HEADS * D_V), jnp.float32) / np.sqrt(NUM_HEADS * D_V)
    gamma = jnp.ones((D_OUT,), jnp.float32)   # LayerNorm default init
    beta = jnp.zeros((D_OUT,), jnp.float32)
    pano = jnp.asarray(build_pano_constant())

    params = dict(Wq=Wq, Wk=Wk, Wv=Wv, Wf=Wf, gamma=gamma, beta=beta, pano=pano)

    # deterministic example inputs
    Q = jax.random.normal(ks[4], (B, D2, D_Q_IN), jnp.float32)
    K = jax.random.normal(ks[5], (B, P, D2, D_K_IN), jnp.float32)
    V = jax.random.normal(ks[6], (B, P, D2, D_V_IN), jnp.float32)

    out = pano_attention_forward(Q, K, V, params)
    out = jax.block_until_ready(out)

    ref = reference_forward_np(
        np.asarray(Q), np.asarray(K), np.asarray(V),
        np.asarray(Wq), np.asarray(Wk), np.asarray(Wv), np.asarray(Wf),
        np.asarray(gamma), np.asarray(beta), np.asarray(pano))

    assert out.shape == (B, D2, D_OUT)
    diff = np.max(np.abs(np.asarray(out) - ref))
    assert np.allclose(np.asarray(out), ref, atol=5e-2, rtol=5e-2), f"max abs diff {diff}"
    print("KERNEL_OK")
</pallas_src>

<mosaic_0001>
module attributes {stable_mosaic.version = 11 : i64} {
  func.func @pano_attention_kernel(%arg0: i32, %arg1: memref<36x32xf32, #tpu.memory_space<vmem>>, %arg2: memref<864x40xf32, #tpu.memory_space<vmem>>, %arg3: memref<864x20xf32, #tpu.memory_space<vmem>>, %arg4: memref<32x192xbf16, #tpu.memory_space<vmem>>, %arg5: memref<40x192xbf16, #tpu.memory_space<vmem>>, %arg6: memref<20x36xbf16, #tpu.memory_space<vmem>>, %arg7: memref<36x64xbf16, #tpu.memory_space<vmem>>, %arg8: memref<192x12xf32, #tpu.memory_space<vmem>>, %arg9: memref<12x36xf32, #tpu.memory_space<vmem>>, %arg10: memref<864x36xf32, #tpu.memory_space<vmem>>, %arg11: memref<36x864xf32, #tpu.memory_space<vmem>>, %arg12: memref<36x36xf32, #tpu.memory_space<vmem>>, %arg13: memref<1x64xf32, #tpu.memory_space<vmem>>, %arg14: memref<1x64xf32, #tpu.memory_space<vmem>>, %arg15: memref<36x64xf32, #tpu.memory_space<vmem>>) attributes {dimension_semantics = [#tpu.dimension_semantics<arbitrary>], iteration_bounds = array<i64: 1>, scalar_prefetch = 0 : i64, scratch_operands = 0 : i64, tpu.core_type = #tpu.core_type<tc>, window_params = [{pipeline_mode = #tpu.pipeline_mode<synchronous>, transform_indices = @transform_0, window_bounds = array<i64: 36, 32>}, {pipeline_mode = #tpu.pipeline_mode<synchronous>, transform_indices = @transform_1, window_bounds = array<i64: 864, 40>}, {pipeline_mode = #tpu.pipeline_mode<synchronous>, transform_indices = @transform_2, window_bounds = array<i64: 864, 20>}, {pipeline_mode = #tpu.pipeline_mode<synchronous>, transform_indices = @transform_3, window_bounds = array<i64: 32, 192>}, {pipeline_mode = #tpu.pipeline_mode<synchronous>, transform_indices = @transform_4, window_bounds = array<i64: 40, 192>}, {pipeline_mode = #tpu.pipeline_mode<synchronous>, transform_indices = @transform_5, window_bounds = array<i64: 20, 36>}, {pipeline_mode = #tpu.pipeline_mode<synchronous>, transform_indices = @transform_6, window_bounds = array<i64: 36, 64>}, {pipeline_mode = #tpu.pipeline_mode<synchronous>, transform_indices = @transform_7, window_bounds = array<i64: 192, 12>}, {pipeline_mode = #tpu.pipeline_mode<synchronous>, transform_indices = @transform_8, window_bounds = array<i64: 12, 36>}, {pipeline_mode = #tpu.pipeline_mode<synchronous>, transform_indices = @transform_9, window_bounds = array<i64: 864, 36>}, {pipeline_mode = #tpu.pipeline_mode<synchronous>, transform_indices = @transform_10, window_bounds = array<i64: 36, 864>}, {pipeline_mode = #tpu.pipeline_mode<synchronous>, transform_indices = @transform_11, window_bounds = array<i64: 36, 36>}, {pipeline_mode = #tpu.pipeline_mode<synchronous>, transform_indices = @transform_12, window_bounds = array<i64: 1, 64>}, {pipeline_mode = #tpu.pipeline_mode<synchronous>, transform_indices = @transform_13, window_bounds = array<i64: 1, 64>}, {pipeline_mode = #tpu.pipeline_mode<synchronous>, transform_indices = @transform_14, window_bounds = array<i64: 36, 64>}]} {
    %c0 = arith.constant 0 : index
    %c0_0 = arith.constant 0 : index
    %0 = vector.load %arg1[%c0, %c0_0] : memref<36x32xf32, #tpu.memory_space<vmem>>, vector<36x32xf32>
    %1 = arith.truncf %0 : vector<36x32xf32> to vector<36x32xbf16>
    %c0_1 = arith.constant 0 : index
    %c0_2 = arith.constant 0 : index
    %2 = vector.load %arg4[%c0_1, %c0_2] : memref<32x192xbf16, #tpu.memory_space<vmem>>, vector<32x192xbf16>
    %cst = arith.constant dense<0.000000e+00> : vector<36x192xf32>
    %3 = tpu.matmul %1, %2, %cst {dimension_numbers = #tpu.dot_dimension_numbers<[1], [0], [0], [1], [0, 0, 1, 1], [], []>} : vector<36x32xbf16>, vector<32x192xbf16>, vector<36x192xf32> -> vector<36x192xf32>
    %c0_3 = arith.constant 0 : index
    %c0_4 = arith.constant 0 : index
    %4 = vector.load %arg2[%c0_3, %c0_4] : memref<864x40xf32, #tpu.memory_space<vmem>>, vector<864x40xf32>
    %5 = arith.truncf %4 : vector<864x40xf32> to vector<864x40xbf16>
    %c0_5 = arith.constant 0 : index
    %c0_6 = arith.constant 0 : index
    %6 = vector.load %arg5[%c0_5, %c0_6] : memref<40x192xbf16, #tpu.memory_space<vmem>>, vector<40x192xbf16>
    %cst_7 = arith.constant dense<0.000000e+00> : vector<864x192xf32>
    %7 = tpu.matmul %5, %6, %cst_7 {dimension_numbers = #tpu.dot_dimension_numbers<[1], [0], [0], [1], [0, 0, 1, 1], [], []>} : vector<864x40xbf16>, vector<40x192xbf16>, vector<864x192xf32> -> vector<864x192xf32>
    %c0_8 = arith.constant 0 : index
    %c0_9 = arith.constant 0 : index
    %8 = vector.load %arg3[%c0_8, %c0_9] : memref<864x20xf32, #tpu.memory_space<vmem>>, vector<864x20xf32>
    %9 = arith.truncf %8 : vector<864x20xf32> to vector<864x20xbf16>
    %c0_10 = arith.constant 0 : index
    %c0_11 = arith.constant 0 : index
    %10 = vector.load %arg6[%c0_10, %c0_11] : memref<20x36xbf16, #tpu.memory_space<vmem>>, vector<20x36xbf16>
    %cst_12 = arith.constant dense<0.000000e+00> : vector<864x36xf32>
    %11 = tpu.matmul %9, %10, %cst_12 {dimension_numbers = #tpu.dot_dimension_numbers<[1], [0], [0], [1], [0, 0, 1, 1], [], []>} : vector<864x20xbf16>, vector<20x36xbf16>, vector<864x36xf32> -> vector<864x36xf32>
    %c0_13 = arith.constant 0 : index
    %c0_14 = arith.constant 0 : index
    %12 = vector.load %arg10[%c0_13, %c0_14] : memref<864x36xf32, #tpu.memory_space<vmem>>, vector<864x36xf32>
    %cst_15 = arith.constant dense<0.000000e+00> : vector<864x192xf32>
    %13 = tpu.matmul %12, %3, %cst_15 {dimension_numbers = #tpu.dot_dimension_numbers<[1], [0], [0], [1], [0, 0, 1, 1], [], []>} : vector<864x36xf32>, vector<36x192xf32>, vector<864x192xf32> -> vector<864x192xf32>
    %14 = arith.mulf %7, %13 : vector<864x192xf32>
    %c0_16 = arith.constant 0 : index
    %c0_17 = arith.constant 0 : index
    %15 = vector.load %arg8[%c0_16, %c0_17] : memref<192x12xf32, #tpu.memory_space<vmem>>, vector<192x12xf32>
    %cst_18 = arith.constant dense<0.000000e+00> : vector<864x12xf32>
    %16 = tpu.matmul %14, %15, %cst_18 {dimension_numbers = #tpu.dot_dimension_numbers<[1], [0], [0], [1], [0, 0, 1, 1], [], []>} : vector<864x192xf32>, vector<192x12xf32>, vector<864x12xf32> -> vector<864x12xf32>
    %cst_19 = arith.constant 2.500000e-01 : f32
    %17 = vector.broadcast %cst_19 : f32 to vector<864x12xf32>
    %18 = arith.mulf %16, %17 : vector<864x12xf32>
    %cst_20 = arith.constant dense<0xFF800000> : vector<12xf32>
    %19 = vector.multi_reduction <maximumf>, %18, %cst_20 [0] : vector<864x12xf32> to vector<12xf32>
    %20 = vector.shape_cast %19 : vector<12xf32> to vector<1x12xf32>
    %21 = vector.broadcast %20 : vector<1x12xf32> to vector<864x12xf32>
    %22 = arith.subf %18, %21 : vector<864x12xf32>
    %23 = math.exp %22 : vector<864x12xf32>
    %c0_21 = arith.constant 0 : index
    %c0_22 = arith.constant 0 : index
    %24 = vector.load %arg10[%c0_21, %c0_22] : memref<864x36xf32, #tpu.memory_space<vmem>>, vector<864x36xf32>
    %c0_23 = arith.constant 0 : index
    %c0_24 = arith.constant 0 : index
    %25 = vector.load %arg11[%c0_23, %c0_24] : memref<36x864xf32, #tpu.memory_space<vmem>>, vector<36x864xf32>
    %cst_25 = arith.constant dense<0.000000e+00> : vector<36x12xf32>
    %26 = tpu.matmul %25, %23, %cst_25 {dimension_numbers = #tpu.dot_dimension_numbers<[1], [0], [0], [1], [0, 0, 1, 1], [], []>} : vector<36x864xf32>, vector<864x12xf32>, vector<36x12xf32> -> vector<36x12xf32>
    %cst_26 = arith.constant dense<0.000000e+00> : vector<864x12xf32>
    %27 = tpu.matmul %24, %26, %cst_26 {dimension_numbers = #tpu.dot_dimension_numbers<[1], [0], [0], [1], [0, 0, 1, 1], [], []>} : vector<864x36xf32>, vector<36x12xf32>, vector<864x12xf32> -> vector<864x12xf32>
    %28 = arith.divf %23, %27 : vector<864x12xf32>
    %c0_27 = arith.constant 0 : index
    %c0_28 = arith.constant 0 : index
    %29 = vector.load %arg9[%c0_27, %c0_28] : memref<12x36xf32, #tpu.memory_space<vmem>>, vector<12x36xf32>
    %cst_29 = arith.constant dense<0.000000e+00> : vector<864x36xf32>
    %30 = tpu.matmul %28, %29, %cst_29 {dimension_numbers = #tpu.dot_dimension_numbers<[1], [0], [0], [1], [0, 0, 1, 1], [], []>} : vector<864x12xf32>, vector<12x36xf32>, vector<864x36xf32> -> vector<864x36xf32>
    %c0_30 = arith.constant 0 : index
    %c0_31 = arith.constant 0 : index
    %31 = vector.load %arg11[%c0_30, %c0_31] : memref<36x864xf32, #tpu.memory_space<vmem>>, vector<36x864xf32>
    %32 = arith.mulf %30, %11 : vector<864x36xf32>
    %cst_32 = arith.constant dense<0.000000e+00> : vector<36x36xf32>
    %33 = tpu.matmul %31, %32, %cst_32 {dimension_numbers = #tpu.dot_dimension_numbers<[1], [0], [0], [1], [0, 0, 1, 1], [], []>} : vector<36x864xf32>, vector<864x36xf32>, vector<36x36xf32> -> vector<36x36xf32>
    %c0_33 = arith.constant 0 : index
    %c0_34 = arith.constant 0 : index
    %34 = vector.load %arg12[%c0_33, %c0_34] : memref<36x36xf32, #tpu.memory_space<vmem>>, vector<36x36xf32>
    %35 = arith.mulf %33, %34 : vector<36x36xf32>
    %36 = arith.truncf %35 : vector<36x36xf32> to vector<36x36xbf16>
    %c0_35 = arith.constant 0 : index
    %c0_36 = arith.constant 0 : index
    %37 = vector.load %arg7[%c0_35, %c0_36] : memref<36x64xbf16, #tpu.memory_space<vmem>>, vector<36x64xbf16>
    %cst_37 = arith.constant dense<0.000000e+00> : vector<36x64xf32>
    %38 = tpu.matmul %36, %37, %cst_37 {dimension_numbers = #tpu.dot_dimension_numbers<[1], [0], [0], [1], [0, 0, 1, 1], [], []>} : vector<36x36xbf16>, vector<36x64xbf16>, vector<36x64xf32> -> vector<36x64xf32>
    %cst_38 = arith.constant dense<0.000000e+00> : vector<36xf32>
    %39 = vector.multi_reduction <add>, %38, %cst_38 [1] : vector<36x64xf32> to vector<36xf32>
    %40 = vector.shape_cast %39 : vector<36xf32> to vector<36x1xf32>
    %cst_39 = arith.constant 6.400000e+01 : f32
    %41 = vector.broadcast %cst_39 : f32 to vector<36x1xf32>
    %42 = arith.divf %40, %41 : vector<36x1xf32>
    %43 = vector.broadcast %42 : vector<36x1xf32> to vector<36x64xf32>
    %44 = arith.subf %38, %43 : vector<36x64xf32>
    %45 = arith.mulf %44, %44 : vector<36x64xf32>
    %cst_40 = arith.constant dense<0.000000e+00> : vector<36xf32>
    %46 = vector.multi_reduction <add>, %45, %cst_40 [1] : vector<36x64xf32> to vector<36xf32>
    %47 = vector.shape_cast %46 : vector<36xf32> to vector<36x1xf32>
    %cst_41 = arith.constant 6.400000e+01 : f32
    %48 = vector.broadcast %cst_41 : f32 to vector<36x1xf32>
    %49 = arith.divf %47, %48 : vector<36x1xf32>
    %50 = vector.broadcast %42 : vector<36x1xf32> to vector<36x64xf32>
    %51 = arith.subf %38, %50 : vector<36x64xf32>
    %cst_42 = arith.constant 9.99999997E-7 : f32
    %52 = vector.broadcast %cst_42 : f32 to vector<36x1xf32>
    %53 = arith.addf %49, %52 : vector<36x1xf32>
    %54 = math.rsqrt %53 : vector<36x1xf32>
    %55 = vector.broadcast %54 : vector<36x1xf32> to vector<36x64xf32>
    %56 = arith.mulf %51, %55 : vector<36x64xf32>
    %c0_43 = arith.constant 0 : index
    %c0_44 = arith.constant 0 : index
    %57 = vector.load %arg13[%c0_43, %c0_44] : memref<1x64xf32, #tpu.memory_space<vmem>>, vector<1x64xf32>
    %58 = vector.broadcast %57 : vector<1x64xf32> to vector<36x64xf32>
    %59 = arith.mulf %56, %58 : vector<36x64xf32>
    %c0_45 = arith.constant 0 : index
    %c0_46 = arith.constant 0 : index
    %60 = vector.load %arg14[%c0_45, %c0_46] : memref<1x64xf32, #tpu.memory_space<vmem>>, vector<1x64xf32>
    %61 = vector.broadcast %60 : vector<1x64xf32> to vector<36x64xf32>
    %62 = arith.addf %59, %61 : vector<36x64xf32>
    %c0_47 = arith.constant 0 : index
    %c0_48 = arith.constant 0 : index
    %63 = vector.load %arg15[%c0_47, %c0_48] : memref<36x64xf32, #tpu.memory_space<vmem>>, vector<36x64xf32>
    tpu.vector_store %arg15[%c0_47, %c0_48], %62 {strides = array<i32>} : memref<36x64xf32, #tpu.memory_space<vmem>>, vector<36x64xf32>,
    return
  }
  func.func @transform_0(%arg0: i32) -> (i32, i32) {
    %c0_i32 = arith.constant 0 : i32
    %c0_i32_0 = arith.constant 0 : i32
    %c0_i32_1 = arith.constant 0 : i32
    return %c0_i32, %c0_i32_0 : i32, i32
  }
  func.func @transform_1(%arg0: i32) -> (i32, i32) {
    %c0_i32 = arith.constant 0 : i32
    %c0_i32_0 = arith.constant 0 : i32
    %c0_i32_1 = arith.constant 0 : i32
    return %c0_i32, %c0_i32_0 : i32, i32
  }
  func.func @transform_2(%arg0: i32) -> (i32, i32) {
    %c0_i32 = arith.constant 0 : i32
    %c0_i32_0 = arith.constant 0 : i32
    %c0_i32_1 = arith.constant 0 : i32
    return %c0_i32, %c0_i32_0 : i32, i32
  }
  func.func @transform_3(%arg0: i32) -> (i32, i32) {
    %c0_i32 = arith.constant 0 : i32
    %c0_i32_0 = arith.constant 0 : i32
    %c0_i32_1 = arith.constant 0 : i32
    return %c0_i32, %c0_i32_0 : i32, i32
  }
  func.func @transform_4(%arg0: i32) -> (i32, i32) {
    %c0_i32 = arith.constant 0 : i32
    %c0_i32_0 = arith.constant 0 : i32
    %c0_i32_1 = arith.constant 0 : i32
    return %c0_i32, %c0_i32_0 : i32, i32
  }
  func.func @transform_5(%arg0: i32) -> (i32, i32) {
    %c0_i32 = arith.constant 0 : i32
    %c0_i32_0 = arith.constant 0 : i32
    %c0_i32_1 = arith.constant 0 : i32
    return %c0_i32, %c0_i32_0 : i32, i32
  }
  func.func @transform_6(%arg0: i32) -> (i32, i32) {
    %c0_i32 = arith.constant 0 : i32
    %c0_i32_0 = arith.constant 0 : i32
    %c0_i32_1 = arith.constant 0 : i32
    return %c0_i32, %c0_i32_0 : i32, i32
  }
  func.func @transform_7(%arg0: i32) -> (i32, i32) {
    %c0_i32 = arith.constant 0 : i32
    %c0_i32_0 = arith.constant 0 : i32
    %c0_i32_1 = arith.constant 0 : i32
    return %c0_i32, %c0_i32_0 : i32, i32
  }
  func.func @transform_8(%arg0: i32) -> (i32, i32) {
    %c0_i32 = arith.constant 0 : i32
    %c0_i32_0 = arith.constant 0 : i32
    %c0_i32_1 = arith.constant 0 : i32
    return %c0_i32, %c0_i32_0 : i32, i32
  }
  func.func @transform_9(%arg0: i32) -> (i32, i32) {
    %c0_i32 = arith.constant 0 : i32
    %c0_i32_0 = arith.constant 0 : i32
    %c0_i32_1 = arith.constant 0 : i32
    return %c0_i32, %c0_i32_0 : i32, i32
  }
  func.func @transform_10(%arg0: i32) -> (i32, i32) {
    %c0_i32 = arith.constant 0 : i32
    %c0_i32_0 = arith.constant 0 : i32
    %c0_i32_1 = arith.constant 0 : i32
    return %c0_i32, %c0_i32_0 : i32, i32
  }
  func.func @transform_11(%arg0: i32) -> (i32, i32) {
    %c0_i32 = arith.constant 0 : i32
    %c0_i32_0 = arith.constant 0 : i32
    %c0_i32_1 = arith.constant 0 : i32
    return %c0_i32, %c0_i32_0 : i32, i32
  }
  func.func @transform_12(%arg0: i32) -> (i32, i32) {
    %c0_i32 = arith.constant 0 : i32
    %c0_i32_0 = arith.constant 0 : i32
    %c0_i32_1 = arith.constant 0 : i32
    return %c0_i32, %c0_i32_0 : i32, i32
  }
  func.func @transform_13(%arg0: i32) -> (i32, i32) {
    %c0_i32 = arith.constant 0 : i32
    %c0_i32_0 = arith.constant 0 : i32
    %c0_i32_1 = arith.constant 0 : i32
    return %c0_i32, %c0_i32_0 : i32, i32
  }
  func.func @transform_14(%arg0: i32) -> (i32, i32) {
    %c0_i32 = arith.constant 0 : i32
    %c0_i32_0 = arith.constant 0 : i32
    %c0_i32_1 = arith.constant 0 : i32
    return %c0_i32, %c0_i32_0 : i32, i32
  }
}

</mosaic_0001>

<bundles_post_ra>
// kernel: tpu_custom_call.1
= control target key start
LH: loop header
LB: loop body
LE: loop exit
PB: predicated region body
PF: predicated region fallthrough
CT: control target
= control target key end

     0   :  { %v15399_v2 = vmov 0   ;;  %vm81_vm0 = vcmask 261120   ;;  %vm507_vm1 = vcmask 1043456   ;;  %vm1424_vm2 = vcmask 1041408   ;;  %s15382_s0 = inlined_call_operand.vmem [shape: f32[36,32], index: 0, kind: input, shape index: {}]   ;;  %s15383_s1 = inlined_call_operand.vmem [shape: f32[864,40], index: 1, kind: input, shape index: {}]   ;;  %s15384_s2 = inlined_call_operand.vmem [shape: f32[864,20], index: 2, kind: input, shape index: {}]   ;;  %s15385_s3 = inlined_call_operand.vmem [shape: bf16[32,192], index: 3, kind: input, shape index: {}]   ;;  %s15386_s4 = inlined_call_operand.vmem [shape: bf16[40,192], index: 4, kind: input, shape index: {}]   ;;  %s15387_s5 = inlined_call_operand.vmem [shape: bf16[20,36], index: 5, kind: input, shape index: {}]   ;;  %s15388_s6 = inlined_call_operand.vmem [shape: bf16[36,64], index: 6, kind: input, shape index: {}]   ;;  %s15389_s7 = inlined_call_operand.vmem [shape: f32[192,12], index: 7, kind: input, shape index: {}]   ;;  %s15390_s8 = inlined_call_operand.vmem [shape: f32[12,36], index: 8, kind: input, shape index: {}]   ;;  %s15391_s9 = inlined_call_operand.vmem [shape: f32[864,36], index: 9, kind: input, shape index: {}]   ;;  %s15392_s10 = inlined_call_operand.vmem [shape: f32[36,864], index: 10, kind: input, shape index: {}]   ;;  %s15393_s11 = inlined_call_operand.vmem [shape: f32[36,36], index: 11, kind: input, shape index: {}]   ;;  %s15394_s12 = inlined_call_operand.vmem [shape: f32[1,64], index: 12, kind: input, shape index: {}]   ;;  %s15395_s13 = inlined_call_operand.vmem [shape: f32[1,64], index: 13, kind: input, shape index: {}]   ;;  %s15396_s14 = inlined_call_operand.hbm [shape: f32[36,64], index: 14, kind: output, shape index: {}]  }
   0x1   :  { %v9739_v0 = vld [vmem:[%s15385_s3 + $0x4] ss:$8 sps:$4 sm:$0xff]   ;;  %v9741_v1 = vld [vmem:[%s15385_s3] ss:$8 sps:$4 sm:$0xff]   ;;  %123 = vmatprep.mubr.bf16.mxu0 %v15399_v2  ;;  %546 = vmatprep.mubr.bf16.mxu1 %v15399_v2  ;;  %v9742_v3 = vld [vmem:[%s15385_s3 + $0x14] ss:$8 sps:$4 sm:$0xff]  }
   0x2   :  { %91 = vmatprep.subr.bf16.mxu0 %v9739_v0  ;;  %v9744_v4 = vld [vmem:[%s15385_s3 + $0x10] ss:$8 sps:$4 sm:$0xff]   ;;  %v49_v5 = vld [vmem:[%s15382_s0] sm:$0xff]  ;;  %v50_v6 = vld [vmem:[%s15382_s0 + $0x8] sm:$0xff]  ;;  %vm344_vm3 = vcmask 326656   ;;  %vm1261_vm4 = vcmask 162816  }
   0x3   :  { %92 = vmatpush1.bf16.msra.mxu0 %v9741_v1  ;;  %v9745_v7 = vld [vmem:[%s15386_s4 + $0x4] ss:$8 sps:$4 sm:$0xff]   ;;  %v9747_v8 = vld [vmem:[%s15386_s4] ss:$8 sps:$4 sm:$0xff]   ;;  %v54_v9 = vpack.c.bf16 %v50_v6, %v49_v5  ;;  %v9748_v10 = vld [vmem:[%s15386_s4 + $0x14] ss:$8 sps:$4 sm:$0xff]  }
   0x4   :  { %93 = vmatprep.subr.bf16.mxu0 %v9742_v3  ;;  %514 = vmatprep.subr.bf16.mxu1 %v9745_v7  ;;  %v9750_v11 = vld [vmem:[%s15386_s4 + $0x10] ss:$8 sps:$4 sm:$0xff]   ;;  %v9751_v12 = vld [vmem:[%s15387_s5] sm:$0xff]   ;;  %v9754_v16 = vld [vmem:[%s15387_s5 + $0x8] ss:$0 sps:$4 sm:$0x33]  }
   0x5   :  { %515 = vmatpush1.bf16.msra.mxu1 %v9747_v8  ;;  %v318_v13 = vld [vmem:[%s15386_s4 + $0x20] sm:$0xff]  ;;  %v51_v17 = vld [vmem:[%s15382_s0 + $0x10] sm:$0xff]  ;;  %v52_v18 = vld [vmem:[%s15382_s0 + $0x18] sm:$0xff]  ;;  %v1426_v22 = vsel %vm1424_vm2, %v9754_v16, 0 }
   0x6   :  { %516 = vmatprep.subr.bf16.mxu1 %v9748_v10  ;;  %v7731_v14 = vcombine.high %v318_v13, %v318_v13  ;;  %v7730_v15 = vcombine.low %v318_v13, %v318_v13  ;;  %v152_v19 = vld [vmem:[%s15383_s1] sm:$0xff]  ;;  %v153_v20 = vld [vmem:[%s15383_s1 + $0x8] sm:$0xff]  ;;  %v55_v23 = vpack.c.bf16 %v52_v18, %v51_v17  ;;  %v154_v26 = vld [vmem:[%s15383_s1 + $0x10] sm:$0xff] }
   0x7   :  { %94 = vmatpush1.bf16.msra.mxu0 %v9744_v4  ;;  %v260_v24 = vpack.c.bf16 %v153_v20, %v152_v19  ;;  %v53_v25 = vld [vmem:[%s15382_s0 + $0x20] sm:$0xf]  ;;  %v155_v27 = vld [vmem:[%s15383_s1 + $0x18] sm:$0xff]  ;;  %v1088_v29 = vld [vmem:[%s15384_s2 + $0x8] sm:$0xff] }
   0x8   :  { %8898 = vmatprep.subr.bf16.mxu0 %v9751_v12  ;;  %v509_v21 = vsel %vm507_vm1, %v7730_v15, 0  ;;  %v1087_v28 = vld [vmem:[%s15384_s2] sm:$0xff]  ;;  %v56_v30 = vpack.c.bf16 %v53_v25, %v53_v25  ;;  %v261_v31 = vpack.c.bf16 %v155_v27, %v154_v26  ;;  %v1089_v33 = vld [vmem:[%s15384_s2 + $0x10] sm:$0xff]  ;;  %v1090_v34 = vld [vmem:[%s15384_s2 + $0x18] sm:$0xff] }
   0x9   :  { %517 = vmatpush1.bf16.msra.mxu1 %v9750_v11  ;;  %v1195_v32 = vpack.c.bf16 %v1088_v29, %v1087_v28  ;;  %v156_v35 = vld [vmem:[%s15383_s1 + $0x20] sm:$0xff]  ;;  %v157_v36 = vld [vmem:[%s15383_s1 + $0x28] sm:$0xff]  ;;  %v1196_v39 = vpack.c.bf16 %v1090_v34, %v1089_v33  ;;  %v1093_v42 = vld [vmem:[%s15384_s2 + $0x30] sm:$0xff] }
   0xa   :  { %7723 = vmatmul.mubr.msk.bf16.vlgmr.msra.gmra.mrb[0].mxu0 %vm81_vm0, %v54_v9  ;;  %7732 = vmatprep.subr.msk.bf16.mxu1 %vm507_vm1, %v7731_v14  ;;  %v1091_v37 = vld [vmem:[%s15384_s2 + $0x20] sm:$0xff]  ;;  %v1092_v38 = vld [vmem:[%s15384_s2 + $0x28] sm:$0xff]  ;;  %v262_v40 = vpack.c.bf16 %v157_v36, %v156_v35  ;;  %v1094_v43 = vld [vmem:[%s15384_s2 + $0x38] sm:$0xff] }
   0xb   :  { %133 = vmatprep.mubr.bf16.mxu0 %v15399_v2  ;;  %8899 = vmatpush3.bf16.msra.mxu0 %v9751_v12  ;;  %v1197_v41 = vpack.c.bf16 %v1092_v38, %v1091_v37  ;;  %v158_v44 = vld [vmem:[%s15383_s1 + $0x30] sm:$0xff]  ;;  %v159_v45 = vld [vmem:[%s15383_s1 + $0x38] sm:$0xff]  ;;  %v1095_v46 = vld [vmem:[%s15384_s2 + $0x40] sm:$0xff]  ;;  %v1198_v48 = vpack.c.bf16 %v1094_v43, %v1093_v42 }
   0xc   :  { %9730 = vmatprep.subr.msk.bf16.mxu0 %vm1424_vm2, %v9754_v16  ;;  %v1096_v47 = vld [vmem:[%s15384_s2 + $0x48] sm:$0xff]  ;;  %v263_v49 = vpack.c.bf16 %v159_v45, %v158_v44  ;;  %v1097_v51 = vld [vmem:[%s15384_s2 + $0x50] sm:$0xff]  ;;  %v1098_v52 = vld [vmem:[%s15384_s2 + $0x58] sm:$0xff] }
   0xd   :  { %519 = vmatpush1.bf16.msra.mxu1 %v509_v21  ;;  %v1199_v50 = vpack.c.bf16 %v1096_v47, %v1095_v46  ;;  %v160_v53 = vld [vmem:[%s15383_s1 + $0x40] sm:$0xff]  ;;  %v161_v54 = vld [vmem:[%s15383_s1 + $0x48] sm:$0xff]  ;;  %v1200_v57 = vpack.c.bf16 %v1098_v52, %v1097_v51 }
   0xe   :  { %v1099_v55 = vld [vmem:[%s15384_s2 + $0x60] sm:$0xff]  ;;  %v1100_v56 = vld [vmem:[%s15384_s2 + $0x68] sm:$0xff]  ;;  %v264_v58 = vpack.c.bf16 %v161_v54, %v160_v53 }
   0xf   :  { %8901 = vmatpush3.bf16.msra.mxu0 %v1426_v22  ;;  %v1201_v59 = vpack.c.bf16 %v1100_v56, %v1099_v55 }
  0x10   :  { %7733 = vmatmul.mubr.msk.bf16.vlgmr.msra.gmra.mrb[0].mxu1 %vm344_vm3, %v260_v24 }
  0x11   :  { %556 = vmatprep.mubr.bf16.mxu1 %v15399_v2 }
  0x12   :  { %7724 = vmatmul.mubr.msk.bf16.gmra.mrb[4].mxu0 %vm81_vm0, %v55_v23 }
  0x13   :  { %143 = vmatprep.mubr.bf16.mxu0 %v15399_v2 }
  0x18   :  { %7734 = vmatmul.mubr.msk.bf16.gmra.mrb[4].mxu1 %vm344_vm3, %v261_v31 }
  0x19   :  { %566 = vmatprep.mubr.bf16.mxu1 %v15399_v2 }
  0x1a   :  { %7725 = vmatmul.mubr.msk.bf16.gmra.mrb[8].mxu0 %vm81_vm0, %v56_v30 }
  0x1b   :  { %8902 = vmatprep.mubr.msk.bf16.mxu0 %vm1261_vm4, %v1195_v32 }
  0x20   :  { %7735 = vmatmul.mubr.msk.bf16.gmra.mrb[8].mxu1 %vm344_vm3, %v262_v40 }
  0x21   :  { %576 = vmatprep.mubr.bf16.mxu1 %v15399_v2 }
  0x22   :  { %8903 = vmatmul.mubr.msk.bf16.vlgmr.msra.gmra.mrb[12].mxu0 %vm1261_vm4, %v1196_v39 }
  0x23   :  { %8906 = vmatprep.mubr.msk.bf16.mxu0 %vm1261_vm4, %v1197_v41 }
  0x28   :  { %7736 = vmatmul.mubr.msk.bf16.gmra.mrb[12].mxu1 %vm344_vm3, %v263_v49 }
  0x29   :  { %586 = vmatprep.mubr.bf16.mxu1 %v15399_v2 }
  0x2a   :  { %8907 = vmatmul.mubr.msk.bf16.gmra.mrb[16].mxu0 %vm1261_vm4, %v1198_v48 }
  0x2b   :  { %8910 = vmatprep.mubr.msk.bf16.mxu0 %vm1261_vm4, %v1199_v50 }
  0x2c   :  { %19 = vsyncpa [#allocation3], 0  ;;  %v1101_v60 = vld [vmem:[%s15384_s2 + $0x70] sm:$0xff]  ;;  %v1102_v61 = vld [vmem:[%s15384_s2 + $0x78] sm:$0xff]  ;;  %vm2001_vm5 = vcmask 293888   ;;  %vm3285_vm6 = vcmask 523264  }
  0x2d   :  { %v162_v62 = vld [vmem:[%s15383_s1 + $0x50] sm:$0xff]  ;;  %v163_v63 = vld [vmem:[%s15383_s1 + $0x58] sm:$0xff]  ;;  %v1103_v0 = vld [vmem:[%s15384_s2 + $0x80] sm:$0xff]  ;;  %v1202_v3 = vpack.c.bf16 %v1102_v61, %v1101_v60  ;;  %vm4323_vm7 = vcmask 97280   ;;  %vm10370_vm8 = vmmov 0   ;;  %vm4904_vm9 = vcmask 785408  }
  0x2e   :  { %v1104_v1 = vld [vmem:[%s15384_s2 + $0x88] sm:$0xff]  ;;  %v265_v4 = vpack.c.bf16 %v163_v63, %v162_v62  ;;  %v1105_v6 = vld [vmem:[%s15384_s2 + $0x90] sm:$0xff]  ;;  %v1106_v7 = vld [vmem:[%s15384_s2 + $0x98] sm:$0xff]  ;;  %vm10371_vm10 = vmmov 1   ;;  %vm7619_vm12 = vcmask 519168  }
  0x2f   :  { %v1203_v5 = vpack.c.bf16 %v1104_v1, %v1103_v0  ;;  %v164_v8 = vld [vmem:[%s15383_s1 + $0x60] sm:$0xff]  ;;  %v165_v9 = vld [vmem:[%s15383_s1 + $0x68] sm:$0xff]  ;;  %v1204_v12 = vpack.c.bf16 %v1106_v7, %v1105_v6  ;;  %v1109_v15 = vld [vmem:[%s15384_s2 + $0xb0] sm:$0xff] }
  0x30   :  { %7737 = vmatmul.mubr.msk.bf16.gmra.mrb[16].mxu1 %vm344_vm3, %v264_v58  ;;  %v1107_v10 = vld [vmem:[%s15384_s2 + $0xa0] sm:$0xff]  ;;  %v1108_v11 = vld [vmem:[%s15384_s2 + $0xa8] sm:$0xff]  ;;  %v266_v13 = vpack.c.bf16 %v165_v9, %v164_v8  ;;  %v1110_v16 = vld [vmem:[%s15384_s2 + $0xb8] sm:$0xff] }
  0x31   :  { %596 = vmatprep.mubr.bf16.mxu1 %v15399_v2  ;;  %v1205_v14 = vpack.c.bf16 %v1108_v11, %v1107_v10  ;;  %v166_v17 = vld [vmem:[%s15383_s1 + $0x70] sm:$0xff]  ;;  %v167_v18 = vld [vmem:[%s15383_s1 + $0x78] sm:$0xff]  ;;  %v1111_v19 = vld [vmem:[%s15384_s2 + $0xc0] sm:$0xff]  ;;  %v1206_v21 = vpack.c.bf16 %v1110_v16, %v1109_v15 }
  0x32   :  { %8911 = vmatmul.mubr.msk.bf16.gmra.mrb[20].mxu0 %vm1261_vm4, %v1200_v57  ;;  %v1112_v20 = vld [vmem:[%s15384_s2 + $0xc8] sm:$0xff]  ;;  %v267_v22 = vpack.c.bf16 %v167_v18, %v166_v17  ;;  %v1113_v24 = vld [vmem:[%s15384_s2 + $0xd0] sm:$0xff]  ;;  %v1114_v25 = vld [vmem:[%s15384_s2 + $0xd8] sm:$0xff] }
  0x33   :  { %8914 = vmatprep.mubr.msk.bf16.mxu0 %vm1261_vm4, %v1201_v59  ;;  %v1207_v23 = vpack.c.bf16 %v1112_v20, %v1111_v19  ;;  %v168_v26 = vld [vmem:[%s15383_s1 + $0x80] sm:$0xff]  ;;  %v169_v27 = vld [vmem:[%s15383_s1 + $0x88] sm:$0xff]  ;;  %v1208_v30 = vpack.c.bf16 %v1114_v25, %v1113_v24  ;;  %v1117_v33 = vld [vmem:[%s15384_s2 + $0xf0] sm:$0xff] }
  0x34   :  { %v1115_v28 = vld [vmem:[%s15384_s2 + $0xe0] sm:$0xff]  ;;  %v1116_v29 = vld [vmem:[%s15384_s2 + $0xe8] sm:$0xff]  ;;  %v268_v31 = vpack.c.bf16 %v169_v27, %v168_v26  ;;  %v1118_v34 = vld [vmem:[%s15384_s2 + $0xf8] sm:$0xff] }
  0x35   :  { %v1209_v32 = vpack.c.bf16 %v1116_v29, %v1115_v28  ;;  %v170_v35 = vld [vmem:[%s15383_s1 + $0x90] sm:$0xff]  ;;  %v171_v36 = vld [vmem:[%s15383_s1 + $0x98] sm:$0xff]  ;;  %v1119_v37 = vld [vmem:[%s15384_s2 + $0x100] sm:$0xff]  ;;  %v1210_v39 = vpack.c.bf16 %v1118_v34, %v1117_v33 }
  0x36   :  { %v1120_v38 = vld [vmem:[%s15384_s2 + $0x108] sm:$0xff]  ;;  %v269_v40 = vpack.c.bf16 %v171_v36, %v170_v35  ;;  %v1121_v42 = vld [vmem:[%s15384_s2 + $0x110] sm:$0xff]  ;;  %v1122_v43 = vld [vmem:[%s15384_s2 + $0x118] sm:$0xff] }
  0x37   :  { %v1211_v41 = vpack.c.bf16 %v1120_v38, %v1119_v37  ;;  %v172_v44 = vld [vmem:[%s15383_s1 + $0xa0] sm:$0xff]  ;;  %v173_v45 = vld [vmem:[%s15383_s1 + $0xa8] sm:$0xff]  ;;  %v1212_v48 = vpack.c.bf16 %v1122_v43, %v1121_v42  ;;  %v1125_v51 = vld [vmem:[%s15384_s2 + $0x130] sm:$0xff] }
  0x38   :  { %7738 = vmatmul.mubr.msk.bf16.gmra.mrb[20].mxu1 %vm344_vm3, %v265_v4  ;;  %v1123_v46 = vld [vmem:[%s15384_s2 + $0x120] sm:$0xff]  ;;  %v1124_v47 = vld [vmem:[%s15384_s2 + $0x128] sm:$0xff]  ;;  %v270_v49 = vpack.c.bf16 %v173_v45, %v172_v44  ;;  %v1126_v52 = vld [vmem:[%s15384_s2 + $0x138] sm:$0xff] }
  0x39   :  { %606 = vmatprep.mubr.bf16.mxu1 %v15399_v2  ;;  %v1213_v50 = vpack.c.bf16 %v1124_v47, %v1123_v46  ;;  %v174_v53 = vld [vmem:[%s15383_s1 + $0xb0] sm:$0xff]  ;;  %v175_v54 = vld [vmem:[%s15383_s1 + $0xb8] sm:$0xff]  ;;  %v1127_v55 = vld [vmem:[%s15384_s2 + $0x140] sm:$0xff]  ;;  %v1214_v57 = vpack.c.bf16 %v1126_v52, %v1125_v51 }
  0x3a   :  { %8915 = vmatmul.mubr.msk.bf16.gmra.mrb[24].mxu0 %vm1261_vm4, %v1202_v3  ;;  %v1128_v56 = vld [vmem:[%s15384_s2 + $0x148] sm:$0xff]  ;;  %v271_v58 = vpack.c.bf16 %v175_v54, %v174_v53  ;;  %v1129_v60 = vld [vmem:[%s15384_s2 + $0x150] sm:$0xff]  ;;  %v1130_v61 = vld [vmem:[%s15384_s2 + $0x158] sm:$0xff] }
  0x3b   :  { %8918 = vmatprep.mubr.msk.bf16.mxu0 %vm1261_vm4, %v1203_v5  ;;  %v1215_v59 = vpack.c.bf16 %v1128_v56, %v1127_v55  ;;  %v176_v62 = vld [vmem:[%s15383_s1 + $0xc0] sm:$0xff]  ;;  %v177_v63 = vld [vmem:[%s15383_s1 + $0xc8] sm:$0xff]  ;;  %v1216_v3 = vpack.c.bf16 %v1130_v61, %v1129_v60  ;;  %v1133_v6 = vld [vmem:[%s15384_s2 + $0x170] sm:$0xff] }
  0x3c   :  { %v1131_v0 = vld [vmem:[%s15384_s2 + $0x160] sm:$0xff]  ;;  %v1132_v1 = vld [vmem:[%s15384_s2 + $0x168] sm:$0xff]  ;;  %v272_v4 = vpack.c.bf16 %v177_v63, %v176_v62  ;;  %v1134_v7 = vld [vmem:[%s15384_s2 + $0x178] sm:$0xff] }
  0x3d   :  { %v1217_v5 = vpack.c.bf16 %v1132_v1, %v1131_v0  ;;  %v178_v8 = vld [vmem:[%s15383_s1 + $0xd0] sm:$0xff]  ;;  %v179_v9 = vld [vmem:[%s15383_s1 + $0xd8] sm:$0xff]  ;;  %v1135_v10 = vld [vmem:[%s15384_s2 + $0x180] sm:$0xff] }
  0x3e   :  { %v1136_v11 = vld [vmem:[%s15384_s2 + $0x188] sm:$0xff]  ;;  %v1137_v15 = vld [vmem:[%s15384_s2 + $0x190] sm:$0xff]  ;;  %v1138_v16 = vld [vmem:[%s15384_s2 + $0x198] sm:$0xff] }
  0x3f   :  { %v180_v17 = vld [vmem:[%s15383_s1 + $0xe0] sm:$0xff]  ;;  %v181_v18 = vld [vmem:[%s15383_s1 + $0xe8] sm:$0xff]  ;;  %v1141_v24 = vld [vmem:[%s15384_s2 + $0x1b0] sm:$0xff] }
  0x40   :  { %7739 = vmatmul.mubr.msk.bf16.gmra.mrb[24].mxu1 %vm344_vm3, %v266_v13  ;;  %v273_v13 = vpack.c.bf16 %v179_v9, %v178_v8  ;;  %v1139_v19 = vld [vmem:[%s15384_s2 + $0x1a0] sm:$0xff]  ;;  %v1140_v20 = vld [vmem:[%s15384_s2 + $0x1a8] sm:$0xff]  ;;  %v1142_v25 = vld [vmem:[%s15384_s2 + $0x1b8] sm:$0xff] }
  0x41   :  { %616 = vmatprep.mubr.bf16.mxu1 %v15399_v2  ;;  %v182_v26 = vld [vmem:[%s15383_s1 + $0xf0] sm:$0xff]  ;;  %v183_v27 = vld [vmem:[%s15383_s1 + $0xf8] sm:$0xff]  ;;  %v1143_v28 = vld [vmem:[%s15384_s2 + $0x1c0] sm:$0xff] }
  0x42   :  { %8919 = vmatmul.mubr.msk.bf16.gmra.mrb[28].mxu0 %vm1261_vm4, %v1204_v12  ;;  %v1218_v12 = vpack.c.bf16 %v1134_v7, %v1133_v6  ;;  %v1144_v29 = vld [vmem:[%s15384_s2 + $0x1c8] sm:$0xff]  ;;  %v1145_v33 = vld [vmem:[%s15384_s2 + $0x1d0] sm:$0xff]  ;;  %v1146_v34 = vld [vmem:[%s15384_s2 + $0x1d8] sm:$0xff] }
  0x43   :  { %8922 = vmatprep.mubr.msk.bf16.mxu0 %vm1261_vm4, %v1205_v14  ;;  %v1219_v14 = vpack.c.bf16 %v1136_v11, %v1135_v10  ;;  %v184_v35 = vld [vmem:[%s15383_s1 + $0x100] sm:$0xff]  ;;  %v185_v36 = vld [vmem:[%s15383_s1 + $0x108] sm:$0xff]  ;;  %v1149_v42 = vld [vmem:[%s15384_s2 + $0x1f0] sm:$0xff] }
  0x44   :  { %v1147_v37 = vld [vmem:[%s15384_s2 + $0x1e0] sm:$0xff]  ;;  %v1148_v38 = vld [vmem:[%s15384_s2 + $0x1e8] sm:$0xff]  ;;  %v1150_v43 = vld [vmem:[%s15384_s2 + $0x1f8] sm:$0xff] }
  0x45   :  { %v186_v44 = vld [vmem:[%s15383_s1 + $0x110] sm:$0xff]  ;;  %v187_v45 = vld [vmem:[%s15383_s1 + $0x118] sm:$0xff]  ;;  %v1151_v46 = vld [vmem:[%s15384_s2 + $0x200] sm:$0xff] }
  0x46   :  { %v1152_v47 = vld [vmem:[%s15384_s2 + $0x208] sm:$0xff]  ;;  %v1153_v51 = vld [vmem:[%s15384_s2 + $0x210] sm:$0xff]  ;;  %v1154_v52 = vld [vmem:[%s15384_s2 + $0x218] sm:$0xff] }
  0x47   :  { %v188_v53 = vld [vmem:[%s15383_s1 + $0x120] sm:$0xff]  ;;  %v189_v54 = vld [vmem:[%s15383_s1 + $0x128] sm:$0xff]  ;;  %v1157_v60 = vld [vmem:[%s15384_s2 + $0x230] sm:$0xff] }
  0x48   :  { %7740 = vmatmul.mubr.msk.bf16.gmra.mrb[28].mxu1 %vm344_vm3, %v267_v22  ;;  %v274_v22 = vpack.c.bf16 %v181_v18, %v180_v17  ;;  %v1155_v55 = vld [vmem:[%s15384_s2 + $0x220] sm:$0xff]  ;;  %v1156_v56 = vld [vmem:[%s15384_s2 + $0x228] sm:$0xff]  ;;  %v1158_v61 = vld [vmem:[%s15384_s2 + $0x238] sm:$0xff] }
  0x49   :  { %626 = vmatprep.mubr.bf16.mxu1 %v15399_v2  ;;  %v190_v62 = vld [vmem:[%s15383_s1 + $0x130] sm:$0xff]  ;;  %v191_v63 = vld [vmem:[%s15383_s1 + $0x138] sm:$0xff]  ;;  %v1159_v0 = vld [vmem:[%s15384_s2 + $0x240] sm:$0xff] }
  0x4a   :  { %8923 = vmatmul.mubr.msk.bf16.gmra.mrb[32].mxu0 %vm1261_vm4, %v1206_v21  ;;  %v1220_v21 = vpack.c.bf16 %v1138_v16, %v1137_v15  ;;  %v1160_v1 = vld [vmem:[%s15384_s2 + $0x248] sm:$0xff]  ;;  %v1161_v6 = vld [vmem:[%s15384_s2 + $0x250] sm:$0xff]  ;;  %v1162_v7 = vld [vmem:[%s15384_s2 + $0x258] sm:$0xff] }
  0x4b   :  { %8926 = vmatprep.mubr.msk.bf16.mxu0 %vm1261_vm4, %v1207_v23  ;;  %v1221_v23 = vpack.c.bf16 %v1140_v20, %v1139_v19  ;;  %v192_v8 = vld [vmem:[%s15383_s1 + $0x140] sm:$0xff]  ;;  %v193_v9 = vld [vmem:[%s15383_s1 + $0x148] sm:$0xff]  ;;  %v1165_v15 = vld [vmem:[%s15384_s2 + $0x270] sm:$0xff] }
  0x4c   :  { %v1163_v10 = vld [vmem:[%s15384_s2 + $0x260] sm:$0xff]  ;;  %v1164_v11 = vld [vmem:[%s15384_s2 + $0x268] sm:$0xff]  ;;  %v1166_v16 = vld [vmem:[%s15384_s2 + $0x278] sm:$0xff] }
  0x4d   :  { %v194_v17 = vld [vmem:[%s15383_s1 + $0x150] sm:$0xff]  ;;  %v195_v18 = vld [vmem:[%s15383_s1 + $0x158] sm:$0xff]  ;;  %v1167_v19 = vld [vmem:[%s15384_s2 + $0x280] sm:$0xff] }
  0x4e   :  { %v1168_v20 = vld [vmem:[%s15384_s2 + $0x288] sm:$0xff]  ;;  %vm9611_vm11 = vmpackc.low %vm507_vm1, %vm10371_vm10 }
  0x50   :  { %7741 = vmatmul.mubr.msk.bf16.gmra.mrb[32].mxu1 %vm344_vm3, %v268_v31  ;;  %v275_v31 = vpack.c.bf16 %v183_v27, %v182_v26  ;;  %v196_v26 = vld [vmem:[%s15383_s1 + $0x160] sm:$0xff]  ;;  %v197_v27 = vld [vmem:[%s15383_s1 + $0x168] sm:$0xff] }
  0x51   :  { %636 = vmatprep.mubr.bf16.mxu1 %v15399_v2 }
  0x52   :  { %8927 = vmatmul.mubr.msk.bf16.gmra.mrb[36].mxu0 %vm1261_vm4, %v1208_v30  ;;  %v1222_v30 = vpack.c.bf16 %v1142_v25, %v1141_v24  ;;  %v1169_v24 = vld [vmem:[%s15384_s2 + $0x290] sm:$0xff]  ;;  %v1170_v25 = vld [vmem:[%s15384_s2 + $0x298] sm:$0xff] }
  0x53   :  { %8930 = vmatprep.mubr.msk.bf16.mxu0 %vm1261_vm4, %v1209_v32  ;;  %v1223_v32 = vpack.c.bf16 %v1144_v29, %v1143_v28  ;;  %v1171_v28 = vld [vmem:[%s15384_s2 + $0x2a0] sm:$0xff]  ;;  %v1172_v29 = vld [vmem:[%s15384_s2 + $0x2a8] sm:$0xff] }
  0x58   :  { %7742 = vmatmul.mubr.msk.bf16.gmra.mrb[36].mxu1 %vm344_vm3, %v269_v40  ;;  %v276_v40 = vpack.c.bf16 %v185_v36, %v184_v35  ;;  %v198_v35 = vld [vmem:[%s15383_s1 + $0x170] sm:$0xff]  ;;  %v199_v36 = vld [vmem:[%s15383_s1 + $0x178] sm:$0xff] }
  0x59   :  { %646 = vmatprep.mubr.bf16.mxu1 %v15399_v2 }
  0x5a   :  { %8931 = vmatmul.mubr.msk.bf16.gmra.mrb[40].mxu0 %vm1261_vm4, %v1210_v39  ;;  %v1224_v39 = vpack.c.bf16 %v1146_v34, %v1145_v33  ;;  %v1173_v33 = vld [vmem:[%s15384_s2 + $0x2b0] sm:$0xff]  ;;  %v1174_v34 = vld [vmem:[%s15384_s2 + $0x2b8] sm:$0xff] }
  0x5b   :  { %8934 = vmatprep.mubr.msk.bf16.mxu0 %vm1261_vm4, %v1211_v41  ;;  %v1225_v41 = vpack.c.bf16 %v1148_v38, %v1147_v37  ;;  %v1175_v37 = vld [vmem:[%s15384_s2 + $0x2c0] sm:$0xff]  ;;  %v1176_v38 = vld [vmem:[%s15384_s2 + $0x2c8] sm:$0xff] }
  0x60   :  { %7743 = vmatmul.mubr.msk.bf16.gmra.mrb[40].mxu1 %vm344_vm3, %v270_v49  ;;  %v277_v49 = vpack.c.bf16 %v187_v45, %v186_v44  ;;  %v200_v44 = vld [vmem:[%s15383_s1 + $0x180] sm:$0xff]  ;;  %v201_v45 = vld [vmem:[%s15383_s1 + $0x188] sm:$0xff] }
  0x61   :  { %656 = vmatprep.mubr.bf16.mxu1 %v15399_v2 }
  0x62   :  { %8935 = vmatmul.mubr.msk.bf16.gmra.mrb[44].mxu0 %vm1261_vm4, %v1212_v48  ;;  %v1226_v48 = vpack.c.bf16 %v1150_v43, %v1149_v42  ;;  %v1177_v42 = vld [vmem:[%s15384_s2 + $0x2d0] sm:$0xff]  ;;  %v1178_v43 = vld [vmem:[%s15384_s2 + $0x2d8] sm:$0xff] }
  0x63   :  { %8938 = vmatprep.mubr.msk.bf16.mxu0 %vm1261_vm4, %v1213_v50  ;;  %v1227_v50 = vpack.c.bf16 %v1152_v47, %v1151_v46  ;;  %v1179_v46 = vld [vmem:[%s15384_s2 + $0x2e0] sm:$0xff]  ;;  %v1180_v47 = vld [vmem:[%s15384_s2 + $0x2e8] sm:$0xff] }
  0x68   :  { %7744 = vmatmul.mubr.msk.bf16.gmra.mrb[44].mxu1 %vm344_vm3, %v271_v58  ;;  %v278_v58 = vpack.c.bf16 %v189_v54, %v188_v53  ;;  %v202_v53 = vld [vmem:[%s15383_s1 + $0x190] sm:$0xff]  ;;  %v203_v54 = vld [vmem:[%s15383_s1 + $0x198] sm:$0xff] }
  0x69   :  { %666 = vmatprep.mubr.bf16.mxu1 %v15399_v2 }
  0x6a   :  { %8939 = vmatmul.mubr.msk.bf16.gmra.mrb[48].mxu0 %vm1261_vm4, %v1214_v57  ;;  %v1228_v57 = vpack.c.bf16 %v1154_v52, %v1153_v51  ;;  %v1181_v51 = vld [vmem:[%s15384_s2 + $0x2f0] sm:$0xff]  ;;  %v1182_v52 = vld [vmem:[%s15384_s2 + $0x2f8] sm:$0xff] }
  0x6b   :  { %8942 = vmatprep.mubr.msk.bf16.mxu0 %vm1261_vm4, %v1215_v59  ;;  %v1229_v59 = vpack.c.bf16 %v1156_v56, %v1155_v55  ;;  %v1183_v55 = vld [vmem:[%s15384_s2 + $0x300] sm:$0xff]  ;;  %v1184_v56 = vld [vmem:[%s15384_s2 + $0x308] sm:$0xff] }
  0x70   :  { %7745 = vmatmul.mubr.msk.bf16.gmra.mrb[48].mxu1 %vm344_vm3, %v272_v4  ;;  %v279_v4 = vpack.c.bf16 %v191_v63, %v190_v62  ;;  %v204_v62 = vld [vmem:[%s15383_s1 + $0x1a0] sm:$0xff]  ;;  %v205_v63 = vld [vmem:[%s15383_s1 + $0x1a8] sm:$0xff] }
  0x71   :  { %676 = vmatprep.mubr.bf16.mxu1 %v15399_v2 }
  0x72   :  { %8943 = vmatmul.mubr.msk.bf16.gmra.mrb[52].mxu0 %vm1261_vm4, %v1216_v3  ;;  %v1230_v3 = vpack.c.bf16 %v1158_v61, %v1157_v60  ;;  %v1185_v60 = vld [vmem:[%s15384_s2 + $0x310] sm:$0xff]  ;;  %v1186_v61 = vld [vmem:[%s15384_s2 + $0x318] sm:$0xff] }
  0x73   :  { %8946 = vmatprep.mubr.msk.bf16.mxu0 %vm1261_vm4, %v1217_v5  ;;  %v1231_v5 = vpack.c.bf16 %v1160_v1, %v1159_v0  ;;  %v1187_v0 = vld [vmem:[%s15384_s2 + $0x320] sm:$0xff]  ;;  %v1188_v1 = vld [vmem:[%s15384_s2 + $0x328] sm:$0xff] }
  0x78   :  { %7746 = vmatmul.mubr.msk.bf16.gmra.mrb[52].mxu1 %vm344_vm3, %v273_v13  ;;  %v280_v13 = vpack.c.bf16 %v193_v9, %v192_v8  ;;  %v1245_v8 = vpack.c.bf16 %v1188_v1, %v1187_v0 }
  0x79   :  { %686 = vmatprep.mubr.bf16.mxu1 %v15399_v2 }
  0x7a   :  { %8947 = vmatmul.mubr.msk.bf16.gmra.mrb[56].mxu0 %vm1261_vm4, %v1218_v12  ;;  %v1232_v12 = vpack.c.bf16 %v1162_v7, %v1161_v6  ;;  %v286_v6 = vpack.c.bf16 %v205_v63, %v204_v62 }
  0x7b   :  { %8950 = vmatprep.mubr.msk.bf16.mxu0 %vm1261_vm4, %v1219_v14  ;;  %v1233_v14 = vpack.c.bf16 %v1164_v11, %v1163_v10 }
  0x80   :  { %7747 = vmatmul.mubr.msk.bf16.gmra.mrb[56].mxu1 %vm344_vm3, %v274_v22  ;;  %v281_v22 = vpack.c.bf16 %v195_v18, %v194_v17  ;;  %v1192_v17 = vld [vmem:[%s15384_s2 + $0x348] sm:$0xff] }
  0x81   :  { %696 = vmatprep.mubr.bf16.mxu1 %v15399_v2 }
  0x82   :  { %8951 = vmatmul.mubr.msk.bf16.gmra.mrb[60].mxu0 %vm1261_vm4, %v1220_v21  ;;  %v1234_v21 = vpack.c.bf16 %v1166_v16, %v1165_v15  ;;  %v207_v15 = vld [vmem:[%s15383_s1 + $0x1b8] sm:$0xff]  ;;  %v1191_v16 = vld [vmem:[%s15384_s2 + $0x340] sm:$0xff] }
  0x83   :  { %8954 = vmatprep.mubr.msk.bf16.mxu0 %vm1261_vm4, %v1221_v23  ;;  %v1235_v23 = vpack.c.bf16 %v1168_v20, %v1167_v19 }
  0x88   :  { %7748 = vmatmul.mubr.msk.bf16.gmra.mrb[60].mxu1 %vm344_vm3, %v275_v31  ;;  %v282_v31 = vpack.c.bf16 %v197_v27, %v196_v26 }
  0x89   :  { %706 = vmatprep.mubr.bf16.mxu1 %v15399_v2 }
  0x8a   :  { %8955 = vmatmul.mubr.msk.bf16.gmra.mrb[64].mxu0 %vm1261_vm4, %v1222_v30  ;;  %v1236_v30 = vpack.c.bf16 %v1170_v25, %v1169_v24  ;;  %v1247_v25 = vpack.c.bf16 %v1192_v17, %v1191_v16  ;;  %v1897_v17 = vld [vmem:[%s15391_s9 + $0x20] sm:$0xff] }
  0x8b   :  { %8958 = vmatprep.mubr.msk.bf16.mxu0 %vm1261_vm4, %v1223_v32  ;;  %v1237_v32 = vpack.c.bf16 %v1172_v29, %v1171_v28 }
  0x90   :  { %7749 = vmatmul.mubr.msk.bf16.gmra.mrb[64].mxu1 %vm344_vm3, %v276_v40  ;;  %v283_v40 = vpack.c.bf16 %v199_v36, %v198_v35 }
  0x91   :  { %716 = vmatprep.mubr.bf16.mxu1 %v15399_v2 }
  0x92   :  { %8959 = vmatmul.mubr.msk.bf16.gmra.mrb[68].mxu0 %vm1261_vm4, %v1224_v39  ;;  %v1238_v39 = vpack.c.bf16 %v1174_v34, %v1173_v33  ;;  %v208_v33 = vld [vmem:[%s15383_s1 + $0x1c0] sm:$0xff]  ;;  %v209_v34 = vld [vmem:[%s15383_s1 + $0x1c8] sm:$0xff] }
  0x93   :  { %8962 = vmatprep.mubr.msk.bf16.mxu0 %vm1261_vm4, %v1225_v41  ;;  %v1239_v41 = vpack.c.bf16 %v1176_v38, %v1175_v37 }
  0x98   :  { %7750 = vmatmul.mubr.msk.bf16.gmra.mrb[68].mxu1 %vm344_vm3, %v277_v49  ;;  %v284_v49 = vpack.c.bf16 %v201_v45, %v200_v44  ;;  %v15397_v45 = vmov 0.0  }
  0x99   :  { %726 = vmatprep.mubr.bf16.mxu1 %v15399_v2 }
  0x9a   :  { %8963 = vmatmul.mubr.msk.bf16.gmra.mrb[72].mxu0 %vm1261_vm4, %v1226_v48  ;;  %v1240_v48 = vpack.c.bf16 %v1178_v43, %v1177_v42 }
  0x9b   :  { %8966 = vmatprep.mubr.msk.bf16.mxu0 %vm1261_vm4, %v1227_v50  ;;  %v1241_v50 = vpack.c.bf16 %v1180_v47, %v1179_v46  ;;  %v210_v46 = vld [vmem:[%s15383_s1 + $0x1d0] sm:$0xff]  ;;  %v211_v47 = vld [vmem:[%s15383_s1 + $0x1d8] sm:$0xff] }
  0xa0   :  { %7751 = vmatmul.mubr.msk.bf16.gmra.mrb[72].mxu1 %vm344_vm3, %v278_v58  ;;  %v285_v58 = vpack.c.bf16 %v203_v54, %v202_v53  ;;  %v1893_v54 = vld [vmem:[%s15391_s9] sm:$0xff] }
  0xa1   :  { %736 = vmatprep.mubr.bf16.mxu1 %v15399_v2 }
  0xa2   :  { %8967 = vmatmul.mubr.msk.bf16.gmra.mrb[76].mxu0 %vm1261_vm4, %v1228_v57  ;;  %v1242_v57 = vpack.c.bf16 %v1182_v52, %v1181_v51  ;;  %v289_v52 = vpack.c.bf16 %v211_v47, %v210_v46 }
  0xa3   :  { %8970 = vmatprep.mubr.msk.bf16.mxu0 %vm1261_vm4, %v1229_v59  ;;  %v1243_v59 = vpack.c.bf16 %v1184_v56, %v1183_v55 }
  0xa8   :  { %7752 = vmatmul.mubr.msk.bf16.gmra.mrb[76].mxu1 %vm344_vm3, %v279_v4 }
  0xa9   :  { %746 = vmatprep.mubr.bf16.mxu1 %v15399_v2 }
  0xaa   :  { %8971 = vmatmul.mubr.msk.bf16.gmra.mrb[80].mxu0 %vm1261_vm4, %v1230_v3 }
  0xab   :  { %8974 = vmatprep.mubr.msk.bf16.mxu0 %vm1261_vm4, %v1231_v5  ;;  %v1244_v5 = vpack.c.bf16 %v1186_v61, %v1185_v60  ;;  %v213_v60 = vld [vmem:[%s15383_s1 + $0x1e8] sm:$0xff] }
  0xb0   :  { %7753 = vmatmul.mubr.msk.bf16.gmra.mrb[80].mxu1 %vm344_vm3, %v280_v13  ;;  %v1190_v13 = vld [vmem:[%s15384_s2 + $0x338] sm:$0xff] }
  0xb1   :  { %756 = vmatprep.mubr.bf16.mxu1 %v15399_v2 }
  0xb2   :  { %8975 = vmatmul.mubr.msk.bf16.gmra.mrb[84].mxu0 %vm1261_vm4, %v1232_v12  ;;  %v1189_v12 = vld [vmem:[%s15384_s2 + $0x330] sm:$0xff] }
  0xb3   :  { %8978 = vmatprep.mubr.msk.bf16.mxu0 %vm1261_vm4, %v1233_v14  ;;  %v206_v14 = vld [vmem:[%s15383_s1 + $0x1b0] sm:$0xff] }
  0xb8   :  { %7754 = vmatmul.mubr.msk.bf16.gmra.mrb[84].mxu1 %vm344_vm3, %v281_v22 }
  0xb9   :  { %766 = vmatprep.mubr.bf16.mxu1 %v15399_v2 }
  0xba   :  { %8979 = vmatmul.mubr.msk.bf16.gmra.mrb[88].mxu0 %vm1261_vm4, %v1234_v21  ;;  %v1246_v21 = vpack.c.bf16 %v1190_v13, %v1189_v12 }
  0xbb   :  { %8982 = vmatprep.mubr.msk.bf16.mxu0 %vm1261_vm4, %v1235_v23  ;;  %v287_v23 = vpack.c.bf16 %v207_v15, %v206_v14 }
  0xc0   :  { %7755 = vmatmul.mubr.msk.bf16.gmra.mrb[88].mxu1 %vm344_vm3, %v282_v31  ;;  %v1193_v31 = vld [vmem:[%s15384_s2 + $0x350] sm:$0xff] }
  0xc1   :  { %776 = vmatprep.mubr.bf16.mxu1 %v15399_v2 }
  0xc2   :  { %8983 = vmatmul.mubr.msk.bf16.gmra.mrb[92].mxu0 %vm1261_vm4, %v1236_v30 }
  0xc3   :  { %8986 = vmatprep.mubr.msk.bf16.mxu0 %vm1261_vm4, %v1237_v32  ;;  %v1194_v32 = vld [vmem:[%s15384_s2 + $0x358] sm:$0xff] }
  0xc4   :  { %v1248_v38 = vpack.c.bf16 %v1194_v32, %v1193_v31 }
  0xc8   :  { %7756 = vmatmul.mubr.msk.bf16.gmra.mrb[92].mxu1 %vm344_vm3, %v283_v40  ;;  %v288_v40 = vpack.c.bf16 %v209_v34, %v208_v33  ;;  %v1899_v34 = vld [vmem:[%s15391_s9 + $0x30] sm:$0xff] }
  0xc9   :  { %786 = vmatprep.mubr.bf16.mxu1 %v15399_v2 }
  0xca   :  { %8987 = vmatmul.mubr.msk.bf16.gmra.mrb[96].mxu0 %vm1261_vm4, %v1238_v39 }
  0xcb   :  { %8990 = vmatprep.mubr.msk.bf16.mxu0 %vm1261_vm4, %v1239_v41 }
  0xd0   :  { %7757 = vmatmul.mubr.msk.bf16.gmra.mrb[96].mxu1 %vm344_vm3, %v284_v49 }
  0xd1   :  { %796 = vmatprep.mubr.bf16.mxu1 %v15399_v2 }
  0xd2   :  { %8991 = vmatmul.mubr.msk.bf16.gmra.mrb[100].mxu0 %vm1261_vm4, %v1240_v48 }
  0xd3   :  { %8994 = vmatprep.mubr.msk.bf16.mxu0 %vm1261_vm4, %v1241_v50 }
  0xd8   :  { %7758 = vmatmul.mubr.msk.bf16.gmra.mrb[100].mxu1 %vm344_vm3, %v285_v58  ;;  %v1894_v58 = vld [vmem:[%s15391_s9 + $0x8] sm:$0xff] }
  0xd9   :  { %806 = vmatprep.mubr.bf16.mxu1 %v15399_v2 }
  0xda   :  { %8995 = vmatmul.mubr.msk.bf16.gmra.mrb[104].mxu0 %vm1261_vm4, %v1242_v57 }
  0xdb   :  { %8998 = vmatprep.mubr.msk.bf16.mxu0 %vm1261_vm4, %v1243_v59  ;;  %v212_v59 = vld [vmem:[%s15383_s1 + $0x1e0] sm:$0xff] }
  0xdc   :  { %v290_v1 = vpack.c.bf16 %v213_v60, %v212_v59  ;;  %v1901_v60 = vld [vmem:[%s15391_s9 + $0x40] sm:$0xff] }
  0xdd   :  { %v125_v3 = vpop.f32.mrb[0].mxu0 }
  0xde   :  { %v127_v4 = vpop.f32.mrb[1].mxu0 }
  0xdf   :  { %v129_v7 = vpop.f32.mrb[2].mxu0 }
  0xe0   :  { %v9446_v9 = vpack.c.bf16 %v129_v7, %v125_v3  ;;  %v131_v10 = vpop.f32.mrb[3].mxu0  ;;  %7759 = vmatmul.mubr.msk.bf16.gmra.mrb[104].mxu1 %vm344_vm3, %v286_v6 }
  0xe1   :  { %v9444_v11 = vpack.c.bf16 %v131_v10, %v127_v4  ;;  %816 = vmatprep.mubr.bf16.mxu1 %v15399_v2  ;;  %v1895_v4 = vld [vmem:[%s15391_s9 + $0x10] sm:$0xff]  ;;  %v215_v10 = vld [vmem:[%s15383_s1 + $0x1f8] sm:$0xff] }
  0xe2   :  { %8999 = vmatmul.mubr.msk.bf16.gmra.mrb[108].mxu0 %vm1261_vm4, %v1244_v5 }
  0xe3   :  { %9445 = vmatprep.subr.bf16.mxu0 %v9444_v11  ;;  %9002 = vmatprep.mubr.msk.bf16.mxu0 %vm1261_vm4, %v1245_v8  ;;  %v11100_v19 = vpop.f32.mrb[0].mxu1  ;;  %v1896_v8 = vld [vmem:[%s15391_s9 + $0x18] sm:$0xff] }
  0xe4   :  { %9447 = vmatpush1.bf16.msra.mxu0 %v9446_v9  ;;  %v11102_v22 = vpop.f32.mrb[1].mxu1  ;;  %v214_v9 = vld [vmem:[%s15383_s1 + $0x1f0] sm:$0xff] }
  0xe5   :  { %v135_v18 = vpop.f32.mrb[4].mxu0  ;;  %v11104_v26 = vpop.f32.mrb[2].mxu1  ;;  %v291_v15 = vpack.c.bf16 %v215_v10, %v214_v9  ;;  %v1902_v9 = vld [vmem:[%s15391_s9 + $0x48] sm:$0xff]  ;;  %v220_v10 = vld [vmem:[%s15383_s1 + $0x220] sm:$0xff] }
  0xe6   :  { %v137_v20 = vpop.f32.mrb[5].mxu0  ;;  %v11106_v29 = vpop.f32.mrb[3].mxu1 }
  0xe7   :  { %v139_v24 = vpop.f32.mrb[6].mxu0 }
  0xe8   :  { %v9450_v27 = vpack.c.bf16 %v139_v24, %v135_v18  ;;  %v141_v28 = vpop.f32.mrb[7].mxu0  ;;  %7760 = vmatmul.mubr.msk.bf16.gmra.mrb[108].mxu1 %vm344_vm3, %v287_v23  ;;  %v1898_v23 = vld [vmem:[%s15391_s9 + $0x28] sm:$0xff]  ;;  %v216_v24 = vld [vmem:[%s15383_s1 + $0x200] sm:$0xff] }
  0xe9   :  { %v9448_v30 = vpack.c.bf16 %v141_v28, %v137_v20  ;;  %826 = vmatprep.mubr.bf16.mxu1 %v15399_v2 }
  0xea   :  { %9003 = vmatmul.mubr.msk.bf16.gmra.mrb[112].mxu0 %vm1261_vm4, %v1246_v21 }
  0xeb   :  { %9449 = vmatprep.subr.bf16.mxu0 %v9448_v30  ;;  %9006 = vmatprep.mubr.msk.bf16.mxu0 %vm1261_vm4, %v1247_v25  ;;  %v11124_v36 = vpop.f32.mrb[4].mxu1  ;;  %v217_v25 = vld [vmem:[%s15383_s1 + $0x208] sm:$0xff] }
  0xec   :  { %9451 = vmatpush1.bf16.msra.mxu0 %v9450_v27  ;;  %v11126_v39 = vpop.f32.mrb[5].mxu1  ;;  %v292_v32 = vpack.c.bf16 %v217_v25, %v216_v24 }
  0xed   :  { %v145_v35 = vpop.f32.mrb[8].mxu0  ;;  %v11129_v42 = vpop.f32.mrb[6].mxu1 }
  0xee   :  { %v147_v37 = vpop.f32.mrb[9].mxu0  ;;  %v11132_v44 = vpop.f32.mrb[7].mxu1 }
  0xef   :  { %v149_v41 = vpop.f32.mrb[10].mxu0  ;;  %7843 = vmatprep.subr.msk.mxu0 %vm507_vm1, %v147_v37 }
  0xf0   :  { %v150_v43 = vpop.f32.mrb[11].mxu0  ;;  %7844 = vmatpush1.msk.msra.mxu0 %vm507_vm1, %v145_v35  ;;  %7761 = vmatmul.mubr.msk.bf16.gmra.mrb[112].mxu1 %vm344_vm3, %v288_v40  ;;  %v1900_v40 = vld [vmem:[%s15391_s9 + $0x38] sm:$0xff]  ;;  %v218_v41 = vld [vmem:[%s15383_s1 + $0x210] sm:$0xff] }
  0xf1   :  { %836 = vmatprep.mubr.bf16.mxu1 %v15399_v2  ;;  %v219_v43 = vld [vmem:[%s15383_s1 + $0x218] sm:$0xff] }
  0xf2   :  { %9007 = vmatmul.mubr.msk.bf16.gmra.mrb[116].mxu0 %vm1261_vm4, %v1248_v38 }
  0xf3   :  { %2396 = vmatprep.mubr.f32.mxu0 %v15397_v45  ;;  %v11146_v49 = vpop.f32.mrb[8].mxu1 }
  0xf4   :  { %v11150_v51 = vpop.f32.mrb[9].mxu1 }
  0xf5   :  { %v11144_v48 = vpop.f32.mrb[12].mxu0  ;;  %v11157_v55 = vpop.f32.mrb[10].mxu1 }
  0xf6   :  { %15543 = vst [vmem:[#allocation5_spill] sm:$0xff] %v11144_v48  ;;  %v11148_v50 = vpop.f32.mrb[13].mxu0  ;;  %v11161_v57 = vpop.f32.mrb[11].mxu1 }
  0xf7   :  { %15544 = vst [vmem:[#allocation6_spill] sm:$0xff] %v11148_v50  ;;  %v11152_v53 = vpop.f32.mrb[14].mxu0 }
  0xf8   :  { %15545 = vst [vmem:[#allocation7_spill] sm:$0xff] %v11152_v53  ;;  %v11159_v56 = vpop.f32.mrb[15].mxu0  ;;  %7762 = vmatmul.mubr.msk.bf16.gmra.mrb[116].mxu1 %vm344_vm3, %v289_v52 }
  0xf9   :  { %15546 = vst [vmem:[#allocation8_spill] sm:$0xff] %v11159_v56  ;;  %846 = vmatprep.mubr.bf16.mxu1 %v15399_v2 }
  0xfa   :  { %7845 = vmatmul.mubr.msk.f32.vlgmr.msra.gmra.mrb[120].mxu0 %vm2001_vm5, %v1893_v54 }
  0xfb   :  { %2402 = vmatprep.mubr.f32.mxu0 %v15397_v45  ;;  %v11178_v62 = vpop.f32.mrb[12].mxu1 }
  0xfc   :  { %v11183_v0 = vpop.f32.mrb[13].mxu1 }
  0xfd   :  { %v11176_v61 = vpop.f32.mrb[16].mxu0  ;;  %v11191_v5 = vpop.f32.mrb[14].mxu1 }
  0xfe   :  { %15547 = vst [vmem:[#allocation9_spill] sm:$0xff] %v11176_v61  ;;  %v11180_v63 = vpop.f32.mrb[17].mxu0  ;;  %7846 = vmatmul.mubr.msk.f32.gmra.mrb[122].mxu0 %vm2001_vm5, %v1894_v58  ;;  %v11195_v7 = vpop.f32.mrb[15].mxu1  ;;  %v293_v58 = vpack.c.bf16 %v219_v43, %v218_v41 }
  0xff   :  { %15548 = vst [vmem:[#allocation10_spill] sm:$0xff] %v11180_v63  ;;  %v11185_v3 = vpop.f32.mrb[18].mxu0  ;;  %2408 = vmatprep.mubr.f32.mxu0 %v15397_v45 }
 0x100   :  { %15549 = vst [vmem:[#allocation11_spill] sm:$0xff] %v11185_v3  ;;  %v11193_v6 = vpop.f32.mrb[19].mxu0  ;;  %7763 = vmatmul.mubr.msk.bf16.gmra.mrb[120].mxu1 %vm344_vm3, %v290_v1 }
 0x101   :  { %15550 = vst [vmem:[#allocation12_spill] sm:$0xff] %v11193_v6  ;;  %856 = vmatprep.mubr.bf16.mxu1 %v15399_v2 }
 0x102   :  { %7847 = vmatmul.mubr.msk.f32.gmra.mrb[124].mxu0 %vm2001_vm5, %v1895_v4 }
 0x103   :  { %2414 = vmatprep.mubr.f32.mxu0 %v15397_v45  ;;  %v11212_v12 = vpop.f32.mrb[16].mxu1 }
 0x104   :  { %v11217_v14 = vpop.f32.mrb[17].mxu1 }
 0x105   :  { %v11210_v11 = vpop.f32.mrb[20].mxu0  ;;  %v11225_v18 = vpop.f32.mrb[18].mxu1 }
 0x106   :  { %15551 = vst [vmem:[#allocation13_spill] sm:$0xff] %v11210_v11  ;;  %v11214_v13 = vpop.f32.mrb[21].mxu0  ;;  %7848 = vmatmul.mubr.msk.f32.gmra.mrb[126].mxu0 %vm2001_vm5, %v1896_v8  ;;  %v11229_v21 = vpop.f32.mrb[19].mxu1 }
 0x107   :  { %15552 = vst [vmem:[#allocation14_spill] sm:$0xff] %v11214_v13  ;;  %v11219_v16 = vpop.f32.mrb[22].mxu0  ;;  %2420 = vmatprep.mubr.f32.mxu0 %v15397_v45 }
 0x108   :  { %15553 = vst [vmem:[#allocation15_spill] sm:$0xff] %v11219_v16  ;;  %v11227_v20 = vpop.f32.mrb[23].mxu0  ;;  %7764 = vmatmul.mubr.msk.bf16.gmra.mrb[124].mxu1 %vm344_vm3, %v291_v15  ;;  %v221_v15 = vld [vmem:[%s15383_s1 + $0x228] sm:$0xff] }
 0x109   :  { %15554 = vst [vmem:[#allocation16_spill] sm:$0xff] %v11227_v20  ;;  %866 = vmatprep.mubr.bf16.mxu1 %v15399_v2 }
 0x10a   :  { %7849 = vmatmul.mubr.msk.f32.gmra.mrb[128].mxu0 %vm2001_vm5, %v1897_v17 }
 0x10b   :  { %2426 = vmatprep.mubr.f32.mxu0 %v15397_v45  ;;  %v11246_v28 = vpop.f32.mrb[20].mxu1 }
 0x10c   :  { %v11251_v31 = vpop.f32.mrb[21].mxu1 }
 0x10d   :  { %v11244_v27 = vpop.f32.mrb[24].mxu0  ;;  %v11259_v35 = vpop.f32.mrb[22].mxu1 }
 0x10e   :  { %15555 = vst [vmem:[#allocation17_spill] sm:$0xff] %v11244_v27  ;;  %v11248_v30 = vpop.f32.mrb[25].mxu0  ;;  %7850 = vmatmul.mubr.msk.f32.gmra.mrb[130].mxu0 %vm2001_vm5, %v1898_v23  ;;  %v11263_v38 = vpop.f32.mrb[23].mxu1 }
 0x10f   :  { %15556 = vst [vmem:[#allocation18_spill] sm:$0xff] %v11248_v30  ;;  %v11253_v33 = vpop.f32.mrb[26].mxu0  ;;  %2432 = vmatprep.mubr.f32.mxu0 %v15397_v45 }
 0x110   :  { %15557 = vst [vmem:[#allocation19_spill] sm:$0xff] %v11253_v33  ;;  %v11261_v37 = vpop.f32.mrb[27].mxu0  ;;  %7765 = vmatmul.mubr.msk.bf16.gmra.mrb[128].mxu1 %vm344_vm3, %v292_v32  ;;  %v294_v32 = vpack.c.bf16 %v221_v15, %v220_v10  ;;  %v1904_v15 = vld [vmem:[%s15391_s9 + $0x58] sm:$0xff] }
 0x111   :  { %15558 = vst [vmem:[#allocation20_spill] sm:$0xff] %v11261_v37  ;;  %876 = vmatprep.mubr.bf16.mxu1 %v15399_v2 }
 0x112   :  { %7851 = vmatmul.mubr.msk.f32.gmra.mrb[132].mxu0 %vm2001_vm5, %v1899_v34 }
 0x113   :  { %2438 = vmatprep.mubr.f32.mxu0 %v15397_v45  ;;  %v11280_v47 = vpop.f32.mrb[24].mxu1 }
 0x114   :  { %v11285_v54 = vpop.f32.mrb[25].mxu1 }
 0x115   :  { %v11278_v46 = vpop.f32.mrb[28].mxu0  ;;  %v11293_v1 = vpop.f32.mrb[26].mxu1 }
 0x116   :  { %15559 = vst [vmem:[#allocation21_spill] sm:$0xff] %v11278_v46  ;;  %v11282_v52 = vpop.f32.mrb[29].mxu0  ;;  %7852 = vmatmul.mubr.msk.f32.gmra.mrb[134].mxu0 %vm2001_vm5, %v1900_v40  ;;  %v11297_v8 = vpop.f32.mrb[27].mxu1  ;;  %v1903_v40 = vld [vmem:[%s15391_s9 + $0x50] sm:$0xff] }
 0x117   :  { %15560 = vst [vmem:[#allocation22_spill] sm:$0xff] %v11282_v52  ;;  %v11287_v59 = vpop.f32.mrb[30].mxu0  ;;  %2444 = vmatprep.mubr.f32.mxu0 %v15397_v45 }
 0x118   :  { %15561 = vst [vmem:[#allocation23_spill] sm:$0xff] %v11287_v59  ;;  %v11295_v4 = vpop.f32.mrb[31].mxu0  ;;  %7766 = vmatmul.mubr.msk.bf16.gmra.mrb[132].mxu1 %vm344_vm3, %v293_v58 }
 0x119   :  { %15562 = vst [vmem:[#allocation24_spill] sm:$0xff] %v11295_v4  ;;  %886 = vmatprep.mubr.bf16.mxu1 %v15399_v2 }
 0x11a   :  { %7853 = vmatmul.mubr.msk.f32.gmra.mrb[136].mxu0 %vm2001_vm5, %v1901_v60  ;;  %v3261_v60 = vld [vmem:[%s15389_s7] sm:$0xff] }
 0x11b   :  { %2450 = vmatprep.mubr.f32.mxu0 %v15397_v45  ;;  %v11314_v23 = vpop.f32.mrb[28].mxu1 }
 0x11c   :  { %v11319_v25 = vpop.f32.mrb[29].mxu1 }
 0x11d   :  { %v11312_v17 = vpop.f32.mrb[32].mxu0  ;;  %v11327_v41 = vpop.f32.mrb[30].mxu1 }
 0x11e   :  { %15563 = vst [vmem:[#allocation25_spill] sm:$0xff] %v11312_v17  ;;  %v11316_v24 = vpop.f32.mrb[33].mxu0  ;;  %7854 = vmatmul.mubr.msk.f32.gmra.mrb[138].mxu0 %vm2001_vm5, %v1902_v9  ;;  %v11331_v58 = vpop.f32.mrb[31].mxu1  ;;  %v3262_v9 = vld [vmem:[%s15389_s7 + $0x8] sm:$0xff]  ;;  %v222_v17 = vld [vmem:[%s15383_s1 + $0x230] sm:$0xff] }
 0x11f   :  { %15564 = vst [vmem:[#allocation26_spill] sm:$0xff] %v11316_v24  ;;  %v11321_v34 = vpop.f32.mrb[34].mxu0  ;;  %2456 = vmatprep.mubr.f32.mxu0 %v15397_v45  ;;  %v9453_v10 = vpack.c.bf16 %v3262_v9, %v3261_v60  ;;  %v223_v60 = vld [vmem:[%s15383_s1 + $0x238] sm:$0xff]  ;;  %v15401_v9 = vmov 0.0|0.0  }
 0x120   :  { %15565 = vst [vmem:[#allocation27_spill] sm:$0xff] %v11321_v34  ;;  %v11329_v43 = vpop.f32.mrb[35].mxu0  ;;  %7767 = vmatmul.mubr.msk.bf16.gmra.mrb[136].mxu1 %vm344_vm3, %v294_v32  ;;  %9452 = vmatprep.subr.bf16.mxu1 %v15401_v9  ;;  %v3263_v32 = vld [vmem:[%s15389_s7 + $0x10] sm:$0xff]  ;;  %v295_v9 = vpack.c.bf16 %v223_v60, %v222_v17  ;;  %v3265_v17 = vld [vmem:[%s15389_s7 + $0x20] sm:$0xff]  ;;  %v1906_v60 = vld [vmem:[%s15391_s9 + $0x68] sm:$0xff] }
 0x121   :  { %15566 = vst [vmem:[#allocation28_spill] sm:$0xff] %v11329_v43  ;;  %896 = vmatprep.mubr.bf16.mxu1 %v15399_v2  ;;  %9454 = vmatpush1.bf16.msra.mxu1 %v9453_v10  ;;  %v3264_v2 = vld [vmem:[%s15389_s7 + $0x18] sm:$0xff]  ;;  %v15569_v43 = vmov 0.0|0.0   ;;  %v1905_v10 = vld [vmem:[%s15391_s9 + $0x60] sm:$0xff] }
 0x122   :  { %7855 = vmatmul.mubr.msk.f32.gmra.mrb[140].mxu0 %vm2001_vm5, %v1903_v40  ;;  %9455 = vmatprep.subr.bf16.mxu1 %v15569_v43  ;;  %v9456_v46 = vpack.c.bf16 %v3264_v2, %v3263_v32  ;;  %v3266_v2 = vld [vmem:[%s15389_s7 + $0x28] sm:$0xff]  ;;  %v15573_v32 = vmov 0  }
 0x123   :  { %2462 = vmatprep.mubr.f32.mxu0 %v15397_v45  ;;  %v11358_v45 = vpop.f32.mrb[32].mxu1 }
 0x124   :  { %v11366_v24 = vpop.f32.mrb[33].mxu1 }
 0x125   :  { %v11356_v40 = vpop.f32.mrb[36].mxu0  ;;  %v11375_v52 = vpop.f32.mrb[34].mxu1  ;;  %9457 = vmatpush1.bf16.msra.mxu1 %v9456_v46  ;;  %v225_v46 = vld [vmem:[%s15383_s1 + $0x248] sm:$0xff] }
 0x126   :  { %15567 = vst [vmem:[#allocation29_spill] sm:$0xff] %v11356_v40  ;;  %v11363_v34 = vpop.f32.mrb[37].mxu0  ;;  %7856 = vmatmul.mubr.msk.f32.gmra.mrb[142].mxu0 %vm2001_vm5, %v1904_v15  ;;  %v15571_v40 = vmov 0.0   ;;  %v9459_v15 = vpack.c.bf16 %v3266_v2, %v3265_v17  ;;  %9458 = vmatprep.subr.bf16.mxu1 %v15569_v43  ;;  %v3268_v2 = vld [vmem:[%s15389_s7 + $0x38] sm:$0xff] }
 0x127   :  { %15568 = vst [vmem:[#allocation30_spill] sm:$0xff] %v11363_v34  ;;  %v11369_v59 = vpop.f32.mrb[38].mxu0  ;;  %2468 = vmatprep.mubr.f32.mxu0 %v15571_v40  ;;  %v11379_v34 = vpop.f32.mrb[35].mxu1 }
 0x128   :  { %15570 = vst [vmem:[#allocation31_spill] sm:$0xff] %v11369_v59  ;;  %v11377_v4 = vpop.f32.mrb[39].mxu0  ;;  %7768 = vmatmul.mubr.msk.bf16.gmra.mrb[140].mxu1 %vm344_vm3, %v295_v9  ;;  %v224_v59 = vld [vmem:[%s15383_s1 + $0x240] sm:$0xff]  ;;  %v3267_v9 = vld [vmem:[%s15389_s7 + $0x30] sm:$0xff] }
 0x129   :  { %15572 = vst [vmem:[#allocation32_spill] sm:$0xff] %v11377_v4  ;;  %906 = vmatprep.mubr.bf16.mxu1 %v15573_v32  ;;  %9460 = vmatpush1.bf16.msra.mxu1 %v9459_v15  ;;  %v296_v33 = vpack.c.bf16 %v225_v46, %v224_v59  ;;  %v9462_v30 = vpack.c.bf16 %v3268_v2, %v3267_v9  ;;  %v1907_v15 = vld [vmem:[%s15391_s9 + $0x70] sm:$0xff]  ;;  %v3269_v59 = vld [vmem:[%s15389_s7 + $0x40] sm:$0xff]  ;;  %v1908_v9 = vld [vmem:[%s15391_s9 + $0x78] sm:$0xff] }
 0x12a   :  { %7857 = vmatmul.mubr.msk.f32.gmra.mrb[144].mxu0 %vm2001_vm5, %v1905_v10  ;;  %9461 = vmatprep.subr.bf16.mxu1 %v15569_v43  ;;  %v226_v2 = vld [vmem:[%s15383_s1 + $0x250] sm:$0xff] }
 0x12b   :  { %2474 = vmatprep.mubr.f32.mxu0 %v15571_v40  ;;  %v11406_v17 = vpop.f32.mrb[36].mxu1 }
 0x12c   :  { %v11414_v27 = vpop.f32.mrb[37].mxu1 }
 0x12d   :  { %v11404_v10 = vpop.f32.mrb[40].mxu0  ;;  %9463 = vmatpush1.bf16.msra.mxu1 %v9462_v30  ;;  %v227_v30 = vld [vmem:[%s15383_s1 + $0x258] sm:$0xff] }
 0x12e   :  { %15574 = vst [vmem:[#allocation33_spill] sm:$0xff] %v11404_v10  ;;  %v11411_v4 = vpop.f32.mrb[41].mxu0  ;;  %7858 = vmatmul.mubr.msk.f32.gmra.mrb[146].mxu0 %vm2001_vm5, %v1906_v60  ;;  %v11423_v10 = vpop.f32.mrb[38].mxu1  ;;  %v3270_v60 = vld [vmem:[%s15389_s7 + $0x48] sm:$0xff]  ;;  %9464 = vmatprep.subr.bf16.mxu1 %v15569_v43  ;;  %v297_v16 = vpack.c.bf16 %v227_v30, %v226_v2 }
 0x12f   :  { %15575 = vst [vmem:[#allocation34_spill] sm:$0xff] %v11411_v4  ;;  %v11417_v37 = vpop.f32.mrb[42].mxu0  ;;  %2480 = vmatprep.mubr.f32.mxu0 %v15571_v40  ;;  %v11427_v4 = vpop.f32.mrb[39].mxu1  ;;  %v9465_v46 = vpack.c.bf16 %v3270_v60, %v3269_v59  ;;  %v3272_v60 = vld [vmem:[%s15389_s7 + $0x58] sm:$0xff]  ;;  %v3274_v2 = vld [vmem:[%s15389_s7 + $0x68] sm:$0xff] }
 0x130   :  { %15576 = vst [vmem:[#allocation35_spill] sm:$0xff] %v11417_v37  ;;  %v11425_v11 = vpop.f32.mrb[43].mxu0  ;;  %7769 = vmatmul.mubr.msk.bf16.gmra.mrb[144].mxu1 %vm344_vm3, %v296_v33  ;;  %v3271_v33 = vld [vmem:[%s15389_s7 + $0x50] sm:$0xff] }
 0x131   :  { %15577 = vst [vmem:[#allocation36_spill] sm:$0xff] %v11425_v11  ;;  %916 = vmatprep.mubr.bf16.mxu1 %v15573_v32  ;;  %9466 = vmatpush1.bf16.msra.mxu1 %v9465_v46  ;;  %v9468_v13 = vpack.c.bf16 %v3272_v60, %v3271_v33  ;;  %v1909_v46 = vld [vmem:[%s15391_s9 + $0x80] sm:$0xff]  ;;  %v1910_v33 = vld [vmem:[%s15391_s9 + $0x88] sm:$0xff] }
 0x132   :  { %7859 = vmatmul.mubr.msk.f32.gmra.mrb[148].mxu0 %vm2001_vm5, %v1907_v15  ;;  %9467 = vmatprep.subr.bf16.mxu1 %v15569_v43  ;;  %v228_v60 = vld [vmem:[%s15383_s1 + $0x260] sm:$0xff] }
 0x133   :  { %2486 = vmatprep.mubr.f32.mxu0 %v15571_v40  ;;  %v11454_v59 = vpop.f32.mrb[40].mxu1 }
 0x134   :  { %v11462_v11 = vpop.f32.mrb[41].mxu1 }
 0x135   :  { %v11452_v15 = vpop.f32.mrb[44].mxu0  ;;  %9469 = vmatpush1.bf16.msra.mxu1 %v9468_v13  ;;  %v229_v13 = vld [vmem:[%s15383_s1 + $0x268] sm:$0xff] }
 0x136   :  { %15578 = vst [vmem:[#allocation37_spill] sm:$0xff] %v11452_v15  ;;  %v11459_v37 = vpop.f32.mrb[45].mxu0  ;;  %7860 = vmatmul.mubr.msk.f32.gmra.mrb[150].mxu0 %vm2001_vm5, %v1908_v9  ;;  %v11471_v15 = vpop.f32.mrb[42].mxu1  ;;  %v3273_v9 = vld [vmem:[%s15389_s7 + $0x60] sm:$0xff]  ;;  %9470 = vmatprep.subr.bf16.mxu1 %v15569_v43  ;;  %v298_v3 = vpack.c.bf16 %v229_v13, %v228_v60  ;;  %v3278_v60 = vld [vmem:[%s15389_s7 + $0x88] sm:$0xff] }
 0x137   :  { %15579 = vst [vmem:[#allocation38_spill] sm:$0xff] %v11459_v37  ;;  %v11465_v20 = vpop.f32.mrb[46].mxu0  ;;  %2492 = vmatprep.mubr.f32.mxu0 %v15571_v40  ;;  %v11475_v37 = vpop.f32.mrb[43].mxu1  ;;  %v9471_v30 = vpack.c.bf16 %v3274_v2, %v3273_v9  ;;  %v3276_v2 = vld [vmem:[%s15389_s7 + $0x78] sm:$0xff] }
 0x138   :  { %15580 = vst [vmem:[#allocation39_spill] sm:$0xff] %v11465_v20  ;;  %v11473_v61 = vpop.f32.mrb[47].mxu0  ;;  %7770 = vmatmul.mubr.msk.bf16.gmra.mrb[148].mxu1 %vm344_vm3, %v297_v16  ;;  %v3275_v16 = vld [vmem:[%s15389_s7 + $0x70] sm:$0xff] }
 0x139   :  { %15581 = vst [vmem:[#allocation40_spill] sm:$0xff] %v11473_v61  ;;  %926 = vmatprep.mubr.bf16.mxu1 %v15573_v32  ;;  %9472 = vmatpush1.bf16.msra.mxu1 %v9471_v30  ;;  %v9474_v63 = vpack.c.bf16 %v3276_v2, %v3275_v16  ;;  %v1911_v30 = vld [vmem:[%s15391_s9 + $0x90] sm:$0xff]  ;;  %v1912_v16 = vld [vmem:[%s15391_s9 + $0x98] sm:$0xff] }
 0x13a   :  { %7861 = vmatmul.mubr.msk.f32.gmra.mrb[152].mxu0 %vm2001_vm5, %v1909_v46  ;;  %9473 = vmatprep.subr.bf16.mxu1 %v15569_v43  ;;  %v230_v2 = vld [vmem:[%s15383_s1 + $0x270] sm:$0xff] }
 0x13b   :  { %2498 = vmatprep.mubr.f32.mxu0 %v15571_v40  ;;  %v11502_v9 = vpop.f32.mrb[44].mxu1 }
 0x13c   :  { %v11510_v61 = vpop.f32.mrb[45].mxu1 }
 0x13d   :  { %v11500_v46 = vpop.f32.mrb[48].mxu0  ;;  %9475 = vmatpush1.bf16.msra.mxu1 %v9474_v63  ;;  %v231_v63 = vld [vmem:[%s15383_s1 + $0x278] sm:$0xff] }
 0x13e   :  { %15582 = vst [vmem:[#allocation41_spill] sm:$0xff] %v11500_v46  ;;  %v11507_v20 = vpop.f32.mrb[49].mxu0  ;;  %7862 = vmatmul.mubr.msk.f32.gmra.mrb[154].mxu0 %vm2001_vm5, %v1910_v33  ;;  %v11519_v46 = vpop.f32.mrb[46].mxu1  ;;  %v3277_v33 = vld [vmem:[%s15389_s7 + $0x80] sm:$0xff]  ;;  %9476 = vmatprep.subr.bf16.mxu1 %v15569_v43  ;;  %v299_v53 = vpack.c.bf16 %v231_v63, %v230_v2  ;;  %v3282_v2 = vld [vmem:[%s15389_s7 + $0xa8] sm:$0xff] }
 0x13f   :  { %15583 = vst [vmem:[#allocation42_spill] sm:$0xff] %v11507_v20  ;;  %v11513_v6 = vpop.f32.mrb[50].mxu0  ;;  %2504 = vmatprep.mubr.f32.mxu0 %v15571_v40  ;;  %v11523_v20 = vpop.f32.mrb[47].mxu1  ;;  %v9477_v13 = vpack.c.bf16 %v3278_v60, %v3277_v33  ;;  %v3280_v60 = vld [vmem:[%s15389_s7 + $0x98] sm:$0xff] }
 0x140   :  { %15584 = vst [vmem:[#allocation43_spill] sm:$0xff] %v11513_v6  ;;  %v11521_v48 = vpop.f32.mrb[51].mxu0  ;;  %7771 = vmatmul.mubr.msk.bf16.gmra.mrb[152].mxu1 %vm344_vm3, %v298_v3  ;;  %v3279_v3 = vld [vmem:[%s15389_s7 + $0x90] sm:$0xff] }
 0x141   :  { %15585 = vst [vmem:[#allocation44_spill] sm:$0xff] %v11521_v48  ;;  %936 = vmatprep.mubr.bf16.mxu1 %v15573_v32  ;;  %9478 = vmatpush1.bf16.msra.mxu1 %v9477_v13  ;;  %v9480_v50 = vpack.c.bf16 %v3280_v60, %v3279_v3  ;;  %v1913_v13 = vld [vmem:[%s15391_s9 + $0xa0] sm:$0xff]  ;;  %v1914_v3 = vld [vmem:[%s15391_s9 + $0xa8] sm:$0xff] }
 0x142   :  { %7863 = vmatmul.mubr.msk.f32.gmra.mrb[156].mxu0 %vm2001_vm5, %v1911_v30  ;;  %9479 = vmatprep.subr.bf16.mxu1 %v15569_v43  ;;  %v232_v60 = vld [vmem:[%s15383_s1 + $0x280] sm:$0xff] }
 0x143   :  { %2510 = vmatprep.mubr.f32.mxu0 %v15571_v40  ;;  %v11550_v33 = vpop.f32.mrb[48].mxu1 }
 0x144   :  { %15587 = vst [vmem:[#allocation46_spill] sm:$0xff] %v11550_v33  ;;  %v11558_v48 = vpop.f32.mrb[49].mxu1 }
 0x145   :  { %v11548_v30 = vpop.f32.mrb[52].mxu0  ;;  %15589 = vst [vmem:[#allocation48_spill] sm:$0xff] %v11558_v48  ;;  %9481 = vmatpush1.bf16.msra.mxu1 %v9480_v50  ;;  %v233_v50 = vld [vmem:[%s15383_s1 + $0x288] sm:$0xff] }
 0x146   :  { %15586 = vst [vmem:[#allocation45_spill] sm:$0xff] %v11548_v30  ;;  %v11555_v6 = vpop.f32.mrb[53].mxu0  ;;  %7864 = vmatmul.mubr.msk.f32.gmra.mrb[158].mxu0 %vm2001_vm5, %v1912_v16  ;;  %v11567_v30 = vpop.f32.mrb[50].mxu1  ;;  %v3281_v16 = vld [vmem:[%s15389_s7 + $0xa0] sm:$0xff]  ;;  %9482 = vmatprep.subr.bf16.mxu1 %v15569_v43 }
 0x147   :  { %15588 = vst [vmem:[#allocation47_spill] sm:$0xff] %v11555_v6  ;;  %v11561_v56 = vpop.f32.mrb[54].mxu0  ;;  %2516 = vmatprep.mubr.f32.mxu0 %v15571_v40  ;;  %15591 = vst [vmem:[#allocation50_spill] sm:$0xff] %v11567_v30  ;;  %v11571_v6 = vpop.f32.mrb[51].mxu1  ;;  %v9483_v63 = vpack.c.bf16 %v3282_v2, %v3281_v16  ;;  %v300_v30 = vpack.c.bf16 %v233_v50, %v232_v60  ;;  %v234_v60 = vld [vmem:[%s15383_s1 + $0x290] sm:$0xff] }
 0x148   :  { %15590 = vst [vmem:[#allocation49_spill] sm:$0xff] %v11561_v56  ;;  %v11569_v33 = vpop.f32.mrb[55].mxu0  ;;  %15593 = vst [vmem:[#allocation52_spill] sm:$0xff] %v11571_v6  ;;  %7772 = vmatmul.mubr.msk.bf16.gmra.mrb[156].mxu1 %vm344_vm3, %v299_v53  ;;  %v3283_v53 = vld [vmem:[%s15389_s7 + $0xb0] sm:$0xff] }
 0x149   :  { %15592 = vst [vmem:[#allocation51_spill] sm:$0xff] %v11569_v33  ;;  %946 = vmatprep.mubr.bf16.mxu1 %v15573_v32  ;;  %9484 = vmatpush1.bf16.msra.mxu1 %v9483_v63 }
 0x14a   :  { %7865 = vmatmul.mubr.msk.f32.gmra.mrb[160].mxu0 %vm2001_vm5, %v1913_v13  ;;  %v3284_v13 = vld [vmem:[%s15389_s7 + $0xb8] sm:$0xff]  ;;  %9485 = vmatprep.subr.bf16.mxu1 %v15569_v43 }
 0x14b   :  { %2522 = vmatprep.mubr.f32.mxu0 %v15571_v40  ;;  %v11601_v2 = vpop.f32.mrb[52].mxu1  ;;  %v9486_v56 = vpack.c.bf16 %v3284_v13, %v3283_v53 }
 0x14c   :  { %15595 = vst [vmem:[#allocation54_spill] sm:$0xff] %v11601_v2  ;;  %v11606_v6 = vpop.f32.mrb[53].mxu1 }
 0x14d   :  { %v11599_v16 = vpop.f32.mrb[56].mxu0  ;;  %v11615_v2 = vpop.f32.mrb[54].mxu1  ;;  %9487 = vmatpush1.bf16.msra.mxu1 %v9486_v56  ;;  %v235_v56 = vld [vmem:[%s15383_s1 + $0x298] sm:$0xff] }
 0x14e   :  { %15594 = vst [vmem:[#allocation53_spill] sm:$0xff] %v11599_v16  ;;  %v11603_v33 = vpop.f32.mrb[57].mxu0  ;;  %7866 = vmatmul.mubr.msk.f32.gmra.mrb[162].mxu0 %vm2001_vm5, %v1914_v3  ;;  %v1915_v16 = vld [vmem:[%s15391_s9 + $0xb0] sm:$0xff]  ;;  %v11619_v53 = vpop.f32.mrb[55].mxu1  ;;  %v1916_v3 = vld [vmem:[%s15391_s9 + $0xb8] sm:$0xff] }
 0x14f   :  { %15596 = vst [vmem:[#allocation55_spill] sm:$0xff] %v11603_v33  ;;  %v11609_v48 = vpop.f32.mrb[58].mxu0  ;;  %2528 = vmatprep.mubr.f32.mxu0 %v15571_v40 }
 0x150   :  { %15597 = vst [vmem:[#allocation56_spill] sm:$0xff] %v11609_v48  ;;  %v11617_v63 = vpop.f32.mrb[59].mxu0  ;;  %7773 = vmatmul.mubr.msk.bf16.gmra.mrb[160].mxu1 %vm344_vm3, %v300_v30  ;;  %v301_v48 = vpack.c.bf16 %v235_v56, %v234_v60  ;;  %v236_v60 = vld [vmem:[%s15383_s1 + $0x2a0] sm:$0xff]  ;;  %v237_v56 = vld [vmem:[%s15383_s1 + $0x2a8] sm:$0xff] }
 0x151   :  { %15598 = vst [vmem:[#allocation57_spill] sm:$0xff] %v11617_v63  ;;  %956 = vmatprep.mubr.bf16.mxu1 %v15573_v32  ;;  %v1917_v63 = vld [vmem:[%s15391_s9 + $0xc0] sm:$0xff] }
 0x152   :  { %7867 = vmatmul.mubr.msk.f32.gmra.mrb[164].mxu0 %vm2001_vm5, %v1915_v16 }
 0x153   :  { %2534 = vmatprep.mubr.f32.mxu0 %v15571_v40  ;;  %v11636_v13 = vpop.f32.mrb[56].mxu1 }
 0x154   :  { %15600 = vst [vmem:[#allocation59_spill] sm:$0xff] %v11636_v13  ;;  %v11641_v16 = vpop.f32.mrb[57].mxu1 }
 0x155   :  { %v11634_v50 = vpop.f32.mrb[60].mxu0  ;;  %15602 = vst [vmem:[#allocation61_spill] sm:$0xff] %v11641_v16  ;;  %v11649_v43 = vpop.f32.mrb[58].mxu1 }
 0x156   :  { %15599 = vst [vmem:[#allocation58_spill] sm:$0xff] %v11634_v50  ;;  %v11638_v30 = vpop.f32.mrb[61].mxu0  ;;  %7868 = vmatmul.mubr.msk.f32.gmra.mrb[166].mxu0 %vm2001_vm5, %v1916_v3  ;;  %15604 = vst [vmem:[#allocation63_spill] sm:$0xff] %v11649_v43  ;;  %v11653_v13 = vpop.f32.mrb[59].mxu1  ;;  %v1918_v3 = vld [vmem:[%s15391_s9 + $0xc8] sm:$0xff]  ;;  %v1919_v43 = vld [vmem:[%s15391_s9 + $0xd0] sm:$0xff] }
 0x157   :  { %15601 = vst [vmem:[#allocation60_spill] sm:$0xff] %v11638_v30  ;;  %v11643_v33 = vpop.f32.mrb[62].mxu0  ;;  %2540 = vmatprep.mubr.f32.mxu0 %v15571_v40  ;;  %15606 = vst [vmem:[#allocation65_spill] sm:$0xff] %v11653_v13 }
 0x158   :  { %15603 = vst [vmem:[#allocation62_spill] sm:$0xff] %v11643_v33  ;;  %v11651_v50 = vpop.f32.mrb[63].mxu0  ;;  %7774 = vmatmul.mubr.msk.bf16.gmra.mrb[164].mxu1 %vm344_vm3, %v301_v48 }
 0x159   :  { %15605 = vst [vmem:[#allocation64_spill] sm:$0xff] %v11651_v50  ;;  %966 = vmatprep.mubr.bf16.mxu1 %v15573_v32  ;;  %v302_v50 = vpack.c.bf16 %v237_v56, %v236_v60  ;;  %v238_v60 = vld [vmem:[%s15383_s1 + $0x2b0] sm:$0xff]  ;;  %v239_v56 = vld [vmem:[%s15383_s1 + $0x2b8] sm:$0xff] }
 0x15a   :  { %7869 = vmatmul.mubr.msk.f32.gmra.mrb[168].mxu0 %vm2001_vm5, %v1917_v63 }
 0x15b   :  { %2546 = vmatprep.mubr.f32.mxu0 %v15571_v40  ;;  %v11670_v63 = vpop.f32.mrb[60].mxu1 }
 0x15c   :  { %15608 = vst [vmem:[#allocation67_spill] sm:$0xff] %v11670_v63  ;;  %v11675_v30 = vpop.f32.mrb[61].mxu1 }
 0x15d   :  { %v11668_v33 = vpop.f32.mrb[64].mxu0  ;;  %15610 = vst [vmem:[#allocation69_spill] sm:$0xff] %v11675_v30  ;;  %v11683_v16 = vpop.f32.mrb[62].mxu1 }
 0x15e   :  { %15607 = vst [vmem:[#allocation66_spill] sm:$0xff] %v11668_v33  ;;  %v11672_v48 = vpop.f32.mrb[65].mxu0  ;;  %7870 = vmatmul.mubr.msk.f32.gmra.mrb[170].mxu0 %vm2001_vm5, %v1918_v3  ;;  %15612 = vst [vmem:[#allocation71_spill] sm:$0xff] %v11683_v16  ;;  %v11687_v63 = vpop.f32.mrb[63].mxu1  ;;  %v1920_v3 = vld [vmem:[%s15391_s9 + $0xd8] sm:$0xff]  ;;  %v1921_v16 = vld [vmem:[%s15391_s9 + $0xe0] sm:$0xff] }
 0x15f   :  { %15609 = vst [vmem:[#allocation68_spill] sm:$0xff] %v11672_v48  ;;  %v11677_v13 = vpop.f32.mrb[66].mxu0  ;;  %2552 = vmatprep.mubr.f32.mxu0 %v15571_v40  ;;  %15614 = vst [vmem:[#allocation73_spill] sm:$0xff] %v11687_v63 }
 0x160   :  { %15611 = vst [vmem:[#allocation70_spill] sm:$0xff] %v11677_v13  ;;  %v11685_v33 = vpop.f32.mrb[67].mxu0  ;;  %7775 = vmatmul.mubr.msk.bf16.gmra.mrb[168].mxu1 %vm344_vm3, %v302_v50 }
 0x161   :  { %15613 = vst [vmem:[#allocation72_spill] sm:$0xff] %v11685_v33  ;;  %976 = vmatprep.mubr.bf16.mxu1 %v15573_v32  ;;  %v303_v33 = vpack.c.bf16 %v239_v56, %v238_v60  ;;  %v240_v60 = vld [vmem:[%s15383_s1 + $0x2c0] sm:$0xff]  ;;  %v241_v56 = vld [vmem:[%s15383_s1 + $0x2c8] sm:$0xff] }
 0x162   :  { %7871 = vmatmul.mubr.msk.f32.gmra.mrb[172].mxu0 %vm2001_vm5, %v1919_v43 }
 0x163   :  { %2558 = vmatprep.mubr.f32.mxu0 %v15571_v40  ;;  %v11704_v43 = vpop.f32.mrb[64].mxu1 }
 0x164   :  { %15616 = vst [vmem:[#allocation75_spill] sm:$0xff] %v11704_v43  ;;  %v11709_v48 = vpop.f32.mrb[65].mxu1 }
 0x165   :  { %v11702_v13 = vpop.f32.mrb[68].mxu0  ;;  %15618 = vst [vmem:[#allocation77_spill] sm:$0xff] %v11709_v48  ;;  %v11717_v30 = vpop.f32.mrb[66].mxu1 }
 0x166   :  { %15615 = vst [vmem:[#allocation74_spill] sm:$0xff] %v11702_v13  ;;  %v11706_v50 = vpop.f32.mrb[69].mxu0  ;;  %7872 = vmatmul.mubr.msk.f32.gmra.mrb[174].mxu0 %vm2001_vm5, %v1920_v3  ;;  %15620 = vst [vmem:[#allocation79_spill] sm:$0xff] %v11717_v30  ;;  %v11721_v43 = vpop.f32.mrb[67].mxu1  ;;  %v1922_v3 = vld [vmem:[%s15391_s9 + $0xe8] sm:$0xff]  ;;  %v1923_v30 = vld [vmem:[%s15391_s9 + $0xf0] sm:$0xff] }
 0x167   :  { %15617 = vst [vmem:[#allocation76_spill] sm:$0xff] %v11706_v50  ;;  %v11711_v63 = vpop.f32.mrb[70].mxu0  ;;  %2564 = vmatprep.mubr.f32.mxu0 %v15571_v40  ;;  %15622 = vst [vmem:[#allocation81_spill] sm:$0xff] %v11721_v43 }
 0x168   :  { %15619 = vst [vmem:[#allocation78_spill] sm:$0xff] %v11711_v63  ;;  %v11719_v13 = vpop.f32.mrb[71].mxu0  ;;  %7776 = vmatmul.mubr.msk.bf16.gmra.mrb[172].mxu1 %vm344_vm3, %v303_v33 }
 0x169   :  { %15621 = vst [vmem:[#allocation80_spill] sm:$0xff] %v11719_v13  ;;  %986 = vmatprep.mubr.bf16.mxu1 %v15573_v32  ;;  %v304_v13 = vpack.c.bf16 %v241_v56, %v240_v60  ;;  %v242_v60 = vld [vmem:[%s15383_s1 + $0x2d0] sm:$0xff]  ;;  %v243_v56 = vld [vmem:[%s15383_s1 + $0x2d8] sm:$0xff] }
 0x16a   :  { %7873 = vmatmul.mubr.msk.f32.gmra.mrb[176].mxu0 %vm2001_vm5, %v1921_v16 }
 0x16b   :  { %2570 = vmatprep.mubr.f32.mxu0 %v15571_v40  ;;  %v11738_v16 = vpop.f32.mrb[68].mxu1 }
 0x16c   :  { %15624 = vst [vmem:[#allocation83_spill] sm:$0xff] %v11738_v16  ;;  %v11743_v50 = vpop.f32.mrb[69].mxu1 }
 0x16d   :  { %v11736_v63 = vpop.f32.mrb[72].mxu0  ;;  %15626 = vst [vmem:[#allocation85_spill] sm:$0xff] %v11743_v50  ;;  %v11751_v48 = vpop.f32.mrb[70].mxu1 }
 0x16e   :  { %15623 = vst [vmem:[#allocation82_spill] sm:$0xff] %v11736_v63  ;;  %v11740_v33 = vpop.f32.mrb[73].mxu0  ;;  %7874 = vmatmul.mubr.msk.f32.gmra.mrb[178].mxu0 %vm2001_vm5, %v1922_v3  ;;  %15628 = vst [vmem:[#allocation87_spill] sm:$0xff] %v11751_v48  ;;  %v11755_v16 = vpop.f32.mrb[71].mxu1  ;;  %v1924_v3 = vld [vmem:[%s15391_s9 + $0xf8] sm:$0xff]  ;;  %v1925_v48 = vld [vmem:[%s15391_s9 + $0x100] sm:$0xff] }
 0x16f   :  { %15625 = vst [vmem:[#allocation84_spill] sm:$0xff] %v11740_v33  ;;  %v11745_v43 = vpop.f32.mrb[74].mxu0  ;;  %2576 = vmatprep.mubr.f32.mxu0 %v15571_v40  ;;  %15630 = vst [vmem:[#allocation89_spill] sm:$0xff] %v11755_v16 }
 0x170   :  { %15627 = vst [vmem:[#allocation86_spill] sm:$0xff] %v11745_v43  ;;  %v11753_v63 = vpop.f32.mrb[75].mxu0  ;;  %7777 = vmatmul.mubr.msk.bf16.gmra.mrb[176].mxu1 %vm344_vm3, %v304_v13 }
 0x171   :  { %15629 = vst [vmem:[#allocation88_spill] sm:$0xff] %v11753_v63  ;;  %996 = vmatprep.mubr.bf16.mxu1 %v15573_v32  ;;  %v305_v63 = vpack.c.bf16 %v243_v56, %v242_v60  ;;  %v244_v60 = vld [vmem:[%s15383_s1 + $0x2e0] sm:$0xff]  ;;  %v245_v56 = vld [vmem:[%s15383_s1 + $0x2e8] sm:$0xff] }
 0x172   :  { %7875 = vmatmul.mubr.msk.f32.gmra.mrb[180].mxu0 %vm2001_vm5, %v1923_v30 }
 0x173   :  { %2582 = vmatprep.mubr.f32.mxu0 %v15571_v40  ;;  %v11772_v30 = vpop.f32.mrb[72].mxu1 }
 0x174   :  { %15632 = vst [vmem:[#allocation91_spill] sm:$0xff] %v11772_v30  ;;  %v11777_v33 = vpop.f32.mrb[73].mxu1 }
 0x175   :  { %v11770_v43 = vpop.f32.mrb[76].mxu0  ;;  %15634 = vst [vmem:[#allocation93_spill] sm:$0xff] %v11777_v33  ;;  %v11785_v50 = vpop.f32.mrb[74].mxu1 }
 0x176   :  { %15631 = vst [vmem:[#allocation90_spill] sm:$0xff] %v11770_v43  ;;  %v11774_v13 = vpop.f32.mrb[77].mxu0  ;;  %7876 = vmatmul.mubr.msk.f32.gmra.mrb[182].mxu0 %vm2001_vm5, %v1924_v3  ;;  %15636 = vst [vmem:[#allocation95_spill] sm:$0xff] %v11785_v50  ;;  %v11789_v30 = vpop.f32.mrb[75].mxu1  ;;  %v1926_v3 = vld [vmem:[%s15391_s9 + $0x108] sm:$0xff]  ;;  %v1927_v50 = vld [vmem:[%s15391_s9 + $0x110] sm:$0xff] }
 0x177   :  { %15633 = vst [vmem:[#allocation92_spill] sm:$0xff] %v11774_v13  ;;  %v11779_v16 = vpop.f32.mrb[78].mxu0  ;;  %2588 = vmatprep.mubr.f32.mxu0 %v15571_v40  ;;  %15638 = vst [vmem:[#allocation97_spill] sm:$0xff] %v11789_v30 }
 0x178   :  { %15635 = vst [vmem:[#allocation94_spill] sm:$0xff] %v11779_v16  ;;  %v11787_v43 = vpop.f32.mrb[79].mxu0  ;;  %7778 = vmatmul.mubr.msk.bf16.gmra.mrb[180].mxu1 %vm344_vm3, %v305_v63 }
 0x179   :  { %15637 = vst [vmem:[#allocation96_spill] sm:$0xff] %v11787_v43  ;;  %1006 = vmatprep.mubr.bf16.mxu1 %v15573_v32  ;;  %v306_v43 = vpack.c.bf16 %v245_v56, %v244_v60  ;;  %v246_v60 = vld [vmem:[%s15383_s1 + $0x2f0] sm:$0xff]  ;;  %v247_v56 = vld [vmem:[%s15383_s1 + $0x2f8] sm:$0xff] }
 0x17a   :  { %7877 = vmatmul.mubr.msk.f32.gmra.mrb[184].mxu0 %vm2001_vm5, %v1925_v48 }
 0x17b   :  { %2594 = vmatprep.mubr.f32.mxu0 %v15571_v40  ;;  %v11806_v48 = vpop.f32.mrb[76].mxu1 }
 0x17c   :  { %15640 = vst [vmem:[#allocation99_spill] sm:$0xff] %v11806_v48  ;;  %v11811_v13 = vpop.f32.mrb[77].mxu1 }
 0x17d   :  { %v11804_v16 = vpop.f32.mrb[80].mxu0  ;;  %15642 = vst [vmem:[#allocation101_spill] sm:$0xff] %v11811_v13  ;;  %v11819_v33 = vpop.f32.mrb[78].mxu1 }
 0x17e   :  { %15639 = vst [vmem:[#allocation98_spill] sm:$0xff] %v11804_v16  ;;  %v11808_v63 = vpop.f32.mrb[81].mxu0  ;;  %7878 = vmatmul.mubr.msk.f32.gmra.mrb[186].mxu0 %vm2001_vm5, %v1926_v3  ;;  %15644 = vst [vmem:[#allocation103_spill] sm:$0xff] %v11819_v33  ;;  %v11823_v48 = vpop.f32.mrb[79].mxu1  ;;  %v1928_v3 = vld [vmem:[%s15391_s9 + $0x118] sm:$0xff]  ;;  %v1929_v33 = vld [vmem:[%s15391_s9 + $0x120] sm:$0xff] }
 0x17f   :  { %15641 = vst [vmem:[#allocation100_spill] sm:$0xff] %v11808_v63  ;;  %v11813_v30 = vpop.f32.mrb[82].mxu0  ;;  %2600 = vmatprep.mubr.f32.mxu0 %v15571_v40  ;;  %15646 = vst [vmem:[#allocation105_spill] sm:$0xff] %v11823_v48 }
 0x180   :  { %15643 = vst [vmem:[#allocation102_spill] sm:$0xff] %v11813_v30  ;;  %v11821_v16 = vpop.f32.mrb[83].mxu0  ;;  %7779 = vmatmul.mubr.msk.bf16.gmra.mrb[184].mxu1 %vm344_vm3, %v306_v43 }
 0x181   :  { %15645 = vst [vmem:[#allocation104_spill] sm:$0xff] %v11821_v16  ;;  %1016 = vmatprep.mubr.bf16.mxu1 %v15573_v32  ;;  %v307_v16 = vpack.c.bf16 %v247_v56, %v246_v60  ;;  %v248_v60 = vld [vmem:[%s15383_s1 + $0x300] sm:$0xff]  ;;  %v249_v56 = vld [vmem:[%s15383_s1 + $0x308] sm:$0xff] }
 0x182   :  { %7879 = vmatmul.mubr.msk.f32.gmra.mrb[188].mxu0 %vm2001_vm5, %v1927_v50 }
 0x183   :  { %2606 = vmatprep.mubr.f32.mxu0 %v15571_v40  ;;  %v11840_v50 = vpop.f32.mrb[80].mxu1 }
 0x184   :  { %15648 = vst [vmem:[#allocation107_spill] sm:$0xff] %v11840_v50  ;;  %v11845_v63 = vpop.f32.mrb[81].mxu1 }
 0x185   :  { %v11838_v30 = vpop.f32.mrb[84].mxu0  ;;  %15650 = vst [vmem:[#allocation109_spill] sm:$0xff] %v11845_v63  ;;  %v11853_v13 = vpop.f32.mrb[82].mxu1 }
 0x186   :  { %15647 = vst [vmem:[#allocation106_spill] sm:$0xff] %v11838_v30  ;;  %v11842_v43 = vpop.f32.mrb[85].mxu0  ;;  %7880 = vmatmul.mubr.msk.f32.gmra.mrb[190].mxu0 %vm2001_vm5, %v1928_v3  ;;  %15652 = vst [vmem:[#allocation111_spill] sm:$0xff] %v11853_v13  ;;  %v11857_v50 = vpop.f32.mrb[83].mxu1  ;;  %v1930_v3 = vld [vmem:[%s15391_s9 + $0x128] sm:$0xff]  ;;  %v1931_v13 = vld [vmem:[%s15391_s9 + $0x130] sm:$0xff] }
 0x187   :  { %15649 = vst [vmem:[#allocation108_spill] sm:$0xff] %v11842_v43  ;;  %v11847_v48 = vpop.f32.mrb[86].mxu0  ;;  %2612 = vmatprep.mubr.f32.mxu0 %v15571_v40  ;;  %15654 = vst [vmem:[#allocation113_spill] sm:$0xff] %v11857_v50 }
 0x188   :  { %15651 = vst [vmem:[#allocation110_spill] sm:$0xff] %v11847_v48  ;;  %v11855_v30 = vpop.f32.mrb[87].mxu0  ;;  %7780 = vmatmul.mubr.msk.bf16.gmra.mrb[188].mxu1 %vm344_vm3, %v307_v16 }
 0x189   :  { %15653 = vst [vmem:[#allocation112_spill] sm:$0xff] %v11855_v30  ;;  %1026 = vmatprep.mubr.bf16.mxu1 %v15573_v32  ;;  %v308_v30 = vpack.c.bf16 %v249_v56, %v248_v60  ;;  %v250_v60 = vld [vmem:[%s15383_s1 + $0x310] sm:$0xff]  ;;  %v251_v56 = vld [vmem:[%s15383_s1 + $0x318] sm:$0xff] }
 0x18a   :  { %7881 = vmatmul.mubr.msk.f32.gmra.mrb[192].mxu0 %vm2001_vm5, %v1929_v33 }
 0x18b   :  { %2618 = vmatprep.mubr.f32.mxu0 %v15571_v40  ;;  %v11874_v33 = vpop.f32.mrb[84].mxu1 }
 0x18c   :  { %15656 = vst [vmem:[#allocation115_spill] sm:$0xff] %v11874_v33  ;;  %v11879_v43 = vpop.f32.mrb[85].mxu1 }
 0x18d   :  { %v11872_v48 = vpop.f32.mrb[88].mxu0  ;;  %15658 = vst [vmem:[#allocation117_spill] sm:$0xff] %v11879_v43  ;;  %v11887_v63 = vpop.f32.mrb[86].mxu1 }
 0x18e   :  { %15655 = vst [vmem:[#allocation114_spill] sm:$0xff] %v11872_v48  ;;  %v11876_v16 = vpop.f32.mrb[89].mxu0  ;;  %7882 = vmatmul.mubr.msk.f32.gmra.mrb[194].mxu0 %vm2001_vm5, %v1930_v3  ;;  %15660 = vst [vmem:[#allocation119_spill] sm:$0xff] %v11887_v63  ;;  %v11891_v33 = vpop.f32.mrb[87].mxu1  ;;  %v1932_v3 = vld [vmem:[%s15391_s9 + $0x138] sm:$0xff]  ;;  %v1933_v63 = vld [vmem:[%s15391_s9 + $0x140] sm:$0xff] }
 0x18f   :  { %15657 = vst [vmem:[#allocation116_spill] sm:$0xff] %v11876_v16  ;;  %v11881_v50 = vpop.f32.mrb[90].mxu0  ;;  %2624 = vmatprep.mubr.f32.mxu0 %v15571_v40  ;;  %15662 = vst [vmem:[#allocation121_spill] sm:$0xff] %v11891_v33 }
 0x190   :  { %15659 = vst [vmem:[#allocation118_spill] sm:$0xff] %v11881_v50  ;;  %v11889_v48 = vpop.f32.mrb[91].mxu0  ;;  %7781 = vmatmul.mubr.msk.bf16.gmra.mrb[192].mxu1 %vm344_vm3, %v308_v30 }
 0x191   :  { %15661 = vst [vmem:[#allocation120_spill] sm:$0xff] %v11889_v48  ;;  %1036 = vmatprep.mubr.bf16.mxu1 %v15573_v32  ;;  %v309_v48 = vpack.c.bf16 %v251_v56, %v250_v60  ;;  %v252_v60 = vld [vmem:[%s15383_s1 + $0x320] sm:$0xff]  ;;  %v253_v56 = vld [vmem:[%s15383_s1 + $0x328] sm:$0xff] }
 0x192   :  { %7883 = vmatmul.mubr.msk.f32.gmra.mrb[196].mxu0 %vm2001_vm5, %v1931_v13 }
 0x193   :  { %2630 = vmatprep.mubr.f32.mxu0 %v15571_v40  ;;  %v11908_v13 = vpop.f32.mrb[88].mxu1 }
 0x194   :  { %15664 = vst [vmem:[#allocation123_spill] sm:$0xff] %v11908_v13  ;;  %v11913_v16 = vpop.f32.mrb[89].mxu1 }
 0x195   :  { %v11906_v50 = vpop.f32.mrb[92].mxu0  ;;  %15666 = vst [vmem:[#allocation125_spill] sm:$0xff] %v11913_v16  ;;  %v11921_v43 = vpop.f32.mrb[90].mxu1 }
 0x196   :  { %15663 = vst [vmem:[#allocation122_spill] sm:$0xff] %v11906_v50  ;;  %v11910_v30 = vpop.f32.mrb[93].mxu0  ;;  %7884 = vmatmul.mubr.msk.f32.gmra.mrb[198].mxu0 %vm2001_vm5, %v1932_v3  ;;  %15668 = vst [vmem:[#allocation127_spill] sm:$0xff] %v11921_v43  ;;  %v11925_v13 = vpop.f32.mrb[91].mxu1  ;;  %v1934_v3 = vld [vmem:[%s15391_s9 + $0x148] sm:$0xff]  ;;  %v1935_v43 = vld [vmem:[%s15391_s9 + $0x150] sm:$0xff] }
 0x197   :  { %15665 = vst [vmem:[#allocation124_spill] sm:$0xff] %v11910_v30  ;;  %v11915_v33 = vpop.f32.mrb[94].mxu0  ;;  %2636 = vmatprep.mubr.f32.mxu0 %v15571_v40  ;;  %15670 = vst [vmem:[#allocation129_spill] sm:$0xff] %v11925_v13 }
 0x198   :  { %15667 = vst [vmem:[#allocation126_spill] sm:$0xff] %v11915_v33  ;;  %v11923_v50 = vpop.f32.mrb[95].mxu0  ;;  %7782 = vmatmul.mubr.msk.bf16.gmra.mrb[196].mxu1 %vm344_vm3, %v309_v48 }
 0x199   :  { %15669 = vst [vmem:[#allocation128_spill] sm:$0xff] %v11923_v50  ;;  %1046 = vmatprep.mubr.bf16.mxu1 %v15573_v32  ;;  %v310_v50 = vpack.c.bf16 %v253_v56, %v252_v60  ;;  %v254_v60 = vld [vmem:[%s15383_s1 + $0x330] sm:$0xff]  ;;  %v255_v56 = vld [vmem:[%s15383_s1 + $0x338] sm:$0xff] }
 0x19a   :  { %7885 = vmatmul.mubr.msk.f32.gmra.mrb[200].mxu0 %vm2001_vm5, %v1933_v63 }
 0x19b   :  { %2642 = vmatprep.mubr.f32.mxu0 %v15571_v40  ;;  %v11942_v63 = vpop.f32.mrb[92].mxu1 }
 0x19c   :  { %15672 = vst [vmem:[#allocation131_spill] sm:$0xff] %v11942_v63  ;;  %v11947_v30 = vpop.f32.mrb[93].mxu1 }
 0x19d   :  { %v11940_v33 = vpop.f32.mrb[96].mxu0  ;;  %15674 = vst [vmem:[#allocation133_spill] sm:$0xff] %v11947_v30  ;;  %v11955_v16 = vpop.f32.mrb[94].mxu1 }
 0x19e   :  { %15671 = vst [vmem:[#allocation130_spill] sm:$0xff] %v11940_v33  ;;  %v11944_v48 = vpop.f32.mrb[97].mxu0  ;;  %7886 = vmatmul.mubr.msk.f32.gmra.mrb[202].mxu0 %vm2001_vm5, %v1934_v3  ;;  %15676 = vst [vmem:[#allocation135_spill] sm:$0xff] %v11955_v16  ;;  %v11959_v63 = vpop.f32.mrb[95].mxu1  ;;  %v1936_v3 = vld [vmem:[%s15391_s9 + $0x158] sm:$0xff]  ;;  %v1937_v16 = vld [vmem:[%s15391_s9 + $0x160] sm:$0xff] }
 0x19f   :  { %15673 = vst [vmem:[#allocation132_spill] sm:$0xff] %v11944_v48  ;;  %v11949_v13 = vpop.f32.mrb[98].mxu0  ;;  %2648 = vmatprep.mubr.f32.mxu0 %v15571_v40  ;;  %15678 = vst [vmem:[#allocation137_spill] sm:$0xff] %v11959_v63 }
 0x1a0   :  { %15675 = vst [vmem:[#allocation134_spill] sm:$0xff] %v11949_v13  ;;  %v11957_v33 = vpop.f32.mrb[99].mxu0  ;;  %7783 = vmatmul.mubr.msk.bf16.gmra.mrb[200].mxu1 %vm344_vm3, %v310_v50 }
 0x1a1   :  { %15677 = vst [vmem:[#allocation136_spill] sm:$0xff] %v11957_v33  ;;  %1056 = vmatprep.mubr.bf16.mxu1 %v15573_v32  ;;  %v311_v33 = vpack.c.bf16 %v255_v56, %v254_v60  ;;  %v256_v60 = vld [vmem:[%s15383_s1 + $0x340] sm:$0xff]  ;;  %v257_v56 = vld [vmem:[%s15383_s1 + $0x348] sm:$0xff] }
 0x1a2   :  { %7887 = vmatmul.mubr.msk.f32.gmra.mrb[204].mxu0 %vm2001_vm5, %v1935_v43 }
 0x1a3   :  { %2654 = vmatprep.mubr.f32.mxu0 %v15571_v40  ;;  %v11976_v43 = vpop.f32.mrb[96].mxu1 }
 0x1a4   :  { %15680 = vst [vmem:[#allocation139_spill] sm:$0xff] %v11976_v43  ;;  %v11981_v48 = vpop.f32.mrb[97].mxu1 }
 0x1a5   :  { %v11974_v13 = vpop.f32.mrb[100].mxu0  ;;  %15682 = vst [vmem:[#allocation141_spill] sm:$0xff] %v11981_v48  ;;  %v11989_v30 = vpop.f32.mrb[98].mxu1 }
 0x1a6   :  { %15679 = vst [vmem:[#allocation138_spill] sm:$0xff] %v11974_v13  ;;  %v11978_v50 = vpop.f32.mrb[101].mxu0  ;;  %7888 = vmatmul.mubr.msk.f32.gmra.mrb[206].mxu0 %vm2001_vm5, %v1936_v3  ;;  %15684 = vst [vmem:[#allocation143_spill] sm:$0xff] %v11989_v30  ;;  %v11993_v43 = vpop.f32.mrb[99].mxu1  ;;  %v1938_v3 = vld [vmem:[%s15391_s9 + $0x168] sm:$0xff]  ;;  %v1939_v30 = vld [vmem:[%s15391_s9 + $0x170] sm:$0xff] }
 0x1a7   :  { %15681 = vst [vmem:[#allocation140_spill] sm:$0xff] %v11978_v50  ;;  %v11983_v63 = vpop.f32.mrb[102].mxu0  ;;  %2660 = vmatprep.mubr.f32.mxu0 %v15571_v40  ;;  %15686 = vst [vmem:[#allocation145_spill] sm:$0xff] %v11993_v43 }
 0x1a8   :  { %15683 = vst [vmem:[#allocation142_spill] sm:$0xff] %v11983_v63  ;;  %v11991_v13 = vpop.f32.mrb[103].mxu0  ;;  %7784 = vmatmul.mubr.msk.bf16.gmra.mrb[204].mxu1 %vm344_vm3, %v311_v33 }
 0x1a9   :  { %15685 = vst [vmem:[#allocation144_spill] sm:$0xff] %v11991_v13  ;;  %1066 = vmatprep.mubr.bf16.mxu1 %v15573_v32  ;;  %v312_v13 = vpack.c.bf16 %v257_v56, %v256_v60  ;;  %v258_v60 = vld [vmem:[%s15383_s1 + $0x350] sm:$0xff]  ;;  %v259_v56 = vld [vmem:[%s15383_s1 + $0x358] sm:$0xff] }
 0x1aa   :  { %7889 = vmatmul.mubr.msk.f32.gmra.mrb[208].mxu0 %vm2001_vm5, %v1937_v16 }
 0x1ab   :  { %2666 = vmatprep.mubr.f32.mxu0 %v15571_v40  ;;  %v12010_v16 = vpop.f32.mrb[100].mxu1 }
 0x1ac   :  { %15688 = vst [vmem:[#allocation147_spill] sm:$0xff] %v12010_v16  ;;  %v12015_v50 = vpop.f32.mrb[101].mxu1 }
 0x1ad   :  { %v12008_v63 = vpop.f32.mrb[104].mxu0  ;;  %v12023_v48 = vpop.f32.mrb[102].mxu1 }
 0x1ae   :  { %15687 = vst [vmem:[#allocation146_spill] sm:$0xff] %v12008_v63  ;;  %v12012_v33 = vpop.f32.mrb[105].mxu0  ;;  %7890 = vmatmul.mubr.msk.f32.gmra.mrb[210].mxu0 %vm2001_vm5, %v1938_v3  ;;  %15691 = vst [vmem:[#allocation150_spill] sm:$0xff] %v12023_v48  ;;  %v12027_v16 = vpop.f32.mrb[103].mxu1  ;;  %v1940_v3 = vld [vmem:[%s15391_s9 + $0x178] sm:$0xff] }
 0x1af   :  { %15689 = vst [vmem:[#allocation148_spill] sm:$0xff] %v12012_v33  ;;  %v12017_v43 = vpop.f32.mrb[106].mxu0  ;;  %2672 = vmatprep.mubr.f32.mxu0 %v15571_v40  ;;  %15693 = vst [vmem:[#allocation152_spill] sm:$0xff] %v12027_v16  ;;  %v1941_v16 = vld [vmem:[%s15391_s9 + $0x180] sm:$0xff] }
 0x1b0   :  { %15690 = vst [vmem:[#allocation149_spill] sm:$0xff] %v12017_v43  ;;  %v12025_v63 = vpop.f32.mrb[107].mxu0  ;;  %7785 = vmatmul.mubr.msk.bf16.gmra.mrb[208].mxu1 %vm344_vm3, %v312_v13 }
 0x1b1   :  { %15692 = vst [vmem:[#allocation151_spill] sm:$0xff] %v12025_v63  ;;  %1076 = vmatprep.mubr.bf16.mxu1 %v15573_v32  ;;  %v313_v63 = vpack.c.bf16 %v259_v56, %v258_v60 }
 0x1b2   :  { %7891 = vmatmul.mubr.msk.f32.gmra.mrb[212].mxu0 %vm2001_vm5, %v1939_v30 }
 0x1b3   :  { %2678 = vmatprep.mubr.f32.mxu0 %v15571_v40  ;;  %v12044_v30 = vpop.f32.mrb[104].mxu1 }
 0x1b4   :  { %15695 = vst [vmem:[#allocation154_spill] sm:$0xff] %v12044_v30  ;;  %v12049_v33 = vpop.f32.mrb[105].mxu1 }
 0x1b5   :  { %v12042_v43 = vpop.f32.mrb[108].mxu0  ;;  %v12057_v48 = vpop.f32.mrb[106].mxu1 }
 0x1b6   :  { %15694 = vst [vmem:[#allocation153_spill] sm:$0xff] %v12042_v43  ;;  %v12046_v13 = vpop.f32.mrb[109].mxu0  ;;  %7892 = vmatmul.mubr.msk.f32.gmra.mrb[214].mxu0 %vm2001_vm5, %v1940_v3  ;;  %15698 = vst [vmem:[#allocation157_spill] sm:$0xff] %v12057_v48  ;;  %v12061_v30 = vpop.f32.mrb[107].mxu1  ;;  %v1942_v3 = vld [vmem:[%s15391_s9 + $0x188] sm:$0xff] }
 0x1b7   :  { %15696 = vst [vmem:[#allocation155_spill] sm:$0xff] %v12046_v13  ;;  %v12051_v32 = vpop.f32.mrb[110].mxu0  ;;  %2684 = vmatprep.mubr.f32.mxu0 %v15571_v40  ;;  %15700 = vst [vmem:[#allocation159_spill] sm:$0xff] %v12061_v30 }
 0x1b8   :  { %15697 = vst [vmem:[#allocation156_spill] sm:$0xff] %v12051_v32  ;;  %v12059_v43 = vpop.f32.mrb[111].mxu0  ;;  %7786 = vmatmul.mubr.msk.bf16.gmra.mrb[212].mxu1 %vm344_vm3, %v313_v63  ;;  %v1943_v63 = vld [vmem:[%s15391_s9 + $0x190] sm:$0xff] }
 0x1b9   :  { %15699 = vst [vmem:[#allocation158_spill] sm:$0xff] %v12059_v43 }
 0x1ba   :  { %7893 = vmatmul.mubr.msk.f32.gmra.mrb[216].mxu0 %vm2001_vm5, %v1941_v16 }
 0x1bb   :  { %2690 = vmatprep.mubr.f32.mxu0 %v15571_v40  ;;  %v12071_v56 = vpop.f32.mrb[108].mxu1 }
 0x1bc   :  { %15702 = vst [vmem:[#allocation161_spill] sm:$0xff] %v12071_v56  ;;  %v12076_v13 = vpop.f32.mrb[109].mxu1 }
 0x1bd   :  { %v12069_v60 = vpop.f32.mrb[112].mxu0  ;;  %15704 = vst [vmem:[#allocation163_spill] sm:$0xff] %v12076_v13  ;;  %v12084_v16 = vpop.f32.mrb[110].mxu1 }
 0x1be   :  { %15701 = vst [vmem:[#allocation160_spill] sm:$0xff] %v12069_v60  ;;  %v12073_v32 = vpop.f32.mrb[113].mxu0  ;;  %7894 = vmatmul.mubr.msk.f32.gmra.mrb[218].mxu0 %vm2001_vm5, %v1942_v3  ;;  %15706 = vst [vmem:[#allocation165_spill] sm:$0xff] %v12084_v16  ;;  %v12088_v60 = vpop.f32.mrb[111].mxu1  ;;  %v1944_v3 = vld [vmem:[%s15391_s9 + $0x198] sm:$0xff] }
 0x1bf   :  { %15703 = vst [vmem:[#allocation162_spill] sm:$0xff] %v12073_v32  ;;  %v12078_v43 = vpop.f32.mrb[114].mxu0  ;;  %2696 = vmatprep.mubr.f32.mxu0 %v15571_v40  ;;  %15708 = vst [vmem:[#allocation167_spill] sm:$0xff] %v12088_v60 }
 0x1c0   :  { %15705 = vst [vmem:[#allocation164_spill] sm:$0xff] %v12078_v43  ;;  %v12086_v30 = vpop.f32.mrb[115].mxu0 }
 0x1c1   :  { %15707 = vst [vmem:[#allocation166_spill] sm:$0xff] %v12086_v30 }
 0x1c2   :  { %7895 = vmatmul.mubr.msk.f32.gmra.mrb[220].mxu0 %vm2001_vm5, %v1943_v63  ;;  %v1945_v63 = vld [vmem:[%s15391_s9 + $0x1a0] sm:$0xff] }
 0x1c3   :  { %2702 = vmatprep.mubr.f32.mxu0 %v15571_v40  ;;  %v12097_v32 = vpop.f32.mrb[112].mxu1 }
 0x1c4   :  { %15710 = vst [vmem:[#allocation169_spill] sm:$0xff] %v12097_v32  ;;  %v12102_v16 = vpop.f32.mrb[113].mxu1 }
 0x1c5   :  { %v12095_v43 = vpop.f32.mrb[116].mxu0  ;;  %15712 = vst [vmem:[#allocation171_spill] sm:$0xff] %v12102_v16  ;;  %v12110_v60 = vpop.f32.mrb[114].mxu1 }
 0x1c6   :  { %15709 = vst [vmem:[#allocation168_spill] sm:$0xff] %v12095_v43  ;;  %v12099_v13 = vpop.f32.mrb[117].mxu0  ;;  %7896 = vmatmul.mubr.msk.f32.gmra.mrb[222].mxu0 %vm2001_vm5, %v1944_v3  ;;  %15714 = vst [vmem:[#allocation173_spill] sm:$0xff] %v12110_v60  ;;  %v12114_v43 = vpop.f32.mrb[115].mxu1  ;;  %v1946_v3 = vld [vmem:[%s15391_s9 + $0x1a8] sm:$0xff] }
 0x1c7   :  { %15711 = vst [vmem:[#allocation170_spill] sm:$0xff] %v12099_v13  ;;  %v12104_v30 = vpop.f32.mrb[118].mxu0  ;;  %2708 = vmatprep.mubr.f32.mxu0 %v15571_v40  ;;  %15716 = vst [vmem:[#allocation175_spill] sm:$0xff] %v12114_v43 }
 0x1c8   :  { %15713 = vst [vmem:[#allocation172_spill] sm:$0xff] %v12104_v30  ;;  %v12112_v56 = vpop.f32.mrb[119].mxu0 }
 0x1c9   :  { %15715 = vst [vmem:[#allocation174_spill] sm:$0xff] %v12112_v56 }
 0x1ca   :  { %7897 = vmatmul.mubr.msk.f32.gmra.mrb[224].mxu0 %vm2001_vm5, %v1945_v63  ;;  %v1947_v63 = vld [vmem:[%s15391_s9 + $0x1b0] sm:$0xff] }
 0x1cb   :  { %2714 = vmatprep.mubr.f32.mxu0 %v15571_v40  ;;  %v12121_v13 = vpop.f32.mrb[116].mxu1 }
 0x1cc   :  { %15717 = vst [vmem:[#allocation176_spill] sm:$0xff] %v12121_v13  ;;  %v12125_v56 = vpop.f32.mrb[117].mxu1 }
 0x1cd   :  { %v2398_v30 = vpop.f32.mrb[120].mxu0  ;;  %v12132_v60 = vpop.f32.mrb[118].mxu1 }
 0x1ce   :  { %v3045_v16 = vmul.f32 %v2398_v30, %v11100_v19  ;;  %v2400_v32 = vpop.f32.mrb[121].mxu0  ;;  %7898 = vmatmul.mubr.msk.f32.gmra.mrb[226].mxu0 %vm2001_vm5, %v1946_v3  ;;  %v12134_v48 = vpop.f32.mrb[119].mxu1 }
 0x1cf   :  { %v3046_v43 = vmul.f32 %v2400_v32, %v11102_v22  ;;  %2720 = vmatprep.mubr.f32.mxu0 %v15571_v40  ;;  %15718 = vst [vmem:[#allocation177_spill] sm:$0xff] %v12134_v48  ;;  %v1948_v32 = vld [vmem:[%s15391_s9 + $0x1b8] sm:$0xff] }
 0x1d1   :  { %v2404_v13 = vpop.f32.mrb[122].mxu0  ;;  %7953 = vmatprep.mubr.msk.f32.mxu1 %vm3285_vm6, %v3046_v43 }
 0x1d2   :  { %v3047_v19 = vmul.f32 %v2404_v13, %v11104_v26  ;;  %v2406_v30 = vpop.f32.mrb[123].mxu0  ;;  %7899 = vmatmul.mubr.msk.f32.gmra.mrb[228].mxu0 %vm2001_vm5, %v1947_v63  ;;  %3675 = vmatmul.mubr.f32.vlgmr.msra.gmra.mrb[216].mxu1 %v3045_v16  ;;  %v1949_v16 = vld [vmem:[%s15391_s9 + $0x1c0] sm:$0xff] }
 0x1d3   :  { %v3048_v22 = vmul.f32 %v2406_v30, %v11106_v29  ;;  %2726 = vmatprep.mubr.f32.mxu0 %v15571_v40  ;;  %v12145_v48 = vpop.f32.mrb[120].mxu1 }
 0x1d4   :  { %v12149_v13 = vpop.f32.mrb[121].mxu1 }
 0x1d5   :  { %v2410_v3 = vpop.f32.mrb[124].mxu0  ;;  %7954 = vmatprep.mubr.msk.f32.mxu1 %vm3285_vm6, %v3048_v22  ;;  %v12156_v63 = vpop.f32.mrb[122].mxu1 }
 0x1d6   :  { %v3049_v43 = vmul.f32 %v2410_v3, %v11124_v36  ;;  %v2412_v26 = vpop.f32.mrb[125].mxu0  ;;  %7900 = vmatmul.mubr.msk.f32.gmra.mrb[230].mxu0 %vm2001_vm5, %v1948_v32  ;;  %3680 = vmatmul.mubr.f32.gmra.mrb[218].mxu1 %v3047_v19  ;;  %v12158_v30 = vpop.f32.mrb[123].mxu1  ;;  %v1950_v32 = vld [vmem:[%s15391_s9 + $0x1c8] sm:$0xff] }
 0x1d7   :  { %v3050_v29 = vmul.f32 %v2412_v26, %v11126_v39  ;;  %2732 = vmatprep.mubr.f32.mxu0 %v15571_v40 }
 0x1d9   :  { %v2416_v22 = vpop.f32.mrb[126].mxu0  ;;  %7955 = vmatprep.mubr.msk.f32.mxu1 %vm3285_vm6, %v3050_v29 }
 0x1da   :  { %v3051_v36 = vmul.f32 %v2416_v22, %v11129_v42  ;;  %v2418_v19 = vpop.f32.mrb[127].mxu0  ;;  %7901 = vmatmul.mubr.msk.f32.gmra.mrb[232].mxu0 %vm2001_vm5, %v1949_v16  ;;  %3685 = vmatmul.mubr.f32.gmra.mrb[220].mxu1 %v3049_v43  ;;  %v1951_v16 = vld [vmem:[%s15391_s9 + $0x1d0] sm:$0xff] }
 0x1db   :  { %v3052_v39 = vmul.f32 %v2418_v19, %v11132_v44  ;;  %2738 = vmatprep.mubr.f32.mxu0 %v15571_v40  ;;  %v12169_v26 = vpop.f32.mrb[124].mxu1 }
 0x1dc   :  { %v12173_v43 = vpop.f32.mrb[125].mxu1 }
 0x1dd   :  { %v2422_v3 = vpop.f32.mrb[128].mxu0  ;;  %7956 = vmatprep.mubr.msk.f32.mxu1 %vm3285_vm6, %v3052_v39  ;;  %v12180_v22 = vpop.f32.mrb[126].mxu1 }
 0x1de   :  { %v3053_v29 = vmul.f32 %v2422_v3, %v11146_v49  ;;  %v2424_v42 = vpop.f32.mrb[129].mxu0  ;;  %7902 = vmatmul.mubr.msk.f32.gmra.mrb[234].mxu0 %vm2001_vm5, %v1950_v32  ;;  %3690 = vmatmul.mubr.f32.gmra.mrb[222].mxu1 %v3051_v36  ;;  %v12182_v19 = vpop.f32.mrb[127].mxu1  ;;  %v1952_v32 = vld [vmem:[%s15391_s9 + $0x1d8] sm:$0xff] }
 0x1df   :  { %v3054_v44 = vmul.f32 %v2424_v42, %v11150_v51  ;;  %2744 = vmatprep.mubr.f32.mxu0 %v15571_v40 }
 0x1e1   :  { %v2428_v39 = vpop.f32.mrb[130].mxu0  ;;  %7957 = vmatprep.mubr.msk.f32.mxu1 %vm3285_vm6, %v3054_v44 }
 0x1e2   :  { %v3055_v49 = vmul.f32 %v2428_v39, %v11157_v55  ;;  %v2430_v36 = vpop.f32.mrb[131].mxu0  ;;  %7903 = vmatmul.mubr.msk.f32.gmra.mrb[236].mxu0 %vm2001_vm5, %v1951_v16  ;;  %3695 = vmatmul.mubr.f32.gmra.mrb[224].mxu1 %v3053_v29  ;;  %v1953_v16 = vld [vmem:[%s15391_s9 + $0x1e0] sm:$0xff] }
 0x1e3   :  { %v3056_v51 = vmul.f32 %v2430_v36, %v11161_v57  ;;  %2750 = vmatprep.mubr.f32.mxu0 %v15571_v40  ;;  %v12193_v42 = vpop.f32.mrb[128].mxu1 }
 0x1e4   :  { %v12197_v29 = vpop.f32.mrb[129].mxu1 }
 0x1e5   :  { %v2434_v3 = vpop.f32.mrb[132].mxu0  ;;  %7958 = vmatprep.mubr.msk.f32.mxu1 %vm3285_vm6, %v3056_v51  ;;  %v12204_v39 = vpop.f32.mrb[130].mxu1 }
 0x1e6   :  { %v3057_v44 = vmul.f32 %v2434_v3, %v11178_v62  ;;  %v2436_v55 = vpop.f32.mrb[133].mxu0  ;;  %7904 = vmatmul.mubr.msk.f32.gmra.mrb[238].mxu0 %vm2001_vm5, %v1952_v32  ;;  %3700 = vmatmul.mubr.f32.gmra.mrb[226].mxu1 %v3055_v49  ;;  %v12206_v36 = vpop.f32.mrb[131].mxu1  ;;  %v1954_v32 = vld [vmem:[%s15391_s9 + $0x1e8] sm:$0xff] }
 0x1e7   :  { %v3058_v57 = vmul.f32 %v2436_v55, %v11183_v0  ;;  %2756 = vmatprep.mubr.f32.mxu0 %v15571_v40 }
 0x1e9   :  { %v2440_v51 = vpop.f32.mrb[134].mxu0  ;;  %7959 = vmatprep.mubr.msk.f32.mxu1 %vm3285_vm6, %v3058_v57 }
 0x1ea   :  { %v3059_v62 = vmul.f32 %v2440_v51, %v11191_v5  ;;  %v2442_v49 = vpop.f32.mrb[135].mxu0  ;;  %7905 = vmatmul.mubr.msk.f32.gmra.mrb[240].mxu0 %vm2001_vm5, %v1953_v16  ;;  %3705 = vmatmul.mubr.f32.gmra.mrb[228].mxu1 %v3057_v44  ;;  %v1955_v16 = vld [vmem:[%s15391_s9 + $0x1f0] sm:$0xff] }
 0x1eb   :  { %v3060_v0 = vmul.f32 %v2442_v49, %v11195_v7  ;;  %2762 = vmatprep.mubr.f32.mxu0 %v15571_v40  ;;  %v12217_v55 = vpop.f32.mrb[132].mxu1 }
 0x1ec   :  { %v12221_v44 = vpop.f32.mrb[133].mxu1 }
 0x1ed   :  { %v2446_v3 = vpop.f32.mrb[136].mxu0  ;;  %7960 = vmatprep.mubr.msk.f32.mxu1 %vm3285_vm6, %v3060_v0  ;;  %v12228_v51 = vpop.f32.mrb[134].mxu1 }
 0x1ee   :  { %v3061_v57 = vmul.f32 %v2446_v3, %v11212_v12  ;;  %v2448_v5 = vpop.f32.mrb[137].mxu0  ;;  %7906 = vmatmul.mubr.msk.f32.gmra.mrb[242].mxu0 %vm2001_vm5, %v1954_v32  ;;  %3710 = vmatmul.mubr.f32.gmra.mrb[230].mxu1 %v3059_v62  ;;  %v12230_v49 = vpop.f32.mrb[135].mxu1  ;;  %v1956_v32 = vld [vmem:[%s15391_s9 + $0x1f8] sm:$0xff] }
 0x1ef   :  { %v3062_v7 = vmul.f32 %v2448_v5, %v11217_v14  ;;  %2768 = vmatprep.mubr.f32.mxu0 %v15571_v40 }
 0x1f1   :  { %v2452_v0 = vpop.f32.mrb[138].mxu0  ;;  %7961 = vmatprep.mubr.msk.f32.mxu1 %vm3285_vm6, %v3062_v7 }
 0x1f2   :  { %v3063_v12 = vmul.f32 %v2452_v0, %v11225_v18  ;;  %v2454_v62 = vpop.f32.mrb[139].mxu0  ;;  %7907 = vmatmul.mubr.msk.f32.gmra.mrb[244].mxu0 %vm2001_vm5, %v1955_v16  ;;  %3715 = vmatmul.mubr.f32.gmra.mrb[232].mxu1 %v3061_v57  ;;  %v1957_v16 = vld [vmem:[%s15391_s9 + $0x200] sm:$0xff] }
 0x1f3   :  { %v3064_v14 = vmul.f32 %v2454_v62, %v11229_v21  ;;  %2774 = vmatprep.mubr.f32.mxu0 %v15571_v40  ;;  %v12241_v5 = vpop.f32.mrb[136].mxu1 }
 0x1f4   :  { %v12245_v57 = vpop.f32.mrb[137].mxu1 }
 0x1f5   :  { %v2458_v3 = vpop.f32.mrb[140].mxu0  ;;  %7962 = vmatprep.mubr.msk.f32.mxu1 %vm3285_vm6, %v3064_v14  ;;  %v12252_v0 = vpop.f32.mrb[138].mxu1 }
 0x1f6   :  { %v3065_v7 = vmul.f32 %v2458_v3, %v11246_v28  ;;  %v2460_v18 = vpop.f32.mrb[141].mxu0  ;;  %7908 = vmatmul.mubr.msk.f32.gmra.mrb[246].mxu0 %vm2001_vm5, %v1956_v32  ;;  %3720 = vmatmul.mubr.f32.gmra.mrb[234].mxu1 %v3063_v12  ;;  %v12254_v62 = vpop.f32.mrb[139].mxu1  ;;  %v1958_v32 = vld [vmem:[%s15391_s9 + $0x208] sm:$0xff] }
 0x1f7   :  { %v3066_v21 = vmul.f32 %v2460_v18, %v11251_v31  ;;  %2780 = vmatprep.mubr.f32.mxu0 %v15571_v40 }
 0x1f9   :  { %v2464_v14 = vpop.f32.mrb[142].mxu0  ;;  %7963 = vmatprep.mubr.msk.f32.mxu1 %vm3285_vm6, %v3066_v21 }
 0x1fa   :  { %v3067_v28 = vmul.f32 %v2464_v14, %v11259_v35  ;;  %v2466_v12 = vpop.f32.mrb[143].mxu0  ;;  %7909 = vmatmul.mubr.msk.f32.gmra.mrb[248].mxu0 %vm2001_vm5, %v1957_v16  ;;  %3725 = vmatmul.mubr.f32.gmra.mrb[236].mxu1 %v3065_v7  ;;  %v1959_v16 = vld [vmem:[%s15391_s9 + $0x210] sm:$0xff] }
 0x1fb   :  { %v3068_v31 = vmul.f32 %v2466_v12, %v11263_v38  ;;  %2786 = vmatprep.mubr.f32.mxu0 %v15571_v40  ;;  %v12265_v18 = vpop.f32.mrb[140].mxu1 }
 0x1fc   :  { %v12269_v7 = vpop.f32.mrb[141].mxu1 }
 0x1fd   :  { %v2470_v3 = vpop.f32.mrb[144].mxu0  ;;  %7964 = vmatprep.mubr.msk.f32.mxu1 %vm3285_vm6, %v3068_v31  ;;  %v12276_v14 = vpop.f32.mrb[142].mxu1 }
 0x1fe   :  { %v3069_v21 = vmul.f32 %v2470_v3, %v11280_v47  ;;  %v2472_v35 = vpop.f32.mrb[145].mxu0  ;;  %7910 = vmatmul.mubr.msk.f32.gmra.mrb[250].mxu0 %vm2001_vm5, %v1958_v32  ;;  %3730 = vmatmul.mubr.f32.gmra.mrb[238].mxu1 %v3067_v28  ;;  %v12278_v12 = vpop.f32.mrb[143].mxu1  ;;  %v1960_v32 = vld [vmem:[%s15391_s9 + $0x218] sm:$0xff] }
 0x1ff   :  { %v3070_v38 = vmul.f32 %v2472_v35, %v11285_v54  ;;  %2792 = vmatprep.mubr.f32.mxu0 %v15571_v40 }
 0x201   :  { %v2476_v31 = vpop.f32.mrb[146].mxu0  ;;  %7965 = vmatprep.mubr.msk.f32.mxu1 %vm3285_vm6, %v3070_v38 }
 0x202   :  { %v3071_v47 = vmul.f32 %v2476_v31, %v11293_v1  ;;  %v2478_v28 = vpop.f32.mrb[147].mxu0  ;;  %7911 = vmatmul.mubr.msk.f32.gmra.mrb[252].mxu0 %vm2001_vm5, %v1959_v16  ;;  %3735 = vmatmul.mubr.f32.gmra.mrb[240].mxu1 %v3069_v21  ;;  %v1961_v16 = vld [vmem:[%s15391_s9 + $0x220] sm:$0xff] }
 0x203   :  { %v3072_v54 = vmul.f32 %v2478_v28, %v11297_v8  ;;  %2798 = vmatprep.mubr.f32.mxu0 %v15571_v40  ;;  %v12289_v35 = vpop.f32.mrb[144].mxu1 }
 0x204   :  { %v12293_v21 = vpop.f32.mrb[145].mxu1 }
 0x205   :  { %v2482_v3 = vpop.f32.mrb[148].mxu0  ;;  %7966 = vmatprep.mubr.msk.f32.mxu1 %vm3285_vm6, %v3072_v54  ;;  %v12300_v31 = vpop.f32.mrb[146].mxu1 }
 0x206   :  { %v3073_v38 = vmul.f32 %v2482_v3, %v11314_v23  ;;  %v2484_v1 = vpop.f32.mrb[149].mxu0  ;;  %7912 = vmatmul.mubr.msk.f32.gmra.mrb[254].mxu0 %vm2001_vm5, %v1960_v32  ;;  %3740 = vmatmul.mubr.f32.gmra.mrb[242].mxu1 %v3071_v47  ;;  %v12302_v28 = vpop.f32.mrb[147].mxu1  ;;  %v1962_v32 = vld [vmem:[%s15391_s9 + $0x228] sm:$0xff] }
 0x207   :  { %v3074_v8 = vmul.f32 %v2484_v1, %v11319_v25  ;;  %2804 = vmatprep.mubr.f32.mxu0 %v15571_v40 }
 0x209   :  { %v2488_v54 = vpop.f32.mrb[150].mxu0  ;;  %7967 = vmatprep.mubr.msk.f32.mxu1 %vm3285_vm6, %v3074_v8 }
 0x20a   :  { %v3075_v23 = vmul.f32 %v2488_v54, %v11327_v41  ;;  %v2490_v47 = vpop.f32.mrb[151].mxu0  ;;  %7913 = vmatmul.mubr.msk.f32.gmra.mrb[0].mxu0 %vm2001_vm5, %v1961_v16  ;;  %3745 = vmatmul.mubr.f32.gmra.mrb[244].mxu1 %v3073_v38  ;;  %v1963_v16 = vld [vmem:[%s15391_s9 + $0x230] sm:$0xff] }
 0x20b   :  { %v3076_v25 = vmul.f32 %v2490_v47, %v11331_v58  ;;  %2810 = vmatprep.mubr.f32.mxu0 %v15571_v40  ;;  %v12313_v1 = vpop.f32.mrb[148].mxu1 }
 0x20c   :  { %v12317_v38 = vpop.f32.mrb[149].mxu1 }
 0x20d   :  { %v2494_v3 = vpop.f32.mrb[152].mxu0  ;;  %7968 = vmatprep.mubr.msk.f32.mxu1 %vm3285_vm6, %v3076_v25  ;;  %v12324_v54 = vpop.f32.mrb[150].mxu1 }
 0x20e   :  { %v3077_v8 = vmul.f32 %v2494_v3, %v11358_v45  ;;  %v2496_v41 = vpop.f32.mrb[153].mxu0  ;;  %7914 = vmatmul.mubr.msk.f32.gmra.mrb[2].mxu0 %vm2001_vm5, %v1962_v32  ;;  %3750 = vmatmul.mubr.f32.gmra.mrb[246].mxu1 %v3075_v23  ;;  %v12326_v47 = vpop.f32.mrb[151].mxu1  ;;  %v1964_v32 = vld [vmem:[%s15391_s9 + $0x238] sm:$0xff] }
 0x20f   :  { %v3078_v58 = vmul.f32 %v2496_v41, %v11366_v24  ;;  %2816 = vmatprep.mubr.f32.mxu0 %v15571_v40 }
 0x211   :  { %v2500_v25 = vpop.f32.mrb[154].mxu0  ;;  %7969 = vmatprep.mubr.msk.f32.mxu1 %vm3285_vm6, %v3078_v58 }
 0x212   :  { %v3079_v45 = vmul.f32 %v2500_v25, %v11375_v52  ;;  %v2502_v23 = vpop.f32.mrb[155].mxu0  ;;  %7915 = vmatmul.mubr.msk.f32.gmra.mrb[4].mxu0 %vm2001_vm5, %v1963_v16  ;;  %3755 = vmatmul.mubr.f32.gmra.mrb[248].mxu1 %v3077_v8  ;;  %v1965_v16 = vld [vmem:[%s15391_s9 + $0x240] sm:$0xff] }
 0x213   :  { %v3080_v24 = vmul.f32 %v2502_v23, %v11379_v34  ;;  %2822 = vmatprep.mubr.f32.mxu0 %v15571_v40  ;;  %v12337_v41 = vpop.f32.mrb[152].mxu1 }
 0x214   :  { %v12341_v8 = vpop.f32.mrb[153].mxu1 }
 0x215   :  { %v2506_v3 = vpop.f32.mrb[156].mxu0  ;;  %7970 = vmatprep.mubr.msk.f32.mxu1 %vm3285_vm6, %v3080_v24  ;;  %v12348_v25 = vpop.f32.mrb[154].mxu1 }
 0x216   :  { %v3081_v58 = vmul.f32 %v2506_v3, %v11406_v17  ;;  %v2508_v52 = vpop.f32.mrb[157].mxu0  ;;  %7916 = vmatmul.mubr.msk.f32.gmra.mrb[6].mxu0 %vm2001_vm5, %v1964_v32  ;;  %3760 = vmatmul.mubr.f32.gmra.mrb[250].mxu1 %v3079_v45  ;;  %v12350_v23 = vpop.f32.mrb[155].mxu1  ;;  %v1966_v32 = vld [vmem:[%s15391_s9 + $0x248] sm:$0xff] }
 0x217   :  { %v3082_v34 = vmul.f32 %v2508_v52, %v11414_v27  ;;  %2828 = vmatprep.mubr.f32.mxu0 %v15571_v40 }
 0x219   :  { %v2512_v24 = vpop.f32.mrb[158].mxu0  ;;  %7971 = vmatprep.mubr.msk.f32.mxu1 %vm3285_vm6, %v3082_v34 }
 0x21a   :  { %v3083_v17 = vmul.f32 %v2512_v24, %v11423_v10  ;;  %v2514_v45 = vpop.f32.mrb[159].mxu0  ;;  %7917 = vmatmul.mubr.msk.f32.gmra.mrb[8].mxu0 %vm2001_vm5, %v1965_v16  ;;  %3765 = vmatmul.mubr.f32.gmra.mrb[252].mxu1 %v3081_v58  ;;  %v1967_v16 = vld [vmem:[%s15391_s9 + $0x250] sm:$0xff] }
 0x21b   :  { %v3084_v27 = vmul.f32 %v2514_v45, %v11427_v4  ;;  %2834 = vmatprep.mubr.f32.mxu0 %v15571_v40  ;;  %v12361_v52 = vpop.f32.mrb[156].mxu1 }
 0x21c   :  { %v12365_v58 = vpop.f32.mrb[157].mxu1 }
 0x21d   :  { %v2518_v3 = vpop.f32.mrb[160].mxu0  ;;  %7972 = vmatprep.mubr.msk.f32.mxu1 %vm3285_vm6, %v3084_v27  ;;  %v12372_v24 = vpop.f32.mrb[158].mxu1 }
 0x21e   :  { %v3085_v34 = vmul.f32 %v2518_v3, %v11454_v59  ;;  %v2520_v10 = vpop.f32.mrb[161].mxu0  ;;  %7918 = vmatmul.mubr.msk.f32.gmra.mrb[10].mxu0 %vm2001_vm5, %v1966_v32  ;;  %3770 = vmatmul.mubr.f32.gmra.mrb[254].mxu1 %v3083_v17  ;;  %v12374_v45 = vpop.f32.mrb[159].mxu1  ;;  %v1968_v32 = vld [vmem:[%s15391_s9 + $0x258] sm:$0xff] }
 0x21f   :  { %v3086_v4 = vmul.f32 %v2520_v10, %v11462_v11  ;;  %2840 = vmatprep.mubr.f32.mxu0 %v15571_v40 }
 0x221   :  { %v2524_v27 = vpop.f32.mrb[162].mxu0  ;;  %7973 = vmatprep.mubr.msk.f32.mxu1 %vm3285_vm6, %v3086_v4 }
 0x222   :  { %v3087_v59 = vmul.f32 %v2524_v27, %v11471_v15  ;;  %v2526_v17 = vpop.f32.mrb[163].mxu0  ;;  %7919 = vmatmul.mubr.msk.f32.gmra.mrb[12].mxu0 %vm2001_vm5, %v1967_v16  ;;  %3775 = vmatmul.mubr.f32.gmra.mrb[0].mxu1 %v3085_v34  ;;  %v1969_v16 = vld [vmem:[%s15391_s9 + $0x260] sm:$0xff] }
 0x223   :  { %v3088_v11 = vmul.f32 %v2526_v17, %v11475_v37  ;;  %2846 = vmatprep.mubr.f32.mxu0 %v15571_v40  ;;  %v12385_v10 = vpop.f32.mrb[160].mxu1 }
 0x224   :  { %v12389_v34 = vpop.f32.mrb[161].mxu1 }
 0x225   :  { %v2530_v3 = vpop.f32.mrb[164].mxu0  ;;  %7974 = vmatprep.mubr.msk.f32.mxu1 %vm3285_vm6, %v3088_v11  ;;  %v12396_v27 = vpop.f32.mrb[162].mxu1 }
 0x226   :  { %v3089_v4 = vmul.f32 %v2530_v3, %v11502_v9  ;;  %v2532_v15 = vpop.f32.mrb[165].mxu0  ;;  %7920 = vmatmul.mubr.msk.f32.gmra.mrb[14].mxu0 %vm2001_vm5, %v1968_v32  ;;  %3780 = vmatmul.mubr.f32.gmra.mrb[2].mxu1 %v3087_v59  ;;  %v12398_v17 = vpop.f32.mrb[163].mxu1  ;;  %v1970_v32 = vld [vmem:[%s15391_s9 + $0x268] sm:$0xff] }
 0x227   :  { %v3090_v37 = vmul.f32 %v2532_v15, %v11510_v61  ;;  %2852 = vmatprep.mubr.f32.mxu0 %v15571_v40  ;;  %15719 = vst [vmem:[#allocation178_spill] sm:$0xff] %v12398_v17 }
 0x229   :  { %v2536_v11 = vpop.f32.mrb[166].mxu0  ;;  %7975 = vmatprep.mubr.msk.f32.mxu1 %vm3285_vm6, %v3090_v37  ;;  %v15721_v37 = vld [vmem:[#allocation46_spill] sm:$0xff] }
 0x22a   :  { %v3091_v9 = vmul.f32 %v2536_v11, %v11519_v46  ;;  %v2538_v59 = vpop.f32.mrb[167].mxu0  ;;  %7921 = vmatmul.mubr.msk.f32.gmra.mrb[16].mxu0 %vm2001_vm5, %v1969_v16  ;;  %3785 = vmatmul.mubr.f32.gmra.mrb[4].mxu1 %v3089_v4  ;;  %v1971_v11 = vld [vmem:[%s15391_s9 + $0x270] sm:$0xff] }
 0x22b   :  { %v3092_v61 = vmul.f32 %v2538_v59, %v11523_v20  ;;  %2858 = vmatprep.mubr.f32.mxu0 %v15571_v40  ;;  %v12409_v15 = vpop.f32.mrb[164].mxu1  ;;  %v15723_v20 = vld [vmem:[#allocation48_spill] sm:$0xff] }
 0x22c   :  { %15720 = vst [vmem:[#allocation179_spill] sm:$0xff] %v12409_v15  ;;  %v12413_v4 = vpop.f32.mrb[165].mxu1 }
 0x22d   :  { %v2542_v3 = vpop.f32.mrb[168].mxu0  ;;  %7976 = vmatprep.mubr.msk.f32.mxu1 %vm3285_vm6, %v3092_v61  ;;  %15722 = vst [vmem:[#allocation46_spill] sm:$0xff] %v12413_v4  ;;  %v12420_v59 = vpop.f32.mrb[166].mxu1 }
 0x22e   :  { %v3093_v17 = vmul.f32 %v2542_v3, %v15721_v37  ;;  %v2544_v46 = vpop.f32.mrb[169].mxu0  ;;  %7922 = vmatmul.mubr.msk.f32.gmra.mrb[18].mxu0 %vm2001_vm5, %v1970_v32  ;;  %3790 = vmatmul.mubr.f32.gmra.mrb[6].mxu1 %v3091_v9  ;;  %15724 = vst [vmem:[#allocation48_spill] sm:$0xff] %v12420_v59  ;;  %v12422_v61 = vpop.f32.mrb[167].mxu1  ;;  %v15726_v3 = vld [vmem:[#allocation50_spill] sm:$0xff]  ;;  %v15727_v37 = vld [vmem:[#allocation52_spill] sm:$0xff] }
 0x22f   :  { %v3094_v16 = vmul.f32 %v2544_v46, %v15723_v20  ;;  %2864 = vmatprep.mubr.f32.mxu0 %v15571_v40  ;;  %15725 = vst [vmem:[#allocation180_spill] sm:$0xff] %v12422_v61  ;;  %v1972_v20 = vld [vmem:[%s15391_s9 + $0x278] sm:$0xff] }
 0x231   :  { %v2548_v15 = vpop.f32.mrb[170].mxu0  ;;  %7977 = vmatprep.mubr.msk.f32.mxu1 %vm3285_vm6, %v3094_v16  ;;  %v15728_v16 = vld [vmem:[#allocation54_spill] sm:$0xff] }
 0x232   :  { %v3095_v32 = vmul.f32 %v2548_v15, %v15726_v3  ;;  %v2550_v9 = vpop.f32.mrb[171].mxu0  ;;  %7923 = vmatmul.mubr.msk.f32.gmra.mrb[20].mxu0 %vm2001_vm5, %v1971_v11  ;;  %3795 = vmatmul.mubr.f32.gmra.mrb[8].mxu1 %v3093_v17  ;;  %v1973_v3 = vld [vmem:[%s15391_s9 + $0x280] sm:$0xff] }
 0x233   :  { %v3096_v46 = vmul.f32 %v2550_v9, %v15727_v37  ;;  %2870 = vmatprep.mubr.f32.mxu0 %v15571_v40  ;;  %v12433_v61 = vpop.f32.mrb[168].mxu1 }
 0x234   :  { %v12437_v17 = vpop.f32.mrb[169].mxu1 }
 0x235   :  { %v2554_v59 = vpop.f32.mrb[172].mxu0  ;;  %7978 = vmatprep.mubr.msk.f32.mxu1 %vm3285_vm6, %v3096_v46  ;;  %15729 = vst [vmem:[#allocation50_spill] sm:$0xff] %v12437_v17  ;;  %v12444_v9 = vpop.f32.mrb[170].mxu1 }
 0x236   :  { %v3097_v4 = vmul.f32 %v2554_v59, %v15728_v16  ;;  %v2556_v15 = vpop.f32.mrb[173].mxu0  ;;  %7924 = vmatmul.mubr.msk.f32.gmra.mrb[22].mxu0 %vm2001_vm5, %v1972_v20  ;;  %3800 = vmatmul.mubr.f32.gmra.mrb[10].mxu1 %v3095_v32  ;;  %15730 = vst [vmem:[#allocation52_spill] sm:$0xff] %v12444_v9  ;;  %v12446_v37 = vpop.f32.mrb[171].mxu1  ;;  %v1974_v20 = vld [vmem:[%s15391_s9 + $0x288] sm:$0xff] }
 0x237   :  { %v3098_v11 = vmul.f32 %v2556_v15, %v11606_v6  ;;  %2876 = vmatprep.mubr.f32.mxu0 %v15571_v40  ;;  %15731 = vst [vmem:[#allocation54_spill] sm:$0xff] %v12446_v37 }
 0x239   :  { %v2560_v46 = vpop.f32.mrb[174].mxu0  ;;  %7979 = vmatprep.mubr.msk.f32.mxu1 %vm3285_vm6, %v3098_v11  ;;  %v15733_v11 = vld [vmem:[#allocation59_spill] sm:$0xff] }
 0x23a   :  { %v3099_v59 = vmul.f32 %v2560_v46, %v11615_v2  ;;  %v2562_v32 = vpop.f32.mrb[175].mxu0  ;;  %7925 = vmatmul.mubr.msk.f32.gmra.mrb[24].mxu0 %vm2001_vm5, %v1973_v3  ;;  %3805 = vmatmul.mubr.f32.gmra.mrb[12].mxu1 %v3097_v4  ;;  %v1975_v46 = vld [vmem:[%s15391_s9 + $0x290] sm:$0xff] }
 0x23b   :  { %v3100_v6 = vmul.f32 %v2562_v32, %v11619_v53  ;;  %2882 = vmatprep.mubr.f32.mxu0 %v15571_v40  ;;  %v12457_v15 = vpop.f32.mrb[172].mxu1  ;;  %v15735_v53 = vld [vmem:[#allocation61_spill] sm:$0xff] }
 0x23c   :  { %15732 = vst [vmem:[#allocation181_spill] sm:$0xff] %v12457_v15  ;;  %v12461_v4 = vpop.f32.mrb[173].mxu1 }
 0x23d   :  { %v2566_v16 = vpop.f32.mrb[176].mxu0  ;;  %7980 = vmatprep.mubr.msk.f32.mxu1 %vm3285_vm6, %v3100_v6  ;;  %15734 = vst [vmem:[#allocation59_spill] sm:$0xff] %v12461_v4  ;;  %v12468_v32 = vpop.f32.mrb[174].mxu1 }
 0x23e   :  { %v3101_v37 = vmul.f32 %v2566_v16, %v15733_v11  ;;  %v2568_v2 = vpop.f32.mrb[177].mxu0  ;;  %7926 = vmatmul.mubr.msk.f32.gmra.mrb[26].mxu0 %vm2001_vm5, %v1974_v20  ;;  %3810 = vmatmul.mubr.f32.gmra.mrb[14].mxu1 %v3099_v59  ;;  %15736 = vst [vmem:[#allocation61_spill] sm:$0xff] %v12468_v32  ;;  %v12470_v6 = vpop.f32.mrb[175].mxu1  ;;  %v15738_v16 = vld [vmem:[#allocation63_spill] sm:$0xff]  ;;  %v15739_v11 = vld [vmem:[#allocation65_spill] sm:$0xff] }
 0x23f   :  { %v3102_v3 = vmul.f32 %v2568_v2, %v15735_v53  ;;  %2888 = vmatprep.mubr.f32.mxu0 %v15571_v40  ;;  %15737 = vst [vmem:[#allocation182_spill] sm:$0xff] %v12470_v6  ;;  %v1976_v53 = vld [vmem:[%s15391_s9 + $0x298] sm:$0xff] }
 0x241   :  { %v2572_v15 = vpop.f32.mrb[178].mxu0  ;;  %7981 = vmatprep.mubr.msk.f32.mxu1 %vm3285_vm6, %v3102_v3  ;;  %v15741_v3 = vld [vmem:[#allocation67_spill] sm:$0xff] }
 0x242   :  { %v3103_v20 = vmul.f32 %v2572_v15, %v15738_v16  ;;  %v2574_v59 = vpop.f32.mrb[179].mxu0  ;;  %7927 = vmatmul.mubr.msk.f32.gmra.mrb[28].mxu0 %vm2001_vm5, %v1975_v46  ;;  %3815 = vmatmul.mubr.f32.gmra.mrb[16].mxu1 %v3101_v37  ;;  %v15743_v46 = vld [vmem:[#allocation69_spill] sm:$0xff] }
 0x243   :  { %v3104_v2 = vmul.f32 %v2574_v59, %v15739_v11  ;;  %2894 = vmatprep.mubr.f32.mxu0 %v15571_v40  ;;  %v12481_v6 = vpop.f32.mrb[176].mxu1  ;;  %v1977_v59 = vld [vmem:[%s15391_s9 + $0x2a0] sm:$0xff] }
 0x244   :  { %15740 = vst [vmem:[#allocation63_spill] sm:$0xff] %v12481_v6  ;;  %v12485_v37 = vpop.f32.mrb[177].mxu1 }
 0x245   :  { %v2578_v32 = vpop.f32.mrb[180].mxu0  ;;  %7982 = vmatprep.mubr.msk.f32.mxu1 %vm3285_vm6, %v3104_v2  ;;  %15742 = vst [vmem:[#allocation65_spill] sm:$0xff] %v12485_v37  ;;  %v12492_v11 = vpop.f32.mrb[178].mxu1 }
 0x246   :  { %v3105_v4 = vmul.f32 %v2578_v32, %v15741_v3  ;;  %v2580_v15 = vpop.f32.mrb[181].mxu0  ;;  %7928 = vmatmul.mubr.msk.f32.gmra.mrb[30].mxu0 %vm2001_vm5, %v1976_v53  ;;  %3820 = vmatmul.mubr.f32.gmra.mrb[18].mxu1 %v3103_v20  ;;  %15744 = vst [vmem:[#allocation67_spill] sm:$0xff] %v12492_v11  ;;  %v12494_v2 = vpop.f32.mrb[179].mxu1  ;;  %v15746_v32 = vld [vmem:[#allocation71_spill] sm:$0xff]  ;;  %v15747_v3 = vld [vmem:[#allocation73_spill] sm:$0xff] }
 0x247   :  { %v3106_v16 = vmul.f32 %v2580_v15, %v15743_v46  ;;  %2900 = vmatprep.mubr.f32.mxu0 %v15571_v40  ;;  %15745 = vst [vmem:[#allocation69_spill] sm:$0xff] %v12494_v2  ;;  %v1978_v46 = vld [vmem:[%s15391_s9 + $0x2a8] sm:$0xff] }
 0x249   :  { %v2584_v6 = vpop.f32.mrb[182].mxu0  ;;  %7983 = vmatprep.mubr.msk.f32.mxu1 %vm3285_vm6, %v3106_v16  ;;  %v15749_v16 = vld [vmem:[#allocation75_spill] sm:$0xff] }
 0x24a   :  { %v3107_v53 = vmul.f32 %v2584_v6, %v15746_v32  ;;  %v2586_v20 = vpop.f32.mrb[183].mxu0  ;;  %7929 = vmatmul.mubr.msk.f32.gmra.mrb[32].mxu0 %vm2001_vm5, %v1977_v59  ;;  %3825 = vmatmul.mubr.f32.gmra.mrb[20].mxu1 %v3105_v4  ;;  %v15751_v59 = vld [vmem:[#allocation77_spill] sm:$0xff] }
 0x24b   :  { %v3108_v15 = vmul.f32 %v2586_v20, %v15747_v3  ;;  %2906 = vmatprep.mubr.f32.mxu0 %v15571_v40  ;;  %v12505_v2 = vpop.f32.mrb[180].mxu1  ;;  %v1979_v20 = vld [vmem:[%s15391_s9 + $0x2b0] sm:$0xff] }
 0x24c   :  { %15748 = vst [vmem:[#allocation71_spill] sm:$0xff] %v12505_v2  ;;  %v12509_v4 = vpop.f32.mrb[181].mxu1 }
 0x24d   :  { %v2590_v11 = vpop.f32.mrb[184].mxu0  ;;  %7984 = vmatprep.mubr.msk.f32.mxu1 %vm3285_vm6, %v3108_v15  ;;  %15750 = vst [vmem:[#allocation73_spill] sm:$0xff] %v12509_v4  ;;  %v12516_v3 = vpop.f32.mrb[182].mxu1 }
 0x24e   :  { %v3109_v37 = vmul.f32 %v2590_v11, %v15749_v16  ;;  %v2592_v6 = vpop.f32.mrb[185].mxu0  ;;  %7930 = vmatmul.mubr.msk.f32.gmra.mrb[34].mxu0 %vm2001_vm5, %v1978_v46  ;;  %3830 = vmatmul.mubr.f32.gmra.mrb[22].mxu1 %v3107_v53  ;;  %15752 = vst [vmem:[#allocation75_spill] sm:$0xff] %v12516_v3  ;;  %v12518_v15 = vpop.f32.mrb[183].mxu1  ;;  %v15754_v11 = vld [vmem:[#allocation79_spill] sm:$0xff]  ;;  %v15755_v16 = vld [vmem:[#allocation81_spill] sm:$0xff] }
 0x24f   :  { %v3110_v32 = vmul.f32 %v2592_v6, %v15751_v59  ;;  %2912 = vmatprep.mubr.f32.mxu0 %v15571_v40  ;;  %15753 = vst [vmem:[#allocation77_spill] sm:$0xff] %v12518_v15  ;;  %v1980_v59 = vld [vmem:[%s15391_s9 + $0x2b8] sm:$0xff] }
 0x251   :  { %v2596_v2 = vpop.f32.mrb[186].mxu0  ;;  %7985 = vmatprep.mubr.msk.f32.mxu1 %vm3285_vm6, %v3110_v32  ;;  %v15757_v32 = vld [vmem:[#allocation83_spill] sm:$0xff] }
 0x252   :  { %v3111_v46 = vmul.f32 %v2596_v2, %v15754_v11  ;;  %v2598_v53 = vpop.f32.mrb[187].mxu0  ;;  %7931 = vmatmul.mubr.msk.f32.gmra.mrb[36].mxu0 %vm2001_vm5, %v1979_v20  ;;  %3835 = vmatmul.mubr.f32.gmra.mrb[24].mxu1 %v3109_v37  ;;  %v15759_v20 = vld [vmem:[#allocation85_spill] sm:$0xff] }
 0x253   :  { %v3112_v6 = vmul.f32 %v2598_v53, %v15755_v16  ;;  %2918 = vmatprep.mubr.f32.mxu0 %v15571_v40  ;;  %v12529_v15 = vpop.f32.mrb[184].mxu1  ;;  %v1981_v53 = vld [vmem:[%s15391_s9 + $0x2c0] sm:$0xff] }
 0x254   :  { %15756 = vst [vmem:[#allocation79_spill] sm:$0xff] %v12529_v15  ;;  %v12533_v37 = vpop.f32.mrb[185].mxu1 }
 0x255   :  { %v2602_v3 = vpop.f32.mrb[188].mxu0  ;;  %7986 = vmatprep.mubr.msk.f32.mxu1 %vm3285_vm6, %v3112_v6  ;;  %15758 = vst [vmem:[#allocation81_spill] sm:$0xff] %v12533_v37  ;;  %v12540_v16 = vpop.f32.mrb[186].mxu1 }
 0x256   :  { %v3113_v4 = vmul.f32 %v2602_v3, %v15757_v32  ;;  %v2604_v2 = vpop.f32.mrb[189].mxu0  ;;  %7932 = vmatmul.mubr.msk.f32.gmra.mrb[38].mxu0 %vm2001_vm5, %v1980_v59  ;;  %3840 = vmatmul.mubr.f32.gmra.mrb[26].mxu1 %v3111_v46  ;;  %15760 = vst [vmem:[#allocation83_spill] sm:$0xff] %v12540_v16  ;;  %v12542_v6 = vpop.f32.mrb[187].mxu1  ;;  %v15762_v3 = vld [vmem:[#allocation87_spill] sm:$0xff]  ;;  %v15763_v32 = vld [vmem:[#allocation89_spill] sm:$0xff] }
 0x257   :  { %v3114_v11 = vmul.f32 %v2604_v2, %v15759_v20  ;;  %2924 = vmatprep.mubr.f32.mxu0 %v15571_v40  ;;  %15761 = vst [vmem:[#allocation85_spill] sm:$0xff] %v12542_v6  ;;  %v1982_v20 = vld [vmem:[%s15391_s9 + $0x2c8] sm:$0xff] }
 0x259   :  { %v2608_v15 = vpop.f32.mrb[190].mxu0  ;;  %7987 = vmatprep.mubr.msk.f32.mxu1 %vm3285_vm6, %v3114_v11  ;;  %v15765_v11 = vld [vmem:[#allocation91_spill] sm:$0xff] }
 0x25a   :  { %v3115_v59 = vmul.f32 %v2608_v15, %v15762_v3  ;;  %v2610_v46 = vpop.f32.mrb[191].mxu0  ;;  %7933 = vmatmul.mubr.msk.f32.gmra.mrb[40].mxu0 %vm2001_vm5, %v1981_v53  ;;  %3845 = vmatmul.mubr.f32.gmra.mrb[28].mxu1 %v3113_v4  ;;  %v15767_v53 = vld [vmem:[#allocation93_spill] sm:$0xff] }
 0x25b   :  { %v3116_v2 = vmul.f32 %v2610_v46, %v15763_v32  ;;  %2930 = vmatprep.mubr.f32.mxu0 %v15571_v40  ;;  %v12553_v6 = vpop.f32.mrb[188].mxu1  ;;  %v1983_v46 = vld [vmem:[%s15391_s9 + $0x2d0] sm:$0xff] }
 0x25c   :  { %15764 = vst [vmem:[#allocation87_spill] sm:$0xff] %v12553_v6  ;;  %v12557_v4 = vpop.f32.mrb[189].mxu1 }
 0x25d   :  { %v2614_v16 = vpop.f32.mrb[192].mxu0  ;;  %7988 = vmatprep.mubr.msk.f32.mxu1 %vm3285_vm6, %v3116_v2  ;;  %15766 = vst [vmem:[#allocation89_spill] sm:$0xff] %v12557_v4  ;;  %v12564_v32 = vpop.f32.mrb[190].mxu1 }
 0x25e   :  { %v3117_v37 = vmul.f32 %v2614_v16, %v15765_v11  ;;  %v2616_v15 = vpop.f32.mrb[193].mxu0  ;;  %7934 = vmatmul.mubr.msk.f32.gmra.mrb[42].mxu0 %vm2001_vm5, %v1982_v20  ;;  %3850 = vmatmul.mubr.f32.gmra.mrb[30].mxu1 %v3115_v59  ;;  %15768 = vst [vmem:[#allocation91_spill] sm:$0xff] %v12564_v32  ;;  %v12566_v2 = vpop.f32.mrb[191].mxu1  ;;  %v15770_v16 = vld [vmem:[#allocation95_spill] sm:$0xff]  ;;  %v15771_v11 = vld [vmem:[#allocation97_spill] sm:$0xff] }
 0x25f   :  { %v3118_v3 = vmul.f32 %v2616_v15, %v15767_v53  ;;  %2936 = vmatprep.mubr.f32.mxu0 %v15571_v40  ;;  %15769 = vst [vmem:[#allocation93_spill] sm:$0xff] %v12566_v2  ;;  %v1984_v53 = vld [vmem:[%s15391_s9 + $0x2d8] sm:$0xff] }
 0x261   :  { %v2620_v6 = vpop.f32.mrb[194].mxu0  ;;  %7989 = vmatprep.mubr.msk.f32.mxu1 %vm3285_vm6, %v3118_v3  ;;  %v15773_v3 = vld [vmem:[#allocation99_spill] sm:$0xff] }
 0x262   :  { %v3119_v20 = vmul.f32 %v2620_v6, %v15770_v16  ;;  %v2622_v59 = vpop.f32.mrb[195].mxu0  ;;  %7935 = vmatmul.mubr.msk.f32.gmra.mrb[44].mxu0 %vm2001_vm5, %v1983_v46  ;;  %3855 = vmatmul.mubr.f32.gmra.mrb[32].mxu1 %v3117_v37  ;;  %v15775_v46 = vld [vmem:[#allocation101_spill] sm:$0xff] }
 0x263   :  { %v3120_v15 = vmul.f32 %v2622_v59, %v15771_v11  ;;  %2942 = vmatprep.mubr.f32.mxu0 %v15571_v40  ;;  %v12577_v2 = vpop.f32.mrb[192].mxu1  ;;  %v1985_v59 = vld [vmem:[%s15391_s9 + $0x2e0] sm:$0xff] }
 0x264   :  { %15772 = vst [vmem:[#allocation95_spill] sm:$0xff] %v12577_v2  ;;  %v12581_v37 = vpop.f32.mrb[193].mxu1 }
 0x265   :  { %v2626_v32 = vpop.f32.mrb[196].mxu0  ;;  %7990 = vmatprep.mubr.msk.f32.mxu1 %vm3285_vm6, %v3120_v15  ;;  %15774 = vst [vmem:[#allocation97_spill] sm:$0xff] %v12581_v37  ;;  %v12588_v11 = vpop.f32.mrb[194].mxu1 }
 0x266   :  { %v3121_v4 = vmul.f32 %v2626_v32, %v15773_v3  ;;  %v2628_v6 = vpop.f32.mrb[197].mxu0  ;;  %7936 = vmatmul.mubr.msk.f32.gmra.mrb[46].mxu0 %vm2001_vm5, %v1984_v53  ;;  %3860 = vmatmul.mubr.f32.gmra.mrb[34].mxu1 %v3119_v20  ;;  %15776 = vst [vmem:[#allocation99_spill] sm:$0xff] %v12588_v11  ;;  %v12590_v15 = vpop.f32.mrb[195].mxu1  ;;  %v15778_v32 = vld [vmem:[#allocation103_spill] sm:$0xff]  ;;  %v15779_v3 = vld [vmem:[#allocation105_spill] sm:$0xff] }
 0x267   :  { %v3122_v16 = vmul.f32 %v2628_v6, %v15775_v46  ;;  %2948 = vmatprep.mubr.f32.mxu0 %v15571_v40  ;;  %15777 = vst [vmem:[#allocation101_spill] sm:$0xff] %v12590_v15  ;;  %v1986_v46 = vld [vmem:[%s15391_s9 + $0x2e8] sm:$0xff] }
 0x269   :  { %v2632_v2 = vpop.f32.mrb[198].mxu0  ;;  %7991 = vmatprep.mubr.msk.f32.mxu1 %vm3285_vm6, %v3122_v16  ;;  %v15781_v16 = vld [vmem:[#allocation107_spill] sm:$0xff] }
 0x26a   :  { %v3123_v53 = vmul.f32 %v2632_v2, %v15778_v32  ;;  %v2634_v20 = vpop.f32.mrb[199].mxu0  ;;  %7937 = vmatmul.mubr.msk.f32.gmra.mrb[48].mxu0 %vm2001_vm5, %v1985_v59  ;;  %3865 = vmatmul.mubr.f32.gmra.mrb[36].mxu1 %v3121_v4  ;;  %v15783_v59 = vld [vmem:[#allocation109_spill] sm:$0xff] }
 0x26b   :  { %v3124_v6 = vmul.f32 %v2634_v20, %v15779_v3  ;;  %2954 = vmatprep.mubr.f32.mxu0 %v15571_v40  ;;  %v12601_v15 = vpop.f32.mrb[196].mxu1  ;;  %v1987_v20 = vld [vmem:[%s15391_s9 + $0x2f0] sm:$0xff] }
 0x26c   :  { %15780 = vst [vmem:[#allocation103_spill] sm:$0xff] %v12601_v15  ;;  %v12605_v4 = vpop.f32.mrb[197].mxu1 }
 0x26d   :  { %v2638_v11 = vpop.f32.mrb[200].mxu0  ;;  %7992 = vmatprep.mubr.msk.f32.mxu1 %vm3285_vm6, %v3124_v6  ;;  %15782 = vst [vmem:[#allocation105_spill] sm:$0xff] %v12605_v4  ;;  %v12612_v3 = vpop.f32.mrb[198].mxu1 }
 0x26e   :  { %v3125_v37 = vmul.f32 %v2638_v11, %v15781_v16  ;;  %v2640_v2 = vpop.f32.mrb[201].mxu0  ;;  %7938 = vmatmul.mubr.msk.f32.gmra.mrb[50].mxu0 %vm2001_vm5, %v1986_v46  ;;  %3870 = vmatmul.mubr.f32.gmra.mrb[38].mxu1 %v3123_v53  ;;  %15784 = vst [vmem:[#allocation107_spill] sm:$0xff] %v12612_v3  ;;  %v12614_v6 = vpop.f32.mrb[199].mxu1  ;;  %v15786_v11 = vld [vmem:[#allocation111_spill] sm:$0xff]  ;;  %v15787_v16 = vld [vmem:[#allocation113_spill] sm:$0xff] }
 0x26f   :  { %v3126_v32 = vmul.f32 %v2640_v2, %v15783_v59  ;;  %2960 = vmatprep.mubr.f32.mxu0 %v15571_v40  ;;  %15785 = vst [vmem:[#allocation109_spill] sm:$0xff] %v12614_v6  ;;  %v1988_v59 = vld [vmem:[%s15391_s9 + $0x2f8] sm:$0xff] }
 0x271   :  { %v2644_v15 = vpop.f32.mrb[202].mxu0  ;;  %7993 = vmatprep.mubr.msk.f32.mxu1 %vm3285_vm6, %v3126_v32  ;;  %v15789_v32 = vld [vmem:[#allocation115_spill] sm:$0xff] }
 0x272   :  { %v3127_v46 = vmul.f32 %v2644_v15, %v15786_v11  ;;  %v2646_v53 = vpop.f32.mrb[203].mxu0  ;;  %7939 = vmatmul.mubr.msk.f32.gmra.mrb[52].mxu0 %vm2001_vm5, %v1987_v20  ;;  %3875 = vmatmul.mubr.f32.gmra.mrb[40].mxu1 %v3125_v37  ;;  %v15791_v20 = vld [vmem:[#allocation117_spill] sm:$0xff] }
 0x273   :  { %v3128_v2 = vmul.f32 %v2646_v53, %v15787_v16  ;;  %2966 = vmatprep.mubr.f32.mxu0 %v15571_v40  ;;  %v12625_v6 = vpop.f32.mrb[200].mxu1  ;;  %v1989_v53 = vld [vmem:[%s15391_s9 + $0x300] sm:$0xff] }
 0x274   :  { %15788 = vst [vmem:[#allocation111_spill] sm:$0xff] %v12625_v6  ;;  %v12629_v37 = vpop.f32.mrb[201].mxu1 }
 0x275   :  { %v2650_v3 = vpop.f32.mrb[204].mxu0  ;;  %7994 = vmatprep.mubr.msk.f32.mxu1 %vm3285_vm6, %v3128_v2  ;;  %15790 = vst [vmem:[#allocation113_spill] sm:$0xff] %v12629_v37  ;;  %v12636_v16 = vpop.f32.mrb[202].mxu1 }
 0x276   :  { %v3129_v4 = vmul.f32 %v2650_v3, %v15789_v32  ;;  %v2652_v15 = vpop.f32.mrb[205].mxu0  ;;  %7940 = vmatmul.mubr.msk.f32.gmra.mrb[54].mxu0 %vm2001_vm5, %v1988_v59  ;;  %3880 = vmatmul.mubr.f32.gmra.mrb[42].mxu1 %v3127_v46  ;;  %15792 = vst [vmem:[#allocation115_spill] sm:$0xff] %v12636_v16  ;;  %v12638_v2 = vpop.f32.mrb[203].mxu1  ;;  %v15794_v3 = vld [vmem:[#allocation119_spill] sm:$0xff]  ;;  %v15795_v32 = vld [vmem:[#allocation121_spill] sm:$0xff] }
 0x277   :  { %v3130_v11 = vmul.f32 %v2652_v15, %v15791_v20  ;;  %2972 = vmatprep.mubr.f32.mxu0 %v15571_v40  ;;  %15793 = vst [vmem:[#allocation117_spill] sm:$0xff] %v12638_v2  ;;  %v1990_v20 = vld [vmem:[%s15391_s9 + $0x308] sm:$0xff] }
 0x279   :  { %v2656_v6 = vpop.f32.mrb[206].mxu0  ;;  %7995 = vmatprep.mubr.msk.f32.mxu1 %vm3285_vm6, %v3130_v11  ;;  %v15797_v11 = vld [vmem:[#allocation123_spill] sm:$0xff] }
 0x27a   :  { %v3131_v59 = vmul.f32 %v2656_v6, %v15794_v3  ;;  %v2658_v46 = vpop.f32.mrb[207].mxu0  ;;  %7941 = vmatmul.mubr.msk.f32.gmra.mrb[56].mxu0 %vm2001_vm5, %v1989_v53  ;;  %3885 = vmatmul.mubr.f32.gmra.mrb[44].mxu1 %v3129_v4  ;;  %v15799_v53 = vld [vmem:[#allocation125_spill] sm:$0xff] }
 0x27b   :  { %v3132_v15 = vmul.f32 %v2658_v46, %v15795_v32  ;;  %2978 = vmatprep.mubr.f32.mxu0 %v15571_v40  ;;  %v12649_v2 = vpop.f32.mrb[204].mxu1  ;;  %v1991_v46 = vld [vmem:[%s15391_s9 + $0x310] sm:$0xff] }
 0x27c   :  { %15796 = vst [vmem:[#allocation119_spill] sm:$0xff] %v12649_v2  ;;  %v12653_v4 = vpop.f32.mrb[205].mxu1 }
 0x27d   :  { %v2662_v16 = vpop.f32.mrb[208].mxu0  ;;  %7996 = vmatprep.mubr.msk.f32.mxu1 %vm3285_vm6, %v3132_v15  ;;  %15798 = vst [vmem:[#allocation121_spill] sm:$0xff] %v12653_v4  ;;  %v12660_v32 = vpop.f32.mrb[206].mxu1 }
 0x27e   :  { %v3133_v37 = vmul.f32 %v2662_v16, %v15797_v11  ;;  %v2664_v6 = vpop.f32.mrb[209].mxu0  ;;  %7942 = vmatmul.mubr.msk.f32.gmra.mrb[58].mxu0 %vm2001_vm5, %v1990_v20  ;;  %3890 = vmatmul.mubr.f32.gmra.mrb[46].mxu1 %v3131_v59  ;;  %15800 = vst [vmem:[#allocation123_spill] sm:$0xff] %v12660_v32  ;;  %v12662_v15 = vpop.f32.mrb[207].mxu1  ;;  %v15802_v16 = vld [vmem:[#allocation127_spill] sm:$0xff]  ;;  %v15803_v11 = vld [vmem:[#allocation129_spill] sm:$0xff] }
 0x27f   :  { %v3134_v3 = vmul.f32 %v2664_v6, %v15799_v53  ;;  %2984 = vmatprep.mubr.f32.mxu0 %v15571_v40  ;;  %15801 = vst [vmem:[#allocation125_spill] sm:$0xff] %v12662_v15  ;;  %v1992_v53 = vld [vmem:[%s15391_s9 + $0x318] sm:$0xff] }
 0x281   :  { %v2668_v2 = vpop.f32.mrb[210].mxu0  ;;  %7997 = vmatprep.mubr.msk.f32.mxu1 %vm3285_vm6, %v3134_v3  ;;  %v15805_v3 = vld [vmem:[#allocation131_spill] sm:$0xff] }
 0x282   :  { %v3135_v20 = vmul.f32 %v2668_v2, %v15802_v16  ;;  %v2670_v59 = vpop.f32.mrb[211].mxu0  ;;  %7943 = vmatmul.mubr.msk.f32.gmra.mrb[60].mxu0 %vm2001_vm5, %v1991_v46  ;;  %3895 = vmatmul.mubr.f32.gmra.mrb[48].mxu1 %v3133_v37  ;;  %v15807_v46 = vld [vmem:[#allocation133_spill] sm:$0xff] }
 0x283   :  { %v3136_v6 = vmul.f32 %v2670_v59, %v15803_v11  ;;  %2990 = vmatprep.mubr.f32.mxu0 %v15571_v40  ;;  %v12673_v15 = vpop.f32.mrb[208].mxu1  ;;  %v1993_v59 = vld [vmem:[%s15391_s9 + $0x320] sm:$0xff] }
 0x284   :  { %15804 = vst [vmem:[#allocation127_spill] sm:$0xff] %v12673_v15  ;;  %v12677_v37 = vpop.f32.mrb[209].mxu1 }
 0x285   :  { %v2674_v32 = vpop.f32.mrb[212].mxu0  ;;  %7998 = vmatprep.mubr.msk.f32.mxu1 %vm3285_vm6, %v3136_v6  ;;  %15806 = vst [vmem:[#allocation129_spill] sm:$0xff] %v12677_v37  ;;  %v12684_v11 = vpop.f32.mrb[210].mxu1 }
 0x286   :  { %v3137_v4 = vmul.f32 %v2674_v32, %v15805_v3  ;;  %v2676_v2 = vpop.f32.mrb[213].mxu0  ;;  %7944 = vmatmul.mubr.msk.f32.gmra.mrb[62].mxu0 %vm2001_vm5, %v1992_v53  ;;  %3900 = vmatmul.mubr.f32.gmra.mrb[50].mxu1 %v3135_v20  ;;  %15808 = vst [vmem:[#allocation131_spill] sm:$0xff] %v12684_v11  ;;  %v12686_v6 = vpop.f32.mrb[211].mxu1  ;;  %v15810_v32 = vld [vmem:[#allocation135_spill] sm:$0xff]  ;;  %v15811_v3 = vld [vmem:[#allocation137_spill] sm:$0xff] }
 0x287   :  { %v3138_v16 = vmul.f32 %v2676_v2, %v15807_v46  ;;  %2996 = vmatprep.mubr.f32.mxu0 %v15571_v40  ;;  %15809 = vst [vmem:[#allocation133_spill] sm:$0xff] %v12686_v6  ;;  %v1994_v46 = vld [vmem:[%s15391_s9 + $0x328] sm:$0xff] }
 0x289   :  { %v2680_v15 = vpop.f32.mrb[214].mxu0  ;;  %7999 = vmatprep.mubr.msk.f32.mxu1 %vm3285_vm6, %v3138_v16  ;;  %v15813_v16 = vld [vmem:[#allocation139_spill] sm:$0xff] }
 0x28a   :  { %v3139_v53 = vmul.f32 %v2680_v15, %v15810_v32  ;;  %v2682_v20 = vpop.f32.mrb[215].mxu0  ;;  %7945 = vmatmul.mubr.msk.f32.gmra.mrb[64].mxu0 %vm2001_vm5, %v1993_v59  ;;  %3905 = vmatmul.mubr.f32.gmra.mrb[52].mxu1 %v3137_v4  ;;  %v15815_v59 = vld [vmem:[#allocation141_spill] sm:$0xff] }
 0x28b   :  { %v3140_v2 = vmul.f32 %v2682_v20, %v15811_v3  ;;  %3002 = vmatprep.mubr.f32.mxu0 %v15571_v40  ;;  %v12697_v6 = vpop.f32.mrb[212].mxu1  ;;  %v1995_v20 = vld [vmem:[%s15391_s9 + $0x330] sm:$0xff] }
 0x28c   :  { %15812 = vst [vmem:[#allocation135_spill] sm:$0xff] %v12697_v6  ;;  %v12701_v4 = vpop.f32.mrb[213].mxu1 }
 0x28d   :  { %v2686_v11 = vpop.f32.mrb[216].mxu0  ;;  %8000 = vmatprep.mubr.msk.f32.mxu1 %vm3285_vm6, %v3140_v2  ;;  %15814 = vst [vmem:[#allocation137_spill] sm:$0xff] %v12701_v4  ;;  %v12708_v3 = vpop.f32.mrb[214].mxu1 }
 0x28e   :  { %v3141_v37 = vmul.f32 %v2686_v11, %v15813_v16  ;;  %v2688_v15 = vpop.f32.mrb[217].mxu0  ;;  %7946 = vmatmul.mubr.msk.f32.gmra.mrb[66].mxu0 %vm2001_vm5, %v1994_v46  ;;  %3910 = vmatmul.mubr.f32.gmra.mrb[54].mxu1 %v3139_v53  ;;  %15816 = vst [vmem:[#allocation139_spill] sm:$0xff] %v12708_v3  ;;  %v12710_v2 = vpop.f32.mrb[215].mxu1  ;;  %v15818_v11 = vld [vmem:[#allocation143_spill] sm:$0xff]  ;;  %v15819_v16 = vld [vmem:[#allocation145_spill] sm:$0xff] }
 0x28f   :  { %v3142_v32 = vmul.f32 %v2688_v15, %v15815_v59  ;;  %3008 = vmatprep.mubr.f32.mxu0 %v15571_v40  ;;  %15817 = vst [vmem:[#allocation141_spill] sm:$0xff] %v12710_v2  ;;  %v1996_v59 = vld [vmem:[%s15391_s9 + $0x338] sm:$0xff]  ;;  %v15820_v2 = vld [vmem:[#allocation147_spill] sm:$0xff] }
 0x291   :  { %v2692_v6 = vpop.f32.mrb[218].mxu0  ;;  %8001 = vmatprep.mubr.msk.f32.mxu1 %vm3285_vm6, %v3142_v32 }
 0x292   :  { %v3143_v46 = vmul.f32 %v2692_v6, %v15818_v11  ;;  %v2694_v53 = vpop.f32.mrb[219].mxu0  ;;  %7947 = vmatmul.mubr.msk.f32.gmra.mrb[68].mxu0 %vm2001_vm5, %v1995_v20  ;;  %3915 = vmatmul.mubr.f32.gmra.mrb[56].mxu1 %v3141_v37  ;;  %v1997_v37 = vld [vmem:[%s15391_s9 + $0x340] sm:$0xff]  ;;  %v15821_v11 = vld [vmem:[#allocation150_spill] sm:$0xff] }
 0x293   :  { %v3144_v15 = vmul.f32 %v2694_v53, %v15819_v16  ;;  %3014 = vmatprep.mubr.f32.mxu0 %v15571_v40 }
 0x295   :  { %v2698_v3 = vpop.f32.mrb[220].mxu0  ;;  %8002 = vmatprep.mubr.msk.f32.mxu1 %vm3285_vm6, %v3144_v15  ;;  %v15823_v15 = vld [vmem:[#allocation154_spill] sm:$0xff] }
 0x296   :  { %v3145_v4 = vmul.f32 %v2698_v3, %v15820_v2  ;;  %v2700_v32 = vpop.f32.mrb[221].mxu0  ;;  %7948 = vmatmul.mubr.msk.f32.gmra.mrb[70].mxu0 %vm2001_vm5, %v1996_v59  ;;  %3920 = vmatmul.mubr.f32.gmra.mrb[58].mxu1 %v3143_v46  ;;  %v15822_v3 = vld [vmem:[#allocation152_spill] sm:$0xff] }
 0x297   :  { %v3146_v6 = vmul.f32 %v2700_v32, %v12015_v50  ;;  %3020 = vmatprep.mubr.f32.mxu0 %v15571_v40  ;;  %v1998_v50 = vld [vmem:[%s15391_s9 + $0x348] sm:$0xff] }
 0x299   :  { %v2704_v20 = vpop.f32.mrb[222].mxu0  ;;  %8003 = vmatprep.mubr.msk.f32.mxu1 %vm3285_vm6, %v3146_v6 }
 0x29a   :  { %v3147_v53 = vmul.f32 %v2704_v20, %v15821_v11  ;;  %v2706_v16 = vpop.f32.mrb[223].mxu0  ;;  %7949 = vmatmul.mubr.msk.f32.gmra.mrb[72].mxu0 %vm2001_vm5, %v1997_v37  ;;  %3925 = vmatmul.mubr.f32.gmra.mrb[60].mxu1 %v3145_v4  ;;  %v1999_v4 = vld [vmem:[%s15391_s9 + $0x350] sm:$0xff] }
 0x29b   :  { %v3148_v2 = vmul.f32 %v2706_v16, %v15822_v3  ;;  %3026 = vmatprep.mubr.f32.mxu0 %v15571_v40  ;;  %v15824_v20 = vld [vmem:[#allocation157_spill] sm:$0xff]  ;;  %v15825_v3 = vld [vmem:[#allocation159_spill] sm:$0xff] }
 0x29d   :  { %v2710_v46 = vpop.f32.mrb[224].mxu0  ;;  %8004 = vmatprep.mubr.msk.f32.mxu1 %vm3285_vm6, %v3148_v2 }
 0x29e   :  { %v3149_v59 = vmul.f32 %v2710_v46, %v15823_v15  ;;  %v2712_v32 = vpop.f32.mrb[225].mxu0  ;;  %7950 = vmatmul.mubr.msk.f32.gmra.mrb[74].mxu0 %vm2001_vm5, %v1998_v50  ;;  %3930 = vmatmul.mubr.f32.gmra.mrb[62].mxu1 %v3147_v53  ;;  %v15827_v46 = vld [vmem:[#allocation161_spill] sm:$0xff] }
 0x29f   :  { %v3150_v6 = vmul.f32 %v2712_v32, %v12049_v33  ;;  %3032 = vmatprep.mubr.f32.mxu0 %v15571_v40  ;;  %v2000_v33 = vld [vmem:[%s15391_s9 + $0x358] sm:$0xff] }
 0x2a1   :  { %v2716_v37 = vpop.f32.mrb[226].mxu0  ;;  %8005 = vmatprep.mubr.msk.f32.mxu1 %vm3285_vm6, %v3150_v6 }
 0x2a2   :  { %v3151_v11 = vmul.f32 %v2716_v37, %v15824_v20  ;;  %v2718_v16 = vpop.f32.mrb[227].mxu0  ;;  %7951 = vmatmul.mubr.msk.f32.gmra.mrb[76].mxu0 %vm2001_vm5, %v1999_v4  ;;  %3935 = vmatmul.mubr.f32.gmra.mrb[64].mxu1 %v3149_v59  ;;  %v15828_v59 = vld [vmem:[#allocation163_spill] sm:$0xff] }
 0x2a3   :  { %v3152_v2 = vmul.f32 %v2718_v16, %v15825_v3  ;;  %3038 = vmatprep.mubr.f32.mxu0 %v15571_v40  ;;  %v15830_v16 = vld [vmem:[#allocation165_spill] sm:$0xff] }
 0x2a5   :  { %v2722_v53 = vpop.f32.mrb[228].mxu0  ;;  %v12752_v50 = vpop.f32.mrb[216].mxu1  ;;  %8006 = vmatprep.mubr.msk.f32.mxu1 %vm3285_vm6, %v3152_v2  ;;  %v15831_v2 = vld [vmem:[#allocation167_spill] sm:$0xff] }
 0x2a6   :  { %15826 = vst [vmem:[#allocation143_spill] sm:$0xff] %v12752_v50  ;;  %v3153_v15 = vmul.f32 %v2722_v53, %v15827_v46  ;;  %v2724_v32 = vpop.f32.mrb[229].mxu0  ;;  %7952 = vmatmul.mubr.msk.f32.gmra.mrb[78].mxu0 %vm2001_vm5, %v2000_v33  ;;  %v3678_v6 = vpop.f32.mrb[217].mxu1  ;;  %3940 = vmatmul.mubr.f32.gmra.mrb[66].mxu1 %v3151_v11  ;;  %v15833_v11 = vld [vmem:[#allocation169_spill] sm:$0xff] }
 0x2a7   :  { %v3154_v4 = vmul.f32 %v2724_v32, %v15828_v59  ;;  %v15834_v59 = vld [vmem:[#allocation171_spill] sm:$0xff] }
 0x2a9   :  { %v2728_v37 = vpop.f32.mrb[230].mxu0  ;;  %v12758_v20 = vpop.f32.mrb[218].mxu1  ;;  %8007 = vmatprep.mubr.msk.f32.mxu1 %vm3285_vm6, %v3154_v4 }
 0x2aa   :  { %15829 = vst [vmem:[#allocation145_spill] sm:$0xff] %v12758_v20  ;;  %v3155_v3 = vmul.f32 %v2728_v37, %v15830_v16  ;;  %v2730_v40 = vpop.f32.mrb[231].mxu0  ;;  %v3683_v50 = vpop.f32.mrb[219].mxu1  ;;  %3945 = vmatmul.mubr.f32.gmra.mrb[68].mxu1 %v3153_v15  ;;  %v15836_v16 = vld [vmem:[#allocation175_spill] sm:$0xff] }
 0x2ab   :  { %v3156_v9 = vmul.f32 %v2730_v40, %v15831_v2  ;;  %v15835_v50 = vld [vmem:[#allocation173_spill] sm:$0xff] }
 0x2ad   :  { %v2734_v53 = vpop.f32.mrb[232].mxu0  ;;  %v12763_v46 = vpop.f32.mrb[220].mxu1  ;;  %8008 = vmatprep.mubr.msk.f32.mxu1 %vm3285_vm6, %v3156_v9 }
 0x2ae   :  { %15832 = vst [vmem:[#allocation147_spill] sm:$0xff] %v12763_v46  ;;  %v3157_v33 = vmul.f32 %v2734_v53, %v15833_v11  ;;  %v2736_v32 = vpop.f32.mrb[233].mxu0  ;;  %v3688_v6 = vpop.f32.mrb[221].mxu1  ;;  %3950 = vmatmul.mubr.f32.gmra.mrb[70].mxu1 %v3155_v3  ;;  %v15837_v3 = vld [vmem:[#allocation176_spill] sm:$0xff] }
 0x2af   :  { %v3158_v20 = vmul.f32 %v2736_v32, %v15834_v59 }
 0x2b1   :  { %v2740_v4 = vpop.f32.mrb[234].mxu0  ;;  %v12768_v17 = vpop.f32.mrb[222].mxu1  ;;  %8009 = vmatprep.mubr.msk.f32.mxu1 %vm3285_vm6, %v3158_v20 }
 0x2b2   :  { %v3159_v15 = vmul.f32 %v2740_v4, %v15835_v50  ;;  %v2742_v40 = vpop.f32.mrb[235].mxu0  ;;  %v3693_v37 = vpop.f32.mrb[223].mxu1  ;;  %3955 = vmatmul.mubr.f32.gmra.mrb[72].mxu1 %v3157_v33 }
 0x2b3   :  { %v3160_v2 = vmul.f32 %v2742_v40, %v15836_v16  ;;  %v15838_v40 = vld [vmem:[#allocation177_spill] sm:$0xff] }
 0x2b5   :  { %v2746_v9 = vpop.f32.mrb[236].mxu0  ;;  %v12773_v46 = vpop.f32.mrb[224].mxu1  ;;  %8010 = vmatprep.mubr.msk.f32.mxu1 %vm3285_vm6, %v3160_v2 }
 0x2b6   :  { %v3161_v53 = vmul.f32 %v2746_v9, %v15837_v3  ;;  %v2748_v11 = vpop.f32.mrb[237].mxu0  ;;  %v3698_v32 = vpop.f32.mrb[225].mxu1  ;;  %3960 = vmatmul.mubr.f32.gmra.mrb[74].mxu1 %v3159_v15 }
 0x2b7   :  { %v3162_v6 = vmul.f32 %v2748_v11, %v12125_v56 }
 0x2b9   :  { %v2752_v20 = vpop.f32.mrb[238].mxu0  ;;  %v12778_v59 = vpop.f32.mrb[226].mxu1  ;;  %8011 = vmatprep.mubr.msk.f32.mxu1 %vm3285_vm6, %v3162_v6 }
 0x2ba   :  { %v3163_v33 = vmul.f32 %v2752_v20, %v12132_v60  ;;  %v2754_v4 = vpop.f32.mrb[239].mxu0  ;;  %v3703_v50 = vpop.f32.mrb[227].mxu1  ;;  %3965 = vmatmul.mubr.f32.gmra.mrb[76].mxu1 %v3161_v53 }
 0x2bb   :  { %v3164_v37 = vmul.f32 %v2754_v4, %v15838_v40 }
 0x2bd   :  { %v2758_v16 = vpop.f32.mrb[240].mxu0  ;;  %v12783_v2 = vpop.f32.mrb[228].mxu1  ;;  %8012 = vmatprep.mubr.msk.f32.mxu1 %vm3285_vm6, %v3164_v37 }
 0x2be   :  { %v3165_v15 = vmul.f32 %v2758_v16, %v12145_v48  ;;  %v2760_v56 = vpop.f32.mrb[241].mxu0  ;;  %v3708_v9 = vpop.f32.mrb[229].mxu1  ;;  %3970 = vmatmul.mubr.f32.gmra.mrb[78].mxu1 %v3163_v33 }
 0x2bf   :  { %v3166_v3 = vmul.f32 %v2760_v56, %v12149_v13 }
 0x2c1   :  { %v2764_v11 = vpop.f32.mrb[242].mxu0  ;;  %v12788_v32 = vpop.f32.mrb[230].mxu1  ;;  %8013 = vmatprep.mubr.msk.f32.mxu1 %vm3285_vm6, %v3166_v3 }
 0x2c2   :  { %v3167_v60 = vmul.f32 %v2764_v11, %v12156_v63  ;;  %v2766_v53 = vpop.f32.mrb[243].mxu0  ;;  %v3713_v6 = vpop.f32.mrb[231].mxu1  ;;  %3975 = vmatmul.mubr.f32.gmra.mrb[80].mxu1 %v3165_v15 }
 0x2c3   :  { %v3168_v20 = vmul.f32 %v2766_v53, %v12158_v30 }
 0x2c5   :  { %v2770_v4 = vpop.f32.mrb[244].mxu0  ;;  %v12793_v50 = vpop.f32.mrb[232].mxu1  ;;  %8014 = vmatprep.mubr.msk.f32.mxu1 %vm3285_vm6, %v3168_v20 }
 0x2c6   :  { %v3169_v48 = vmul.f32 %v2770_v4, %v12169_v26  ;;  %v2772_v13 = vpop.f32.mrb[245].mxu0  ;;  %v3718_v33 = vpop.f32.mrb[233].mxu1  ;;  %3980 = vmatmul.mubr.f32.gmra.mrb[82].mxu1 %v3167_v60 }
 0x2c7   :  { %v3170_v40 = vmul.f32 %v2772_v13, %v12173_v43 }
 0x2c9   :  { %v2776_v37 = vpop.f32.mrb[246].mxu0  ;;  %v12798_v16 = vpop.f32.mrb[234].mxu1  ;;  %8015 = vmatprep.mubr.msk.f32.mxu1 %vm3285_vm6, %v3170_v40 }
 0x2ca   :  { %v3171_v63 = vmul.f32 %v2776_v37, %v12180_v22  ;;  %v2778_v30 = vpop.f32.mrb[247].mxu0  ;;  %v3723_v15 = vpop.f32.mrb[235].mxu1  ;;  %3985 = vmatmul.mubr.f32.gmra.mrb[84].mxu1 %v3169_v48 }
 0x2cb   :  { %v3172_v56 = vmul.f32 %v2778_v30, %v12182_v19 }
 0x2cd   :  { %v2782_v9 = vpop.f32.mrb[248].mxu0  ;;  %v12803_v3 = vpop.f32.mrb[236].mxu1  ;;  %8016 = vmatprep.mubr.msk.f32.mxu1 %vm3285_vm6, %v3172_v56 }
 0x2ce   :  { %v3173_v26 = vmul.f32 %v2782_v9, %v12193_v42  ;;  %v2784_v43 = vpop.f32.mrb[249].mxu0  ;;  %v3728_v11 = vpop.f32.mrb[237].mxu1  ;;  %3990 = vmatmul.mubr.f32.gmra.mrb[86].mxu1 %v3171_v63 }
 0x2cf   :  { %v3174_v60 = vmul.f32 %v2784_v43, %v12197_v29 }
 0x2d1   :  { %v2788_v53 = vpop.f32.mrb[250].mxu0  ;;  %v12808_v6 = vpop.f32.mrb[238].mxu1  ;;  %8017 = vmatprep.mubr.msk.f32.mxu1 %vm3285_vm6, %v3174_v60 }
 0x2d2   :  { %v3175_v22 = vmul.f32 %v2788_v53, %v12204_v39  ;;  %v2790_v19 = vpop.f32.mrb[251].mxu0  ;;  %v3733_v20 = vpop.f32.mrb[239].mxu1  ;;  %3995 = vmatmul.mubr.f32.gmra.mrb[88].mxu1 %v3173_v26 }
 0x2d3   :  { %v3176_v4 = vmul.f32 %v2790_v19, %v12206_v36 }
 0x2d5   :  { %v2794_v48 = vpop.f32.mrb[252].mxu0  ;;  %v12813_v13 = vpop.f32.mrb[240].mxu1  ;;  %8018 = vmatprep.mubr.msk.f32.mxu1 %vm3285_vm6, %v3176_v4 }
 0x2d6   :  { %v3177_v42 = vmul.f32 %v2794_v48, %v12217_v55  ;;  %v2796_v29 = vpop.f32.mrb[253].mxu0  ;;  %v3738_v33 = vpop.f32.mrb[241].mxu1  ;;  %4000 = vmatmul.mubr.f32.gmra.mrb[90].mxu1 %v3175_v22 }
 0x2d7   :  { %v3178_v40 = vmul.f32 %v2796_v29, %v12221_v44 }
 0x2d9   :  { %v2800_v37 = vpop.f32.mrb[254].mxu0  ;;  %v12818_v63 = vpop.f32.mrb[242].mxu1  ;;  %8019 = vmatprep.mubr.msk.f32.mxu1 %vm3285_vm6, %v3178_v40 }
 0x2da   :  { %v3179_v39 = vmul.f32 %v2800_v37, %v12228_v51  ;;  %v2802_v36 = vpop.f32.mrb[255].mxu0  ;;  %v3743_v30 = vpop.f32.mrb[243].mxu1  ;;  %4005 = vmatmul.mubr.f32.gmra.mrb[92].mxu1 %v3177_v42 }
 0x2db   :  { %v3180_v15 = vmul.f32 %v2802_v36, %v12230_v49 }
 0x2dd   :  { %v2806_v56 = vpop.f32.mrb[0].mxu0  ;;  %v12823_v9 = vpop.f32.mrb[244].mxu1  ;;  %8020 = vmatprep.mubr.msk.f32.mxu1 %vm3285_vm6, %v3180_v15 }
 0x2de   :  { %v3181_v55 = vmul.f32 %v2806_v56, %v12241_v5  ;;  %v2808_v44 = vpop.f32.mrb[1].mxu0  ;;  %v3748_v26 = vpop.f32.mrb[245].mxu1  ;;  %4010 = vmatmul.mubr.f32.gmra.mrb[94].mxu1 %v3179_v39 }
 0x2df   :  { %v3182_v43 = vmul.f32 %v2808_v44, %v12245_v57 }
 0x2e1   :  { %v2812_v11 = vpop.f32.mrb[2].mxu0  ;;  %v12828_v60 = vpop.f32.mrb[246].mxu1  ;;  %8021 = vmatprep.mubr.msk.f32.mxu1 %vm3285_vm6, %v3182_v43 }
 0x2e2   :  { %v3183_v51 = vmul.f32 %v2812_v11, %v12252_v0  ;;  %v2814_v49 = vpop.f32.mrb[3].mxu0  ;;  %v3753_v53 = vpop.f32.mrb[247].mxu1  ;;  %4015 = vmatmul.mubr.f32.gmra.mrb[96].mxu1 %v3181_v55 }
 0x2e3   :  { %v3184_v22 = vmul.f32 %v2814_v49, %v12254_v62 }
 0x2e5   :  { %v2818_v19 = vpop.f32.mrb[4].mxu0  ;;  %v12833_v20 = vpop.f32.mrb[248].mxu1  ;;  %8022 = vmatprep.mubr.msk.f32.mxu1 %vm3285_vm6, %v3184_v22 }
 0x2e6   :  { %v3185_v5 = vmul.f32 %v2818_v19, %v12265_v18  ;;  %v2820_v57 = vpop.f32.mrb[5].mxu0  ;;  %v3758_v4 = vpop.f32.mrb[249].mxu1  ;;  %4020 = vmatmul.mubr.f32.gmra.mrb[98].mxu1 %v3183_v51 }
 0x2e7   :  { %v3186_v48 = vmul.f32 %v2820_v57, %v12269_v7 }
 0x2e9   :  { %v2824_v42 = vpop.f32.mrb[6].mxu0  ;;  %v12838_v29 = vpop.f32.mrb[250].mxu1  ;;  %8023 = vmatprep.mubr.msk.f32.mxu1 %vm3285_vm6, %v3186_v48 }
 0x2ea   :  { %v3187_v0 = vmul.f32 %v2824_v42, %v12276_v14  ;;  %v2826_v62 = vpop.f32.mrb[7].mxu0  ;;  %v3763_v33 = vpop.f32.mrb[251].mxu1  ;;  %4025 = vmatmul.mubr.f32.gmra.mrb[100].mxu1 %v3185_v5 }
 0x2eb   :  { %v3188_v40 = vmul.f32 %v2826_v62, %v12278_v12 }
 0x2ed   :  { %v2830_v37 = vpop.f32.mrb[8].mxu0  ;;  %v12843_v39 = vpop.f32.mrb[252].mxu1  ;;  %8024 = vmatprep.mubr.msk.f32.mxu1 %vm3285_vm6, %v3188_v40 }
 0x2ee   :  { %v3189_v18 = vmul.f32 %v2830_v37, %v12289_v35  ;;  %v2832_v7 = vpop.f32.mrb[9].mxu0  ;;  %v3768_v36 = vpop.f32.mrb[253].mxu1  ;;  %4030 = vmatmul.mubr.f32.gmra.mrb[102].mxu1 %v3187_v0 }
 0x2ef   :  { %v3190_v30 = vmul.f32 %v2832_v7, %v12293_v21 }
 0x2f1   :  { %v2836_v15 = vpop.f32.mrb[10].mxu0  ;;  %v12848_v56 = vpop.f32.mrb[254].mxu1  ;;  %8025 = vmatprep.mubr.msk.f32.mxu1 %vm3285_vm6, %v3190_v30 }
 0x2f2   :  { %v3191_v14 = vmul.f32 %v2836_v15, %v12300_v31  ;;  %v2838_v12 = vpop.f32.mrb[11].mxu0  ;;  %v3773_v55 = vpop.f32.mrb[255].mxu1  ;;  %4035 = vmatmul.mubr.f32.gmra.mrb[104].mxu1 %v3189_v18 }
 0x2f3   :  { %v3192_v44 = vmul.f32 %v2838_v12, %v12302_v28 }
 0x2f5   :  { %v2842_v26 = vpop.f32.mrb[12].mxu0  ;;  %v12853_v43 = vpop.f32.mrb[0].mxu1  ;;  %8026 = vmatprep.mubr.msk.f32.mxu1 %vm3285_vm6, %v3192_v44 }
 0x2f6   :  { %v3193_v35 = vmul.f32 %v2842_v26, %v12313_v1  ;;  %v2844_v21 = vpop.f32.mrb[13].mxu0  ;;  %v3778_v11 = vpop.f32.mrb[1].mxu1  ;;  %4040 = vmatmul.mubr.f32.gmra.mrb[106].mxu1 %v3191_v14 }
 0x2f7   :  { %v3194_v51 = vmul.f32 %v2844_v21, %v12317_v38 }
 0x2f9   :  { %v2848_v49 = vpop.f32.mrb[14].mxu0  ;;  %v12858_v53 = vpop.f32.mrb[2].mxu1  ;;  %8027 = vmatprep.mubr.msk.f32.mxu1 %vm3285_vm6, %v3194_v51  ;;  %v15839_v51 = vld [vmem:[#allocation178_spill] sm:$0xff] }
 0x2fa   :  { %v3195_v31 = vmul.f32 %v2848_v49, %v12324_v54  ;;  %v2850_v28 = vpop.f32.mrb[15].mxu0  ;;  %v3783_v22 = vpop.f32.mrb[3].mxu1  ;;  %4045 = vmatmul.mubr.f32.gmra.mrb[108].mxu1 %v3193_v35 }
 0x2fb   :  { %v3196_v19 = vmul.f32 %v2850_v28, %v12326_v47 }
 0x2fd   :  { %v2854_v5 = vpop.f32.mrb[16].mxu0  ;;  %v12863_v57 = vpop.f32.mrb[4].mxu1  ;;  %8028 = vmatprep.mubr.msk.f32.mxu1 %vm3285_vm6, %v3196_v19 }
 0x2fe   :  { %v3197_v1 = vmul.f32 %v2854_v5, %v12337_v41  ;;  %v2856_v38 = vpop.f32.mrb[17].mxu0  ;;  %v3788_v4 = vpop.f32.mrb[5].mxu1  ;;  %4050 = vmatmul.mubr.f32.gmra.mrb[110].mxu1 %v3195_v31  ;;  %v15841_v5 = vld [vmem:[#allocation46_spill] sm:$0xff] }
 0x2ff   :  { %v3198_v48 = vmul.f32 %v2856_v38, %v12341_v8 }
 0x301   :  { %v2860_v42 = vpop.f32.mrb[18].mxu0  ;;  %v12868_v0 = vpop.f32.mrb[6].mxu1  ;;  %8029 = vmatprep.mubr.msk.f32.mxu1 %vm3285_vm6, %v3198_v48 }
 0x302   :  { %v3199_v54 = vmul.f32 %v2860_v42, %v12348_v25  ;;  %v2862_v47 = vpop.f32.mrb[19].mxu0  ;;  %v3793_v62 = vpop.f32.mrb[7].mxu1  ;;  %4055 = vmatmul.mubr.f32.gmra.mrb[112].mxu1 %v3197_v1 }
 0x303   :  { %v3200_v33 = vmul.f32 %v2862_v47, %v12350_v23  ;;  %v15843_v47 = vld [vmem:[#allocation180_spill] sm:$0xff] }
 0x305   :  { %v2866_v40 = vpop.f32.mrb[20].mxu0  ;;  %v12873_v37 = vpop.f32.mrb[8].mxu1  ;;  %8030 = vmatprep.mubr.msk.f32.mxu1 %vm3285_vm6, %v3200_v33 }
 0x306   :  { %v3201_v41 = vmul.f32 %v2866_v40, %v12361_v52  ;;  %v2868_v8 = vpop.f32.mrb[21].mxu0  ;;  %v3798_v18 = vpop.f32.mrb[9].mxu1  ;;  %4060 = vmatmul.mubr.f32.gmra.mrb[114].mxu1 %v3199_v54 }
 0x307   :  { %v3202_v7 = vmul.f32 %v2868_v8, %v12365_v58 }
 0x309   :  { %v2872_v36 = vpop.f32.mrb[22].mxu0  ;;  %v12878_v30 = vpop.f32.mrb[10].mxu1  ;;  %8031 = vmatprep.mubr.msk.f32.mxu1 %vm3285_vm6, %v3202_v7  ;;  %v15844_v7 = vld [vmem:[#allocation50_spill] sm:$0xff] }
 0x30a   :  { %v3203_v25 = vmul.f32 %v2872_v36, %v12372_v24  ;;  %v2874_v23 = vpop.f32.mrb[23].mxu0  ;;  %v3803_v15 = vpop.f32.mrb[11].mxu1  ;;  %4065 = vmatmul.mubr.f32.gmra.mrb[116].mxu1 %v3201_v41 }
 0x30b   :  { %v3204_v14 = vmul.f32 %v2874_v23, %v12374_v45  ;;  %v15845_v15 = vld [vmem:[#allocation52_spill] sm:$0xff] }
 0x30d   :  { %v2878_v12 = vpop.f32.mrb[24].mxu0  ;;  %v12883_v55 = vpop.f32.mrb[12].mxu1  ;;  %8032 = vmatprep.mubr.msk.f32.mxu1 %vm3285_vm6, %v3204_v14 }
 0x30e   :  { %v3205_v52 = vmul.f32 %v2878_v12, %v12385_v10  ;;  %v2880_v58 = vpop.f32.mrb[25].mxu0  ;;  %v3808_v44 = vpop.f32.mrb[13].mxu1  ;;  %4070 = vmatmul.mubr.f32.gmra.mrb[118].mxu1 %v3203_v25  ;;  %v15840_v10 = vld [vmem:[#allocation179_spill] sm:$0xff] }
 0x30f   :  { %v3206_v26 = vmul.f32 %v2880_v58, %v12389_v34  ;;  %v15846_v58 = vld [vmem:[#allocation54_spill] sm:$0xff] }
 0x311   :  { %v2884_v35 = vpop.f32.mrb[26].mxu0  ;;  %v12888_v21 = vpop.f32.mrb[14].mxu1  ;;  %8033 = vmatprep.mubr.msk.f32.mxu1 %vm3285_vm6, %v3206_v26 }
 0x312   :  { %v3207_v24 = vmul.f32 %v2884_v35, %v12396_v27  ;;  %v2886_v45 = vpop.f32.mrb[27].mxu0  ;;  %v3813_v11 = vpop.f32.mrb[15].mxu1  ;;  %4075 = vmatmul.mubr.f32.gmra.mrb[120].mxu1 %v3205_v52  ;;  %v15842_v27 = vld [vmem:[#allocation48_spill] sm:$0xff] }
 0x313   :  { %v3208_v49 = vmul.f32 %v2886_v45, %v15839_v51  ;;  %v15848_v51 = vld [vmem:[#allocation59_spill] sm:$0xff] }
 0x315   :  { %v2890_v31 = vpop.f32.mrb[28].mxu0  ;;  %v12893_v28 = vpop.f32.mrb[16].mxu1  ;;  %8034 = vmatprep.mubr.msk.f32.mxu1 %vm3285_vm6, %v3208_v49 }
 0x316   :  { %v3209_v22 = vmul.f32 %v2890_v31, %v15840_v10  ;;  %v2892_v34 = vpop.f32.mrb[29].mxu0  ;;  %v3818_v19 = vpop.f32.mrb[17].mxu1  ;;  %4080 = vmatmul.mubr.f32.gmra.mrb[122].mxu1 %v3207_v24 }
 0x317   :  { %v3210_v1 = vmul.f32 %v2892_v34, %v15841_v5 }
 0x319   :  { %v2896_v38 = vpop.f32.mrb[30].mxu0  ;;  %v12898_v4 = vpop.f32.mrb[18].mxu1  ;;  %8035 = vmatprep.mubr.msk.f32.mxu1 %vm3285_vm6, %v3210_v1  ;;  %v15850_v1 = vld [vmem:[#allocation182_spill] sm:$0xff] }
 0x31a   :  { %v3211_v48 = vmul.f32 %v2896_v38, %v15842_v27  ;;  %v2898_v42 = vpop.f32.mrb[31].mxu0  ;;  %v3823_v54 = vpop.f32.mrb[19].mxu1  ;;  %4085 = vmatmul.mubr.f32.gmra.mrb[124].mxu1 %v3209_v22  ;;  %v15849_v22 = vld [vmem:[#allocation61_spill] sm:$0xff] }
 0x31b   :  { %v3212_v62 = vmul.f32 %v2898_v42, %v15843_v47  ;;  %v15851_v42 = vld [vmem:[#allocation63_spill] sm:$0xff] }
 0x31d   :  { %v2902_v33 = vpop.f32.mrb[32].mxu0  ;;  %v12903_v40 = vpop.f32.mrb[20].mxu1  ;;  %8036 = vmatprep.mubr.msk.f32.mxu1 %vm3285_vm6, %v3212_v62 }
 0x31e   :  { %v3213_v41 = vmul.f32 %v2902_v33, %v12433_v61  ;;  %v2904_v8 = vpop.f32.mrb[33].mxu0  ;;  %v3828_v18 = vpop.f32.mrb[21].mxu1  ;;  %4090 = vmatmul.mubr.f32.gmra.mrb[126].mxu1 %v3211_v48  ;;  %v15847_v61 = vld [vmem:[#allocation181_spill] sm:$0xff] }
 0x31f   :  { %v3214_v36 = vmul.f32 %v2904_v8, %v15844_v7  ;;  %v15852_v33 = vld [vmem:[#allocation65_spill] sm:$0xff]  ;;  %v15853_v7 = vld [vmem:[#allocation67_spill] sm:$0xff] }
 0x321   :  { %v2908_v25 = vpop.f32.mrb[34].mxu0  ;;  %v12908_v23 = vpop.f32.mrb[22].mxu1  ;;  %8037 = vmatprep.mubr.msk.f32.mxu1 %vm3285_vm6, %v3214_v36 }
 0x322   :  { %v3215_v14 = vmul.f32 %v2908_v25, %v15845_v15  ;;  %v2910_v12 = vpop.f32.mrb[35].mxu0  ;;  %v3833_v52 = vpop.f32.mrb[23].mxu1  ;;  %4095 = vmatmul.mubr.f32.gmra.mrb[128].mxu1 %v3213_v41 }
 0x323   :  { %v3216_v44 = vmul.f32 %v2910_v12, %v15846_v58 }
 0x325   :  { %v2914_v26 = vpop.f32.mrb[36].mxu0  ;;  %v12913_v35 = vpop.f32.mrb[24].mxu1  ;;  %8038 = vmatprep.mubr.msk.f32.mxu1 %vm3285_vm6, %v3216_v44  ;;  %v15855_v44 = vld [vmem:[#allocation71_spill] sm:$0xff] }
 0x326   :  { %v3217_v24 = vmul.f32 %v2914_v26, %v15847_v61  ;;  %v2916_v45 = vpop.f32.mrb[37].mxu0  ;;  %v3838_v11 = vpop.f32.mrb[25].mxu1  ;;  %4100 = vmatmul.mubr.f32.gmra.mrb[130].mxu1 %v3215_v14  ;;  %v15854_v14 = vld [vmem:[#allocation69_spill] sm:$0xff] }
 0x327   :  { %v3218_v49 = vmul.f32 %v2916_v45, %v15848_v51  ;;  %v15856_v45 = vld [vmem:[#allocation73_spill] sm:$0xff] }
 0x329   :  { %v2920_v31 = vpop.f32.mrb[38].mxu0  ;;  %v12918_v10 = vpop.f32.mrb[26].mxu1  ;;  %8039 = vmatprep.mubr.msk.f32.mxu1 %vm3285_vm6, %v3218_v49 }
 0x32a   :  { %v3219_v34 = vmul.f32 %v2920_v31, %v15849_v22  ;;  %v2922_v19 = vpop.f32.mrb[39].mxu0  ;;  %v3843_v5 = vpop.f32.mrb[27].mxu1  ;;  %4105 = vmatmul.mubr.f32.gmra.mrb[132].mxu1 %v3217_v24  ;;  %v15857_v31 = vld [vmem:[#allocation75_spill] sm:$0xff] }
 0x32b   :  { %v3220_v38 = vmul.f32 %v2922_v19, %v15850_v1  ;;  %v15858_v5 = vld [vmem:[#allocation77_spill] sm:$0xff] }
 0x32d   :  { %v2926_v27 = vpop.f32.mrb[40].mxu0  ;;  %v12923_v48 = vpop.f32.mrb[28].mxu1  ;;  %8040 = vmatprep.mubr.msk.f32.mxu1 %vm3285_vm6, %v3220_v38 }
 0x32e   :  { %v3221_v54 = vmul.f32 %v2926_v27, %v15851_v42  ;;  %v2928_v47 = vpop.f32.mrb[41].mxu0  ;;  %v3848_v62 = vpop.f32.mrb[29].mxu1  ;;  %4110 = vmatmul.mubr.f32.gmra.mrb[134].mxu1 %v3219_v34  ;;  %v15859_v42 = vld [vmem:[#allocation79_spill] sm:$0xff] }
 0x32f   :  { %v3222_v41 = vmul.f32 %v2928_v47, %v15852_v33  ;;  %v15860_v33 = vld [vmem:[#allocation81_spill] sm:$0xff] }
 0x331   :  { %v2932_v8 = vpop.f32.mrb[42].mxu0  ;;  %v12928_v18 = vpop.f32.mrb[30].mxu1  ;;  %8041 = vmatprep.mubr.msk.f32.mxu1 %vm3285_vm6, %v3222_v41 }
 0x332   :  { %v3223_v36 = vmul.f32 %v2932_v8, %v15853_v7  ;;  %v2934_v25 = vpop.f32.mrb[43].mxu0  ;;  %v3853_v15 = vpop.f32.mrb[31].mxu1  ;;  %4115 = vmatmul.mubr.f32.gmra.mrb[136].mxu1 %v3221_v54 }
 0x333   :  { %v3224_v12 = vmul.f32 %v2934_v25, %v15854_v14 }
 0x335   :  { %v2938_v52 = vpop.f32.mrb[44].mxu0  ;;  %v12933_v58 = vpop.f32.mrb[32].mxu1  ;;  %8042 = vmatprep.mubr.msk.f32.mxu1 %vm3285_vm6, %v3224_v12  ;;  %v15862_v12 = vld [vmem:[#allocation85_spill] sm:$0xff] }
 0x336   :  { %v3225_v26 = vmul.f32 %v2938_v52, %v15855_v44  ;;  %v2940_v61 = vpop.f32.mrb[45].mxu0  ;;  %v3858_v24 = vpop.f32.mrb[33].mxu1  ;;  %4120 = vmatmul.mubr.f32.gmra.mrb[138].mxu1 %v3223_v36  ;;  %v15861_v36 = vld [vmem:[#allocation83_spill] sm:$0xff] }
 0x337   :  { %v3226_v11 = vmul.f32 %v2940_v61, %v15856_v45  ;;  %v15863_v61 = vld [vmem:[#allocation87_spill] sm:$0xff] }
 0x339   :  { %v2944_v51 = vpop.f32.mrb[46].mxu0  ;;  %v12938_v49 = vpop.f32.mrb[34].mxu1  ;;  %8043 = vmatprep.mubr.msk.f32.mxu1 %vm3285_vm6, %v3226_v11 }
 0x33a   :  { %v3227_v22 = vmul.f32 %v2944_v51, %v15857_v31  ;;  %v2946_v34 = vpop.f32.mrb[47].mxu0  ;;  %v3863_v19 = vpop.f32.mrb[35].mxu1  ;;  %4125 = vmatmul.mubr.f32.gmra.mrb[140].mxu1 %v3225_v26  ;;  %v15864_v51 = vld [vmem:[#allocation89_spill] sm:$0xff] }
 0x33b   :  { %v3228_v1 = vmul.f32 %v2946_v34, %v15858_v5  ;;  %v15865_v19 = vld [vmem:[#allocation91_spill] sm:$0xff] }
 0x33d   :  { %v2950_v38 = vpop.f32.mrb[48].mxu0  ;;  %v12943_v27 = vpop.f32.mrb[36].mxu1  ;;  %8044 = vmatprep.mubr.msk.f32.mxu1 %vm3285_vm6, %v3228_v1 }
 0x33e   :  { %v3229_v54 = vmul.f32 %v2950_v38, %v15859_v42  ;;  %v2952_v47 = vpop.f32.mrb[49].mxu0  ;;  %v3868_v62 = vpop.f32.mrb[37].mxu1  ;;  %4130 = vmatmul.mubr.f32.gmra.mrb[142].mxu1 %v3227_v22  ;;  %v15866_v42 = vld [vmem:[#allocation93_spill] sm:$0xff] }
 0x33f   :  { %v3230_v41 = vmul.f32 %v2952_v47, %v15860_v33  ;;  %v15867_v33 = vld [vmem:[#allocation95_spill] sm:$0xff] }
 0x341   :  { %v2956_v8 = vpop.f32.mrb[50].mxu0  ;;  %v12948_v7 = vpop.f32.mrb[38].mxu1  ;;  %8045 = vmatprep.mubr.msk.f32.mxu1 %vm3285_vm6, %v3230_v41 }
 0x342   :  { %v3231_v25 = vmul.f32 %v2956_v8, %v15861_v36  ;;  %v2958_v15 = vpop.f32.mrb[51].mxu0  ;;  %v3873_v14 = vpop.f32.mrb[39].mxu1  ;;  %4135 = vmatmul.mubr.f32.gmra.mrb[144].mxu1 %v3229_v54 }
 0x343   :  { %v3232_v52 = vmul.f32 %v2958_v15, %v15862_v12 }
 0x345   :  { %v2962_v44 = vpop.f32.mrb[52].mxu0  ;;  %v12953_v26 = vpop.f32.mrb[40].mxu1  ;;  %8046 = vmatprep.mubr.msk.f32.mxu1 %vm3285_vm6, %v3232_v52  ;;  %v15869_v52 = vld [vmem:[#allocation99_spill] sm:$0xff] }
 0x346   :  { %v3233_v24 = vmul.f32 %v2962_v44, %v15863_v61  ;;  %v2964_v45 = vpop.f32.mrb[53].mxu0  ;;  %v3878_v11 = vpop.f32.mrb[41].mxu1  ;;  %4140 = vmatmul.mubr.f32.gmra.mrb[146].mxu1 %v3231_v25  ;;  %v15868_v25 = vld [vmem:[#allocation97_spill] sm:$0xff] }
 0x347   :  { %v3234_v31 = vmul.f32 %v2964_v45, %v15864_v51  ;;  %v15870_v45 = vld [vmem:[#allocation101_spill] sm:$0xff] }
 0x349   :  { %v2968_v22 = vpop.f32.mrb[54].mxu0  ;;  %v12958_v34 = vpop.f32.mrb[42].mxu1  ;;  %8047 = vmatprep.mubr.msk.f32.mxu1 %vm3285_vm6, %v3234_v31 }
 0x34a   :  { %v3235_v5 = vmul.f32 %v2968_v22, %v15865_v19  ;;  %v2970_v1 = vpop.f32.mrb[55].mxu0  ;;  %v3883_v38 = vpop.f32.mrb[43].mxu1  ;;  %4145 = vmatmul.mubr.f32.gmra.mrb[148].mxu1 %v3233_v24  ;;  %v15871_v22 = vld [vmem:[#allocation103_spill] sm:$0xff] }
 0x34b   :  { %v3236_v54 = vmul.f32 %v2970_v1, %v15866_v42  ;;  %v15872_v38 = vld [vmem:[#allocation105_spill] sm:$0xff] }
 0x34d   :  { %v2974_v47 = vpop.f32.mrb[56].mxu0  ;;  %v12963_v62 = vpop.f32.mrb[44].mxu1  ;;  %8048 = vmatprep.mubr.msk.f32.mxu1 %vm3285_vm6, %v3236_v54 }
 0x34e   :  { %v3237_v41 = vmul.f32 %v2974_v47, %v15867_v33  ;;  %v2976_v8 = vpop.f32.mrb[57].mxu0  ;;  %v3888_v36 = vpop.f32.mrb[45].mxu1  ;;  %4150 = vmatmul.mubr.f32.gmra.mrb[150].mxu1 %v3235_v5  ;;  %v15873_v33 = vld [vmem:[#allocation107_spill] sm:$0xff] }
 0x34f   :  { %v3238_v15 = vmul.f32 %v2976_v8, %v15868_v25  ;;  %v15874_v25 = vld [vmem:[#allocation109_spill] sm:$0xff] }
 0x351   :  { %v2980_v14 = vpop.f32.mrb[58].mxu0  ;;  %v12968_v12 = vpop.f32.mrb[46].mxu1  ;;  %8049 = vmatprep.mubr.msk.f32.mxu1 %vm3285_vm6, %v3238_v15 }
 0x352   :  { %v3239_v44 = vmul.f32 %v2980_v14, %v15869_v52  ;;  %v2982_v61 = vpop.f32.mrb[59].mxu0  ;;  %v3893_v24 = vpop.f32.mrb[47].mxu1  ;;  %4155 = vmatmul.mubr.f32.gmra.mrb[152].mxu1 %v3237_v41 }
 0x353   :  { %v3240_v11 = vmul.f32 %v2982_v61, %v15870_v45 }
 0x355   :  { %v2986_v51 = vpop.f32.mrb[60].mxu0  ;;  %v12973_v31 = vpop.f32.mrb[48].mxu1  ;;  %8050 = vmatprep.mubr.msk.f32.mxu1 %vm3285_vm6, %v3240_v11  ;;  %v15876_v11 = vld [vmem:[#allocation113_spill] sm:$0xff] }
 0x356   :  { %v3241_v19 = vmul.f32 %v2986_v51, %v15871_v22  ;;  %v2988_v5 = vpop.f32.mrb[61].mxu0  ;;  %v3898_v1 = vpop.f32.mrb[49].mxu1  ;;  %4160 = vmatmul.mubr.f32.gmra.mrb[154].mxu1 %v3239_v44  ;;  %v15875_v44 = vld [vmem:[#allocation111_spill] sm:$0xff] }
 0x357   :  { %v3242_v42 = vmul.f32 %v2988_v5, %v15872_v38 }
 0x359   :  { %v2992_v54 = vpop.f32.mrb[62].mxu0  ;;  %v12978_v47 = vpop.f32.mrb[50].mxu1  ;;  %8051 = vmatprep.mubr.msk.f32.mxu1 %vm3285_vm6, %v3242_v42 }
 0x35a   :  { %v3243_v41 = vmul.f32 %v2992_v54, %v15873_v33  ;;  %v2994_v8 = vpop.f32.mrb[63].mxu0  ;;  %v3903_v36 = vpop.f32.mrb[51].mxu1  ;;  %4165 = vmatmul.mubr.f32.gmra.mrb[156].mxu1 %v3241_v19  ;;  %v15877_v19 = vld [vmem:[#allocation115_spill] sm:$0xff]  ;;  %v15878_v54 = vld [vmem:[#allocation117_spill] sm:$0xff] }
 0x35b   :  { %v3244_v15 = vmul.f32 %v2994_v8, %v15874_v25 }
 0x35d   :  { %v2998_v14 = vpop.f32.mrb[64].mxu0  ;;  %v12983_v52 = vpop.f32.mrb[52].mxu1  ;;  %8052 = vmatprep.mubr.msk.f32.mxu1 %vm3285_vm6, %v3244_v15 }
 0x35e   :  { %v3245_v61 = vmul.f32 %v2998_v14, %v15875_v44  ;;  %v3000_v24 = vpop.f32.mrb[65].mxu0  ;;  %v3908_v45 = vpop.f32.mrb[53].mxu1  ;;  %4170 = vmatmul.mubr.f32.gmra.mrb[158].mxu1 %v3243_v41  ;;  %v15879_v41 = vld [vmem:[#allocation119_spill] sm:$0xff]  ;;  %v15880_v44 = vld [vmem:[#allocation121_spill] sm:$0xff] }
 0x35f   :  { %v3246_v51 = vmul.f32 %v3000_v24, %v15876_v11 }
 0x361   :  { %v3004_v22 = vpop.f32.mrb[66].mxu0  ;;  %v12988_v5 = vpop.f32.mrb[54].mxu1  ;;  %8053 = vmatprep.mubr.msk.f32.mxu1 %vm3285_vm6, %v3246_v51 }
 0x362   :  { %v3247_v1 = vmul.f32 %v3004_v22, %v15877_v19  ;;  %v3006_v38 = vpop.f32.mrb[67].mxu0  ;;  %v3913_v42 = vpop.f32.mrb[55].mxu1  ;;  %4175 = vmatmul.mubr.f32.gmra.mrb[160].mxu1 %v3245_v61  ;;  %v15882_v61 = vld [vmem:[#allocation123_spill] sm:$0xff] }
 0x363   :  { %v3248_v33 = vmul.f32 %v3006_v38, %v15878_v54  ;;  %v15883_v38 = vld [vmem:[#allocation125_spill] sm:$0xff] }
 0x365   :  { %v3010_v8 = vpop.f32.mrb[68].mxu0  ;;  %v12993_v36 = vpop.f32.mrb[56].mxu1  ;;  %8054 = vmatprep.mubr.msk.f32.mxu1 %vm3285_vm6, %v3248_v33 }
 0x366   :  { %v3249_v25 = vmul.f32 %v3010_v8, %v15879_v41  ;;  %v3012_v15 = vpop.f32.mrb[69].mxu0  ;;  %v3918_v14 = vpop.f32.mrb[57].mxu1  ;;  %4180 = vmatmul.mubr.f32.gmra.mrb[162].mxu1 %v3247_v1  ;;  %v15885_v1 = vld [vmem:[#allocation127_spill] sm:$0xff] }
 0x367   :  { %v3250_v24 = vmul.f32 %v3012_v15, %v15880_v44  ;;  %v15886_v14 = vld [vmem:[#allocation129_spill] sm:$0xff] }
 0x369   :  { %v3016_v45 = vpop.f32.mrb[70].mxu0  ;;  %v12998_v11 = vpop.f32.mrb[58].mxu1  ;;  %8055 = vmatprep.mubr.msk.f32.mxu1 %vm3285_vm6, %v3250_v24 }
 0x36a   :  { %15881 = vst [vmem:[#allocation150_spill] sm:$0xff] %v12998_v11  ;;  %v3251_v51 = vmul.f32 %v3016_v45, %v15882_v61  ;;  %v3018_v22 = vpop.f32.mrb[71].mxu0  ;;  %v3923_v19 = vpop.f32.mrb[59].mxu1  ;;  %4185 = vmatmul.mubr.f32.gmra.mrb[164].mxu1 %v3249_v25  ;;  %v15888_v25 = vld [vmem:[#allocation131_spill] sm:$0xff] }
 0x36b   :  { %v3252_v42 = vmul.f32 %v3018_v22, %v15883_v38  ;;  %v15889_v19 = vld [vmem:[#allocation133_spill] sm:$0xff] }
 0x36d   :  { %v3022_v54 = vpop.f32.mrb[72].mxu0  ;;  %v13003_v33 = vpop.f32.mrb[60].mxu1  ;;  %8056 = vmatprep.mubr.msk.f32.mxu1 %vm3285_vm6, %v3252_v42 }
 0x36e   :  { %15884 = vst [vmem:[#allocation152_spill] sm:$0xff] %v13003_v33  ;;  %v3253_v8 = vmul.f32 %v3022_v54, %v15885_v1  ;;  %v3024_v41 = vpop.f32.mrb[73].mxu0  ;;  %v3928_v15 = vpop.f32.mrb[61].mxu1  ;;  %4190 = vmatmul.mubr.f32.gmra.mrb[166].mxu1 %v3251_v51  ;;  %v15890_v51 = vld [vmem:[#allocation135_spill] sm:$0xff] }
 0x36f   :  { %v3254_v44 = vmul.f32 %v3024_v41, %v15886_v14  ;;  %v15891_v15 = vld [vmem:[#allocation137_spill] sm:$0xff] }
 0x371   :  { %v3028_v24 = vpop.f32.mrb[74].mxu0  ;;  %v13008_v11 = vpop.f32.mrb[62].mxu1  ;;  %8057 = vmatprep.mubr.msk.f32.mxu1 %vm3285_vm6, %v3254_v44 }
 0x372   :  { %15887 = vst [vmem:[#allocation154_spill] sm:$0xff] %v13008_v11  ;;  %v3255_v45 = vmul.f32 %v3028_v24, %v15888_v25  ;;  %v3030_v61 = vpop.f32.mrb[75].mxu0  ;;  %v3933_v22 = vpop.f32.mrb[63].mxu1  ;;  %4195 = vmatmul.mubr.f32.gmra.mrb[168].mxu1 %v3253_v8  ;;  %v15892_v8 = vld [vmem:[#allocation139_spill] sm:$0xff] }
 0x373   :  { %v3256_v38 = vmul.f32 %v3030_v61, %v15889_v19  ;;  %v15893_v22 = vld [vmem:[#allocation141_spill] sm:$0xff] }
 0x375   :  { %v3034_v42 = vpop.f32.mrb[76].mxu0  ;;  %v13013_v33 = vpop.f32.mrb[64].mxu1  ;;  %8058 = vmatprep.mubr.msk.f32.mxu1 %vm3285_vm6, %v3256_v38 }
 0x376   :  { %v3257_v54 = vmul.f32 %v3034_v42, %v15890_v51  ;;  %v3036_v1 = vpop.f32.mrb[77].mxu0  ;;  %v3938_v41 = vpop.f32.mrb[65].mxu1  ;;  %4200 = vmatmul.mubr.f32.gmra.mrb[170].mxu1 %v3255_v45 }
 0x377   :  { %v3258_v14 = vmul.f32 %v3036_v1, %v15891_v15 }
 0x379   :  { %v3040_v44 = vpop.f32.mrb[78].mxu0  ;;  %v13018_v11 = vpop.f32.mrb[66].mxu1  ;;  %8059 = vmatprep.mubr.msk.f32.mxu1 %vm3285_vm6, %v3258_v14 }
 0x37a   :  { %v3259_v24 = vmul.f32 %v3040_v44, %v15892_v8  ;;  %v3042_v25 = vpop.f32.mrb[79].mxu0  ;;  %v3943_v61 = vpop.f32.mrb[67].mxu1  ;;  %4205 = vmatmul.mubr.f32.gmra.mrb[172].mxu1 %v3257_v54 }
 0x37b   :  { %v3260_v19 = vmul.f32 %v3042_v25, %v15893_v22 }
 0x37d   :  { %v13023_v38 = vpop.f32.mrb[68].mxu1  ;;  %8060 = vmatprep.mubr.msk.f32.mxu1 %vm3285_vm6, %v3260_v19 }
 0x37e   :  { %v3948_v42 = vpop.f32.mrb[69].mxu1  ;;  %4210 = vmatmul.mubr.f32.gmra.mrb[174].mxu1 %v3259_v24 }
 0x381   :  { %v13026_v45 = vpop.f32.mrb[70].mxu1 }
 0x382   :  { %v3953_v51 = vpop.f32.mrb[71].mxu1 }
 0x385   :  { %v13028_v1 = vpop.f32.mrb[72].mxu1 }
 0x386   :  { %15894 = vst [vmem:[#allocation157_spill] sm:$0xff] %v13028_v1  ;;  %v3958_v41 = vpop.f32.mrb[73].mxu1 }
 0x389   :  { %v13030_v15 = vpop.f32.mrb[74].mxu1 }
 0x38a   :  { %15895 = vst [vmem:[#allocation159_spill] sm:$0xff] %v13030_v15  ;;  %v3963_v14 = vpop.f32.mrb[75].mxu1 }
 0x38d   :  { %v13032_v44 = vpop.f32.mrb[76].mxu1 }
 0x38e   :  { %15896 = vst [vmem:[#allocation161_spill] sm:$0xff] %v13032_v44  ;;  %v3968_v54 = vpop.f32.mrb[77].mxu1 }
 0x391   :  { %v13034_v8 = vpop.f32.mrb[78].mxu1 }
 0x392   :  { %15897 = vst [vmem:[#allocation163_spill] sm:$0xff] %v13034_v8  ;;  %v3973_v25 = vpop.f32.mrb[79].mxu1 }
 0x395   :  { %v13036_v61 = vpop.f32.mrb[80].mxu1 }
 0x396   :  { %15898 = vst [vmem:[#allocation165_spill] sm:$0xff] %v13036_v61  ;;  %v3978_v22 = vpop.f32.mrb[81].mxu1 }
 0x399   :  { %v13038_v19 = vpop.f32.mrb[82].mxu1 }
 0x39a   :  { %15899 = vst [vmem:[#allocation167_spill] sm:$0xff] %v13038_v19  ;;  %v3983_v24 = vpop.f32.mrb[83].mxu1 }
 0x39d   :  { %v13040_v42 = vpop.f32.mrb[84].mxu1 }
 0x39e   :  { %15900 = vst [vmem:[#allocation169_spill] sm:$0xff] %v13040_v42  ;;  %v3988_v51 = vpop.f32.mrb[85].mxu1 }
 0x3a1   :  { %v13042_v1 = vpop.f32.mrb[86].mxu1 }
 0x3a2   :  { %15901 = vst [vmem:[#allocation171_spill] sm:$0xff] %v13042_v1  ;;  %v3993_v41 = vpop.f32.mrb[87].mxu1 }
 0x3a5   :  { %v13044_v15 = vpop.f32.mrb[88].mxu1 }
 0x3a6   :  { %15902 = vst [vmem:[#allocation173_spill] sm:$0xff] %v13044_v15  ;;  %v3998_v14 = vpop.f32.mrb[89].mxu1 }
 0x3a9   :  { %v13046_v44 = vpop.f32.mrb[90].mxu1 }
 0x3aa   :  { %15903 = vst [vmem:[#allocation175_spill] sm:$0xff] %v13046_v44  ;;  %v4003_v54 = vpop.f32.mrb[91].mxu1 }
 0x3ad   :  { %v13048_v8 = vpop.f32.mrb[92].mxu1 }
 0x3ae   :  { %15904 = vst [vmem:[#allocation176_spill] sm:$0xff] %v13048_v8  ;;  %v4008_v25 = vpop.f32.mrb[93].mxu1 }
 0x3b1   :  { %v13050_v61 = vpop.f32.mrb[94].mxu1 }
 0x3b2   :  { %15905 = vst [vmem:[#allocation177_spill] sm:$0xff] %v13050_v61  ;;  %v4013_v22 = vpop.f32.mrb[95].mxu1 }
 0x3b5   :  { %v13052_v19 = vpop.f32.mrb[96].mxu1 }
 0x3b6   :  { %15906 = vst [vmem:[#allocation178_spill] sm:$0xff] %v13052_v19  ;;  %v4018_v24 = vpop.f32.mrb[97].mxu1 }
 0x3b9   :  { %v13054_v42 = vpop.f32.mrb[98].mxu1 }
 0x3ba   :  { %15907 = vst [vmem:[#allocation179_spill] sm:$0xff] %v13054_v42  ;;  %v4023_v51 = vpop.f32.mrb[99].mxu1 }
 0x3bd   :  { %v13056_v1 = vpop.f32.mrb[100].mxu1 }
 0x3be   :  { %15908 = vst [vmem:[#allocation46_spill] sm:$0xff] %v13056_v1  ;;  %v4028_v41 = vpop.f32.mrb[101].mxu1 }
 0x3c1   :  { %v13058_v15 = vpop.f32.mrb[102].mxu1 }
 0x3c2   :  { %15909 = vst [vmem:[#allocation48_spill] sm:$0xff] %v13058_v15  ;;  %v4033_v14 = vpop.f32.mrb[103].mxu1 }
 0x3c5   :  { %v13060_v44 = vpop.f32.mrb[104].mxu1 }
 0x3c6   :  { %15910 = vst [vmem:[#allocation180_spill] sm:$0xff] %v13060_v44  ;;  %v4038_v54 = vpop.f32.mrb[105].mxu1 }
 0x3c9   :  { %v13062_v8 = vpop.f32.mrb[106].mxu1 }
 0x3ca   :  { %15911 = vst [vmem:[#allocation50_spill] sm:$0xff] %v13062_v8  ;;  %v4043_v25 = vpop.f32.mrb[107].mxu1 }
 0x3cd   :  { %v13064_v61 = vpop.f32.mrb[108].mxu1 }
 0x3ce   :  { %15912 = vst [vmem:[#allocation52_spill] sm:$0xff] %v13064_v61  ;;  %v4048_v22 = vpop.f32.mrb[109].mxu1 }
 0x3d1   :  { %v13066_v19 = vpop.f32.mrb[110].mxu1 }
 0x3d2   :  { %15913 = vst [vmem:[#allocation54_spill] sm:$0xff] %v13066_v19  ;;  %v4053_v24 = vpop.f32.mrb[111].mxu1 }
 0x3d5   :  { %v13068_v42 = vpop.f32.mrb[112].mxu1 }
 0x3d6   :  { %15914 = vst [vmem:[#allocation181_spill] sm:$0xff] %v13068_v42  ;;  %v4058_v51 = vpop.f32.mrb[113].mxu1 }
 0x3d9   :  { %v13070_v1 = vpop.f32.mrb[114].mxu1 }
 0x3da   :  { %15915 = vst [vmem:[#allocation59_spill] sm:$0xff] %v13070_v1  ;;  %v4063_v41 = vpop.f32.mrb[115].mxu1 }
 0x3dd   :  { %v13072_v15 = vpop.f32.mrb[116].mxu1 }
 0x3de   :  { %15916 = vst [vmem:[#allocation61_spill] sm:$0xff] %v13072_v15  ;;  %v4068_v14 = vpop.f32.mrb[117].mxu1 }
 0x3e1   :  { %v13074_v44 = vpop.f32.mrb[118].mxu1 }
 0x3e2   :  { %15917 = vst [vmem:[#allocation182_spill] sm:$0xff] %v13074_v44  ;;  %v4073_v54 = vpop.f32.mrb[119].mxu1 }
 0x3e5   :  { %v13076_v8 = vpop.f32.mrb[120].mxu1 }
 0x3e6   :  { %v4078_v25 = vpop.f32.mrb[121].mxu1 }
 0x3e7   :  { %v13091_v25 = vmul.f32 0.25, %v12773_v46  ;;  %v13111_v46 = vmul.f32 0.25, %v12788_v32 }
 0x3e9   :  { %v13078_v61 = vpop.f32.mrb[122].mxu1  ;;  %15924 = vst [vmem:[#allocation75_spill] sm:$0xff] %v13091_v25  ;;  %15934 = vst [vmem:[#allocation89_spill] sm:$0xff] %v13111_v46 }
 0x3ea   :  { %15918 = vst [vmem:[#allocation63_spill] sm:$0xff] %v13078_v61  ;;  %v4083_v22 = vpop.f32.mrb[123].mxu1  ;;  %v15930_v61 = vld [vmem:[#allocation147_spill] sm:$0xff] }
 0x3eb   :  { %v13094_v22 = vmul.f32 0.25, %v12778_v59  ;;  %v13114_v59 = vmul.f32 0.25, %v12793_v50 }
 0x3ed   :  { %v13080_v19 = vpop.f32.mrb[124].mxu1  ;;  %15925 = vst [vmem:[#allocation77_spill] sm:$0xff] %v13094_v22  ;;  %15935 = vst [vmem:[#allocation91_spill] sm:$0xff] %v13114_v59 }
 0x3ee   :  { %15919 = vst [vmem:[#allocation65_spill] sm:$0xff] %v13080_v19  ;;  %v4088_v24 = vpop.f32.mrb[125].mxu1  ;;  %v15926_v19 = vld [vmem:[#allocation143_spill] sm:$0xff] }
 0x3ef   :  { %v13097_v24 = vmul.f32 0.25, %v15926_v19 }
 0x3f1   :  { %v13082_v42 = vpop.f32.mrb[126].mxu1  ;;  %15927 = vst [vmem:[#allocation79_spill] sm:$0xff] %v13097_v24  ;;  %v4324_v32 = vsel %vm4323_vm7, %v13097_v24, -inf  ;;  %v13147_v24 = vmul.f32 0.25, %v12813_v13  ;;  %v13162_v13 = vmul.f32 0.25, %v12828_v60  ;;  %v13177_v60 = vmul.f32 0.25, %v12843_v39 }
 0x3f2   :  { %15920 = vst [vmem:[#allocation67_spill] sm:$0xff] %v13082_v42  ;;  %v4093_v51 = vpop.f32.mrb[127].mxu1  ;;  %v15928_v42 = vld [vmem:[#allocation145_spill] sm:$0xff]  ;;  %v13192_v39 = vmul.f32 0.25, %v12858_v53  ;;  %v13209_v53 = vmul.f32 0.25, %v12873_v37 }
 0x3f3   :  { %v13100_v51 = vmul.f32 0.25, %v15928_v42  ;;  %v13124_v42 = vmul.f32 0.25, %v12798_v16  ;;  %v4334_v16 = vsel %vm4323_vm7, %v13111_v46, -inf  ;;  %15938 = vst [vmem:[#allocation97_spill] sm:$0xff] %v13147_v24  ;;  %15941 = vst [vmem:[#allocation103_spill] sm:$0xff] %v13162_v13 }
 0x3f5   :  { %v13084_v1 = vpop.f32.mrb[128].mxu1  ;;  %15929 = vst [vmem:[#allocation81_spill] sm:$0xff] %v13100_v51  ;;  %v4325_v50 = vsel %vm4323_vm7, %v13100_v51, -inf  ;;  %v4338_v46 = vsel %vm4323_vm7, %v13124_v42, -inf }
 0x3f6   :  { %15921 = vst [vmem:[#allocation69_spill] sm:$0xff] %v13084_v1  ;;  %v4098_v41 = vpop.f32.mrb[129].mxu1 }
 0x3f7   :  { %v13103_v41 = vmul.f32 0.25, %v15930_v61  ;;  %v4328_v61 = vsel %vm4323_vm7, %v13091_v25, -inf }
 0x3f9   :  { %v13086_v15 = vpop.f32.mrb[130].mxu1  ;;  %15931 = vst [vmem:[#allocation83_spill] sm:$0xff] %v13103_v41 }
 0x3fa   :  { %15922 = vst [vmem:[#allocation71_spill] sm:$0xff] %v13086_v15  ;;  %v4103_v14 = vpop.f32.mrb[131].mxu1  ;;  %v4329_v15 = vmax.f32 %v4324_v32, %v4328_v61  ;;  %v13165_v61 = vmul.f32 0.25, %v12833_v20  ;;  %v4344_v32 = vsel %vm4323_vm7, %v13147_v24, -inf  ;;  %v13245_v24 = vmul.f32 0.25, %v12903_v40 }
 0x3fb   :  { %v13106_v14 = vmul.f32 0.25, %v12783_v2  ;;  %v4330_v2 = vsel %vm4323_vm7, %v13094_v22, -inf  ;;  %v13144_v22 = vmul.f32 0.25, %v12808_v6  ;;  %v13159_v6 = vmul.f32 0.25, %v12823_v9 }
 0x3fc   :  { %v13174_v9 = vmul.f32 0.25, %v12838_v29  ;;  %v13189_v29 = vmul.f32 0.25, %v12853_v43  ;;  %v4356_v43 = vsel %vm4323_vm7, %v13177_v60, -inf  ;;  %v13260_v40 = vmul.f32 0.25, %v12918_v10 }
 0x3fd   :  { %v13088_v44 = vpop.f32.mrb[132].mxu1  ;;  %15932 = vst [vmem:[#allocation85_spill] sm:$0xff] %v13106_v14  ;;  %15940 = vst [vmem:[#allocation101_spill] sm:$0xff] %v13159_v6  ;;  %v13275_v10 = vmul.f32 0.25, %v12933_v58 }
 0x3fe   :  { %15923 = vst [vmem:[#allocation73_spill] sm:$0xff] %v13088_v44  ;;  %v4108_v54 = vpop.f32.mrb[133].mxu1  ;;  %15942 = vst [vmem:[#allocation105_spill] sm:$0xff] %v13260_v40 }
 0x3ff   :  { %v13117_v54 = vmul.f32 0.25, %v12768_v17  ;;  %v4326_v17 = vsel %vm4323_vm7, %v13103_v41, -inf  ;;  %15945 = vst [vmem:[#allocation111_spill] sm:$0xff] %v13275_v10 }
 0x401   :  { %v13108_v44 = vpop.f32.mrb[134].mxu1  ;;  %15936 = vst [vmem:[#allocation93_spill] sm:$0xff] %v13117_v54  ;;  %v4327_v41 = vsel %vm4323_vm7, %v13117_v54, -inf }
 0x402   :  { %15933 = vst [vmem:[#allocation87_spill] sm:$0xff] %v13108_v44  ;;  %v4113_v19 = vpop.f32.mrb[135].mxu1  ;;  %v13127_v44 = vmul.f32 0.25, %v12803_v3  ;;  %v4336_v3 = vsel %vm4323_vm7, %v13114_v59, -inf  ;;  %v4335_v1 = vmax.f32 %v4327_v41, %v4334_v16  ;;  %v4350_v16 = vsel %vm4323_vm7, %v13162_v13, -inf }
 0x403   :  { %v4332_v19 = vsel %vm4323_vm7, %v13106_v14, -inf  ;;  %v4331_v14 = vmax.f32 %v4325_v50, %v4330_v2  ;;  %v4337_v54 = vmax.f32 %v4329_v15, %v4336_v3  ;;  %v4342_v2 = vsel %vm4323_vm7, %v13144_v22, -inf }
 0x404   :  { %v4340_v59 = vsel %vm4323_vm7, %v13127_v44, -inf  ;;  %v4360_v13 = vsel %vm4323_vm7, %v13189_v29, -inf }
 0x405   :  { %v13137_v25 = vpop.f32.mrb[136].mxu1  ;;  %v4339_v41 = vmax.f32 %v4331_v14, %v4338_v46  ;;  %v4343_v14 = vmax.f32 %v4335_v1, %v4342_v2  ;;  %v4345_v46 = vmax.f32 %v4337_v54, %v4344_v32 }
 0x406   :  { %15937 = vst [vmem:[#allocation95_spill] sm:$0xff] %v13137_v25  ;;  %v4118_v51 = vpop.f32.mrb[137].mxu1  ;;  %v13152_v25 = vmul.f32 0.25, %v12818_v63 }
 0x407   :  { %v4333_v51 = vmax.f32 %v4326_v17, %v4332_v19  ;;  %v13182_v17 = vmul.f32 0.25, %v12848_v56  ;;  %v4348_v19 = vsel %vm4323_vm7, %v13159_v6, -inf  ;;  %v13197_v56 = vmul.f32 0.25, %v12863_v57 }
 0x408   :  { %15939 = vst [vmem:[#allocation99_spill] sm:$0xff] %v13152_v25  ;;  %v4346_v20 = vsel %vm4323_vm7, %v13152_v25, -inf  ;;  %v4351_v32 = vmax.f32 %v4343_v14, %v4350_v16  ;;  %v4362_v6 = vsel %vm4323_vm7, %v13192_v39, -inf  ;;  %v13218_v25 = vmul.f32 0.25, %v12878_v30 }
 0x409   :  { %v13167_v63 = vpop.f32.mrb[138].mxu1  ;;  %v4341_v15 = vmax.f32 %v4333_v51, %v4340_v59  ;;  %v4352_v59 = vsel %vm4323_vm7, %v13165_v61, -inf  ;;  %v4354_v51 = vsel %vm4323_vm7, %v13174_v9, -inf  ;;  %v4347_v54 = vmax.f32 %v4339_v41, %v4346_v20 }
 0x40a   :  { %v4123_v50 = vpop.f32.mrb[139].mxu1  ;;  %v4358_v57 = vsel %vm4323_vm7, %v13182_v17, -inf  ;;  %v4353_v37 = vmax.f32 %v4345_v46, %v4352_v59  ;;  %v4368_v16 = vsel %vm4323_vm7, %v13209_v53, -inf  ;;  %v13232_v30 = vmul.f32 0.25, %v12888_v21 }
 0x40b   :  { %v13206_v50 = vmul.f32 0.25, %v12868_v0  ;;  %v4349_v2 = vmax.f32 %v4341_v15, %v4348_v19  ;;  %v13221_v0 = vmul.f32 0.25, %v12883_v55  ;;  %v4364_v15 = vsel %vm4323_vm7, %v13197_v56, -inf }
 0x40c   :  { %v13235_v55 = vmul.f32 0.25, %v12893_v28  ;;  %v4359_v46 = vmax.f32 %v4351_v32, %v4358_v57  ;;  %v4361_v59 = vmax.f32 %v4353_v37, %v4360_v13  ;;  %v13248_v21 = vmul.f32 0.25, %v12908_v23 }
 0x40d   :  { %v13199_v3 = vpop.f32.mrb[140].mxu1  ;;  %v4357_v41 = vmax.f32 %v4349_v2, %v4356_v43  ;;  %v4366_v19 = vsel %vm4323_vm7, %v13206_v50, -inf  ;;  %v13238_v43 = vmul.f32 0.25, %v12898_v4  ;;  %v4372_v2 = vsel %vm4323_vm7, %v13221_v0, -inf }
 0x40e   :  { %v4128_v1 = vpop.f32.mrb[141].mxu1  ;;  %v4369_v32 = vmax.f32 %v4361_v59, %v4368_v16  ;;  %v4374_v13 = vsel %vm4323_vm7, %v13232_v30, -inf  ;;  %v4376_v57 = vsel %vm4323_vm7, %v13235_v55, -inf  ;;  %v13263_v23 = vmul.f32 0.25, %v12923_v48 }
 0x40f   :  { %v4355_v1 = vmax.f32 %v4347_v54, %v4354_v51  ;;  %v4370_v54 = vsel %vm4323_vm7, %v13218_v25, -inf  ;;  %v4365_v28 = vmax.f32 %v4357_v41, %v4364_v15  ;;  %v13268_v15 = vmul.f32 0.25, %v12928_v18 }
 0x410   :  { %15943 = vst [vmem:[#allocation107_spill] sm:$0xff] %v13263_v23  ;;  %v4382_v16 = vsel %vm4323_vm7, %v13248_v21, -inf  ;;  %v13278_v48 = vmul.f32 0.25, %v12938_v49  ;;  %v4377_v59 = vmax.f32 %v4369_v32, %v4376_v57  ;;  %v13283_v18 = vmul.f32 0.25, %v12943_v27 }
 0x411   :  { %v13225_v20 = vpop.f32.mrb[142].mxu1  ;;  %v4363_v51 = vmax.f32 %v4355_v1, %v4362_v6  ;;  %v13251_v6 = vmul.f32 0.25, %v12913_v35  ;;  %v4373_v41 = vmax.f32 %v4365_v28, %v4372_v2  ;;  %v4378_v35 = vsel %vm4323_vm7, %v13238_v43, -inf  ;;  %15944 = vst [vmem:[#allocation109_spill] sm:$0xff] %v13268_v15 }
 0x412   :  { %v4133_v14 = vpop.f32.mrb[143].mxu1  ;;  %15946 = vst [vmem:[#allocation113_spill] sm:$0xff] %v13278_v48  ;;  %15947 = vst [vmem:[#allocation115_spill] sm:$0xff] %v13283_v18  ;;  %v4386_v2 = vsel %vm4323_vm7, %v13260_v40, -inf  ;;  %v4388_v58 = vsel %vm4323_vm7, %v13263_v23, -inf  ;;  %v13292_v28 = vmul.f32 0.25, %v12948_v7 }
 0x413   :  { %v4367_v14 = vmax.f32 %v4359_v46, %v4366_v19  ;;  %v4371_v1 = vmax.f32 %v4363_v51, %v4370_v54  ;;  %v4380_v19 = vsel %vm4323_vm7, %v13245_v24, -inf  ;;  %v4384_v51 = vsel %vm4323_vm7, %v13251_v6, -inf }
 0x414   :  { %15948 = vst [vmem:[#allocation117_spill] sm:$0xff] %v13292_v28  ;;  %v13295_v49 = vmul.f32 0.25, %v12953_v26  ;;  %v4390_v27 = vsel %vm4323_vm7, %v13268_v15, -inf  ;;  %v4394_v40 = vsel %vm4323_vm7, %v13278_v48, -inf  ;;  %v13304_v23 = vmul.f32 0.25, %v12958_v34 }
 0x415   :  { %v13253_v4 = vpop.f32.mrb[144].mxu1  ;;  %v4375_v46 = vmax.f32 %v4367_v14, %v4374_v13  ;;  %v4379_v32 = vmax.f32 %v4371_v1, %v4378_v35  ;;  %v4381_v13 = vmax.f32 %v4373_v41, %v4380_v19  ;;  %v13307_v7 = vmul.f32 0.25, %v12963_v62 }
 0x416   :  { %v4138_v37 = vpop.f32.mrb[145].mxu1  ;;  %15949 = vst [vmem:[#allocation119_spill] sm:$0xff] %v13295_v49  ;;  %15950 = vst [vmem:[#allocation121_spill] sm:$0xff] %v13304_v23  ;;  %v4385_v26 = vmax.f32 %v4377_v59, %v4384_v51  ;;  %v4396_v41 = vsel %vm4323_vm7, %v13283_v18, -inf  ;;  %v4398_v19 = vsel %vm4323_vm7, %v13292_v28, -inf  ;;  %v13318_v34 = vmul.f32 0.25, %v12968_v12 }
 0x417   :  { %v4383_v57 = vmax.f32 %v4375_v46, %v4382_v16  ;;  %v4392_v37 = vsel %vm4323_vm7, %v13275_v10, -inf  ;;  %15951 = vst [vmem:[#allocation123_spill] sm:$0xff] %v13307_v7  ;;  %v4389_v1 = vmax.f32 %v4381_v13, %v4388_v58  ;;  %v4400_v16 = vsel %vm4323_vm7, %v13295_v49, -inf  ;;  %v15972_v18 = vld [vmem:[#allocation165_spill] sm:$0xff] }
 0x418   :  { %15952 = vst [vmem:[#allocation125_spill] sm:$0xff] %v13318_v34  ;;  %v13321_v62 = vmul.f32 0.25, %v12973_v31  ;;  %v4393_v51 = vmax.f32 %v4385_v26, %v4392_v37  ;;  %v13324_v58 = vmul.f32 0.25, %v12978_v47  ;;  %v4404_v13 = vsel %vm4323_vm7, %v13307_v7, -inf  ;;  %v15957_v26 = vld [vmem:[#allocation150_spill] sm:$0xff]  ;;  %v15966_v7 = vld [vmem:[#allocation159_spill] sm:$0xff] }
 0x419   :  { %v13285_v54 = vpop.f32.mrb[146].mxu1  ;;  %v4391_v59 = vmax.f32 %v4383_v57, %v4390_v27  ;;  %v13331_v49 = vmul.f32 0.25, %v12983_v52  ;;  %v13334_v12 = vmul.f32 0.25, %v12988_v5  ;;  %v4406_v27 = vsel %vm4323_vm7, %v13318_v34, -inf }
 0x41a   :  { %v4143_v14 = vpop.f32.mrb[147].mxu1  ;;  %15953 = vst [vmem:[#allocation127_spill] sm:$0xff] %v13321_v62  ;;  %15954 = vst [vmem:[#allocation129_spill] sm:$0xff] %v13324_v58  ;;  %v4401_v31 = vmax.f32 %v4393_v51, %v4400_v16  ;;  %v4408_v37 = vsel %vm4323_vm7, %v13321_v62, -inf  ;;  %v13346_v52 = vmul.f32 0.25, %v15957_v26  ;;  %v13361_v26 = vmul.f32 0.25, %v13013_v33 }
 0x41b   :  { %v4387_v14 = vmax.f32 %v4379_v32, %v4386_v2  ;;  %v4402_v32 = vsel %vm4323_vm7, %v13304_v23, -inf  ;;  %15955 = vst [vmem:[#allocation131_spill] sm:$0xff] %v13331_v49  ;;  %15956 = vst [vmem:[#allocation133_spill] sm:$0xff] %v13334_v12  ;;  %v4399_v57 = vmax.f32 %v4391_v59, %v4398_v19  ;;  %v15959_v19 = vld [vmem:[#allocation154_spill] sm:$0xff]  ;;  %v4412_v51 = vsel %vm4323_vm7, %v13331_v49, -inf }
 0x41c   :  { %v13354_v59 = vmul.f32 0.25, %v15959_v19  ;;  %v4414_v62 = vsel %vm4323_vm7, %v13334_v12, -inf  ;;  %15960 = vst [vmem:[#allocation135_spill] sm:$0xff] %v13361_v26  ;;  %v4418_v19 = vsel %vm4323_vm7, %v13346_v52, -inf  ;;  %v13378_v12 = vmul.f32 0.25, %v13026_v45  ;;  %v15968_v45 = vld [vmem:[#allocation161_spill] sm:$0xff] }
 0x41d   :  { %v13311_v35 = vpop.f32.mrb[148].mxu1  ;;  %v4395_v2 = vmax.f32 %v4387_v14, %v4394_v40  ;;  %v13337_v40 = vmul.f32 0.25, %v12993_v36  ;;  %v15958_v14 = vld [vmem:[#allocation152_spill] sm:$0xff]  ;;  %v4410_v36 = vsel %vm4323_vm7, %v13324_v58, -inf  ;;  %v4424_v58 = vsel %vm4323_vm7, %v13361_v26, -inf }
 0x41e   :  { %v4148_v46 = vpop.f32.mrb[149].mxu1  ;;  %v13349_v5 = vmul.f32 0.25, %v15958_v14  ;;  %v13364_v14 = vmul.f32 0.25, %v13018_v11  ;;  %15963 = vst [vmem:[#allocation141_spill] sm:$0xff] %v13378_v12  ;;  %v15964_v11 = vld [vmem:[#allocation157_spill] sm:$0xff]  ;;  %v13390_v23 = vmul.f32 0.25, %v15966_v7 }
 0x41f   :  { %v4397_v46 = vmax.f32 %v4389_v1, %v4396_v41  ;;  %v4403_v1 = vmax.f32 %v4395_v2, %v4402_v32  ;;  %v4407_v2 = vmax.f32 %v4399_v57, %v4406_v27  ;;  %v4409_v32 = vmax.f32 %v4401_v31, %v4408_v37 }
 0x420   :  { %15961 = vst [vmem:[#allocation137_spill] sm:$0xff] %v13364_v14  ;;  %v4420_v33 = vsel %vm4323_vm7, %v13349_v5, -inf  ;;  %v13381_v57 = vmul.f32 0.25, %v15964_v11  ;;  %v4426_v34 = vsel %vm4323_vm7, %v13364_v14, -inf  ;;  %15967 = vst [vmem:[#allocation145_spill] sm:$0xff] %v13390_v23  ;;  %v13393_v28 = vmul.f32 0.25, %v15968_v45 }
 0x421   :  { %v13339_v47 = vpop.f32.mrb[150].mxu1  ;;  %v4405_v41 = vmax.f32 %v4397_v46, %v4404_v13  ;;  %v4416_v13 = vsel %vm4323_vm7, %v13337_v40, -inf  ;;  %v13369_v46 = vmul.f32 0.25, %v13023_v38  ;;  %v4411_v27 = vmax.f32 %v4403_v1, %v4410_v36 }
 0x422   :  { %v4153_v16 = vpop.f32.mrb[151].mxu1  ;;  %15965 = vst [vmem:[#allocation143_spill] sm:$0xff] %v13381_v57  ;;  %v4415_v49 = vmax.f32 %v4407_v2, %v4414_v62  ;;  %v4422_v38 = vsel %vm4323_vm7, %v13354_v59, -inf  ;;  %15969 = vst [vmem:[#allocation147_spill] sm:$0xff] %v13393_v28  ;;  %v4417_v11 = vmax.f32 %v4409_v32, %v4416_v13  ;;  %v4430_v36 = vsel %vm4323_vm7, %v13378_v12, -inf  ;;  %v15970_v2 = vld [vmem:[#allocation163_spill] sm:$0xff] }
 0x423   :  { %15962 = vst [vmem:[#allocation139_spill] sm:$0xff] %v13369_v46  ;;  %v4413_v37 = vmax.f32 %v4405_v41, %v4412_v51  ;;  %v4428_v62 = vsel %vm4323_vm7, %v13369_v46, -inf  ;;  %v4432_v51 = vsel %vm4323_vm7, %v13381_v57, -inf  ;;  %v13404_v7 = vmul.f32 0.25, %v15970_v2  ;;  %v15976_v57 = vld [vmem:[#allocation169_spill] sm:$0xff]  ;;  %v15978_v2 = vld [vmem:[#allocation171_spill] sm:$0xff] }
 0x424   :  { %v13407_v45 = vmul.f32 0.25, %v15972_v18  ;;  %v4423_v13 = vmax.f32 %v4415_v49, %v4422_v38  ;;  %v4434_v46 = vsel %vm4323_vm7, %v13390_v23, -inf  ;;  %v4436_v12 = vsel %vm4323_vm7, %v13393_v28, -inf  ;;  %v15984_v28 = vld [vmem:[#allocation176_spill] sm:$0xff] }
 0x425   :  { %v13371_v16 = vpop.f32.mrb[152].mxu1  ;;  %v4421_v1 = vmax.f32 %v4413_v37, %v4420_v33  ;;  %15971 = vst [vmem:[#allocation150_spill] sm:$0xff] %v13404_v7  ;;  %v13417_v48 = vmul.f32 0.25, %v15976_v57  ;;  %v13420_v10 = vmul.f32 0.25, %v15978_v2  ;;  %v13435_v2 = vmul.f32 0.25, %v15984_v28  ;;  %v15990_v28 = vld [vmem:[#allocation179_spill] sm:$0xff] }
 0x426   :  { %v4158_v31 = vpop.f32.mrb[153].mxu1  ;;  %15973 = vst [vmem:[#allocation152_spill] sm:$0xff] %v13407_v45  ;;  %v13450_v23 = vmul.f32 0.25, %v15990_v28  ;;  %v15996_v28 = vld [vmem:[#allocation180_spill] sm:$0xff] }
 0x427   :  { %v4419_v31 = vmax.f32 %v4411_v27, %v4418_v19  ;;  %v4425_v19 = vmax.f32 %v4417_v11, %v4424_v58  ;;  %v15974_v27 = vld [vmem:[#allocation167_spill] sm:$0xff]  ;;  %15977 = vst [vmem:[#allocation157_spill] sm:$0xff] %v13417_v48  ;;  %15979 = vst [vmem:[#allocation159_spill] sm:$0xff] %v13420_v10  ;;  %v4429_v18 = vmax.f32 %v4421_v1, %v4428_v62  ;;  %v15980_v58 = vld [vmem:[#allocation173_spill] sm:$0xff]  ;;  %v4438_v11 = vsel %vm4323_vm7, %v13404_v7, -inf }
 0x428   :  { %v13410_v37 = vmul.f32 0.25, %v15974_v27  ;;  %v15982_v27 = vld [vmem:[#allocation175_spill] sm:$0xff]  ;;  %15985 = vst [vmem:[#allocation165_spill] sm:$0xff] %v13435_v2  ;;  %15991 = vst [vmem:[#allocation171_spill] sm:$0xff] %v13450_v23 }
 0x429   :  { %v13397_v41 = vpop.f32.mrb[154].mxu1  ;;  %v4427_v33 = vmax.f32 %v4419_v31, %v4426_v34  ;;  %v4433_v49 = vmax.f32 %v4425_v19, %v4432_v51  ;;  %v13423_v34 = vmul.f32 0.25, %v15980_v58  ;;  %v4440_v31 = vsel %vm4323_vm7, %v13407_v45, -inf }
 0x42a   :  { %v4163_v32 = vpop.f32.mrb[155].mxu1  ;;  %15975 = vst [vmem:[#allocation154_spill] sm:$0xff] %v13410_v37  ;;  %v13432_v57 = vmul.f32 0.25, %v15982_v27  ;;  %v4442_v51 = vsel %vm4323_vm7, %v13410_v37, -inf  ;;  %v4444_v58 = vsel %vm4323_vm7, %v13417_v48, -inf  ;;  %v4446_v45 = vsel %vm4323_vm7, %v13420_v10, -inf }
 0x42b   :  { %v4431_v32 = vmax.f32 %v4423_v13, %v4430_v36  ;;  %15981 = vst [vmem:[#allocation161_spill] sm:$0xff] %v13423_v34  ;;  %v4435_v62 = vmax.f32 %v4427_v33, %v4434_v46  ;;  %v4437_v36 = vmax.f32 %v4429_v18, %v4436_v12  ;;  %v15986_v13 = vld [vmem:[#allocation177_spill] sm:$0xff]  ;;  %v15988_v27 = vld [vmem:[#allocation178_spill] sm:$0xff]  ;;  %v4441_v12 = vmax.f32 %v4433_v49, %v4440_v31  ;;  %v15994_v10 = vld [vmem:[#allocation48_spill] sm:$0xff] }
 0x42c   :  { %15983 = vst [vmem:[#allocation163_spill] sm:$0xff] %v13432_v57  ;;  %v13440_v19 = vmul.f32 0.25, %v15986_v13  ;;  %v13447_v7 = vmul.f32 0.25, %v15988_v27  ;;  %v4448_v33 = vsel %vm4323_vm7, %v13423_v34, -inf  ;;  %v15992_v18 = vld [vmem:[#allocation46_spill] sm:$0xff]  ;;  %v4450_v48 = vsel %vm4323_vm7, %v13432_v57, -inf }
 0x42d   :  { %v13425_v38 = vpop.f32.mrb[156].mxu1  ;;  %v4439_v46 = vmax.f32 %v4431_v32, %v4438_v11  ;;  %v4452_v27 = vsel %vm4323_vm7, %v13435_v2, -inf  ;;  %v13464_v37 = vmul.f32 0.25, %v15994_v10  ;;  %v13467_v32 = vmul.f32 0.25, %v15996_v28  ;;  %v15998_v2 = vld [vmem:[#allocation50_spill] sm:$0xff]  ;;  %v16000_v10 = vld [vmem:[#allocation181_spill] sm:$0xff] }
 0x42e   :  { %v4168_v1 = vpop.f32.mrb[157].mxu1  ;;  %15987 = vst [vmem:[#allocation167_spill] sm:$0xff] %v13440_v19  ;;  %15989 = vst [vmem:[#allocation169_spill] sm:$0xff] %v13447_v7  ;;  %v4443_v11 = vmax.f32 %v4435_v62, %v4442_v51  ;;  %v4445_v31 = vmax.f32 %v4437_v36, %v4444_v58  ;;  %v4456_v14 = vsel %vm4323_vm7, %v13447_v7, -inf  ;;  %v4458_v57 = vsel %vm4323_vm7, %v13450_v23, -inf }
 0x42f   :  { %v13455_v1 = vmul.f32 0.25, %v15992_v18  ;;  %15995 = vst [vmem:[#allocation175_spill] sm:$0xff] %v13464_v37  ;;  %15997 = vst [vmem:[#allocation176_spill] sm:$0xff] %v13467_v32  ;;  %v4447_v34 = vmax.f32 %v4439_v46, %v4446_v45  ;;  %v4454_v18 = vsel %vm4323_vm7, %v13440_v19, -inf  ;;  %v13476_v26 = vmul.f32 0.25, %v15998_v2  ;;  %v16002_v46 = vld [vmem:[#allocation52_spill] sm:$0xff] }
 0x430   :  { %v13479_v15 = vmul.f32 0.25, %v16000_v10  ;;  %v4449_v28 = vmax.f32 %v4441_v12, %v4448_v33  ;;  %v4453_v62 = vmax.f32 %v4445_v31, %v4452_v27  ;;  %v4462_v51 = vsel %vm4323_vm7, %v13464_v37, -inf  ;;  %v16004_v27 = vld [vmem:[#allocation54_spill] sm:$0xff] }
 0x431   :  { %15993 = vst [vmem:[#allocation173_spill] sm:$0xff] %v13455_v1  ;;  %v13457_v13 = vpop.f32.mrb[158].mxu1  ;;  %15999 = vst [vmem:[#allocation177_spill] sm:$0xff] %v13476_v26  ;;  %v4460_v45 = vsel %vm4323_vm7, %v13455_v1, -inf  ;;  %v4464_v58 = vsel %vm4323_vm7, %v13467_v32, -inf  ;;  %v13488_v23 = vmul.f32 0.25, %v16002_v46  ;;  %v4455_v12 = vmax.f32 %v4447_v34, %v4454_v18 }
 0x432   :  { %v4173_v49 = vpop.f32.mrb[159].mxu1  ;;  %16001 = vst [vmem:[#allocation178_spill] sm:$0xff] %v13479_v15  ;;  %v13491_v2 = vmul.f32 0.25, %v13076_v8  ;;  %v4466_v31 = vsel %vm4323_vm7, %v13476_v26, -inf  ;;  %v4472_v37 = vsel %vm4323_vm7, %v13479_v15, -inf  ;;  %v16006_v32 = vld [vmem:[#allocation59_spill] sm:$0xff]  ;;  %v4461_v8 = vmax.f32 %v4453_v62, %v4460_v45 }
 0x433   :  { %v4451_v49 = vmax.f32 %v4443_v11, %v4450_v48  ;;  %16003 = vst [vmem:[#allocation179_spill] sm:$0xff] %v13488_v23  ;;  %v4457_v48 = vmax.f32 %v4449_v28, %v4456_v14  ;;  %v13494_v11 = vmul.f32 0.25, %v16004_v27  ;;  %v13501_v1 = vmul.f32 0.25, %v16006_v32  ;;  %v16008_v46 = vld [vmem:[#allocation69_spill] sm:$0xff]  ;;  %v16012_v27 = vld [vmem:[#allocation63_spill] sm:$0xff] }
 0x434   :  { %v13504_v7 = vmul.f32 0.25, %v16008_v46  ;;  %v16010_v14 = vld [vmem:[#allocation61_spill] sm:$0xff]  ;;  %v4468_v28 = vsel %vm4323_vm7, %v13488_v23, -inf  ;;  %v13514_v15 = vmul.f32 0.25, %v16012_v27  ;;  %v16013_v32 = vld [vmem:[#allocation95_spill] sm:$0xff] }
 0x435   :  { %v4176_v36 = vpop.f32.mrb[160].mxu1  ;;  %v4459_v33 = vmax.f32 %v4451_v49, %v4458_v57  ;;  %16005 = vst [vmem:[#allocation46_spill] sm:$0xff] %v13494_v11  ;;  %16007 = vst [vmem:[#allocation48_spill] sm:$0xff] %v13501_v1  ;;  %v4465_v34 = vmax.f32 %v4457_v48, %v4464_v58  ;;  %v13507_v57 = vmul.f32 0.25, %v16010_v14  ;;  %v4480_v49 = vsel %vm4323_vm7, %v13491_v2, -inf  ;;  %v16015_v58 = vld [vmem:[#allocation182_spill] sm:$0xff] }
 0x436   :  { %v4178_v10 = vpop.f32.mrb[161].mxu1  ;;  %16009 = vst [vmem:[#allocation180_spill] sm:$0xff] %v13504_v7  ;;  %v13517_v26 = vmul.f32 0.25, %v16013_v32  ;;  %v4470_v45 = vsel %vm4323_vm7, %v13494_v11, -inf  ;;  %v4474_v48 = vsel %vm4323_vm7, %v13501_v1, -inf  ;;  %v4488_v14 = vsel %vm4323_vm7, %v13504_v7, -inf }
 0x437   :  { %v4463_v10 = vmax.f32 %v4455_v12, %v4462_v51  ;;  %16011 = vst [vmem:[#allocation50_spill] sm:$0xff] %v13507_v57  ;;  %v4467_v62 = vmax.f32 %v4459_v33, %v4466_v31  ;;  %v4473_v51 = vmax.f32 %v4465_v34, %v4472_v37  ;;  %v13522_v12 = vmul.f32 0.25, %v16015_v58  ;;  %v16017_v27 = vld [vmem:[#allocation71_spill] sm:$0xff]  ;;  %v16019_v34 = vld [vmem:[#allocation65_spill] sm:$0xff] }
 0x438   :  { %16014 = vst [vmem:[#allocation181_spill] sm:$0xff] %v13517_v26  ;;  %v13529_v23 = vmul.f32 0.25, %v16017_v27  ;;  %v13532_v32 = vmul.f32 0.25, %v13253_v4  ;;  %v4469_v33 = vmax.f32 %v4461_v8, %v4468_v28  ;;  %v4476_v31 = vsel %vm4323_vm7, %v13507_v57, -inf }
 0x439   :  { %v4181_v18 = vpop.f32.mrb[162].mxu1  ;;  %16016 = vst [vmem:[#allocation52_spill] sm:$0xff] %v13522_v12  ;;  %v4481_v37 = vmax.f32 %v4473_v51, %v4480_v49  ;;  %v4482_v1 = vsel %vm4323_vm7, %v13514_v15, -inf  ;;  %v4496_v27 = vsel %vm4323_vm7, %v13517_v26, -inf  ;;  %v13546_v11 = vmul.f32 0.25, %v13167_v63 }
 0x43a   :  { %v4183_v46 = vpop.f32.mrb[163].mxu1  ;;  %16018 = vst [vmem:[#allocation54_spill] sm:$0xff] %v13532_v32  ;;  %v13549_v4 = vmul.f32 0.25, %v13371_v16  ;;  %v4471_v28 = vmax.f32 %v4463_v10, %v4470_v45  ;;  %v4475_v49 = vmax.f32 %v4467_v62, %v4474_v48  ;;  %v4478_v51 = vsel %vm4323_vm7, %v13522_v12, -inf  ;;  %v16023_v48 = vld [vmem:[#allocation67_spill] sm:$0xff] }
 0x43b   :  { %v13537_v46 = vmul.f32 0.25, %v16019_v34  ;;  %16020 = vst [vmem:[#allocation59_spill] sm:$0xff] %v13546_v11  ;;  %v4489_v34 = vmax.f32 %v4481_v37, %v4488_v14  ;;  %v4490_v57 = vsel %vm4323_vm7, %v13529_v23, -inf  ;;  %v4504_v7 = vsel %vm4323_vm7, %v13532_v32, -inf }
 0x43c   :  { %16021 = vst [vmem:[#allocation69_spill] sm:$0xff] %v13549_v4  ;;  %v13558_v26 = vmul.f32 0.25, %v13285_v54  ;;  %v13560_v63 = vmul.f32 0.25, %v4176_v36  ;;  %v4477_v16 = vmax.f32 %v4469_v33, %v4476_v31  ;;  %v4483_v19 = vmax.f32 %v4475_v49, %v4482_v1  ;;  %v16024_v31 = vld [vmem:[#allocation73_spill] sm:$0xff] }
 0x43d   :  { %v13539_v58 = vpop.f32.mrb[164].mxu1  ;;  %v4484_v10 = vsel %vm4323_vm7, %v13537_v46, -inf  ;;  %v4497_v62 = vmax.f32 %v4489_v34, %v4496_v27  ;;  %v13565_v14 = vmul.f32 0.25, %v16023_v48  ;;  %v4498_v37 = vsel %vm4323_vm7, %v13546_v11, -inf  ;;  %v16025_v34 = vld [vmem:[#allocation87_spill] sm:$0xff] }
 0x43e   :  { %v4188_v8 = vpop.f32.mrb[165].mxu1  ;;  %16022 = vst [vmem:[#allocation61_spill] sm:$0xff] %v13560_v63  ;;  %v13572_v54 = vmul.f32 0.25, %v13397_v41  ;;  %v4479_v33 = vmax.f32 %v4471_v28, %v4478_v51  ;;  %v4491_v1 = vmax.f32 %v4483_v19, %v4490_v57  ;;  %v13575_v49 = vmul.f32 0.25, %v16024_v31 }
 0x43f   :  { %v4512_v8 = vsel %vm4323_vm7, %v13549_v4, -inf  ;;  %v4505_v27 = vmax.f32 %v4497_v62, %v4504_v7  ;;  %v13578_v12 = vmul.f32 0.25, %v16025_v34  ;;  %v4506_v48 = vsel %vm4323_vm7, %v13558_v26, -inf }
 0x440   :  { %v4520_v32 = vsel %vm4323_vm7, %v13560_v63, -inf  ;;  %v13584_v4 = vmul.f32 0.25, %v4181_v18  ;;  %v4485_v41 = vmax.f32 %v4477_v16, %v4484_v10  ;;  %v4499_v11 = vmax.f32 %v4491_v1, %v4498_v37 }
 0x441   :  { %v4191_v45 = vpop.f32.mrb[166].mxu1  ;;  %v13587_v28 = vmul.f32 0.25, %v13199_v3  ;;  %v4513_v19 = vmax.f32 %v4505_v27, %v4512_v8  ;;  %v4486_v7 = vsel %vm4323_vm7, %v13565_v14, -inf  ;;  %v13592_v51 = vmul.f32 0.25, %v13225_v20 }
 0x442   :  { %v4193_v36 = vpop.f32.mrb[167].mxu1  ;;  %16026 = vst [vmem:[#allocation63_spill] sm:$0xff] %v13584_v4  ;;  %v4514_v62 = vsel %vm4323_vm7, %v13572_v54, -inf  ;;  %v4492_v16 = vsel %vm4323_vm7, %v13575_v49, -inf  ;;  %v4507_v10 = vmax.f32 %v4499_v11, %v4506_v48  ;;  %v13601_v3 = vmul.f32 0.25, %v13311_v35 }
 0x443   :  { %v4521_v37 = vmax.f32 %v4513_v19, %v4520_v32  ;;  %v4494_v8 = vsel %vm4323_vm7, %v13578_v12, -inf  ;;  %v13606_v20 = vmul.f32 0.25, %v13339_v47  ;;  %v4522_v1 = vsel %vm4323_vm7, %v13584_v4, -inf }
 0x444   :  { %v4487_v27 = vmax.f32 %v4479_v33, %v4486_v7  ;;  %v4500_v11 = vsel %vm4323_vm7, %v13587_v28, -inf  ;;  %v4515_v34 = vmax.f32 %v4507_v10, %v4514_v62  ;;  %v4502_v32 = vsel %vm4323_vm7, %v13592_v51, -inf }
 0x445   :  { %v4196_v57 = vpop.f32.mrb[168].mxu1  ;;  %v13617_v19 = vmul.f32 0.25, %v13425_v38  ;;  %v13620_v47 = vmul.f32 0.25, %v13457_v13  ;;  %v4493_v4 = vmax.f32 %v4485_v41, %v4492_v16  ;;  %v4508_v7 = vsel %vm4323_vm7, %v13601_v3, -inf }
 0x446   :  { %v13596_v36 = vmul.f32 0.25, %v4196_v57  ;;  %v4198_v18 = vpop.f32.mrb[169].mxu1  ;;  %v4495_v33 = vmax.f32 %v4487_v27, %v4494_v8  ;;  %v4523_v62 = vmax.f32 %v4515_v34, %v4522_v1  ;;  %v4510_v10 = vsel %vm4323_vm7, %v13606_v20, -inf }
 0x447   :  { %16027 = vst [vmem:[#allocation95_spill] sm:$0xff] %v13620_v47  ;;  %v13631_v38 = vmul.f32 0.25, %v4191_v45  ;;  %v4516_v16 = vsel %vm4323_vm7, %v13617_v19, -inf  ;;  %v4518_v8 = vsel %vm4323_vm7, %v13620_v47, -inf }
 0x448   :  { %v4528_v31 = vsel %vm4323_vm7, %v13596_v36, -inf }
 0x449   :  { %v4529_v35 = vmax.f32 %v4521_v37, %v4528_v31  ;;  %v4201_v48 = vpop.f32.mrb[170].mxu1  ;;  %v13629_v37 = vmul.f32 0.25, %v13539_v58  ;;  %v4501_v31 = vmax.f32 %v4493_v4, %v4500_v11  ;;  %v4526_v4 = vsel %vm4323_vm7, %v13631_v38, -inf }
 0x44a   :  { %v13622_v57 = vmul.f32 0.25, %v4201_v48  ;;  %v4203_v18 = vpop.f32.mrb[171].mxu1  ;;  %v4503_v48 = vmax.f32 %v4495_v33, %v4502_v32 }
 0x44b   :  { %16028 = vst [vmem:[#allocation182_spill] sm:$0xff] %v13629_v37  ;;  %v4509_v58 = vmax.f32 %v4501_v31, %v4508_v7  ;;  %v4524_v63 = vsel %vm4323_vm7, %v13629_v37, -inf }
 0x44c   :  { %v4530_v13 = vsel %vm4323_vm7, %v13622_v57, -inf  ;;  %v4511_v34 = vmax.f32 %v4503_v48, %v4510_v10 }
 0x44d   :  { %v4531_v18 = vmax.f32 %v4523_v62, %v4530_v13  ;;  %v4206_v41 = vpop.f32.mrb[172].mxu1  ;;  %v4517_v11 = vmax.f32 %v4509_v58, %v4516_v16 }
 0x44e   :  { %v13639_v1 = vmul.f32 0.25, %v4206_v41  ;;  %v4208_v27 = vpop.f32.mrb[173].mxu1  ;;  %v4519_v32 = vmax.f32 %v4511_v34, %v4518_v8 }
 0x44f   :  { %v4536_v45 = vmax.f32 %v4529_v35, %v4531_v18  ;;  %v4525_v47 = vmax.f32 %v4517_v11, %v4524_v63 }
 0x450   :  { %v4532_v62 = vsel %vm4323_vm7, %v13639_v1, -inf  ;;  %v4527_v27 = vmax.f32 %v4519_v32, %v4526_v4  ;;  %v16029_v32 = vld [vmem:[#allocation79_spill] sm:$0xff] }
 0x451   :  { %v4211_v33 = vpop.f32.mrb[174].mxu1  ;;  %v4533_v7 = vmax.f32 %v4525_v47, %v4532_v62  ;;  %v4870_v47 = vld [vmem:[%s15392_s10 + $0x8] sm:$0xff]  ;;  %v16030_v62 = vld [vmem:[#allocation81_spill] sm:$0xff] }
 0x452   :  { %v13647_v13 = vmul.f32 0.25, %v4211_v33  ;;  %v4213_v41 = vpop.f32.mrb[175].mxu1  ;;  %4984 = vmatprep.mubr.f32.mxu0 %v4870_v47 }
 0x454   :  { %v4534_v35 = vsel %vm4323_vm7, %v13647_v13, -inf }
 0x455   :  { %v4535_v10 = vmax.f32 %v4527_v27, %v4534_v35 }
 0x457   :  { %v4537_v31 = vmax.f32 %v4533_v7, %v4535_v10 }
 0x459   :  { %v4538_v48 = vmax.f32 %v4536_v45, %v4537_v31  ;;  %v16031_v31 = vld [vmem:[#allocation83_spill] sm:$0xff] }
 0x45b   :  { %v4539_v18 = vrot.slane %v4538_v48, 4 }
 0x45d   :  { %v4540_v37 = vmax.f32 %v4538_v48, %v4539_v18 }
 0x45f   :  { %v4541_v16 = vrot.slane %v4540_v37, 2 }
 0x461   :  { %v4542_v8 = vmax.f32 %v4540_v37, %v4541_v16  ;;  %v16032_v16 = vld [vmem:[#allocation93_spill] sm:$0xff] }
 0x463   :  { %v4543_v58 = vrot.slane %v4542_v8, 1 }
 0x465   :  { %v13651_v34 = vmax.f32 %v4542_v8, %v4543_v58 }
 0x467   :  { %v4561_v63 = vsub.f32 %v13165_v61, %v13651_v34  ;;  %v4562_v4 = vsub.f32 %v13174_v9, %v13651_v34  ;;  %v4545_v9 = vsub.f32 %v16029_v32, %v13651_v34  ;;  %v4546_v41 = vsub.f32 %v16030_v62, %v13651_v34 }
 0x468   :  { %v4563_v27 = vsub.f32 %v13177_v60, %v13651_v34  ;;  %v4564_v7 = vsub.f32 %v13182_v17, %v13651_v34  ;;  %v4547_v48 = vsub.f32 %v16031_v31, %v13651_v34  ;;  %v4548_v8 = vsub.f32 %v16032_v16, %v13651_v34  ;;  %v16033_v17 = vld [vmem:[#allocation75_spill] sm:$0xff] }
 0x469   :  { %v4653_v35 = vmul.f32 1.442695, %v4545_v9  ;;  %v4655_v10 = vmul.f32 1.442695, %v4546_v41  ;;  %v4685_v18 = vmul.f32 1.442695, %v4561_v63  ;;  %v4565_v47 = vsub.f32 %v13189_v29, %v13651_v34 }
 0x46a   :  { %v4687_v58 = vmul.f32 1.442695, %v4562_v4  ;;  %v4689_v32 = vmul.f32 1.442695, %v4563_v27  ;;  %v4566_v60 = vsub.f32 %v13192_v39, %v13651_v34  ;;  %v4691_v9 = vmul.f32 1.442695, %v4564_v7 }
 0x46b   :  { %9758 = vpow2.f32 %v4653_v35  ;;  %v4549_v62 = vsub.f32 %v16033_v17, %v13651_v34  ;;  %v4657_v41 = vmul.f32 1.442695, %v4547_v48  ;;  %v16034_v63 = vld [vmem:[#allocation77_spill] sm:$0xff]  ;;  %v4659_v16 = vmul.f32 1.442695, %v4548_v8 }
 0x46c   :  { %9760 = vpow2.f32 %v4655_v10  ;;  %v4550_v31 = vsub.f32 %v16034_v63, %v13651_v34  ;;  %v4567_v29 = vsub.f32 %v13197_v56, %v13651_v34  ;;  %v4693_v4 = vmul.f32 1.442695, %v4565_v47  ;;  %v16035_v35 = vld [vmem:[#allocation85_spill] sm:$0xff] }
 0x46d   :  { %9762 = vpow2.f32 %v4685_v18  ;;  %v4568_v39 = vsub.f32 %v13206_v50, %v13651_v34  ;;  %v4695_v27 = vmul.f32 1.442695, %v4566_v60  ;;  %v4551_v7 = vsub.f32 %v16035_v35, %v13651_v34  ;;  %v16036_v48 = vld [vmem:[#allocation89_spill] sm:$0xff]  ;;  %v16037_v60 = vld [vmem:[#allocation91_spill] sm:$0xff] }
 0x46e   :  { %9764 = vpow2.f32 %v4687_v58  ;;  %v4661_v10 = vmul.f32 1.442695, %v4549_v62  ;;  %v4552_v18 = vsub.f32 %v16036_v48, %v13651_v34  ;;  %v4663_v8 = vmul.f32 1.442695, %v4550_v31 }
 0x46f   :  { %9766 = vpow2.f32 %v4689_v32  ;;  %v4569_v56 = vsub.f32 %v13209_v53, %v13651_v34  ;;  %v4697_v58 = vmul.f32 1.442695, %v4567_v29  ;;  %v4570_v50 = vsub.f32 %v13218_v25, %v13651_v34 }
 0x470   :  { %9768 = vpow2.f32 %v4691_v9  ;;  %v4699_v47 = vmul.f32 1.442695, %v4568_v39  ;;  %v4553_v9 = vsub.f32 %v16037_v60, %v13651_v34  ;;  %v4665_v17 = vmul.f32 1.442695, %v4551_v7 }
 0x471   :  { %9770 = vpow2.f32 %v4657_v41  ;;  %v4554_v41 = vsub.f32 %v13124_v42, %v13651_v34  ;;  %v4667_v53 = vmul.f32 1.442695, %v4552_v18  ;;  %v4571_v25 = vsub.f32 %v13221_v0, %v13651_v34 }
 0x472   :  { %9772 = vpow2.f32 %v4659_v16  ;;  %v4701_v31 = vmul.f32 1.442695, %v4569_v56  ;;  %v4572_v29 = vsub.f32 %v13232_v30, %v13651_v34  ;;  %v4555_v42 = vsub.f32 %v13127_v44, %v13651_v34 }
 0x473   :  { %9774 = vpow2.f32 %v4693_v4  ;;  %v4703_v4 = vmul.f32 1.442695, %v4570_v50  ;;  %v4556_v0 = vsub.f32 %v13144_v22, %v13651_v34  ;;  %v4573_v7 = vsub.f32 %v13235_v55, %v13651_v34 }
 0x474   :  { %9776 = vpow2.f32 %v4695_v27  ;;  %v4669_v27 = vmul.f32 1.442695, %v4553_v9  ;;  %v4705_v48 = vmul.f32 1.442695, %v4571_v25  ;;  %v4574_v22 = vsub.f32 %v13238_v43, %v13651_v34 }
 0x475   :  { %v13702_v32 = vpop.eup %9758  ;;  %9778 = vpow2.f32 %v4661_v10  ;;  %v4671_v10 = vmul.f32 1.442695, %v4554_v41  ;;  %v4707_v56 = vmul.f32 1.442695, %v4572_v29  ;;  %v4575_v25 = vsub.f32 %v13245_v24, %v13651_v34 }
 0x476   :  { %v13706_v62 = vpop.eup %9760  ;;  %9780 = vpow2.f32 %v4663_v8 }
 0x477   :  { %v13710_v63 = vpop.eup %9762  ;;  %9782 = vpow2.f32 %v4697_v58  ;;  %v9490_v44 = vpack.c.bf16 %v13706_v62, %v13702_v32  ;;  %v16041_v58 = vld [vmem:[#allocation97_spill] sm:$0xff] }
 0x478   :  { %v13714_v16 = vpop.eup %9764  ;;  %9784 = vpow2.f32 %v4699_v47  ;;  %v4557_v50 = vsub.f32 %v16041_v58, %v13651_v34  ;;  %v4673_v47 = vmul.f32 1.442695, %v4555_v42  ;;  %v4711_v42 = vmul.f32 1.442695, %v4574_v22 }
 0x479   :  { %v13718_v39 = vpop.eup %9766  ;;  %9786 = vpow2.f32 %v4665_v17  ;;  %v9488_v18 = vpack.c.bf16 %v13714_v16, %v13710_v63  ;;  %v16043_v17 = vld [vmem:[#allocation99_spill] sm:$0xff]  ;;  %v4593_v58 = vsub.f32 %v13337_v40, %v13651_v34 }
 0x47a   :  { %16038 = vst [vmem:[#allocation71_spill] sm:$0xff] %v13718_v39  ;;  %v13722_v35 = vpop.eup %9768  ;;  %9788 = vpow2.f32 %v4667_v53  ;;  %v4558_v41 = vsub.f32 %v16043_v17, %v13651_v34  ;;  %v4675_v53 = vmul.f32 1.442695, %v4556_v0 }
 0x47b   :  { %16039 = vst [vmem:[#allocation65_spill] sm:$0xff] %v13722_v35  ;;  %v13728_v30 = vpop.eup %9770  ;;  %9790 = vpow2.f32 %v4701_v31  ;;  %9489 = vmatprep.subr.bf16.mxu0 %v9488_v18  ;;  %v9492_v60 = vpack.c.bf16 %v13722_v35, %v13718_v39  ;;  %v4709_v31 = vmul.f32 1.442695, %v4573_v7 }
 0x47c   :  { %v13734_v8 = vpop.eup %9772  ;;  %9792 = vpow2.f32 %v4703_v4  ;;  %9491 = vmatpush3.bf16.msra.mxu0 %v9490_v44  ;;  %v4576_v4 = vsub.f32 %v13248_v21, %v13651_v34  ;;  %v4677_v44 = vmul.f32 1.442695, %v4557_v50  ;;  %v4679_v22 = vmul.f32 1.442695, %v4558_v41 }
 0x47d   :  { %v13738_v55 = vpop.eup %9774  ;;  %9794 = vpow2.f32 %v4669_v27  ;;  %9493 = vmatprep.subr.bf16.mxu0 %v9492_v60  ;;  %v9494_v27 = vpack.c.bf16 %v13734_v8, %v13728_v30  ;;  %v4713_v60 = vmul.f32 1.442695, %v4575_v25 }
 0x47e   :  { %16040 = vst [vmem:[#allocation67_spill] sm:$0xff] %v13738_v55  ;;  %v13744_v9 = vpop.eup %9776  ;;  %9796 = vpow2.f32 %v4671_v10  ;;  %v16045_v10 = vld [vmem:[#allocation101_spill] sm:$0xff]  ;;  %v4715_v17 = vmul.f32 1.442695, %v4576_v4 }
 0x47f   :  { %16042 = vst [vmem:[#allocation73_spill] sm:$0xff] %v13744_v9  ;;  %v13748_v43 = vpop.eup %9778  ;;  %9798 = vpow2.f32 %v4705_v48  ;;  %v4559_v18 = vsub.f32 %v16045_v10, %v13651_v34  ;;  %v9496_v24 = vpack.c.bf16 %v13744_v9, %v13738_v55  ;;  %v16047_v48 = vld [vmem:[#allocation103_spill] sm:$0xff] }
 0x480   :  { %v13752_v29 = vpop.eup %9780  ;;  %9800 = vpow2.f32 %v4707_v56  ;;  %v4560_v21 = vsub.f32 %v16047_v48, %v13651_v34  ;;  %9495 = vmatpush3.bf16.msra.mxu0 %v9494_v27  ;;  %v4577_v27 = vsub.f32 %v13251_v6, %v13651_v34  ;;  %v4749_v48 = vmul.f32 1.442695, %v4593_v58 }
 0x481   :  { %v13758_v0 = vpop.eup %9782  ;;  %9802 = vpow2.f32 %v4673_v47  ;;  %9497 = vmatprep.subr.bf16.mxu0 %v9496_v24  ;;  %v4594_v47 = vsub.f32 %v13346_v52, %v13651_v34  ;;  %v9498_v41 = vpack.c.bf16 %v13752_v29, %v13748_v43  ;;  %v4681_v10 = vmul.f32 1.442695, %v4559_v18 }
 0x482   :  { %16044 = vst [vmem:[#allocation87_spill] sm:$0xff] %v13758_v0  ;;  %v13764_v7 = vpop.eup %9784  ;;  %9804 = vpow2.f32 %v4675_v53  ;;  %v4683_v4 = vmul.f32 1.442695, %v4560_v21  ;;  %v4595_v24 = vsub.f32 %v13349_v5, %v13651_v34  ;;  %v4596_v18 = vsub.f32 %v13354_v59, %v13651_v34 }
 0x483   :  { %16046 = vst [vmem:[#allocation79_spill] sm:$0xff] %v13764_v7  ;;  %v13768_v56 = vpop.eup %9786  ;;  %9806 = vpow2.f32 %v4709_v31  ;;  %v9500_v40 = vpack.c.bf16 %v13764_v7, %v13758_v0  ;;  %v16050_v31 = vld [vmem:[#allocation105_spill] sm:$0xff]  ;;  %v4717_v61 = vmul.f32 1.442695, %v4577_v27 }
 0x484   :  { %v13772_v50 = vpop.eup %9788  ;;  %9808 = vpow2.f32 %v4711_v42  ;;  %v4578_v52 = vsub.f32 %v16050_v31, %v13651_v34  ;;  %9499 = vmatpush3.bf16.msra.mxu0 %v9498_v41  ;;  %v16052_v41 = vld [vmem:[#allocation107_spill] sm:$0xff]  ;;  %v4753_v11 = vmul.f32 1.442695, %v4595_v24  ;;  %v4755_v45 = vmul.f32 1.442695, %v4596_v18 }
 0x485   :  { %v13778_v53 = vpop.eup %9790  ;;  %9810 = vpow2.f32 %v4677_v44  ;;  %9501 = vmatprep.subr.bf16.mxu0 %v9500_v40  ;;  %v4751_v44 = vmul.f32 1.442695, %v4594_v47  ;;  %v9502_v21 = vpack.c.bf16 %v13772_v50, %v13768_v56  ;;  %v4579_v31 = vsub.f32 %v16052_v41, %v13651_v34  ;;  %v16055_v40 = vld [vmem:[#allocation135_spill] sm:$0xff] }
 0x486   :  { %16048 = vst [vmem:[#allocation81_spill] sm:$0xff] %v13778_v53  ;;  %v13784_v25 = vpop.eup %9792  ;;  %9812 = vpow2.f32 %v4679_v22  ;;  %v4719_v47 = vmul.f32 1.442695, %v4578_v52  ;;  %v4597_v33 = vsub.f32 %v16055_v40, %v13651_v34 }
 0x487   :  { %16049 = vst [vmem:[#allocation83_spill] sm:$0xff] %v13784_v25  ;;  %v13788_v42 = vpop.eup %9794  ;;  %9814 = vpow2.f32 %v4713_v60  ;;  %v9504_v5 = vpack.c.bf16 %v13784_v25, %v13778_v53  ;;  %v16054_v60 = vld [vmem:[#allocation109_spill] sm:$0xff]  ;;  %v4721_v37 = vmul.f32 1.442695, %v4579_v31 }
 0x488   :  { %v13792_v6 = vpop.eup %9796  ;;  %9816 = vpow2.f32 %v4715_v17  ;;  %v4580_v59 = vsub.f32 %v16054_v60, %v13651_v34  ;;  %9503 = vmatpush3.bf16.msra.mxu0 %v9502_v21  ;;  %v16058_v21 = vld [vmem:[#allocation111_spill] sm:$0xff]  ;;  %v4757_v53 = vmul.f32 1.442695, %v4597_v33  ;;  %v16062_v31 = vld [vmem:[#allocation141_spill] sm:$0xff] }
 0x489   :  { %v13798_v22 = vpop.eup %9798  ;;  %9818 = vpow2.f32 %v4681_v10  ;;  %9505 = vmatprep.subr.bf16.mxu0 %v9504_v5  ;;  %v16056_v10 = vld [vmem:[#allocation137_spill] sm:$0xff]  ;;  %v9506_v52 = vpack.c.bf16 %v13792_v6, %v13788_v42  ;;  %v4581_v60 = vsub.f32 %v16058_v21, %v13651_v34  ;;  %v4600_v21 = vsub.f32 %v16062_v31, %v13651_v34  ;;  %v16067_v31 = vld [vmem:[#allocation143_spill] sm:$0xff] }
 0x48a   :  { %16051 = vst [vmem:[#allocation93_spill] sm:$0xff] %v13798_v22  ;;  %v13804_v58 = vpop.eup %9800  ;;  %9820 = vpow2.f32 %v4683_v4  ;;  %v4598_v41 = vsub.f32 %v16056_v10, %v13651_v34  ;;  %v16060_v5 = vld [vmem:[#allocation113_spill] sm:$0xff]  ;;  %v4723_v18 = vmul.f32 1.442695, %v4580_v59  ;;  %v16061_v10 = vld [vmem:[#allocation139_spill] sm:$0xff]  ;;  %v4601_v7 = vsub.f32 %v16067_v31, %v13651_v34 }
 0x48b   :  { %16053 = vst [vmem:[#allocation75_spill] sm:$0xff] %v13804_v58  ;;  %v13808_v17 = vpop.eup %9802  ;;  %9822 = vpow2.f32 %v4749_v48  ;;  %v9508_v24 = vpack.c.bf16 %v13804_v58, %v13798_v22  ;;  %v4582_v40 = vsub.f32 %v16060_v5, %v13651_v34  ;;  %v4599_v25 = vsub.f32 %v16061_v10, %v13651_v34 }
 0x48c   :  { %v13812_v27 = vpop.eup %9804  ;;  %9824 = vpow2.f32 %v4751_v44  ;;  %9507 = vmatpush3.bf16.msra.mxu0 %v9506_v52  ;;  %v4759_v58 = vmul.f32 1.442695, %v4598_v41  ;;  %v16064_v52 = vld [vmem:[#allocation115_spill] sm:$0xff]  ;;  %v4725_v22 = vmul.f32 1.442695, %v4581_v60  ;;  %v16068_v60 = vld [vmem:[#allocation145_spill] sm:$0xff] }
 0x48d   :  { %v13818_v4 = vpop.eup %9806  ;;  %9826 = vpow2.f32 %v4717_v61  ;;  %9509 = vmatprep.subr.bf16.mxu0 %v9508_v24  ;;  %v9510_v59 = vpack.c.bf16 %v13812_v27, %v13808_v17  ;;  %v4583_v5 = vsub.f32 %v16064_v52, %v13651_v34  ;;  %v16066_v24 = vld [vmem:[#allocation117_spill] sm:$0xff]  ;;  %v4727_v41 = vmul.f32 1.442695, %v4582_v40 }
 0x48e   :  { %16057 = vst [vmem:[#allocation77_spill] sm:$0xff] %v13818_v4  ;;  %v13824_v48 = vpop.eup %9808  ;;  %9828 = vpow2.f32 %v4719_v47  ;;  %v4584_v10 = vsub.f32 %v16066_v24, %v13651_v34  ;;  %v4761_v0 = vmul.f32 1.442695, %v4599_v25  ;;  %v4602_v52 = vsub.f32 %v16068_v60, %v13651_v34  ;;  %v16074_v60 = vld [vmem:[#allocation147_spill] sm:$0xff] }
 0x48f   :  { %16059 = vst [vmem:[#allocation85_spill] sm:$0xff] %v13824_v48  ;;  %v13828_v44 = vpop.eup %9810  ;;  %9830 = vpow2.f32 %v4753_v11  ;;  %v9512_v33 = vpack.c.bf16 %v13824_v48, %v13818_v4  ;;  %v4763_v48 = vmul.f32 1.442695, %v4600_v21  ;;  %v4729_v4 = vmul.f32 1.442695, %v4583_v5  ;;  %v16076_v5 = vld [vmem:[#allocation150_spill] sm:$0xff] }
 0x490   :  { %v13832_v61 = vpop.eup %9812  ;;  %9832 = vpow2.f32 %v4755_v45  ;;  %9511 = vmatpush3.bf16.msra.mxu0 %v9510_v59  ;;  %v16070_v59 = vld [vmem:[#allocation119_spill] sm:$0xff]  ;;  %v4731_v21 = vmul.f32 1.442695, %v4584_v10  ;;  %v4603_v9 = vsub.f32 %v16074_v60, %v13651_v34  ;;  %v4765_v55 = vmul.f32 1.442695, %v4601_v7 }
 0x491   :  { %v13838_v47 = vpop.eup %9814  ;;  %9834 = vpow2.f32 %v4721_v37  ;;  %9513 = vmatprep.subr.bf16.mxu0 %v9512_v33  ;;  %v9514_v40 = vpack.c.bf16 %v13832_v61, %v13828_v44  ;;  %v4585_v24 = vsub.f32 %v16070_v59, %v13651_v34  ;;  %v16072_v33 = vld [vmem:[#allocation121_spill] sm:$0xff]  ;;  %v4604_v59 = vsub.f32 %v16076_v5, %v13651_v34 }
 0x492   :  { %16063 = vst [vmem:[#allocation89_spill] sm:$0xff] %v13838_v47  ;;  %v13844_v11 = vpop.eup %9816  ;;  %9836 = vpow2.f32 %v4723_v18  ;;  %v4586_v31 = vsub.f32 %v16072_v33, %v13651_v34 }
 0x493   :  { %16065 = vst [vmem:[#allocation91_spill] sm:$0xff] %v13844_v11  ;;  %v13848_v45 = vpop.eup %9818  ;;  %9838 = vpow2.f32 %v4757_v53  ;;  %v9516_v53 = vpack.c.bf16 %v13844_v11, %v13838_v47  ;;  %v4767_v11 = vmul.f32 1.442695, %v4602_v52  ;;  %v4733_v47 = vmul.f32 1.442695, %v4585_v24  ;;  %v16081_v24 = vld [vmem:[#allocation152_spill] sm:$0xff] }
 0x494   :  { %v13852_v37 = vpop.eup %9820  ;;  %9840 = vpow2.f32 %v4759_v58  ;;  %9515 = vmatpush3.bf16.msra.mxu0 %v9514_v40  ;;  %v16078_v40 = vld [vmem:[#allocation123_spill] sm:$0xff]  ;;  %v4735_v52 = vmul.f32 1.442695, %v4586_v31  ;;  %v16083_v31 = vld [vmem:[#allocation154_spill] sm:$0xff] }
 0x495   :  { %v13858_v18 = vpop.eup %9822  ;;  %9842 = vpow2.f32 %v4725_v22  ;;  %9517 = vmatprep.subr.bf16.mxu0 %v9516_v53  ;;  %v9518_v10 = vpack.c.bf16 %v13852_v37, %v13848_v45  ;;  %v4587_v33 = vsub.f32 %v16078_v40, %v13651_v34  ;;  %v16080_v53 = vld [vmem:[#allocation125_spill] sm:$0xff]  ;;  %v4769_v40 = vmul.f32 1.442695, %v4603_v9  ;;  %v16085_v9 = vld [vmem:[#allocation127_spill] sm:$0xff] }
 0x496   :  { %16069 = vst [vmem:[#allocation97_spill] sm:$0xff] %v13858_v18  ;;  %v13864_v25 = vpop.eup %9824  ;;  %9844 = vpow2.f32 %v4727_v41  ;;  %v4588_v60 = vsub.f32 %v16080_v53, %v13651_v34 }
 0x497   :  { %16071 = vst [vmem:[#allocation99_spill] sm:$0xff] %v13864_v25  ;;  %v13868_v58 = vpop.eup %9826  ;;  %9846 = vpow2.f32 %v4761_v0  ;;  %v9520_v0 = vpack.c.bf16 %v13864_v25, %v13858_v18  ;;  %v4877_v25 = vld [vmem:[%s15392_s10 + $0x40] sm:$0xff] }
 0x498   :  { %16073 = vst [vmem:[#allocation101_spill] sm:$0xff] %v13868_v58  ;;  %v13872_v22 = vpop.eup %9828  ;;  %9848 = vpow2.f32 %v4763_v48  ;;  %9519 = vmatpush3.bf16.msra.mxu0 %v9518_v10  ;;  %v4869_v48 = vld [vmem:[%s15392_s10] sm:$0xff]  ;;  %v4771_v10 = vmul.f32 1.442695, %v4604_v59 }
 0x499   :  { %16075 = vst [vmem:[#allocation103_spill] sm:$0xff] %v13872_v22  ;;  %v13878_v41 = vpop.eup %9830  ;;  %9850 = vpow2.f32 %v4729_v4  ;;  %v4605_v4 = vsub.f32 %v16081_v24, %v13651_v34  ;;  %9521 = vmatprep.subr.bf16.mxu0 %v9520_v0  ;;  %v9522_v18 = vpack.c.bf16 %v13872_v22, %v13868_v58  ;;  %v4737_v0 = vmul.f32 1.442695, %v4587_v33  ;;  %v4876_v22 = vld [vmem:[%s15392_s10 + $0x38] sm:$0xff] }
 0x49a   :  { %16077 = vst [vmem:[#allocation105_spill] sm:$0xff] %v13878_v41  ;;  %v13884_v7 = vpop.eup %9832  ;;  %9852 = vpow2.f32 %v4731_v21  ;;  %v4606_v21 = vsub.f32 %v16083_v31, %v13651_v34  ;;  %v16087_v31 = vld [vmem:[#allocation129_spill] sm:$0xff] }
 0x49b   :  { %16079 = vst [vmem:[#allocation107_spill] sm:$0xff] %v13884_v7  ;;  %v13891_v5 = vpop.eup %9834  ;;  %9854 = vpow2.f32 %v4765_v55  ;;  %v4589_v55 = vsub.f32 %v16085_v9, %v13651_v34  ;;  %4985 = vmatmul.mubr.f32.vlgmr.msra.gmra.mrb[80].mxu0 %v4869_v48  ;;  %v9524_v24 = vpack.c.bf16 %v13884_v7, %v13878_v41  ;;  %v4590_v59 = vsub.f32 %v16087_v31, %v13651_v34  ;;  %v4884_v31 = vld [vmem:[%s15392_s10 + $0x78] sm:$0xff] }
 0x49c   :  { %v13898_v53 = vpop.eup %9836  ;;  %9856 = vpow2.f32 %v4767_v11  ;;  %v4739_v11 = vmul.f32 1.442695, %v4588_v60  ;;  %9523 = vmatpush3.bf16.msra.mxu0 %v9522_v18  ;;  %4989 = vmatprep.mubr.f32.mxu0 %v4877_v25  ;;  %v4773_v48 = vmul.f32 1.442695, %v4605_v4  ;;  %v16089_v18 = vld [vmem:[#allocation159_spill] sm:$0xff] }
 0x49d   :  { %16082 = vst [vmem:[#allocation109_spill] sm:$0xff] %v13898_v53  ;;  %v13904_v35 = vpop.eup %9838  ;;  %9858 = vpow2.f32 %v4733_v47  ;;  %v16088_v47 = vld [vmem:[#allocation157_spill] sm:$0xff]  ;;  %9525 = vmatprep.subr.bf16.mxu0 %v9524_v24  ;;  %v4608_v25 = vsub.f32 %v16089_v18, %v13651_v34  ;;  %v9526_v7 = vpack.c.bf16 %v13898_v53, %v13891_v5  ;;  %v16091_v4 = vld [vmem:[#allocation131_spill] sm:$0xff]  ;;  %v4741_v24 = vmul.f32 1.442695, %v4589_v55 }
 0x49e   :  { %16084 = vst [vmem:[#allocation135_spill] sm:$0xff] %v13904_v35  ;;  %v13910_v39 = vpop.eup %9840  ;;  %9860 = vpow2.f32 %v4735_v52  ;;  %v4607_v33 = vsub.f32 %v16088_v47, %v13651_v34  ;;  %v4775_v52 = vmul.f32 1.442695, %v4606_v21  ;;  %v16093_v18 = vld [vmem:[#allocation133_spill] sm:$0xff]  ;;  %v4625_v55 = vsub.f32 %v13491_v2, %v13651_v34 }
 0x49f   :  { %16086 = vst [vmem:[#allocation137_spill] sm:$0xff] %v13910_v39  ;;  %v13917_v9 = vpop.eup %9842  ;;  %9862 = vpow2.f32 %v4769_v40  ;;  %v4591_v40 = vsub.f32 %v16091_v4, %v13651_v34  ;;  %v9528_v47 = vpack.c.bf16 %v13910_v39, %v13904_v35  ;;  %4990 = vmatmul.mubr.f32.gmra.mrb[82].mxu0 %v4876_v22  ;;  %v4592_v21 = vsub.f32 %v16093_v18, %v13651_v34  ;;  %v4883_v53 = vld [vmem:[%s15392_s10 + $0x70] sm:$0xff]  ;;  %v4890_v35 = vld [vmem:[%s15392_s10 + $0xa8] sm:$0xff] }
 0x4a0   :  { %v13924_v60 = vpop.eup %9844  ;;  %9864 = vpow2.f32 %v4771_v10  ;;  %v4743_v10 = vmul.f32 1.442695, %v4590_v59  ;;  %9527 = vmatpush3.bf16.msra.mxu0 %v9526_v7  ;;  %4994 = vmatprep.mubr.f32.mxu0 %v4884_v31  ;;  %v4891_v22 = vld [vmem:[%s15392_s10 + $0xb0] sm:$0xff]  ;;  %v4626_v7 = vsub.f32 %v13514_v15, %v13651_v34  ;;  %v16097_v15 = vld [vmem:[#allocation163_spill] sm:$0xff] }
 0x4a1   :  { %v13930_v41 = vpop.eup %9846  ;;  %9866 = vpow2.f32 %v4737_v0  ;;  %v4777_v0 = vmul.f32 1.442695, %v4607_v33  ;;  %9529 = vmatprep.subr.bf16.mxu0 %v9528_v47  ;;  %v9530_v31 = vpack.c.bf16 %v13924_v60, %v13917_v9  ;;  %v16095_v2 = vld [vmem:[#allocation161_spill] sm:$0xff] }
 0x4a2   :  { %16090 = vst [vmem:[#allocation111_spill] sm:$0xff] %v13930_v41  ;;  %v13936_v58 = vpop.eup %9848  ;;  %9868 = vpow2.f32 %v4739_v11  ;;  %v4779_v11 = vmul.f32 1.442695, %v4608_v25  ;;  %v4609_v33 = vsub.f32 %v16095_v2, %v13651_v34  ;;  %v4610_v25 = vsub.f32 %v16097_v15, %v13651_v34 }
 0x4a3   :  { %16092 = vst [vmem:[#allocation113_spill] sm:$0xff] %v13936_v58  ;;  %v13943_v4 = vpop.eup %9850  ;;  %9870 = vpow2.f32 %v4773_v48  ;;  %v4745_v48 = vmul.f32 1.442695, %v4591_v40  ;;  %v9532_v47 = vpack.c.bf16 %v13936_v58, %v13930_v41  ;;  %4995 = vmatmul.mubr.f32.gmra.mrb[84].mxu0 %v4883_v53  ;;  %v4627_v40 = vsub.f32 %v13537_v46, %v13651_v34  ;;  %v4898_v53 = vld [vmem:[%s15392_s10 + $0xe8] sm:$0xf]  ;;  %v16100_v46 = vld [vmem:[#allocation165_spill] sm:$0xff] }
 0x4a4   :  { %v13950_v59 = vpop.eup %9852  ;;  %9872 = vpow2.f32 %v4775_v52  ;;  %v4747_v52 = vmul.f32 1.442695, %v4592_v21  ;;  %9531 = vmatpush3.bf16.msra.mxu0 %v9530_v31  ;;  %4999 = vmatprep.mubr.f32.mxu0 %v4891_v22  ;;  %v4815_v22 = vmul.f32 1.442695, %v4626_v7  ;;  %v4897_v41 = vld [vmem:[%s15392_s10 + $0xe0] sm:$0xf] }
 0x4a5   :  { %v13956_v18 = vpop.eup %9854  ;;  %9874 = vpow2.f32 %v4741_v24  ;;  %v4813_v24 = vmul.f32 1.442695, %v4625_v55  ;;  %9533 = vmatprep.subr.bf16.mxu0 %v9532_v47  ;;  %v9534_v31 = vpack.c.bf16 %v13950_v59, %v13943_v4  ;;  %v4611_v55 = vsub.f32 %v16100_v46, %v13651_v34 }
 0x4a6   :  { %16094 = vst [vmem:[#allocation139_spill] sm:$0xff] %v13956_v18  ;;  %v13962_v39 = vpop.eup %9856  ;;  %9876 = vpow2.f32 %v4743_v10  ;;  %v4628_v10 = vsub.f32 %v13565_v14, %v13651_v34  ;;  %v16102_v14 = vld [vmem:[#allocation167_spill] sm:$0xff] }
 0x4a7   :  { %16096 = vst [vmem:[#allocation141_spill] sm:$0xff] %v13962_v39  ;;  %v13969_v2 = vpop.eup %9858  ;;  %9878 = vpow2.f32 %v4777_v0  ;;  %v4781_v0 = vmul.f32 1.442695, %v4609_v33  ;;  %v9536_v47 = vpack.c.bf16 %v13962_v39, %v13956_v18  ;;  %5000 = vmatmul.mubr.f32.gmra.mrb[86].mxu0 %v4890_v35  ;;  %v4612_v7 = vsub.f32 %v16102_v14, %v13651_v34  ;;  %v16103_v33 = vld [vmem:[#allocation180_spill] sm:$0xff]  ;;  %v4872_v35 = vld [vmem:[%s15392_s10 + $0x18] sm:$0xff] }
 0x4a8   :  { %v13976_v21 = vpop.eup %9860  ;;  %9880 = vpow2.f32 %v4779_v11  ;;  %v4783_v11 = vmul.f32 1.442695, %v4610_v25  ;;  %9535 = vmatpush3.bf16.msra.mxu0 %v9534_v31  ;;  %5004 = vmatprep.mubr.f32.mxu0 %v4898_v53  ;;  %v4817_v39 = vmul.f32 1.442695, %v4627_v40  ;;  %v4819_v53 = vmul.f32 1.442695, %v4628_v10 }
 0x4a9   :  { %16098 = vst [vmem:[#allocation115_spill] sm:$0xff] %v13976_v21  ;;  %v13982_v15 = vpop.eup %9862  ;;  %9882 = vpow2.f32 %v4745_v48  ;;  %v4629_v48 = vsub.f32 %v16103_v33, %v13651_v34  ;;  %9537 = vmatprep.subr.bf16.mxu0 %v9536_v47  ;;  %v9538_v31 = vpack.c.bf16 %v13976_v21, %v13969_v2  ;;  %v16106_v40 = vld [vmem:[#allocation169_spill] sm:$0xff]  ;;  %v4785_v47 = vmul.f32 1.442695, %v4611_v55 }
 0x4aa   :  { %16099 = vst [vmem:[#allocation117_spill] sm:$0xff] %v13982_v15  ;;  %v13988_v58 = vpop.eup %9864  ;;  %9884 = vpow2.f32 %v4747_v52  ;;  %v4630_v52 = vsub.f32 %v13529_v23, %v13651_v34  ;;  %v16108_v23 = vld [vmem:[#allocation171_spill] sm:$0xff] }
 0x4ab   :  { %16101 = vst [vmem:[#allocation143_spill] sm:$0xff] %v13988_v58  ;;  %v13995_v46 = vpop.eup %9866  ;;  %9886 = vpow2.f32 %v4813_v24  ;;  %v4613_v24 = vsub.f32 %v16106_v40, %v13651_v34  ;;  %v9540_v33 = vpack.c.bf16 %v13988_v58, %v13982_v15  ;;  %5005 = vmatmul.mubr.f32.gmra.mrb[88].mxu0 %v4897_v41  ;;  %v4614_v10 = vsub.f32 %v16108_v23, %v13651_v34 }
 0x4ac   :  { %v14002_v25 = vpop.eup %9868  ;;  %9888 = vpow2.f32 %v4815_v22  ;;  %v4787_v22 = vmul.f32 1.442695, %v4612_v7  ;;  %9539 = vmatpush3.bf16.msra.mxu0 %v9538_v31  ;;  %5074 = vmatprep.mubr.f32.mxu0 %v4872_v35  ;;  %v4631_v40 = vsub.f32 %v13575_v49, %v13651_v34  ;;  %v4821_v55 = vmul.f32 1.442695, %v4629_v48  ;;  %v16111_v35 = vld [vmem:[#allocation173_spill] sm:$0xff]  ;;  %v16113_v48 = vld [vmem:[#allocation175_spill] sm:$0xff] }
 0x4ad   :  { %16104 = vst [vmem:[#allocation145_spill] sm:$0xff] %v14002_v25  ;;  %v14008_v14 = vpop.eup %9870  ;;  %9890 = vpow2.f32 %v4781_v0  ;;  %9541 = vmatprep.subr.bf16.mxu0 %v9540_v33  ;;  %v4632_v41 = vsub.f32 %v13578_v12, %v13651_v34  ;;  %v4823_v58 = vmul.f32 1.442695, %v4630_v52  ;;  %v9542_v7 = vpack.c.bf16 %v14002_v25, %v13995_v46  ;;  %v16114_v33 = vld [vmem:[#allocation181_spill] sm:$0xff] }
 0x4ae   :  { %16105 = vst [vmem:[#allocation119_spill] sm:$0xff] %v14008_v14  ;;  %v14014_v18 = vpop.eup %9872  ;;  %9892 = vpow2.f32 %v4783_v11  ;;  %v4615_v31 = vsub.f32 %v16111_v35, %v13651_v34  ;;  %v4789_v23 = vmul.f32 1.442695, %v4613_v24  ;;  %v4616_v12 = vsub.f32 %v16113_v48, %v13651_v34 }
 0x4af   :  { %16107 = vst [vmem:[#allocation121_spill] sm:$0xff] %v14014_v18  ;;  %v14018_v21 = vpop.eup %9874  ;;  %9894 = vpow2.f32 %v4817_v39  ;;  %v9544_v49 = vpack.c.bf16 %v14014_v18, %v14008_v14  ;;  %v4791_v52 = vmul.f32 1.442695, %v4614_v10  ;;  %v4633_v15 = vsub.f32 %v16114_v33, %v13651_v34 }
 0x4b0   :  { %v14022_v0 = vpop.eup %9876  ;;  %9896 = vpow2.f32 %v4819_v53  ;;  %9543 = vmatpush3.bf16.msra.mxu0 %v9542_v7  ;;  %v4825_v25 = vmul.f32 1.442695, %v4631_v40  ;;  %v4827_v18 = vmul.f32 1.442695, %v4632_v41  ;;  %v16117_v7 = vld [vmem:[#allocation176_spill] sm:$0xff] }
 0x4b1   :  { %16109 = vst [vmem:[#allocation147_spill] sm:$0xff] %v14022_v0  ;;  %v14028_v11 = vpop.eup %9878  ;;  %9898 = vpow2.f32 %v4785_v47  ;;  %9545 = vmatprep.subr.bf16.mxu0 %v9544_v49  ;;  %v16115_v47 = vld [vmem:[#allocation59_spill] sm:$0xff]  ;;  %v9546_v10 = vpack.c.bf16 %v14022_v0, %v14018_v21  ;;  %v4617_v48 = vsub.f32 %v16117_v7, %v13651_v34  ;;  %v4793_v14 = vmul.f32 1.442695, %v4615_v31  ;;  %v16119_v49 = vld [vmem:[#allocation177_spill] sm:$0xff] }
 0x4b2   :  { %16110 = vst [vmem:[#allocation150_spill] sm:$0xff] %v14028_v11  ;;  %v14034_v39 = vpop.eup %9880  ;;  %9900 = vpow2.f32 %v4787_v22  ;;  %v4634_v35 = vsub.f32 %v16115_v47, %v13651_v34  ;;  %v4618_v33 = vsub.f32 %v16119_v49, %v13651_v34  ;;  %v4795_v41 = vmul.f32 1.442695, %v4616_v12 }
 0x4b3   :  { %16112 = vst [vmem:[#allocation123_spill] sm:$0xff] %v14034_v39  ;;  %v14038_v53 = vpop.eup %9882  ;;  %9902 = vpow2.f32 %v4821_v55  ;;  %v9548_v40 = vpack.c.bf16 %v14034_v39, %v14028_v11  ;;  %v4635_v47 = vsub.f32 %v13587_v28, %v13651_v34  ;;  %v4829_v0 = vmul.f32 1.442695, %v4633_v15 }
 0x4b4   :  { %v14042_v24 = vpop.eup %9884  ;;  %9904 = vpow2.f32 %v4823_v58  ;;  %9547 = vmatpush3.bf16.msra.mxu0 %v9546_v10  ;;  %v4831_v7 = vmul.f32 1.442695, %v4634_v35  ;;  %v16122_v10 = vld [vmem:[#allocation179_spill] sm:$0xff]  ;;  %v4797_v39 = vmul.f32 1.442695, %v4617_v48  ;;  %v16125_v48 = vld [vmem:[#allocation54_spill] sm:$0xff] }
 0x4b5   :  { %v14048_v22 = vpop.eup %9886  ;;  %9906 = vpow2.f32 %v4789_v23  ;;  %9549 = vmatprep.subr.bf16.mxu0 %v9548_v40  ;;  %v4636_v23 = vsub.f32 %v13592_v51, %v13651_v34  ;;  %v9550_v12 = vpack.c.bf16 %v14042_v24, %v14038_v53  ;;  %v4619_v49 = vsub.f32 %v16122_v10, %v13651_v34 }
 0x4b6   :  { %16116 = vst [vmem:[#allocation125_spill] sm:$0xff] %v14048_v22  ;;  %v14054_v55 = vpop.eup %9888  ;;  %9908 = vpow2.f32 %v4791_v52  ;;  %v4799_v35 = vmul.f32 1.442695, %v4618_v33  ;;  %v4833_v10 = vmul.f32 1.442695, %v4635_v47  ;;  %v4638_v33 = vsub.f32 %v13558_v26, %v13651_v34  ;;  %v16127_v47 = vld [vmem:[#allocation178_spill] sm:$0xff] }
 0x4b7   :  { %16118 = vst [vmem:[#allocation152_spill] sm:$0xff] %v14054_v55  ;;  %v14058_v58 = vpop.eup %9890  ;;  %9910 = vpow2.f32 %v4825_v25  ;;  %v9552_v28 = vpack.c.bf16 %v14054_v55, %v14048_v22  ;;  %v16124_v25 = vld [vmem:[#allocation46_spill] sm:$0xff]  ;;  %v4879_v55 = vld [vmem:[%s15392_s10 + $0x50] sm:$0xff]  ;;  %v16129_v26 = vld [vmem:[#allocation48_spill] sm:$0xff] }
 0x4b8   :  { %v14062_v31 = vpop.eup %9892  ;;  %9912 = vpow2.f32 %v4827_v18  ;;  %v4620_v51 = vsub.f32 %v16124_v25, %v13651_v34  ;;  %9551 = vmatpush3.bf16.msra.mxu0 %v9550_v12  ;;  %v4871_v18 = vld [vmem:[%s15392_s10 + $0x10] sm:$0xff] }
 0x4b9   :  { %16120 = vst [vmem:[#allocation154_spill] sm:$0xff] %v14062_v31  ;;  %v14068_v52 = vpop.eup %9894  ;;  %9914 = vpow2.f32 %v4793_v14  ;;  %v4637_v14 = vsub.f32 %v16125_v48, %v13651_v34  ;;  %9553 = vmatprep.subr.bf16.mxu0 %v9552_v28  ;;  %v9554_v12 = vpack.c.bf16 %v14062_v31, %v14058_v58  ;;  %v4801_v28 = vmul.f32 1.442695, %v4619_v49  ;;  %v4878_v31 = vld [vmem:[%s15392_s10 + $0x48] sm:$0xff] }
 0x4ba   :  { %16121 = vst [vmem:[#allocation127_spill] sm:$0xff] %v14068_v52  ;;  %v14074_v15 = vpop.eup %9896  ;;  %9916 = vpow2.f32 %v4795_v41  ;;  %v4835_v41 = vmul.f32 1.442695, %v4636_v23  ;;  %v4622_v23 = vsub.f32 %v16129_v26, %v13651_v34 }
 0x4bb   :  { %16123 = vst [vmem:[#allocation129_spill] sm:$0xff] %v14074_v15  ;;  %v14081_v40 = vpop.eup %9898  ;;  %9918 = vpow2.f32 %v4829_v0  ;;  %v4621_v0 = vsub.f32 %v16127_v47, %v13651_v34  ;;  %5075 = vmatmul.mubr.f32.vlgmr.msra.gmra.mrb[90].mxu0 %v4871_v18  ;;  %v9556_v48 = vpack.c.bf16 %v14074_v15, %v14068_v52  ;;  %v4837_v49 = vmul.f32 1.442695, %v4637_v14  ;;  %v4886_v18 = vld [vmem:[%s15392_s10 + $0x88] sm:$0xff] }
 0x4bc   :  { %v14088_v25 = vpop.eup %9900  ;;  %9920 = vpow2.f32 %v4831_v7  ;;  %v4803_v7 = vmul.f32 1.442695, %v4620_v51  ;;  %9555 = vmatpush3.bf16.msra.mxu0 %v9554_v12  ;;  %5079 = vmatprep.mubr.f32.mxu0 %v4879_v55  ;;  %v4640_v55 = vsub.f32 %v13606_v20, %v13651_v34  ;;  %v4807_v52 = vmul.f32 1.442695, %v4622_v23  ;;  %v4885_v20 = vld [vmem:[%s15392_s10 + $0x80] sm:$0xff] }
 0x4bd   :  { %v14094_v22 = vpop.eup %9902  ;;  %9922 = vpow2.f32 %v4797_v39  ;;  %v4639_v39 = vsub.f32 %v13601_v3, %v13651_v34  ;;  %9557 = vmatprep.subr.bf16.mxu0 %v9556_v48  ;;  %v9558_v12 = vpack.c.bf16 %v14088_v25, %v14081_v40  ;;  %v4805_v3 = vmul.f32 1.442695, %v4621_v0  ;;  %v16132_v48 = vld [vmem:[#allocation50_spill] sm:$0xff] }
 0x4be   :  { %16126 = vst [vmem:[#allocation157_spill] sm:$0xff] %v14094_v22  ;;  %v14100_v11 = vpop.eup %9904  ;;  %9924 = vpow2.f32 %v4799_v35  ;;  %v4839_v35 = vmul.f32 1.442695, %v4638_v33  ;;  %v4623_v15 = vsub.f32 %v16132_v48, %v13651_v34 }
 0x4bf   :  { %16128 = vst [vmem:[#allocation159_spill] sm:$0xff] %v14100_v11  ;;  %v14107_v47 = vpop.eup %9906  ;;  %9926 = vpow2.f32 %v4833_v10  ;;  %v9560_v14 = vpack.c.bf16 %v14100_v11, %v14094_v22  ;;  %5080 = vmatmul.mubr.f32.gmra.mrb[92].mxu0 %v4878_v31  ;;  %v4893_v31 = vld [vmem:[%s15392_s10 + $0xc0] sm:$0xff] }
 0x4c0   :  { %v14114_v51 = vpop.eup %9908  ;;  %9928 = vpow2.f32 %v4835_v41  ;;  %9559 = vmatpush3.bf16.msra.mxu0 %v9558_v12  ;;  %5084 = vmatprep.mubr.f32.mxu0 %v4886_v18  ;;  %v16133_v41 = vld [vmem:[#allocation52_spill] sm:$0xff] }
 0x4c1   :  { %v14120_v26 = vpop.eup %9910  ;;  %9930 = vpow2.f32 %v4801_v28  ;;  %v4624_v0 = vsub.f32 %v16133_v41, %v13651_v34  ;;  %v4841_v28 = vmul.f32 1.442695, %v4639_v39  ;;  %9561 = vmatprep.subr.bf16.mxu0 %v9560_v14  ;;  %v9562_v18 = vpack.c.bf16 %v14114_v51, %v14107_v47 }
 0x4c2   :  { %16130 = vst [vmem:[#allocation131_spill] sm:$0xff] %v14120_v26  ;;  %v14124_v10 = vpop.eup %9912  ;;  %9932 = vpow2.f32 %v4803_v7  ;;  %v4843_v7 = vmul.f32 1.442695, %v4640_v55  ;;  %v4809_v41 = vmul.f32 1.442695, %v4623_v15  ;;  %v4892_v55 = vld [vmem:[%s15392_s10 + $0xb8] sm:$0xff] }
 0x4c3   :  { %16131 = vst [vmem:[#allocation133_spill] sm:$0xff] %v14124_v10  ;;  %v14131_v33 = vpop.eup %9914  ;;  %9934 = vpow2.f32 %v4837_v49  ;;  %v9564_v48 = vpack.c.bf16 %v14124_v10, %v14120_v26  ;;  %5085 = vmatmul.mubr.f32.gmra.mrb[94].mxu0 %v4885_v20  ;;  %v16136_v49 = vld [vmem:[#allocation69_spill] sm:$0xff]  ;;  %v4811_v10 = vmul.f32 1.442695, %v4624_v0  ;;  %v4900_v20 = vld [vmem:[%s15392_s10 + $0xf8] sm:$0xf]  ;;  %v4643_v0 = vsub.f32 %v13617_v19, %v13651_v34 }
 0x4c4   :  { %v14138_v23 = vpop.eup %9916  ;;  %9936 = vpow2.f32 %v4839_v35  ;;  %v4641_v14 = vsub.f32 %v16136_v49, %v13651_v34  ;;  %9563 = vmatpush3.bf16.msra.mxu0 %v9562_v18  ;;  %5089 = vmatprep.mubr.f32.mxu0 %v4893_v31  ;;  %v16141_v49 = vld [vmem:[#allocation95_spill] sm:$0xff]  ;;  %v4874_v19 = vld [vmem:[%s15392_s10 + $0x28] sm:$0xff] }
 0x4c5   :  { %v14142_v12 = vpop.eup %9918  ;;  %9938 = vpow2.f32 %v4805_v3  ;;  %v4642_v3 = vsub.f32 %v13572_v54, %v13651_v34  ;;  %9565 = vmatprep.subr.bf16.mxu0 %v9564_v48  ;;  %v4644_v26 = vsub.f32 %v16141_v49, %v13651_v34 }
 0x4c6   :  { %16134 = vst [vmem:[#allocation161_spill] sm:$0xff] %v14142_v12  ;;  %v14146_v39 = vpop.eup %9920  ;;  %9940 = vpow2.f32 %v4807_v52  ;;  %v9566_v52 = vpack.c.bf16 %v14138_v23, %v14131_v33 }
 0x4c7   :  { %16135 = vst [vmem:[#allocation163_spill] sm:$0xff] %v14146_v39  ;;  %v14153_v35 = vpop.eup %9922  ;;  %9942 = vpow2.f32 %v4841_v28  ;;  %v9568_v18 = vpack.c.bf16 %v14146_v39, %v14142_v12  ;;  %5090 = vmatmul.mubr.f32.gmra.mrb[96].mxu0 %v4892_v55  ;;  %v4845_v28 = vmul.f32 1.442695, %v4641_v14  ;;  %v4847_v39 = vmul.f32 1.442695, %v4642_v3  ;;  %v16147_v12 = vld [vmem:[#allocation63_spill] sm:$0xff] }
 0x4c8   :  { %v14160_v15 = vpop.eup %9924  ;;  %9944 = vpow2.f32 %v4843_v7  ;;  %9567 = vmatpush3.bf16.msra.mxu0 %v9566_v52  ;;  %5094 = vmatprep.mubr.f32.mxu0 %v4900_v20  ;;  %v4899_v7 = vld [vmem:[%s15392_s10 + $0xf0] sm:$0xf]  ;;  %v4646_v11 = vsub.f32 %v16147_v12, %v13651_v34  ;;  %v4851_v22 = vmul.f32 1.442695, %v4644_v26 }
 0x4c9   :  { %16137 = vst [vmem:[#allocation165_spill] sm:$0xff] %v14160_v15  ;;  %v14164_v31 = vpop.eup %9926  ;;  %9946 = vpow2.f32 %v4809_v41  ;;  %9569 = vmatprep.subr.bf16.mxu0 %v9568_v18  ;;  %v9570_v41 = vpack.c.bf16 %v14160_v15, %v14153_v35  ;;  %v4849_v18 = vmul.f32 1.442695, %v4643_v0 }
 0x4ca   :  { %16138 = vst [vmem:[#allocation167_spill] sm:$0xff] %v14164_v31  ;;  %v14168_v54 = vpop.eup %9928  ;;  %9948 = vpow2.f32 %v4811_v10  ;;  %v16145_v10 = vld [vmem:[#allocation61_spill] sm:$0xff]  ;;  %v4855_v26 = vmul.f32 1.442695, %v4646_v11 }
 0x4cb   :  { %16139 = vst [vmem:[#allocation180_spill] sm:$0xff] %v14168_v54  ;;  %v14175_v48 = vpop.eup %9930  ;;  %v9572_v20 = vpack.c.bf16 %v14168_v54, %v14164_v31  ;;  %5095 = vmatmul.mubr.f32.gmra.mrb[98].mxu0 %v4899_v7  ;;  %v4645_v3 = vsub.f32 %v16145_v10, %v13651_v34  ;;  %9950 = vpow2.f32 %v4845_v28 }
 0x4cc   :  { %16140 = vst [vmem:[#allocation169_spill] sm:$0xff] %v14175_v48  ;;  %v14182_v14 = vpop.eup %9932  ;;  %9571 = vmatpush3.bf16.msra.mxu0 %v9570_v41  ;;  %5164 = vmatprep.mubr.f32.mxu0 %v4874_v19  ;;  %9952 = vpow2.f32 %v4847_v39  ;;  %v16151_v19 = vld [vmem:[#allocation182_spill] sm:$0xff] }
 0x4cd   :  { %16142 = vst [vmem:[#allocation171_spill] sm:$0xff] %v14182_v14  ;;  %v14186_v55 = vpop.eup %9934  ;;  %9573 = vmatprep.subr.bf16.mxu0 %v9572_v20  ;;  %v9574_v7 = vpack.c.bf16 %v14182_v14, %v14175_v48  ;;  %v4647_v41 = vsub.f32 %v16151_v19, %v13651_v34  ;;  %v4853_v10 = vmul.f32 1.442695, %v4645_v3  ;;  %9954 = vpow2.f32 %v4849_v18 }
 0x4ce   :  { %16143 = vst [vmem:[#allocation173_spill] sm:$0xff] %v14186_v55  ;;  %v14190_v52 = vpop.eup %9936  ;;  %9956 = vpow2.f32 %v4851_v22  ;;  %v16154_v3 = vsub.f32 %v13631_v38, %v13651_v34  ;;  %v4873_v38 = vld [vmem:[%s15392_s10 + $0x20] sm:$0xff] }
 0x4cf   :  { %16144 = vst [vmem:[#allocation175_spill] sm:$0xff] %v14190_v52  ;;  %v14194_v49 = vpop.eup %9938  ;;  %v9576_v0 = vpack.c.bf16 %v14190_v52, %v14186_v55  ;;  %v4857_v55 = vmul.f32 1.442695, %v4647_v41  ;;  %9958 = vpow2.f32 %v4853_v10  ;;  %v16159_v10 = vmov 0.0|0.0  }
 0x4d0   :  { %16146 = vst [vmem:[#allocation181_spill] sm:$0xff] %v14194_v49  ;;  %v14198_v15 = vpop.eup %9940  ;;  %9575 = vmatpush3.bf16.msra.mxu0 %v9574_v7  ;;  %v4859_v18 = vmul.f32 1.442695, %v16154_v3  ;;  %9960 = vpow2.f32 %v4855_v26  ;;  %v4881_v26 = vld [vmem:[%s15392_s10 + $0x60] sm:$0xff]  ;;  %v16162_v3 = vsub.f32 %v13647_v13, %v13651_v34 }
 0x4d1   :  { %16148 = vst [vmem:[#allocation59_spill] sm:$0xff] %v14198_v15  ;;  %v14202_v54 = vpop.eup %9942  ;;  %9577 = vmatprep.subr.bf16.mxu0 %v9576_v0  ;;  %v9578_v39 = vpack.c.bf16 %v14198_v15, %v14194_v49  ;;  %v16157_v0 = vsub.f32 %v13596_v36, %v13651_v34  ;;  %9962 = vpow2.f32 %v4857_v55 }
 0x4d2   :  { %16149 = vst [vmem:[#allocation176_spill] sm:$0xff] %v14202_v54  ;;  %v14206_v28 = vpop.eup %9944  ;;  %9964 = vpow2.f32 %v4859_v18  ;;  %v4880_v18 = vld [vmem:[%s15392_s10 + $0x58] sm:$0xff] }
 0x4d3   :  { %16150 = vst [vmem:[#allocation177_spill] sm:$0xff] %v14206_v28  ;;  %v14210_v12 = vpop.eup %9946  ;;  %v9580_v52 = vpack.c.bf16 %v14206_v28, %v14202_v54  ;;  %v4861_v19 = vmul.f32 1.442695, %v16157_v0 }
 0x4d4   :  { %16152 = vst [vmem:[#allocation179_spill] sm:$0xff] %v14210_v12  ;;  %v14214_v20 = vpop.eup %9948  ;;  %9579 = vmatpush3.bf16.msra.mxu0 %v9578_v39 }
 0x4d5   :  { %16153 = vst [vmem:[#allocation46_spill] sm:$0xff] %v14214_v20  ;;  %9581 = vmatprep.subr.bf16.mxu0 %v9580_v52  ;;  %v14221_v11 = vpop.eup %9950  ;;  %v9582_v22 = vpack.c.bf16 %v14214_v20, %v14210_v12  ;;  %v16158_v52 = vsub.f32 %v13622_v57, %v13651_v34  ;;  %v4867_v57 = vmul.f32 1.442695, %v16162_v3  ;;  %9966 = vpow2.f32 %v4861_v19  ;;  %v4894_v3 = vld [vmem:[%s15392_s10 + $0xc8] sm:$0xff] }
 0x4d6   :  { %16155 = vst [vmem:[#allocation54_spill] sm:$0xff] %v14221_v11  ;;  %v14225_v7 = vpop.eup %9952 }
 0x4d7   :  { %16156 = vst [vmem:[#allocation178_spill] sm:$0xff] %v14225_v7  ;;  %v4863_v41 = vmul.f32 1.442695, %v16158_v52  ;;  %v14240_v39 = vpop.eup %9954  ;;  %v9585_v36 = vpack.c.bf16 %v14225_v7, %v14221_v11 }
 0x4d8   :  { %9583 = vmatpush3.bf16.msra.mxu0 %v9582_v22  ;;  %16160 = vst [vmem:[#allocation48_spill] sm:$0xff] %v14240_v39  ;;  %v14244_v55 = vpop.eup %9956  ;;  %v16163_v22 = vsub.f32 %v13639_v1, %v13651_v34  ;;  %v4887_v1 = vld [vmem:[%s15392_s10 + $0x90] sm:$0xff] }
 0x4d9   :  { %9584 = vmatprep.subr.bf16.mxu0 %v16159_v10  ;;  %16161 = vst [vmem:[#allocation50_spill] sm:$0xff] %v14244_v55  ;;  %9968 = vpow2.f32 %v4863_v41  ;;  %v14259_v13 = vpop.eup %9958  ;;  %v9588_v19 = vpack.c.bf16 %v14244_v55, %v14240_v39  ;;  %v4895_v34 = vld [vmem:[%s15392_s10 + $0xd0] sm:$0xff] }
 0x4da   :  { %v4865_v0 = vmul.f32 1.442695, %v16163_v22  ;;  %16164 = vst [vmem:[#allocation52_spill] sm:$0xff] %v14259_v13  ;;  %v14263_v52 = vpop.eup %9960  ;;  %9970 = vpow2.f32 %v4867_v57  ;;  %v4902_v57 = vld [vmem:[%s15392_s10 + $0x108] sm:$0xf] }
 0x4db   :  { %5165 = vmatmul.mubr.f32.vlgmr.msra.gmra.mrb[100].mxu0 %v4873_v38  ;;  %v4888_v38 = vld [vmem:[%s15392_s10 + $0x98] sm:$0xff]  ;;  %16165 = vst [vmem:[#allocation69_spill] sm:$0xff] %v14263_v52  ;;  %v14272_v41 = vpop.eup %9962 }
 0x4dc   :  { %9586 = vmatpush3.bf16.msra.mxu0 %v9585_v36  ;;  %5169 = vmatprep.mubr.f32.mxu0 %v4881_v26  ;;  %9972 = vpow2.f32 %v4865_v0  ;;  %16166 = vst [vmem:[#allocation95_spill] sm:$0xff] %v14272_v41  ;;  %v9591_v26 = vpack.c.bf16 %v14263_v52, %v14259_v13  ;;  %v14276_v36 = vpop.eup %9964 }
 0x4dd   :  { %9587 = vmatprep.subr.bf16.mxu0 %v16159_v10  ;;  %16167 = vst [vmem:[#allocation61_spill] sm:$0xff] %v14276_v36  ;;  %v9594_v22 = vpack.c.bf16 %v14276_v36, %v14272_v41 }
 0x4df   :  { %5170 = vmatmul.mubr.f32.gmra.mrb[102].mxu0 %v4880_v18  ;;  %v14285_v18 = vpop.eup %9966 }
 0x4e0   :  { %9589 = vmatpush3.bf16.msra.mxu0 %v9588_v19  ;;  %5174 = vmatprep.mubr.f32.mxu0 %v4888_v38  ;;  %16168 = vst [vmem:[#allocation63_spill] sm:$0xff] %v14285_v18  ;;  %v4901_v38 = vld [vmem:[%s15392_s10 + $0x100] sm:$0xf] }
 0x4e1   :  { %9590 = vmatprep.subr.bf16.mxu0 %v16159_v10 }
 0x4e3   :  { %5175 = vmatmul.mubr.f32.gmra.mrb[104].mxu0 %v4887_v1  ;;  %v14289_v0 = vpop.eup %9968 }
 0x4e4   :  { %9592 = vmatpush3.bf16.msra.mxu0 %v9591_v26  ;;  %5179 = vmatprep.mubr.f32.mxu0 %v4895_v34  ;;  %16169 = vst [vmem:[#allocation182_spill] sm:$0xff] %v14289_v0  ;;  %v14295_v19 = vpop.eup %9970  ;;  %v9597_v1 = vpack.c.bf16 %v14289_v0, %v14285_v18  ;;  %v16172_v26 = vmov 0.0  }
 0x4e5   :  { %9593 = vmatprep.subr.bf16.mxu0 %v16159_v10  ;;  %16170 = vst [vmem:[#allocation183_spill] sm:$0xff] %v14295_v19 }
 0x4e6   :  { %v14299_v34 = vpop.eup %9972 }
 0x4e7   :  { %5180 = vmatmul.mubr.f32.gmra.mrb[106].mxu0 %v4894_v3  ;;  %16171 = vst [vmem:[#allocation184_spill] sm:$0xff] %v14299_v34  ;;  %v9600_v3 = vpack.c.bf16 %v14295_v19, %v14299_v34 }
 0x4e8   :  { %9595 = vmatpush3.bf16.msra.mxu0 %v9594_v22  ;;  %5184 = vmatprep.mubr.f32.mxu0 %v4902_v57  ;;  %v4875_v57 = vld [vmem:[%s15392_s10 + $0x30] sm:$0xff]  ;;  %v4882_v22 = vld [vmem:[%s15392_s10 + $0x68] sm:$0xff] }
 0x4e9   :  { %9596 = vmatprep.subr.bf16.mxu0 %v16159_v10 }
 0x4eb   :  { %5185 = vmatmul.mubr.f32.gmra.mrb[108].mxu0 %v4901_v38  ;;  %v4889_v38 = vld [vmem:[%s15392_s10 + $0xa0] sm:$0xff] }
 0x4ec   :  { %9598 = vmatpush3.bf16.msra.mxu0 %v9597_v1  ;;  %9034 = vmatprep.mubr.msk.f32.mxu0 %vm10370_vm8, %v16172_v26  ;;  %v4896_v1 = vld [vmem:[%s15392_s10 + $0xd8] sm:$0xff] }
 0x4ed   :  { %9599 = vmatprep.subr.bf16.mxu0 %v16159_v10 }
 0x4f0   :  { %9601 = vmatpush3.bf16.msra.mxu0 %v9600_v3  ;;  %v4903_v3 = vld [vmem:[%s15392_s10 + $0x110] sm:$0xf] }
 0x4f3   :  { %9035 = vmatmul.mubr.msk.f32.vlgmr.msra.gmra.mrb[110].mxu0 %vm4904_vm9, %v4875_v57  ;;  %v10200_v57 = vld [vmem:[%s15391_s9] sm:$0xff] }
 0x4f4   :  { %9037 = vmatprep.mubr.msk.f32.mxu0 %vm10370_vm8, %v16172_v26 }
 0x4f7   :  { %9038 = vmatmul.mubr.msk.f32.gmra.mrb[112].mxu0 %vm4904_vm9, %v4882_v22 }
 0x4f8   :  { %9040 = vmatprep.mubr.msk.f32.mxu0 %vm10370_vm8, %v16172_v26 }
 0x4fb   :  { %9041 = vmatmul.mubr.msk.f32.gmra.mrb[114].mxu0 %vm4904_vm9, %v4889_v38 }
 0x4fc   :  { %9043 = vmatprep.mubr.msk.f32.mxu0 %vm10370_vm8, %v16172_v26 }
 0x4ff   :  { %9044 = vmatmul.mubr.msk.f32.gmra.mrb[116].mxu0 %vm4904_vm9, %v4896_v1 }
 0x500   :  { %9046 = vmatprep.mubr.msk.f32.mxu0 %vm10370_vm8, %v16172_v26 }
 0x503   :  { %9047 = vmatmul.mubr.msk.f32.gmra.mrb[118].mxu0 %vm4904_vm9, %v4903_v3 }
 0x504   :  { %9059 = vmatprep.mubr.msk.f32.mxu0 %vm2001_vm5, %v10200_v57 }
 0x56e   :  { %v8385_v22 = vpop.f32.mrb[80].mxu0 }
 0x56f   :  { %v8386_v38 = vpop.f32.mrb[81].mxu0 }
 0x570   :  { %v8387_v10 = vadd.f32 %v8386_v38, %v8385_v22 }
 0x572   :  { %v8388_v19 = vpop.f32.mrb[82].mxu0 }
 0x573   :  { %v8389_v1 = vpop.f32.mrb[83].mxu0 }
 0x574   :  { %v8390_v34 = vadd.f32 %v8389_v1, %v8388_v19 }
 0x576   :  { %v8391_v0 = vpop.f32.mrb[84].mxu0 }
 0x577   :  { %v8392_v18 = vpop.f32.mrb[85].mxu0 }
 0x578   :  { %v8393_v36 = vadd.f32 %v8392_v18, %v8391_v0 }
 0x57a   :  { %v8394_v41 = vpop.f32.mrb[86].mxu0 }
 0x57b   :  { %v8395_v52 = vpop.f32.mrb[87].mxu0 }
 0x57c   :  { %v8396_v13 = vadd.f32 %v8395_v52, %v8394_v41 }
 0x57e   :  { %v8397_v55 = vpop.f32.mrb[88].mxu0 }
 0x57f   :  { %v8398_v3 = vpop.f32.mrb[89].mxu0 }
 0x580   :  { %v8399_v39 = vadd.f32 %v8398_v3, %v8397_v55 }
 0x58e   :  { %v8432_v7 = vpop.f32.mrb[90].mxu0 }
 0x58f   :  { %v8433_v11 = vpop.f32.mrb[91].mxu0 }
 0x590   :  { %v8434_v28 = vadd.f32 %v8433_v11, %v8432_v7 }
 0x592   :  { %v5077_v54 = vadd.f32 %v8434_v28, %v8387_v10  ;;  %v8435_v57 = vpop.f32.mrb[92].mxu0 }
 0x593   :  { %v8436_v31 = vpop.f32.mrb[93].mxu0 }
 0x594   :  { %v8437_v20 = vadd.f32 %v8436_v31, %v8435_v57 }
 0x596   :  { %v5082_v22 = vadd.f32 %v8437_v20, %v8390_v34  ;;  %v8438_v38 = vpop.f32.mrb[94].mxu0 }
 0x597   :  { %v8439_v12 = vpop.f32.mrb[95].mxu0 }
 0x598   :  { %v8440_v19 = vadd.f32 %v8439_v12, %v8438_v38 }
 0x59a   :  { %v5087_v1 = vadd.f32 %v8440_v19, %v8393_v36  ;;  %v8441_v15 = vpop.f32.mrb[96].mxu0 }
 0x59b   :  { %v8442_v18 = vpop.f32.mrb[97].mxu0 }
 0x59c   :  { %v8443_v0 = vadd.f32 %v8442_v18, %v8441_v15 }
 0x59e   :  { %v5092_v49 = vadd.f32 %v8443_v0, %v8396_v13  ;;  %v8444_v52 = vpop.f32.mrb[98].mxu0 }
 0x59f   :  { %v8445_v41 = vpop.f32.mrb[99].mxu0 }
 0x5a0   :  { %v8446_v14 = vadd.f32 %v8445_v41, %v8444_v52 }
 0x5a2   :  { %v5097_v55 = vadd.f32 %v8446_v14, %v8399_v39 }
 0x5ae   :  { %v8479_v3 = vpop.f32.mrb[100].mxu0 }
 0x5af   :  { %v8480_v48 = vpop.f32.mrb[101].mxu0 }
 0x5b0   :  { %v8481_v11 = vadd.f32 %v8480_v48, %v8479_v3 }
 0x5b2   :  { %v8482_v28 = vpop.f32.mrb[102].mxu0  ;;  %v5167_v7 = vadd.f32 %v8481_v11, %v5077_v54 }
 0x5b3   :  { %v8483_v10 = vpop.f32.mrb[103].mxu0 }
 0x5b4   :  { %v8484_v31 = vadd.f32 %v8483_v10, %v8482_v28 }
 0x5b6   :  { %v8485_v20 = vpop.f32.mrb[104].mxu0  ;;  %v5172_v34 = vadd.f32 %v8484_v31, %v5082_v22 }
 0x5b7   :  { %v8486_v57 = vpop.f32.mrb[105].mxu0 }
 0x5b8   :  { %v8487_v12 = vadd.f32 %v8486_v57, %v8485_v20 }
 0x5ba   :  { %v8488_v36 = vpop.f32.mrb[106].mxu0  ;;  %v5177_v38 = vadd.f32 %v8487_v12, %v5087_v1 }
 0x5bb   :  { %v8489_v19 = vpop.f32.mrb[107].mxu0 }
 0x5bc   :  { %v8490_v15 = vadd.f32 %v8489_v19, %v8488_v36  ;;  %v10204_v19 = vld [vmem:[%s15391_s9 + $0x20] sm:$0xff] }
 0x5be   :  { %v8491_v13 = vpop.f32.mrb[108].mxu0  ;;  %v5182_v18 = vadd.f32 %v8490_v15, %v5092_v49  ;;  %v10205_v15 = vld [vmem:[%s15391_s9 + $0x28] sm:$0xff] }
 0x5bf   :  { %v8492_v0 = vpop.f32.mrb[109].mxu0 }
 0x5c0   :  { %v8493_v52 = vadd.f32 %v8492_v0, %v8491_v13  ;;  %v10206_v13 = vld [vmem:[%s15391_s9 + $0x30] sm:$0xff]  ;;  %v10208_v0 = vld [vmem:[%s15391_s9 + $0x40] sm:$0xff] }
 0x5c2   :  { %v5187_v14 = vadd.f32 %v8493_v52, %v5097_v55  ;;  %v10209_v52 = vld [vmem:[%s15391_s9 + $0x48] sm:$0xff] }
 0x5c6   :  { %v5256_v39 = vpop.f32.mrb[110].mxu0 }
 0x5c7   :  { %v5257_v41 = vadd.f32 %v5256_v39, %v5167_v7  ;;  %v9036_v48 = vpop.f32.mrb[111].mxu0  ;;  %v10201_v7 = vld [vmem:[%s15391_s9 + $0x8] sm:$0xff]  ;;  %v10211_v39 = vld [vmem:[%s15391_s9 + $0x58] sm:$0xff] }
 0x5c8   :  { %v10213_v48 = vld [vmem:[%s15391_s9 + $0x68] sm:$0xff] }
 0x5ca   :  { %v5261_v3 = vpop.f32.mrb[112].mxu0 }
 0x5cb   :  { %v5262_v54 = vadd.f32 %v5261_v3, %v5172_v34  ;;  %v9039_v11 = vpop.f32.mrb[113].mxu0  ;;  %v10202_v34 = vld [vmem:[%s15391_s9 + $0x10] sm:$0xff] }
 0x5cc   :  { %v10214_v3 = vld [vmem:[%s15391_s9 + $0x70] sm:$0xff]  ;;  %v10216_v11 = vld [vmem:[%s15391_s9 + $0x80] sm:$0xff] }
 0x5cd   :  { %v9602_v28 = vpack.c.bf16 %v5262_v54, %v5257_v41  ;;  %v10212_v41 = vld [vmem:[%s15391_s9 + $0x60] sm:$0xff]  ;;  %v10215_v54 = vld [vmem:[%s15391_s9 + $0x78] sm:$0xff] }
 0x5ce   :  { %v5266_v10 = vpop.f32.mrb[114].mxu0 }
 0x5cf   :  { %v5267_v22 = vadd.f32 %v5266_v10, %v5177_v38  ;;  %v9042_v31 = vpop.f32.mrb[115].mxu0  ;;  %9603 = vmatprep.subr.bf16.mxu0 %v9602_v28  ;;  %v10203_v38 = vld [vmem:[%s15391_s9 + $0x18] sm:$0xff]  ;;  %v10218_v10 = vld [vmem:[%s15391_s9 + $0x90] sm:$0xff] }
 0x5d0   :  { %9605 = vmatpush3.bf16.msra.mxu0 %v9602_v28  ;;  %v10217_v28 = vld [vmem:[%s15391_s9 + $0x88] sm:$0xff]  ;;  %v10220_v31 = vld [vmem:[%s15391_s9 + $0xa0] sm:$0xff] }
 0x5d2   :  { %v5271_v1 = vpop.f32.mrb[116].mxu0 }
 0x5d3   :  { %v5272_v20 = vadd.f32 %v5271_v1, %v5182_v18  ;;  %v9045_v57 = vpop.f32.mrb[117].mxu0  ;;  %v10207_v18 = vld [vmem:[%s15391_s9 + $0x38] sm:$0xff]  ;;  %v10221_v1 = vld [vmem:[%s15391_s9 + $0xa8] sm:$0xff] }
 0x5d4   :  { %v10223_v57 = vld [vmem:[%s15391_s9 + $0xb8] sm:$0xff] }
 0x5d5   :  { %v9606_v12 = vpack.c.bf16 %v5272_v20, %v5267_v22  ;;  %v10219_v22 = vld [vmem:[%s15391_s9 + $0x98] sm:$0xff]  ;;  %v10222_v20 = vld [vmem:[%s15391_s9 + $0xb0] sm:$0xff] }
 0x5d6   :  { %v5276_v49 = vpop.f32.mrb[118].mxu0 }
 0x5d7   :  { %9607 = vmatprep.subr.bf16.mxu0 %v9606_v12  ;;  %v5277_v36 = vadd.f32 %v5276_v49, %v5187_v14  ;;  %v9048_v55 = vpop.f32.mrb[119].mxu0  ;;  %v10210_v14 = vld [vmem:[%s15391_s9 + $0x50] sm:$0xff]  ;;  %v10225_v49 = vld [vmem:[%s15391_s9 + $0xc8] sm:$0xff] }
 0x5d8   :  { %9609 = vmatpush3.bf16.msra.mxu0 %v9606_v12  ;;  %v10224_v12 = vld [vmem:[%s15391_s9 + $0xc0] sm:$0xff]  ;;  %v10227_v55 = vld [vmem:[%s15391_s9 + $0xd8] sm:$0xff] }
 0x5d9   :  { %9057 = vmatprep.subr.msk.mxu0 %vm507_vm1, %v5277_v36 }
 0x5dc   :  { %9058 = vmatpush3.msk.msra.mxu0 %vm507_vm1, %v5277_v36  ;;  %v10226_v36 = vld [vmem:[%s15391_s9 + $0xd0] sm:$0xff] }
 0x5dd   :  { %9060 = vmatmul.mubr.msk.f32.vlgmr.msra.gmra.mrb[120].mxu0 %vm2001_vm5, %v10201_v7  ;;  %v10228_v7 = vld [vmem:[%s15391_s9 + $0xe0] sm:$0xff] }
 0x5de   :  { %9062 = vmatprep.mubr.msk.f32.mxu0 %vm2001_vm5, %v10202_v34  ;;  %v10229_v34 = vld [vmem:[%s15391_s9 + $0xe8] sm:$0xff] }
 0x5e1   :  { %9063 = vmatmul.mubr.msk.f32.gmra.mrb[122].mxu0 %vm2001_vm5, %v10203_v38  ;;  %v10230_v38 = vld [vmem:[%s15391_s9 + $0xf0] sm:$0xff] }
 0x5e2   :  { %9065 = vmatprep.mubr.msk.f32.mxu0 %vm2001_vm5, %v10204_v19  ;;  %v10231_v19 = vld [vmem:[%s15391_s9 + $0xf8] sm:$0xff] }
 0x5e5   :  { %9066 = vmatmul.mubr.msk.f32.gmra.mrb[124].mxu0 %vm2001_vm5, %v10205_v15  ;;  %v10232_v15 = vld [vmem:[%s15391_s9 + $0x100] sm:$0xff] }
 0x5e6   :  { %9068 = vmatprep.mubr.msk.f32.mxu0 %vm2001_vm5, %v10206_v13  ;;  %v10233_v13 = vld [vmem:[%s15391_s9 + $0x108] sm:$0xff] }
 0x5e9   :  { %9069 = vmatmul.mubr.msk.f32.gmra.mrb[126].mxu0 %vm2001_vm5, %v10207_v18  ;;  %v6104_v18 = vld [vmem:[%s15390_s8] sm:$0xff] }
 0x5ea   :  { %9071 = vmatprep.mubr.msk.f32.mxu0 %vm2001_vm5, %v10208_v0  ;;  %v6105_v0 = vld [vmem:[%s15390_s8 + $0x8] sm:$0xf] }
 0x5ed   :  { %9072 = vmatmul.mubr.msk.f32.gmra.mrb[128].mxu0 %vm2001_vm5, %v10209_v52  ;;  %v10234_v52 = vld [vmem:[%s15391_s9 + $0x110] sm:$0xff] }
 0x5ee   :  { %9074 = vmatprep.mubr.msk.f32.mxu0 %vm2001_vm5, %v10210_v14  ;;  %v9610_v14 = vpack.c.bf16 %v6105_v0, %v6104_v18  ;;  %v10258_v18 = vld [vmem:[%s15391_s9 + $0x1d0] sm:$0xff]  ;;  %v10259_v0 = vld [vmem:[%s15391_s9 + $0x1d8] sm:$0xff] }
 0x5f0   :  { %9612 = vmatprep.subr.msk.bf16.mxu1 %vm9611_vm11, %v9610_v14 }
 0x5f1   :  { %9075 = vmatmul.mubr.msk.f32.gmra.mrb[130].mxu0 %vm2001_vm5, %v10211_v39  ;;  %v10235_v39 = vld [vmem:[%s15391_s9 + $0x118] sm:$0xff]  ;;  %9615 = vmatpush3.bf16.msk.msra.mxu1 %vm9611_vm11, %v9610_v14  ;;  %v10261_v14 = vld [vmem:[%s15391_s9 + $0x1e8] sm:$0xff] }
 0x5f2   :  { %9077 = vmatprep.mubr.msk.f32.mxu0 %vm2001_vm5, %v10212_v41  ;;  %v10236_v41 = vld [vmem:[%s15391_s9 + $0x120] sm:$0xff]  ;;  %9426 = vmatprep.subr.bf16.mxu1 %v16172_v26 }
 0x5f5   :  { %9078 = vmatmul.mubr.msk.f32.gmra.mrb[132].mxu0 %vm2001_vm5, %v10213_v48  ;;  %v10237_v48 = vld [vmem:[%s15391_s9 + $0x128] sm:$0xff] }
 0x5f6   :  { %9080 = vmatprep.mubr.msk.f32.mxu0 %vm2001_vm5, %v10214_v3  ;;  %v10238_v3 = vld [vmem:[%s15391_s9 + $0x130] sm:$0xff] }
 0x5f9   :  { %9081 = vmatmul.mubr.msk.f32.gmra.mrb[134].mxu0 %vm2001_vm5, %v10215_v54  ;;  %v10239_v54 = vld [vmem:[%s15391_s9 + $0x138] sm:$0xff] }
 0x5fa   :  { %9083 = vmatprep.mubr.msk.f32.mxu0 %vm2001_vm5, %v10216_v11  ;;  %v10240_v11 = vld [vmem:[%s15391_s9 + $0x140] sm:$0xff] }
 0x5fd   :  { %9084 = vmatmul.mubr.msk.f32.gmra.mrb[136].mxu0 %vm2001_vm5, %v10217_v28  ;;  %v10241_v28 = vld [vmem:[%s15391_s9 + $0x148] sm:$0xff] }
 0x5fe   :  { %9086 = vmatprep.mubr.msk.f32.mxu0 %vm2001_vm5, %v10218_v10  ;;  %v10242_v10 = vld [vmem:[%s15391_s9 + $0x150] sm:$0xff] }
 0x601   :  { %9087 = vmatmul.mubr.msk.f32.gmra.mrb[138].mxu0 %vm2001_vm5, %v10219_v22  ;;  %v10243_v22 = vld [vmem:[%s15391_s9 + $0x158] sm:$0xff] }
 0x602   :  { %9089 = vmatprep.mubr.msk.f32.mxu0 %vm2001_vm5, %v10220_v31  ;;  %v10244_v31 = vld [vmem:[%s15391_s9 + $0x160] sm:$0xff] }
 0x605   :  { %9090 = vmatmul.mubr.msk.f32.gmra.mrb[140].mxu0 %vm2001_vm5, %v10221_v1  ;;  %v10245_v1 = vld [vmem:[%s15391_s9 + $0x168] sm:$0xff] }
 0x606   :  { %9092 = vmatprep.mubr.msk.f32.mxu0 %vm2001_vm5, %v10222_v20  ;;  %v10246_v20 = vld [vmem:[%s15391_s9 + $0x170] sm:$0xff] }
 0x609   :  { %9093 = vmatmul.mubr.msk.f32.gmra.mrb[142].mxu0 %vm2001_vm5, %v10223_v57  ;;  %v10247_v57 = vld [vmem:[%s15391_s9 + $0x178] sm:$0xff] }
 0x60a   :  { %9095 = vmatprep.mubr.msk.f32.mxu0 %vm2001_vm5, %v10224_v12  ;;  %v10248_v12 = vld [vmem:[%s15391_s9 + $0x180] sm:$0xff] }
 0x60d   :  { %9096 = vmatmul.mubr.msk.f32.gmra.mrb[144].mxu0 %vm2001_vm5, %v10225_v49  ;;  %v10249_v49 = vld [vmem:[%s15391_s9 + $0x188] sm:$0xff] }
 0x60e   :  { %9098 = vmatprep.mubr.msk.f32.mxu0 %vm2001_vm5, %v10226_v36  ;;  %v10250_v36 = vld [vmem:[%s15391_s9 + $0x190] sm:$0xff] }
 0x611   :  { %9099 = vmatmul.mubr.msk.f32.gmra.mrb[146].mxu0 %vm2001_vm5, %v10227_v55  ;;  %v10251_v55 = vld [vmem:[%s15391_s9 + $0x198] sm:$0xff] }
 0x612   :  { %9101 = vmatprep.mubr.msk.f32.mxu0 %vm2001_vm5, %v10228_v7  ;;  %v10252_v7 = vld [vmem:[%s15391_s9 + $0x1a0] sm:$0xff] }
 0x615   :  { %9102 = vmatmul.mubr.msk.f32.gmra.mrb[148].mxu0 %vm2001_vm5, %v10229_v34  ;;  %v10253_v34 = vld [vmem:[%s15391_s9 + $0x1a8] sm:$0xff] }
 0x616   :  { %9104 = vmatprep.mubr.msk.f32.mxu0 %vm2001_vm5, %v10230_v38  ;;  %v10254_v38 = vld [vmem:[%s15391_s9 + $0x1b0] sm:$0xff] }
 0x619   :  { %9105 = vmatmul.mubr.msk.f32.gmra.mrb[150].mxu0 %vm2001_vm5, %v10231_v19  ;;  %v10255_v19 = vld [vmem:[%s15391_s9 + $0x1b8] sm:$0xff] }
 0x61a   :  { %9107 = vmatprep.mubr.msk.f32.mxu0 %vm2001_vm5, %v10232_v15  ;;  %v10256_v15 = vld [vmem:[%s15391_s9 + $0x1c0] sm:$0xff] }
 0x61d   :  { %9108 = vmatmul.mubr.msk.f32.gmra.mrb[152].mxu0 %vm2001_vm5, %v10233_v13  ;;  %v10257_v13 = vld [vmem:[%s15391_s9 + $0x1c8] sm:$0xff] }
 0x61e   :  { %9110 = vmatprep.mubr.msk.f32.mxu0 %vm2001_vm5, %v10234_v52  ;;  %v10260_v52 = vld [vmem:[%s15391_s9 + $0x1e0] sm:$0xff] }
 0x621   :  { %9111 = vmatmul.mubr.msk.f32.gmra.mrb[154].mxu0 %vm2001_vm5, %v10235_v39  ;;  %v10262_v39 = vld [vmem:[%s15391_s9 + $0x1f0] sm:$0xff] }
 0x622   :  { %9113 = vmatprep.mubr.msk.f32.mxu0 %vm2001_vm5, %v10236_v41  ;;  %v10263_v41 = vld [vmem:[%s15391_s9 + $0x1f8] sm:$0xff] }
 0x625   :  { %9114 = vmatmul.mubr.msk.f32.gmra.mrb[156].mxu0 %vm2001_vm5, %v10237_v48  ;;  %v10264_v48 = vld [vmem:[%s15391_s9 + $0x200] sm:$0xff] }
 0x626   :  { %9116 = vmatprep.mubr.msk.f32.mxu0 %vm2001_vm5, %v10238_v3  ;;  %v10265_v3 = vld [vmem:[%s15391_s9 + $0x208] sm:$0xff] }
 0x629   :  { %9117 = vmatmul.mubr.msk.f32.gmra.mrb[158].mxu0 %vm2001_vm5, %v10239_v54  ;;  %v10266_v54 = vld [vmem:[%s15391_s9 + $0x210] sm:$0xff] }
 0x62a   :  { %9119 = vmatprep.mubr.msk.f32.mxu0 %vm2001_vm5, %v10240_v11  ;;  %v10267_v11 = vld [vmem:[%s15391_s9 + $0x218] sm:$0xff] }
 0x62d   :  { %9120 = vmatmul.mubr.msk.f32.gmra.mrb[160].mxu0 %vm2001_vm5, %v10241_v28  ;;  %v10268_v28 = vld [vmem:[%s15391_s9 + $0x220] sm:$0xff] }
 0x62e   :  { %9122 = vmatprep.mubr.msk.f32.mxu0 %vm2001_vm5, %v10242_v10  ;;  %v10269_v10 = vld [vmem:[%s15391_s9 + $0x228] sm:$0xff] }
 0x631   :  { %9123 = vmatmul.mubr.msk.f32.gmra.mrb[162].mxu0 %vm2001_vm5, %v10243_v22  ;;  %v10270_v22 = vld [vmem:[%s15391_s9 + $0x230] sm:$0xff] }
 0x632   :  { %9125 = vmatprep.mubr.msk.f32.mxu0 %vm2001_vm5, %v10244_v31  ;;  %v10271_v31 = vld [vmem:[%s15391_s9 + $0x238] sm:$0xff] }
 0x635   :  { %9126 = vmatmul.mubr.msk.f32.gmra.mrb[164].mxu0 %vm2001_vm5, %v10245_v1  ;;  %v10272_v1 = vld [vmem:[%s15391_s9 + $0x240] sm:$0xff] }
 0x636   :  { %9128 = vmatprep.mubr.msk.f32.mxu0 %vm2001_vm5, %v10246_v20  ;;  %v10273_v20 = vld [vmem:[%s15391_s9 + $0x248] sm:$0xff] }
 0x639   :  { %9129 = vmatmul.mubr.msk.f32.gmra.mrb[166].mxu0 %vm2001_vm5, %v10247_v57  ;;  %v10274_v57 = vld [vmem:[%s15391_s9 + $0x250] sm:$0xff] }
 0x63a   :  { %9131 = vmatprep.mubr.msk.f32.mxu0 %vm2001_vm5, %v10248_v12  ;;  %v10275_v12 = vld [vmem:[%s15391_s9 + $0x258] sm:$0xff] }
 0x63d   :  { %9132 = vmatmul.mubr.msk.f32.gmra.mrb[168].mxu0 %vm2001_vm5, %v10249_v49  ;;  %v10276_v49 = vld [vmem:[%s15391_s9 + $0x260] sm:$0xff] }
 0x63e   :  { %9134 = vmatprep.mubr.msk.f32.mxu0 %vm2001_vm5, %v10250_v36  ;;  %v10277_v36 = vld [vmem:[%s15391_s9 + $0x268] sm:$0xff] }
 0x641   :  { %9135 = vmatmul.mubr.msk.f32.gmra.mrb[170].mxu0 %vm2001_vm5, %v10251_v55  ;;  %v10278_v55 = vld [vmem:[%s15391_s9 + $0x270] sm:$0xff] }
 0x642   :  { %9137 = vmatprep.mubr.msk.f32.mxu0 %vm2001_vm5, %v10252_v7  ;;  %v10279_v7 = vld [vmem:[%s15391_s9 + $0x278] sm:$0xff] }
 0x645   :  { %9138 = vmatmul.mubr.msk.f32.gmra.mrb[172].mxu0 %vm2001_vm5, %v10253_v34  ;;  %v10280_v34 = vld [vmem:[%s15391_s9 + $0x280] sm:$0xff] }
 0x646   :  { %9140 = vmatprep.mubr.msk.f32.mxu0 %vm2001_vm5, %v10254_v38  ;;  %v10281_v38 = vld [vmem:[%s15391_s9 + $0x288] sm:$0xff] }
 0x649   :  { %9141 = vmatmul.mubr.msk.f32.gmra.mrb[174].mxu0 %vm2001_vm5, %v10255_v19  ;;  %v10282_v19 = vld [vmem:[%s15391_s9 + $0x290] sm:$0xff] }
 0x64a   :  { %9143 = vmatprep.mubr.msk.f32.mxu0 %vm2001_vm5, %v10256_v15  ;;  %v10283_v15 = vld [vmem:[%s15391_s9 + $0x298] sm:$0xff] }
 0x64d   :  { %9144 = vmatmul.mubr.msk.f32.gmra.mrb[176].mxu0 %vm2001_vm5, %v10257_v13  ;;  %v10284_v13 = vld [vmem:[%s15391_s9 + $0x2a0] sm:$0xff] }
 0x64e   :  { %9146 = vmatprep.mubr.msk.f32.mxu0 %vm2001_vm5, %v10258_v18  ;;  %v10285_v18 = vld [vmem:[%s15391_s9 + $0x2a8] sm:$0xff] }
 0x651   :  { %9147 = vmatmul.mubr.msk.f32.gmra.mrb[178].mxu0 %vm2001_vm5, %v10259_v0  ;;  %v10286_v0 = vld [vmem:[%s15391_s9 + $0x2b0] sm:$0xff] }
 0x652   :  { %9149 = vmatprep.mubr.msk.f32.mxu0 %vm2001_vm5, %v10260_v52  ;;  %v10287_v52 = vld [vmem:[%s15391_s9 + $0x2b8] sm:$0xff] }
 0x655   :  { %9150 = vmatmul.mubr.msk.f32.gmra.mrb[180].mxu0 %vm2001_vm5, %v10261_v14  ;;  %v10288_v14 = vld [vmem:[%s15391_s9 + $0x2c0] sm:$0xff] }
 0x656   :  { %9152 = vmatprep.mubr.msk.f32.mxu0 %vm2001_vm5, %v10262_v39  ;;  %v10289_v39 = vld [vmem:[%s15391_s9 + $0x2c8] sm:$0xff] }
 0x659   :  { %9153 = vmatmul.mubr.msk.f32.gmra.mrb[182].mxu0 %vm2001_vm5, %v10263_v41  ;;  %v10290_v41 = vld [vmem:[%s15391_s9 + $0x2d0] sm:$0xff] }
 0x65a   :  { %9155 = vmatprep.mubr.msk.f32.mxu0 %vm2001_vm5, %v10264_v48  ;;  %v10291_v48 = vld [vmem:[%s15391_s9 + $0x2d8] sm:$0xff] }
 0x65d   :  { %9156 = vmatmul.mubr.msk.f32.gmra.mrb[184].mxu0 %vm2001_vm5, %v10265_v3  ;;  %v10292_v3 = vld [vmem:[%s15391_s9 + $0x2e0] sm:$0xff] }
 0x65e   :  { %9158 = vmatprep.mubr.msk.f32.mxu0 %vm2001_vm5, %v10266_v54  ;;  %v10293_v54 = vld [vmem:[%s15391_s9 + $0x2e8] sm:$0xff] }
 0x661   :  { %9159 = vmatmul.mubr.msk.f32.gmra.mrb[186].mxu0 %vm2001_vm5, %v10267_v11  ;;  %v10294_v11 = vld [vmem:[%s15391_s9 + $0x2f0] sm:$0xff] }
 0x662   :  { %9161 = vmatprep.mubr.msk.f32.mxu0 %vm2001_vm5, %v10268_v28  ;;  %v10295_v28 = vld [vmem:[%s15391_s9 + $0x2f8] sm:$0xff] }
 0x665   :  { %9162 = vmatmul.mubr.msk.f32.gmra.mrb[188].mxu0 %vm2001_vm5, %v10269_v10  ;;  %v10296_v10 = vld [vmem:[%s15391_s9 + $0x300] sm:$0xff] }
 0x666   :  { %9164 = vmatprep.mubr.msk.f32.mxu0 %vm2001_vm5, %v10270_v22  ;;  %v10297_v22 = vld [vmem:[%s15391_s9 + $0x308] sm:$0xff] }
 0x669   :  { %9165 = vmatmul.mubr.msk.f32.gmra.mrb[190].mxu0 %vm2001_vm5, %v10271_v31  ;;  %v10298_v31 = vld [vmem:[%s15391_s9 + $0x310] sm:$0xff] }
 0x66a   :  { %9167 = vmatprep.mubr.msk.f32.mxu0 %vm2001_vm5, %v10272_v1  ;;  %v10299_v1 = vld [vmem:[%s15391_s9 + $0x318] sm:$0xff] }
 0x66d   :  { %9168 = vmatmul.mubr.msk.f32.gmra.mrb[192].mxu0 %vm2001_vm5, %v10273_v20  ;;  %v10300_v20 = vld [vmem:[%s15391_s9 + $0x320] sm:$0xff] }
 0x66e   :  { %9170 = vmatprep.mubr.msk.f32.mxu0 %vm2001_vm5, %v10274_v57  ;;  %v10301_v57 = vld [vmem:[%s15391_s9 + $0x328] sm:$0xff] }
 0x671   :  { %9171 = vmatmul.mubr.msk.f32.gmra.mrb[194].mxu0 %vm2001_vm5, %v10275_v12  ;;  %v10302_v12 = vld [vmem:[%s15391_s9 + $0x330] sm:$0xff] }
 0x672   :  { %9173 = vmatprep.mubr.msk.f32.mxu0 %vm2001_vm5, %v10276_v49  ;;  %v10303_v49 = vld [vmem:[%s15391_s9 + $0x338] sm:$0xff] }
 0x675   :  { %9174 = vmatmul.mubr.msk.f32.gmra.mrb[196].mxu0 %vm2001_vm5, %v10277_v36  ;;  %v10304_v36 = vld [vmem:[%s15391_s9 + $0x340] sm:$0xff] }
 0x676   :  { %9176 = vmatprep.mubr.msk.f32.mxu0 %vm2001_vm5, %v10278_v55  ;;  %v10305_v55 = vld [vmem:[%s15391_s9 + $0x348] sm:$0xff] }
 0x679   :  { %9177 = vmatmul.mubr.msk.f32.gmra.mrb[198].mxu0 %vm2001_vm5, %v10279_v7  ;;  %v10306_v7 = vld [vmem:[%s15391_s9 + $0x350] sm:$0xff] }
 0x67a   :  { %9179 = vmatprep.mubr.msk.f32.mxu0 %vm2001_vm5, %v10280_v34 }
 0x67d   :  { %9180 = vmatmul.mubr.msk.f32.gmra.mrb[200].mxu0 %vm2001_vm5, %v10281_v38 }
 0x67e   :  { %9182 = vmatprep.mubr.msk.f32.mxu0 %vm2001_vm5, %v10282_v19  ;;  %v10307_v19 = vld [vmem:[%s15391_s9 + $0x358] sm:$0xff] }
 0x681   :  { %9183 = vmatmul.mubr.msk.f32.gmra.mrb[202].mxu0 %vm2001_vm5, %v10283_v15  ;;  %v10308_v15 = vld [vmem:[%s15392_s10 + $0x8] sm:$0xff] }
 0x682   :  { %9185 = vmatprep.mubr.msk.f32.mxu0 %vm2001_vm5, %v10284_v13 }
 0x685   :  { %9186 = vmatmul.mubr.msk.f32.gmra.mrb[204].mxu0 %vm2001_vm5, %v10285_v18 }
 0x686   :  { %9188 = vmatprep.mubr.msk.f32.mxu0 %vm2001_vm5, %v10286_v0 }
 0x689   :  { %9189 = vmatmul.mubr.msk.f32.gmra.mrb[206].mxu0 %vm2001_vm5, %v10287_v52 }
 0x68a   :  { %9191 = vmatprep.mubr.msk.f32.mxu0 %vm2001_vm5, %v10288_v14 }
 0x68d   :  { %9192 = vmatmul.mubr.msk.f32.gmra.mrb[208].mxu0 %vm2001_vm5, %v10289_v39 }
 0x68e   :  { %9194 = vmatprep.mubr.msk.f32.mxu0 %vm2001_vm5, %v10290_v41 }
 0x691   :  { %9195 = vmatmul.mubr.msk.f32.gmra.mrb[210].mxu0 %vm2001_vm5, %v10291_v48 }
 0x692   :  { %9197 = vmatprep.mubr.msk.f32.mxu0 %vm2001_vm5, %v10292_v3 }
 0x695   :  { %9198 = vmatmul.mubr.msk.f32.gmra.mrb[212].mxu0 %vm2001_vm5, %v10293_v54 }
 0x696   :  { %9200 = vmatprep.mubr.msk.f32.mxu0 %vm2001_vm5, %v10294_v11 }
 0x699   :  { %9201 = vmatmul.mubr.msk.f32.gmra.mrb[214].mxu0 %vm2001_vm5, %v10295_v28 }
 0x69a   :  { %9203 = vmatprep.mubr.msk.f32.mxu0 %vm2001_vm5, %v10296_v10 }
 0x69d   :  { %9204 = vmatmul.mubr.msk.f32.gmra.mrb[216].mxu0 %vm2001_vm5, %v10297_v22 }
 0x69e   :  { %9206 = vmatprep.mubr.msk.f32.mxu0 %vm2001_vm5, %v10298_v31 }
 0x6a1   :  { %9207 = vmatmul.mubr.msk.f32.gmra.mrb[218].mxu0 %vm2001_vm5, %v10299_v1 }
 0x6a2   :  { %9209 = vmatprep.mubr.msk.f32.mxu0 %vm2001_vm5, %v10300_v20 }
 0x6a5   :  { %9210 = vmatmul.mubr.msk.f32.gmra.mrb[220].mxu0 %vm2001_vm5, %v10301_v57 }
 0x6a6   :  { %9212 = vmatprep.mubr.msk.f32.mxu0 %vm2001_vm5, %v10302_v12 }
 0x6a9   :  { %9213 = vmatmul.mubr.msk.f32.gmra.mrb[222].mxu0 %vm2001_vm5, %v10303_v49 }
 0x6aa   :  { %9215 = vmatprep.mubr.msk.f32.mxu0 %vm2001_vm5, %v10304_v36 }
 0x6ad   :  { %9216 = vmatmul.mubr.msk.f32.gmra.mrb[224].mxu0 %vm2001_vm5, %v10305_v55 }
 0x6ae   :  { %9218 = vmatprep.mubr.msk.f32.mxu0 %vm2001_vm5, %v10306_v7 }
 0x6b0   :  { %v9061_v34 = vpop.f32.mrb[120].mxu0 }
 0x6b1   :  { %9974 = vrcp.f32 %v9061_v34  ;;  %v5349_v38 = vpop.f32.mrb[121].mxu0  ;;  %9219 = vmatmul.mubr.msk.f32.gmra.mrb[226].mxu0 %vm2001_vm5, %v10307_v19 }
 0x6b2   :  { %9976 = vrcp.f32 %v5349_v38  ;;  %7210 = vmatprep.mubr.f32.mxu0 %v10308_v15 }
 0x6b4   :  { %v9064_v13 = vpop.f32.mrb[122].mxu0 }
 0x6b5   :  { %9978 = vrcp.f32 %v9064_v13  ;;  %v5359_v18 = vpop.f32.mrb[123].mxu0 }
 0x6b6   :  { %9980 = vrcp.f32 %v5359_v18 }
 0x6b8   :  { %v9067_v0 = vpop.f32.mrb[124].mxu0 }
 0x6b9   :  { %9982 = vrcp.f32 %v9067_v0  ;;  %v5369_v52 = vpop.f32.mrb[125].mxu0 }
 0x6ba   :  { %9984 = vrcp.f32 %v5369_v52 }
 0x6bb   :  { %v9975_v14 = vpop.eup %9974 }
 0x6bc   :  { %v9977_v39 = vpop.eup %9976  ;;  %v9070_v41 = vpop.f32.mrb[126].mxu0  ;;  %v5891_v54 = vmul.f32 %v9975_v14, %v13706_v62 }
 0x6bd   :  { %9986 = vrcp.f32 %v9070_v41  ;;  %v5379_v48 = vpop.f32.mrb[127].mxu0  ;;  %v5889_v3 = vmul.f32 %v9977_v39, %v13702_v32 }
 0x6be   :  { %9988 = vrcp.f32 %v5379_v48 }
 0x6bf   :  { %v9979_v11 = vpop.eup %9978  ;;  %9225 = vmatprep.mubr.msk.f32.mxu1 %vm4323_vm7, %v5889_v3 }
 0x6c0   :  { %v9981_v28 = vpop.eup %9980  ;;  %v9073_v10 = vpop.f32.mrb[128].mxu0  ;;  %9226 = vmatmul.mubr.msk.f32.vlgmr.msra.gmra.mrb[176].mxu1 %vm4323_vm7, %v5891_v54  ;;  %v5895_v1 = vmul.f32 %v9979_v11, %v13734_v8 }
 0x6c1   :  { %9990 = vrcp.f32 %v9073_v10  ;;  %v5389_v22 = vpop.f32.mrb[129].mxu0  ;;  %v5893_v31 = vmul.f32 %v9981_v28, %v13728_v30 }
 0x6c2   :  { %9992 = vrcp.f32 %v5389_v22 }
 0x6c3   :  { %v9983_v20 = vpop.eup %9982  ;;  %9228 = vmatprep.mubr.msk.f32.mxu1 %vm4323_vm7, %v5893_v31 }
 0x6c4   :  { %v9985_v32 = vpop.eup %9984  ;;  %v9076_v62 = vpop.f32.mrb[130].mxu0  ;;  %9229 = vmatmul.mubr.msk.f32.gmra.mrb[178].mxu1 %vm4323_vm7, %v5895_v1  ;;  %v5899_v49 = vmul.f32 %v9983_v20, %v13752_v29 }
 0x6c5   :  { %9994 = vrcp.f32 %v9076_v62  ;;  %v5399_v57 = vpop.f32.mrb[131].mxu0  ;;  %v5897_v12 = vmul.f32 %v9985_v32, %v13748_v43 }
 0x6c6   :  { %9996 = vrcp.f32 %v5399_v57  ;;  %v16173_v57 = vld [vmem:[#allocation71_spill] sm:$0xff] }
 0x6c7   :  { %v9987_v36 = vpop.eup %9986  ;;  %9231 = vmatprep.mubr.msk.f32.mxu1 %vm4323_vm7, %v5897_v12 }
 0x6c8   :  { %v9989_v30 = vpop.eup %9988  ;;  %v9079_v8 = vpop.f32.mrb[132].mxu0  ;;  %9232 = vmatmul.mubr.msk.f32.gmra.mrb[180].mxu1 %vm4323_vm7, %v5899_v49  ;;  %v5903_v34 = vmul.f32 %v9987_v36, %v13772_v50  ;;  %v16174_v49 = vld [vmem:[#allocation65_spill] sm:$0xff] }
 0x6c9   :  { %9998 = vrcp.f32 %v9079_v8  ;;  %v5409_v55 = vpop.f32.mrb[133].mxu0  ;;  %v5901_v7 = vmul.f32 %v9989_v30, %v13768_v56 }
 0x6ca   :  { %10000 = vrcp.f32 %v5409_v55  ;;  %v16175_v55 = vld [vmem:[#allocation67_spill] sm:$0xff] }
 0x6cb   :  { %v9991_v38 = vpop.eup %9990  ;;  %9234 = vmatprep.mubr.msk.f32.mxu1 %vm4323_vm7, %v5901_v7 }
 0x6cc   :  { %v9993_v43 = vpop.eup %9992  ;;  %v9082_v29 = vpop.f32.mrb[134].mxu0  ;;  %9235 = vmatmul.mubr.msk.f32.gmra.mrb[182].mxu1 %vm4323_vm7, %v5903_v34  ;;  %v5907_v13 = vmul.f32 %v9991_v38, %v13792_v6  ;;  %v16176_v34 = vld [vmem:[#allocation73_spill] sm:$0xff] }
 0x6cd   :  { %10002 = vrcp.f32 %v9082_v29  ;;  %v5419_v19 = vpop.f32.mrb[135].mxu0  ;;  %v5905_v15 = vmul.f32 %v9993_v43, %v13788_v42 }
 0x6ce   :  { %10004 = vrcp.f32 %v5419_v19 }
 0x6cf   :  { %v9995_v18 = vpop.eup %9994  ;;  %9237 = vmatprep.mubr.msk.f32.mxu1 %vm4323_vm7, %v5905_v15 }
 0x6d0   :  { %v9997_v56 = vpop.eup %9996  ;;  %v9085_v50 = vpop.f32.mrb[136].mxu0  ;;  %9238 = vmatmul.mubr.msk.f32.gmra.mrb[184].mxu1 %vm4323_vm7, %v5907_v13  ;;  %v5911_v14 = vmul.f32 %v9995_v18, %v13812_v27  ;;  %v16177_v13 = vld [vmem:[#allocation87_spill] sm:$0xff] }
 0x6d1   :  { %10006 = vrcp.f32 %v9085_v50  ;;  %v5429_v0 = vpop.f32.mrb[137].mxu0  ;;  %v5909_v52 = vmul.f32 %v9997_v56, %v13808_v17  ;;  %v16178_v56 = vld [vmem:[#allocation79_spill] sm:$0xff] }
 0x6d2   :  { %10008 = vrcp.f32 %v5429_v0 }
 0x6d3   :  { %v9999_v39 = vpop.eup %9998  ;;  %9240 = vmatprep.mubr.msk.f32.mxu1 %vm4323_vm7, %v5909_v52 }
 0x6d4   :  { %v10001_v42 = vpop.eup %10000  ;;  %v9088_v6 = vpop.f32.mrb[138].mxu0  ;;  %9241 = vmatmul.mubr.msk.f32.gmra.mrb[186].mxu1 %vm4323_vm7, %v5911_v14  ;;  %v5915_v3 = vmul.f32 %v9999_v39, %v13832_v61 }
 0x6d5   :  { %10010 = vrcp.f32 %v9088_v6  ;;  %v5439_v41 = vpop.f32.mrb[139].mxu0  ;;  %v5913_v48 = vmul.f32 %v10001_v42, %v13828_v44  ;;  %v16179_v42 = vld [vmem:[#allocation81_spill] sm:$0xff] }
 0x6d6   :  { %10012 = vrcp.f32 %v5439_v41  ;;  %v16180_v41 = vld [vmem:[#allocation83_spill] sm:$0xff] }
 0x6d7   :  { %v10003_v54 = vpop.eup %10002  ;;  %9243 = vmatprep.mubr.msk.f32.mxu1 %vm4323_vm7, %v5913_v48 }
 0x6d8   :  { %v10005_v17 = vpop.eup %10004  ;;  %v9091_v27 = vpop.f32.mrb[140].mxu0  ;;  %9244 = vmatmul.mubr.msk.f32.gmra.mrb[188].mxu1 %vm4323_vm7, %v5915_v3  ;;  %v5919_v10 = vmul.f32 %v10003_v54, %v13852_v37 }
 0x6d9   :  { %10014 = vrcp.f32 %v9091_v27  ;;  %v5449_v11 = vpop.f32.mrb[141].mxu0  ;;  %v5917_v28 = vmul.f32 %v10005_v17, %v13848_v45 }
 0x6da   :  { %10016 = vrcp.f32 %v5449_v11  ;;  %v16181_v11 = vld [vmem:[#allocation93_spill] sm:$0xff] }
 0x6db   :  { %v10007_v22 = vpop.eup %10006  ;;  %9246 = vmatprep.mubr.msk.f32.mxu1 %vm4323_vm7, %v5917_v28 }
 0x6dc   :  { %v10009_v44 = vpop.eup %10008  ;;  %v9094_v61 = vpop.f32.mrb[142].mxu0  ;;  %9247 = vmatmul.mubr.msk.f32.gmra.mrb[190].mxu1 %vm4323_vm7, %v5919_v10  ;;  %v5923_v20 = vmul.f32 %v10007_v22, %v13714_v16  ;;  %v16182_v10 = vld [vmem:[#allocation75_spill] sm:$0xff] }
 0x6dd   :  { %10018 = vrcp.f32 %v9094_v61  ;;  %v5459_v31 = vpop.f32.mrb[143].mxu0  ;;  %v5921_v1 = vmul.f32 %v10009_v44, %v13710_v63 }
 0x6de   :  { %10020 = vrcp.f32 %v5459_v31 }
 0x6df   :  { %v10011_v32 = vpop.eup %10010  ;;  %9249 = vmatprep.mubr.msk.f32.mxu1 %vm4323_vm7, %v5921_v1 }
 0x6e0   :  { %v10013_v45 = vpop.eup %10012  ;;  %v9097_v37 = vpop.f32.mrb[144].mxu0  ;;  %9250 = vmatmul.mubr.msk.f32.gmra.mrb[192].mxu1 %vm4323_vm7, %v5923_v20  ;;  %v5927_v36 = vmul.f32 %v10011_v32, %v16174_v49  ;;  %v16183_v20 = vld [vmem:[#allocation77_spill] sm:$0xff] }
 0x6e1   :  { %10022 = vrcp.f32 %v9097_v37  ;;  %v5469_v62 = vpop.f32.mrb[145].mxu0  ;;  %v5925_v12 = vmul.f32 %v10013_v45, %v16173_v57  ;;  %v16184_v45 = vld [vmem:[#allocation85_spill] sm:$0xff] }
 0x6e2   :  { %10024 = vrcp.f32 %v5469_v62 }
 0x6e3   :  { %v10015_v30 = vpop.eup %10014  ;;  %9252 = vmatprep.mubr.msk.f32.mxu1 %vm4323_vm7, %v5925_v12 }
 0x6e4   :  { %v10017_v63 = vpop.eup %10016  ;;  %v9100_v16 = vpop.f32.mrb[146].mxu0  ;;  %9253 = vmatmul.mubr.msk.f32.gmra.mrb[194].mxu1 %vm4323_vm7, %v5927_v36  ;;  %v5931_v38 = vmul.f32 %v10015_v30, %v16176_v34  ;;  %v16185_v36 = vld [vmem:[#allocation89_spill] sm:$0xff] }
 0x6e5   :  { %10026 = vrcp.f32 %v9100_v16  ;;  %v5479_v8 = vpop.f32.mrb[147].mxu0  ;;  %v5929_v7 = vmul.f32 %v10017_v63, %v16175_v55  ;;  %v16186_v63 = vld [vmem:[#allocation91_spill] sm:$0xff] }
 0x6e6   :  { %10028 = vrcp.f32 %v5479_v8 }
 0x6e7   :  { %v10019_v43 = vpop.eup %10018  ;;  %9255 = vmatprep.mubr.msk.f32.mxu1 %vm4323_vm7, %v5929_v7 }
 0x6e8   :  { %v10021_v29 = vpop.eup %10020  ;;  %v9103_v19 = vpop.f32.mrb[148].mxu0  ;;  %9256 = vmatmul.mubr.msk.f32.gmra.mrb[196].mxu1 %vm4323_vm7, %v5931_v38  ;;  %v5935_v50 = vmul.f32 %v10019_v43, %v16178_v56  ;;  %v16187_v38 = vld [vmem:[#allocation101_spill] sm:$0xff] }
 0x6e9   :  { %10030 = vrcp.f32 %v9103_v19  ;;  %v5489_v15 = vpop.f32.mrb[149].mxu0  ;;  %v5933_v18 = vmul.f32 %v10021_v29, %v16177_v13  ;;  %v16188_v29 = vld [vmem:[#allocation103_spill] sm:$0xff] }
 0x6ea   :  { %10032 = vrcp.f32 %v5489_v15 }
 0x6eb   :  { %v10023_v0 = vpop.eup %10022  ;;  %9258 = vmatprep.mubr.msk.f32.mxu1 %vm4323_vm7, %v5933_v18 }
 0x6ec   :  { %v10025_v52 = vpop.eup %10024  ;;  %v9106_v14 = vpop.f32.mrb[150].mxu0  ;;  %9259 = vmatmul.mubr.msk.f32.gmra.mrb[198].mxu1 %vm4323_vm7, %v5935_v50  ;;  %v5939_v48 = vmul.f32 %v10023_v0, %v16180_v41  ;;  %v16189_v0 = vld [vmem:[#allocation109_spill] sm:$0xff] }
 0x6ed   :  { %10034 = vrcp.f32 %v9106_v14  ;;  %v5499_v39 = vpop.f32.mrb[151].mxu0  ;;  %v5937_v6 = vmul.f32 %v10025_v52, %v16179_v42 }
 0x6ee   :  { %10036 = vrcp.f32 %v5499_v39 }
 0x6ef   :  { %v10027_v3 = vpop.eup %10026  ;;  %9261 = vmatprep.mubr.msk.f32.mxu1 %vm4323_vm7, %v5937_v6 }
 0x6f0   :  { %v10029_v54 = vpop.eup %10028  ;;  %v9109_v17 = vpop.f32.mrb[152].mxu0  ;;  %9262 = vmatmul.mubr.msk.f32.gmra.mrb[200].mxu1 %vm4323_vm7, %v5939_v48  ;;  %v5943_v22 = vmul.f32 %v10027_v3, %v16182_v10 }
 0x6f1   :  { %10038 = vrcp.f32 %v9109_v17  ;;  %v5509_v27 = vpop.f32.mrb[153].mxu0  ;;  %v5941_v28 = vmul.f32 %v10029_v54, %v16181_v11 }
 0x6f2   :  { %10040 = vrcp.f32 %v5509_v27 }
 0x6f3   :  { %v10031_v44 = vpop.eup %10030  ;;  %9264 = vmatprep.mubr.msk.f32.mxu1 %vm4323_vm7, %v5941_v28 }
 0x6f4   :  { %v10033_v61 = vpop.eup %10032  ;;  %v9112_v31 = vpop.f32.mrb[154].mxu0  ;;  %9265 = vmatmul.mubr.msk.f32.gmra.mrb[202].mxu1 %vm4323_vm7, %v5943_v22  ;;  %v5947_v37 = vmul.f32 %v10031_v44, %v16184_v45  ;;  %v16190_v44 = vld [vmem:[#allocation115_spill] sm:$0xff] }
 0x6f5   :  { %10042 = vrcp.f32 %v9112_v31  ;;  %v5519_v1 = vpop.f32.mrb[155].mxu0  ;;  %v5945_v32 = vmul.f32 %v10033_v61, %v16183_v20 }
 0x6f6   :  { %10044 = vrcp.f32 %v5519_v1 }
 0x6f7   :  { %v10035_v62 = vpop.eup %10034  ;;  %9267 = vmatprep.mubr.msk.f32.mxu1 %vm4323_vm7, %v5945_v32  ;;  %v16191_v32 = vld [vmem:[#allocation145_spill] sm:$0xff] }
 0x6f8   :  { %v10037_v57 = vpop.eup %10036  ;;  %v9115_v12 = vpop.f32.mrb[156].mxu0  ;;  %9268 = vmatmul.mubr.msk.f32.gmra.mrb[204].mxu1 %vm4323_vm7, %v5947_v37  ;;  %v5951_v16 = vmul.f32 %v10035_v62, %v16186_v63 }
 0x6f9   :  { %10046 = vrcp.f32 %v9115_v12  ;;  %v5529_v49 = vpop.f32.mrb[157].mxu0  ;;  %v5949_v30 = vmul.f32 %v10037_v57, %v16185_v36 }
 0x6fa   :  { %10048 = vrcp.f32 %v5529_v49  ;;  %v16192_v49 = vld [vmem:[#allocation147_spill] sm:$0xff] }
 0x6fb   :  { %v10039_v8 = vpop.eup %10038  ;;  %9270 = vmatprep.mubr.msk.f32.mxu1 %vm4323_vm7, %v5949_v30 }
 0x6fc   :  { %v10041_v55 = vpop.eup %10040  ;;  %v9118_v7 = vpop.f32.mrb[158].mxu0  ;;  %9271 = vmatmul.mubr.msk.f32.gmra.mrb[206].mxu1 %vm4323_vm7, %v5951_v16  ;;  %v5955_v19 = vmul.f32 %v10039_v8, %v16188_v29 }
 0x6fd   :  { %10050 = vrcp.f32 %v9118_v7  ;;  %v5539_v34 = vpop.f32.mrb[159].mxu0  ;;  %v5953_v43 = vmul.f32 %v10041_v55, %v16187_v38 }
 0x6fe   :  { %10052 = vrcp.f32 %v5539_v34 }
 0x6ff   :  { %v10043_v15 = vpop.eup %10042  ;;  %9273 = vmatprep.mubr.msk.f32.mxu1 %vm4323_vm7, %v5953_v43  ;;  %v16193_v43 = vld [vmem:[#allocation97_spill] sm:$0xff] }
 0x700   :  { %v10045_v13 = vpop.eup %10044  ;;  %v9121_v18 = vpop.f32.mrb[160].mxu0  ;;  %9274 = vmatmul.mubr.msk.f32.gmra.mrb[208].mxu1 %vm4323_vm7, %v5955_v19  ;;  %v5959_v52 = vmul.f32 %v10043_v15, %v16189_v0  ;;  %v16194_v19 = vld [vmem:[#allocation99_spill] sm:$0xff] }
 0x701   :  { %10054 = vrcp.f32 %v9121_v18  ;;  %v5549_v56 = vpop.f32.mrb[161].mxu0  ;;  %v5957_v50 = vmul.f32 %v10045_v13, %v13891_v5  ;;  %v16196_v0 = vld [vmem:[#allocation107_spill] sm:$0xff] }
 0x702   :  { %10056 = vrcp.f32 %v5549_v56  ;;  %v16195_v56 = vld [vmem:[#allocation105_spill] sm:$0xff] }
 0x703   :  { %v10047_v14 = vpop.eup %10046  ;;  %9276 = vmatprep.mubr.msk.f32.mxu1 %vm4323_vm7, %v5957_v50 }
 0x704   :  { %v10049_v39 = vpop.eup %10048  ;;  %v9124_v42 = vpop.f32.mrb[162].mxu0  ;;  %9277 = vmatmul.mubr.msk.f32.gmra.mrb[210].mxu1 %vm4323_vm7, %v5959_v52  ;;  %v5963_v48 = vmul.f32 %v10047_v14, %v13924_v60 }
 0x705   :  { %10058 = vrcp.f32 %v9124_v42  ;;  %v5559_v6 = vpop.f32.mrb[163].mxu0  ;;  %v5961_v41 = vmul.f32 %v10049_v39, %v13917_v9 }
 0x706   :  { %10060 = vrcp.f32 %v5559_v6 }
 0x707   :  { %v10051_v3 = vpop.eup %10050  ;;  %9279 = vmatprep.mubr.msk.f32.mxu1 %vm4323_vm7, %v5961_v41  ;;  %v16197_v41 = vld [vmem:[#allocation135_spill] sm:$0xff] }
 0x708   :  { %v10053_v5 = vpop.eup %10052  ;;  %v9127_v54 = vpop.f32.mrb[164].mxu0  ;;  %9280 = vmatmul.mubr.msk.f32.gmra.mrb[212].mxu1 %vm4323_vm7, %v5963_v48  ;;  %v5967_v11 = vmul.f32 %v10051_v3, %v13950_v59  ;;  %v16198_v3 = vld [vmem:[#allocation137_spill] sm:$0xff] }
 0x709   :  { %10062 = vrcp.f32 %v9127_v54  ;;  %v5569_v17 = vpop.f32.mrb[165].mxu0  ;;  %v5965_v27 = vmul.f32 %v10053_v5, %v13943_v4 }
 0x70a   :  { %10064 = vrcp.f32 %v5569_v17 }
 0x70b   :  { %v10055_v28 = vpop.eup %10054  ;;  %9282 = vmatprep.mubr.msk.f32.mxu1 %vm4323_vm7, %v5965_v27 }
 0x70c   :  { %v10057_v9 = vpop.eup %10056  ;;  %v9130_v60 = vpop.f32.mrb[166].mxu0  ;;  %9283 = vmatmul.mubr.msk.f32.gmra.mrb[214].mxu1 %vm4323_vm7, %v5967_v11  ;;  %v5971_v61 = vmul.f32 %v10055_v28, %v16190_v44  ;;  %v16199_v28 = vld [vmem:[#allocation111_spill] sm:$0xff] }
 0x70d   :  { %10066 = vrcp.f32 %v9130_v60  ;;  %v5579_v10 = vpop.f32.mrb[167].mxu0  ;;  %v5969_v22 = vmul.f32 %v10057_v9, %v13969_v2  ;;  %v16200_v60 = vld [vmem:[#allocation113_spill] sm:$0xff] }
 0x70e   :  { %10068 = vrcp.f32 %v5579_v10 }
 0x70f   :  { %v10059_v31 = vpop.eup %10058  ;;  %9285 = vmatprep.mubr.msk.f32.mxu1 %vm4323_vm7, %v5969_v22 }
 0x710   :  { %v10061_v4 = vpop.eup %10060  ;;  %v9133_v59 = vpop.f32.mrb[168].mxu0  ;;  %9286 = vmatmul.mubr.msk.f32.gmra.mrb[216].mxu1 %vm4323_vm7, %v5971_v61  ;;  %v5975_v45 = vmul.f32 %v10059_v31, %v16191_v32 }
 0x711   :  { %10070 = vrcp.f32 %v9133_v59  ;;  %v5589_v1 = vpop.f32.mrb[169].mxu0  ;;  %v5973_v20 = vmul.f32 %v10061_v4, %v13995_v46  ;;  %v16201_v4 = vld [vmem:[#allocation139_spill] sm:$0xff] }
 0x712   :  { %10072 = vrcp.f32 %v5589_v1  ;;  %v16202_v1 = vld [vmem:[#allocation141_spill] sm:$0xff] }
 0x713   :  { %v10063_v37 = vpop.eup %10062  ;;  %9288 = vmatprep.mubr.msk.f32.mxu1 %vm4323_vm7, %v5973_v20 }
 0x714   :  { %v10065_v2 = vpop.eup %10064  ;;  %v9136_v62 = vpop.f32.mrb[170].mxu0  ;;  %9289 = vmatmul.mubr.msk.f32.gmra.mrb[218].mxu1 %vm4323_vm7, %v5975_v45  ;;  %v5979_v36 = vmul.f32 %v10063_v37, %v16192_v49 }
 0x715   :  { %10074 = vrcp.f32 %v9136_v62  ;;  %v5599_v57 = vpop.f32.mrb[171].mxu0  ;;  %v5977_v12 = vmul.f32 %v10065_v2, %v14018_v21  ;;  %v16203_v62 = vld [vmem:[#allocation117_spill] sm:$0xff] }
 0x716   :  { %10076 = vrcp.f32 %v5599_v57 }
 0x717   :  { %v10067_v30 = vpop.eup %10066  ;;  %9291 = vmatprep.mubr.msk.f32.mxu1 %vm4323_vm7, %v5977_v12  ;;  %v16204_v12 = vld [vmem:[#allocation143_spill] sm:$0xff] }
 0x718   :  { %v10069_v46 = vpop.eup %10068  ;;  %v9139_v63 = vpop.f32.mrb[172].mxu0  ;;  %9292 = vmatmul.mubr.msk.f32.gmra.mrb[220].mxu1 %vm4323_vm7, %v5979_v36  ;;  %v5983_v55 = vmul.f32 %v10067_v30, %v14042_v24 }
 0x719   :  { %10078 = vrcp.f32 %v9139_v63  ;;  %v5609_v16 = vpop.f32.mrb[173].mxu0  ;;  %v5981_v8 = vmul.f32 %v10069_v46, %v14038_v53 }
 0x71a   :  { %10080 = vrcp.f32 %v5609_v16  ;;  %v16205_v16 = vld [vmem:[#allocation119_spill] sm:$0xff] }
 0x71b   :  { %v10071_v7 = vpop.eup %10070  ;;  %9294 = vmatprep.mubr.msk.f32.mxu1 %vm4323_vm7, %v5981_v8 }
 0x71c   :  { %v10073_v21 = vpop.eup %10072  ;;  %v9142_v34 = vpop.f32.mrb[174].mxu0  ;;  %9295 = vmatmul.mubr.msk.f32.gmra.mrb[222].mxu1 %vm4323_vm7, %v5983_v55  ;;  %v5987_v15 = vmul.f32 %v10071_v7, %v16194_v19  ;;  %v16206_v55 = vld [vmem:[#allocation121_spill] sm:$0xff] }
 0x71d   :  { %10082 = vrcp.f32 %v9142_v34  ;;  %v5619_v38 = vpop.f32.mrb[175].mxu0  ;;  %v5985_v29 = vmul.f32 %v10073_v21, %v16193_v43 }
 0x71e   :  { %10084 = vrcp.f32 %v5619_v38 }
 0x71f   :  { %v10075_v13 = vpop.eup %10074  ;;  %9297 = vmatprep.mubr.msk.f32.mxu1 %vm4323_vm7, %v5985_v29  ;;  %v16207_v29 = vld [vmem:[#allocation150_spill] sm:$0xff] }
 0x720   :  { %v10077_v53 = vpop.eup %10076  ;;  %v9145_v24 = vpop.f32.mrb[176].mxu0  ;;  %9298 = vmatmul.mubr.msk.f32.gmra.mrb[224].mxu1 %vm4323_vm7, %v5987_v15  ;;  %v5991_v52 = vmul.f32 %v10075_v13, %v16196_v0  ;;  %v16208_v15 = vld [vmem:[#allocation123_spill] sm:$0xff]  ;;  %v16209_v0 = vld [vmem:[#allocation154_spill] sm:$0xff] }
 0x721   :  { %10086 = vrcp.f32 %v9145_v24  ;;  %v5629_v18 = vpop.f32.mrb[177].mxu0  ;;  %v5989_v50 = vmul.f32 %v10077_v53, %v16195_v56 }
 0x722   :  { %10088 = vrcp.f32 %v5629_v18 }
 0x723   :  { %v10079_v14 = vpop.eup %10078  ;;  %9300 = vmatprep.mubr.msk.f32.mxu1 %vm4323_vm7, %v5989_v50 }
 0x724   :  { %v10081_v39 = vpop.eup %10080  ;;  %v9148_v42 = vpop.f32.mrb[178].mxu0  ;;  %9301 = vmatmul.mubr.msk.f32.gmra.mrb[226].mxu1 %vm4323_vm7, %v5991_v52  ;;  %v5995_v5 = vmul.f32 %v10079_v14, %v16198_v3 }
 0x725   :  { %10090 = vrcp.f32 %v9148_v42  ;;  %v5639_v6 = vpop.f32.mrb[179].mxu0  ;;  %v5993_v48 = vmul.f32 %v10081_v39, %v16197_v41 }
 0x726   :  { %10092 = vrcp.f32 %v5639_v6 }
 0x727   :  { %v10083_v54 = vpop.eup %10082  ;;  %9303 = vmatprep.mubr.msk.f32.mxu1 %vm4323_vm7, %v5993_v48 }
 0x728   :  { %v10085_v17 = vpop.eup %10084  ;;  %v9151_v27 = vpop.f32.mrb[180].mxu0  ;;  %9304 = vmatmul.mubr.msk.f32.gmra.mrb[228].mxu1 %vm4323_vm7, %v5995_v5  ;;  %v5999_v10 = vmul.f32 %v10083_v54, %v16200_v60 }
 0x729   :  { %10094 = vrcp.f32 %v9151_v27  ;;  %v5649_v11 = vpop.f32.mrb[181].mxu0  ;;  %v5997_v9 = vmul.f32 %v10085_v17, %v16199_v28 }
 0x72a   :  { %10096 = vrcp.f32 %v5649_v11 }
 0x72b   :  { %v10087_v22 = vpop.eup %10086  ;;  %9306 = vmatprep.mubr.msk.f32.mxu1 %vm4323_vm7, %v5997_v9 }
 0x72c   :  { %v10089_v44 = vpop.eup %10088  ;;  %v9154_v61 = vpop.f32.mrb[182].mxu0  ;;  %9307 = vmatmul.mubr.msk.f32.gmra.mrb[230].mxu1 %vm4323_vm7, %v5999_v10  ;;  %v6003_v20 = vmul.f32 %v10087_v22, %v16202_v1  ;;  %v16211_v1 = vld [vmem:[#allocation169_spill] sm:$0xff] }
 0x72d   :  { %10098 = vrcp.f32 %v9154_v61  ;;  %v5659_v31 = vpop.f32.mrb[183].mxu0  ;;  %v6001_v59 = vmul.f32 %v10089_v44, %v16201_v4  ;;  %v16210_v61 = vld [vmem:[#allocation165_spill] sm:$0xff] }
 0x72e   :  { %10100 = vrcp.f32 %v5659_v31 }
 0x72f   :  { %v10091_v32 = vpop.eup %10090  ;;  %9309 = vmatprep.mubr.msk.f32.mxu1 %vm4323_vm7, %v6001_v59 }
 0x730   :  { %v10093_v45 = vpop.eup %10092  ;;  %v9157_v37 = vpop.f32.mrb[184].mxu0  ;;  %9310 = vmatmul.mubr.msk.f32.gmra.mrb[232].mxu1 %vm4323_vm7, %v6003_v20  ;;  %v6007_v49 = vmul.f32 %v10091_v32, %v16204_v12  ;;  %v16212_v32 = vld [vmem:[#allocation171_spill] sm:$0xff] }
 0x731   :  { %10102 = vrcp.f32 %v9157_v37  ;;  %v5669_v2 = vpop.f32.mrb[185].mxu0  ;;  %v6005_v57 = vmul.f32 %v10093_v45, %v16203_v62 }
 0x732   :  { %10104 = vrcp.f32 %v5669_v2 }
 0x733   :  { %v10095_v36 = vpop.eup %10094  ;;  %9312 = vmatprep.mubr.msk.f32.mxu1 %vm4323_vm7, %v6005_v57  ;;  %v16213_v57 = vld [vmem:[#allocation181_spill] sm:$0xff] }
 0x734   :  { %v10097_v30 = vpop.eup %10096  ;;  %v9160_v46 = vpop.f32.mrb[186].mxu0  ;;  %9313 = vmatmul.mubr.msk.f32.gmra.mrb[234].mxu1 %vm4323_vm7, %v6007_v49  ;;  %v6011_v7 = vmul.f32 %v10095_v36, %v16206_v55  ;;  %v16214_v49 = vld [vmem:[#allocation59_spill] sm:$0xff] }
 0x735   :  { %10106 = vrcp.f32 %v9160_v46  ;;  %v5679_v63 = vpop.f32.mrb[187].mxu0  ;;  %v6009_v8 = vmul.f32 %v10097_v30, %v16205_v16 }
 0x736   :  { %10108 = vrcp.f32 %v5679_v63 }
 0x737   :  { %v10099_v21 = vpop.eup %10098  ;;  %9315 = vmatprep.mubr.msk.f32.mxu1 %vm4323_vm7, %v6009_v8  ;;  %v16215_v8 = vld [vmem:[#allocation179_spill] sm:$0xff] }
 0x738   :  { %v10101_v34 = vpop.eup %10100  ;;  %v9163_v38 = vpop.f32.mrb[188].mxu0  ;;  %9316 = vmatmul.mubr.msk.f32.gmra.mrb[236].mxu1 %vm4323_vm7, %v6011_v7  ;;  %v6015_v13 = vmul.f32 %v10099_v21, %v16208_v15  ;;  %v16216_v7 = vld [vmem:[#allocation46_spill] sm:$0xff] }
 0x739   :  { %10110 = vrcp.f32 %v9163_v38  ;;  %v5689_v43 = vpop.f32.mrb[189].mxu0  ;;  %v6013_v19 = vmul.f32 %v10101_v34, %v16207_v29 }
 0x73a   :  { %10112 = vrcp.f32 %v5689_v43 }
 0x73b   :  { %v10103_v53 = vpop.eup %10102  ;;  %9318 = vmatprep.mubr.msk.f32.mxu1 %vm4323_vm7, %v6013_v19  ;;  %v16217_v19 = vld [vmem:[#allocation125_spill] sm:$0xff] }
 0x73c   :  { %v10105_v24 = vpop.eup %10104  ;;  %v9166_v18 = vpop.f32.mrb[190].mxu0  ;;  %9319 = vmatmul.mubr.msk.f32.gmra.mrb[238].mxu1 %vm4323_vm7, %v6015_v13  ;;  %v6019_v52 = vmul.f32 %v10103_v53, %v16209_v0  ;;  %v16218_v13 = vld [vmem:[#allocation152_spill] sm:$0xff]  ;;  %v16219_v0 = vld [vmem:[#allocation127_spill] sm:$0xff] }
 0x73d   :  { %10114 = vrcp.f32 %v9166_v18  ;;  %v5699_v56 = vpop.f32.mrb[191].mxu0  ;;  %v6017_v50 = vmul.f32 %v10105_v24, %v14058_v58 }
 0x73e   :  { %10116 = vrcp.f32 %v5699_v56 }
 0x73f   :  { %v10107_v14 = vpop.eup %10106  ;;  %9321 = vmatprep.mubr.msk.f32.mxu1 %vm4323_vm7, %v6017_v50 }
 0x740   :  { %v10109_v39 = vpop.eup %10108  ;;  %v9169_v42 = vpop.f32.mrb[192].mxu0  ;;  %9322 = vmatmul.mubr.msk.f32.gmra.mrb[240].mxu1 %vm4323_vm7, %v6019_v52  ;;  %v6023_v48 = vmul.f32 %v10107_v14, %v14088_v25  ;;  %v16220_v14 = vld [vmem:[#allocation129_spill] sm:$0xff] }
 0x741   :  { %10118 = vrcp.f32 %v9169_v42  ;;  %v5709_v6 = vpop.f32.mrb[193].mxu0  ;;  %v6021_v41 = vmul.f32 %v10109_v39, %v14081_v40 }
 0x742   :  { %10120 = vrcp.f32 %v5709_v6 }
 0x743   :  { %v10111_v3 = vpop.eup %10110  ;;  %9324 = vmatprep.mubr.msk.f32.mxu1 %vm4323_vm7, %v6021_v41 }
 0x744   :  { %v10113_v58 = vpop.eup %10112  ;;  %v9172_v5 = vpop.f32.mrb[194].mxu0  ;;  %9325 = vmatmul.mubr.msk.f32.gmra.mrb[242].mxu1 %vm4323_vm7, %v6023_v48  ;;  %v6027_v27 = vmul.f32 %v10111_v3, %v14114_v51  ;;  %v16221_v3 = vld [vmem:[#allocation157_spill] sm:$0xff] }
 0x745   :  { %10122 = vrcp.f32 %v9172_v5  ;;  %v5719_v54 = vpop.f32.mrb[195].mxu0  ;;  %v6025_v17 = vmul.f32 %v10113_v58, %v14107_v47  ;;  %v16222_v5 = vld [vmem:[#allocation159_spill] sm:$0xff] }
 0x746   :  { %10124 = vrcp.f32 %v5719_v54 }
 0x747   :  { %v10115_v11 = vpop.eup %10114  ;;  %9327 = vmatprep.mubr.msk.f32.mxu1 %vm4323_vm7, %v6025_v17 }
 0x748   :  { %v10117_v40 = vpop.eup %10116  ;;  %v9175_v25 = vpop.f32.mrb[196].mxu0  ;;  %9328 = vmatmul.mubr.msk.f32.gmra.mrb[244].mxu1 %vm4323_vm7, %v6027_v27  ;;  %v6031_v60 = vmul.f32 %v10115_v11, %v14138_v23 }
 0x749   :  { %10126 = vrcp.f32 %v9175_v25  ;;  %v5729_v28 = vpop.f32.mrb[197].mxu0  ;;  %v6029_v9 = vmul.f32 %v10117_v40, %v14131_v33  ;;  %v16223_v25 = vld [vmem:[#allocation131_spill] sm:$0xff] }
 0x74a   :  { %10128 = vrcp.f32 %v5729_v28 }
 0x74b   :  { %v10119_v10 = vpop.eup %10118  ;;  %9330 = vmatprep.mubr.msk.f32.mxu1 %vm4323_vm7, %v6029_v9  ;;  %v16224_v9 = vld [vmem:[#allocation133_spill] sm:$0xff] }
 0x74c   :  { %v10121_v47 = vpop.eup %10120  ;;  %v9178_v51 = vpop.f32.mrb[198].mxu0  ;;  %9331 = vmatmul.mubr.msk.f32.gmra.mrb[246].mxu1 %vm4323_vm7, %v6031_v60  ;;  %v6035_v31 = vmul.f32 %v10119_v10, %v16210_v61 }
 0x74d   :  { %10130 = vrcp.f32 %v9178_v51  ;;  %v5739_v22 = vpop.f32.mrb[199].mxu0  ;;  %v6033_v44 = vmul.f32 %v10121_v47, %v14153_v35 }
 0x74e   :  { %10132 = vrcp.f32 %v5739_v22 }
 0x74f   :  { %v10123_v4 = vpop.eup %10122  ;;  %9333 = vmatprep.mubr.msk.f32.mxu1 %vm4323_vm7, %v6033_v44  ;;  %v16225_v44 = vld [vmem:[#allocation161_spill] sm:$0xff] }
 0x750   :  { %v10125_v33 = vpop.eup %10124  ;;  %v9181_v23 = vpop.f32.mrb[200].mxu0  ;;  %9334 = vmatmul.mubr.msk.f32.gmra.mrb[248].mxu1 %vm4323_vm7, %v6035_v31  ;;  %v6039_v45 = vmul.f32 %v10123_v4, %v16212_v32  ;;  %v16226_v31 = vld [vmem:[#allocation163_spill] sm:$0xff] }
 0x751   :  { %10134 = vrcp.f32 %v9181_v23  ;;  %v5749_v59 = vpop.f32.mrb[201].mxu0  ;;  %v6037_v20 = vmul.f32 %v10125_v33, %v16211_v1 }
 0x752   :  { %10136 = vrcp.f32 %v5749_v59 }
 0x753   :  { %v10127_v37 = vpop.eup %10126  ;;  %9336 = vmatprep.mubr.msk.f32.mxu1 %vm4323_vm7, %v6037_v20  ;;  %v16227_v20 = vld [vmem:[#allocation167_spill] sm:$0xff] }
 0x754   :  { %v10129_v35 = vpop.eup %10128  ;;  %v9184_v2 = vpop.f32.mrb[202].mxu0  ;;  %9337 = vmatmul.mubr.msk.f32.gmra.mrb[250].mxu1 %vm4323_vm7, %v6039_v45  ;;  %v6043_v36 = vmul.f32 %v10127_v37, %v16214_v49  ;;  %v16228_v45 = vld [vmem:[#allocation180_spill] sm:$0xff] }
 0x755   :  { %10138 = vrcp.f32 %v9184_v2  ;;  %v5759_v62 = vpop.f32.mrb[203].mxu0  ;;  %v6041_v12 = vmul.f32 %v10129_v35, %v16213_v57 }
 0x756   :  { %10140 = vrcp.f32 %v5759_v62 }
 0x757   :  { %v10131_v30 = vpop.eup %10130  ;;  %9339 = vmatprep.mubr.msk.f32.mxu1 %vm4323_vm7, %v6041_v12  ;;  %v16229_v12 = vld [vmem:[#allocation173_spill] sm:$0xff] }
 0x758   :  { %v10133_v46 = vpop.eup %10132  ;;  %v9187_v63 = vpop.f32.mrb[204].mxu0  ;;  %9340 = vmatmul.mubr.msk.f32.gmra.mrb[252].mxu1 %vm4323_vm7, %v6043_v36  ;;  %v6047_v21 = vmul.f32 %v10131_v30, %v16216_v7  ;;  %v16230_v36 = vld [vmem:[#allocation175_spill] sm:$0xff] }
 0x759   :  { %10142 = vrcp.f32 %v9187_v63  ;;  %v5769_v16 = vpop.f32.mrb[205].mxu0  ;;  %v6045_v55 = vmul.f32 %v10133_v46, %v16215_v8 }
 0x75a   :  { %10144 = vrcp.f32 %v5769_v16 }
 0x75b   :  { %v10135_v34 = vpop.eup %10134  ;;  %9342 = vmatprep.mubr.msk.f32.mxu1 %vm4323_vm7, %v6045_v55  ;;  %v16231_v55 = vld [vmem:[#allocation176_spill] sm:$0xff] }
 0x75c   :  { %v10137_v38 = vpop.eup %10136  ;;  %v9190_v43 = vpop.f32.mrb[206].mxu0  ;;  %9343 = vmatmul.mubr.msk.f32.gmra.mrb[254].mxu1 %vm4323_vm7, %v6047_v21  ;;  %v6051_v53 = vmul.f32 %v10135_v34, %v16218_v13  ;;  %v16232_v21 = vld [vmem:[#allocation177_spill] sm:$0xff] }
 0x75d   :  { %10146 = vrcp.f32 %v9190_v43  ;;  %v5779_v29 = vpop.f32.mrb[207].mxu0  ;;  %v6049_v15 = vmul.f32 %v10137_v38, %v16217_v19 }
 0x75e   :  { %10148 = vrcp.f32 %v5779_v29 }
 0x75f   :  { %v10139_v24 = vpop.eup %10138  ;;  %9345 = vmatprep.mubr.msk.f32.mxu1 %vm4323_vm7, %v6049_v15  ;;  %v16233_v15 = vld [vmem:[#allocation54_spill] sm:$0xff] }
 0x760   :  { %v10141_v18 = vpop.eup %10140  ;;  %v9193_v56 = vpop.f32.mrb[208].mxu0  ;;  %9346 = vmatmul.mubr.msk.f32.gmra.mrb[0].mxu1 %vm4323_vm7, %v6051_v53  ;;  %v6055_v39 = vmul.f32 %v10139_v24, %v16220_v14  ;;  %v16234_v53 = vld [vmem:[#allocation178_spill] sm:$0xff] }
 0x761   :  { %10150 = vrcp.f32 %v9193_v56  ;;  %v5789_v50 = vpop.f32.mrb[209].mxu0  ;;  %v6053_v52 = vmul.f32 %v10141_v18, %v16219_v0 }
 0x762   :  { %10152 = vrcp.f32 %v5789_v50 }
 0x763   :  { %v10143_v42 = vpop.eup %10142  ;;  %9348 = vmatprep.mubr.msk.f32.mxu1 %vm4323_vm7, %v6053_v52  ;;  %v16235_v52 = vld [vmem:[#allocation48_spill] sm:$0xff] }
 0x764   :  { %v10145_v6 = vpop.eup %10144  ;;  %v9196_v41 = vpop.f32.mrb[210].mxu0  ;;  %9349 = vmatmul.mubr.msk.f32.gmra.mrb[2].mxu1 %vm4323_vm7, %v6055_v39  ;;  %v6059_v54 = vmul.f32 %v10143_v42, %v16222_v5  ;;  %v16236_v39 = vld [vmem:[#allocation50_spill] sm:$0xff] }
 0x765   :  { %10154 = vrcp.f32 %v9196_v41  ;;  %v5799_v48 = vpop.f32.mrb[211].mxu0  ;;  %v6057_v58 = vmul.f32 %v10145_v6, %v16221_v3 }
 0x766   :  { %10156 = vrcp.f32 %v5799_v48 }
 0x767   :  { %v10147_v17 = vpop.eup %10146  ;;  %9351 = vmatprep.mubr.msk.f32.mxu1 %vm4323_vm7, %v6057_v58  ;;  %v16237_v58 = vld [vmem:[#allocation52_spill] sm:$0xff] }
 0x768   :  { %v10149_v27 = vpop.eup %10148  ;;  %v9199_v11 = vpop.f32.mrb[212].mxu0  ;;  %9352 = vmatmul.mubr.msk.f32.gmra.mrb[4].mxu1 %vm4323_vm7, %v6059_v54  ;;  %v6063_v60 = vmul.f32 %v10147_v17, %v16224_v9  ;;  %v16238_v54 = vld [vmem:[#allocation69_spill] sm:$0xff] }
 0x769   :  { %10158 = vrcp.f32 %v9199_v11  ;;  %v5809_v40 = vpop.f32.mrb[213].mxu0  ;;  %v6061_v28 = vmul.f32 %v10149_v27, %v16223_v25 }
 0x76a   :  { %10160 = vrcp.f32 %v5809_v40  ;;  %v16239_v40 = vld [vmem:[#allocation95_spill] sm:$0xff] }
 0x76b   :  { %v10151_v10 = vpop.eup %10150  ;;  %9354 = vmatprep.mubr.msk.f32.mxu1 %vm4323_vm7, %v6061_v28  ;;  %v16240_v28 = vld [vmem:[#allocation61_spill] sm:$0xff] }
 0x76c   :  { %v10153_v47 = vpop.eup %10152  ;;  %v9202_v51 = vpop.f32.mrb[214].mxu0  ;;  %9355 = vmatmul.mubr.msk.f32.gmra.mrb[6].mxu1 %vm4323_vm7, %v6063_v60  ;;  %v6067_v4 = vmul.f32 %v10151_v10, %v16226_v31 }
 0x76d   :  { %10162 = vrcp.f32 %v9202_v51  ;;  %v5819_v22 = vpop.f32.mrb[215].mxu0  ;;  %v6065_v61 = vmul.f32 %v10153_v47, %v16225_v44  ;;  %v16241_v47 = vld [vmem:[#allocation63_spill] sm:$0xff] }
 0x76e   :  { %10164 = vrcp.f32 %v5819_v22  ;;  %v16242_v22 = vld [vmem:[#allocation182_spill] sm:$0xff] }
 0x76f   :  { %v10155_v33 = vpop.eup %10154  ;;  %9357 = vmatprep.mubr.msk.f32.mxu1 %vm4323_vm7, %v6065_v61 }
 0x770   :  { %v10157_v23 = vpop.eup %10156  ;;  %v9205_v59 = vpop.f32.mrb[216].mxu0  ;;  %9358 = vmatmul.mubr.msk.f32.gmra.mrb[8].mxu1 %vm4323_vm7, %v6067_v4  ;;  %v6071_v37 = vmul.f32 %v10155_v33, %v16228_v45  ;;  %v16243_v4 = vld [vmem:[#allocation184_spill] sm:$0xff] }
 0x771   :  { %10166 = vrcp.f32 %v9205_v59  ;;  %v5829_v1 = vpop.f32.mrb[217].mxu0  ;;  %v6069_v32 = vmul.f32 %v10157_v23, %v16227_v20  ;;  %v16244_v23 = vld [vmem:[#allocation183_spill] sm:$0xff]  ;;  %v16245_v20 = vld [vmem:[#allocation8_spill] sm:$0xff] }
 0x772   :  { %10168 = vrcp.f32 %v5829_v1 }
 0x773   :  { %v10159_v35 = vpop.eup %10158  ;;  %9360 = vmatprep.mubr.msk.f32.mxu1 %vm4323_vm7, %v6069_v32 }
 0x774   :  { %v10161_v2 = vpop.eup %10160  ;;  %v9208_v62 = vpop.f32.mrb[218].mxu0  ;;  %9361 = vmatmul.mubr.msk.f32.gmra.mrb[10].mxu1 %vm4323_vm7, %v6071_v37  ;;  %v6075_v30 = vmul.f32 %v10159_v35, %v16230_v36  ;;  %v16246_v37 = vld [vmem:[#allocation6_spill] sm:$0xff]  ;;  %v16248_v36 = vld [vmem:[#allocation5_spill] sm:$0xff] }
 0x775   :  { %10170 = vrcp.f32 %v9208_v62  ;;  %v5839_v57 = vpop.f32.mrb[219].mxu0  ;;  %v6073_v49 = vmul.f32 %v10161_v2, %v16229_v12 }
 0x776   :  { %10172 = vrcp.f32 %v5839_v57  ;;  %v16247_v57 = vld [vmem:[#allocation7_spill] sm:$0xff] }
 0x777   :  { %v10163_v46 = vpop.eup %10162  ;;  %9363 = vmatprep.mubr.msk.f32.mxu1 %vm4323_vm7, %v6073_v49 }
 0x778   :  { %v10165_v63 = vpop.eup %10164  ;;  %v9211_v16 = vpop.f32.mrb[220].mxu0  ;;  %9364 = vmatmul.mubr.msk.f32.gmra.mrb[12].mxu1 %vm4323_vm7, %v6075_v30  ;;  %v6079_v34 = vmul.f32 %v10163_v46, %v16232_v21 }
 0x779   :  { %10174 = vrcp.f32 %v9211_v16  ;;  %v5849_v8 = vpop.f32.mrb[221].mxu0  ;;  %v6077_v7 = vmul.f32 %v10165_v63, %v16231_v55  ;;  %v16249_v16 = vld [vmem:[#allocation12_spill] sm:$0xff] }
 0x77a   :  { %10176 = vrcp.f32 %v5849_v8 }
 0x77b   :  { %v10167_v38 = vpop.eup %10166  ;;  %9366 = vmatprep.mubr.msk.f32.mxu1 %vm4323_vm7, %v6077_v7  ;;  %v16250_v7 = vld [vmem:[#allocation10_spill] sm:$0xff] }
 0x77c   :  { %v10169_v43 = vpop.eup %10168  ;;  %v9214_v29 = vpop.f32.mrb[222].mxu0  ;;  %9367 = vmatmul.mubr.msk.f32.gmra.mrb[14].mxu1 %vm4323_vm7, %v6079_v34  ;;  %v6083_v24 = vmul.f32 %v10167_v38, %v16234_v53 }
 0x77d   :  { %10178 = vrcp.f32 %v9214_v29  ;;  %v5859_v19 = vpop.f32.mrb[223].mxu0  ;;  %v6081_v13 = vmul.f32 %v10169_v43, %v16233_v15  ;;  %v16251_v43 = vld [vmem:[#allocation11_spill] sm:$0xff]  ;;  %v16252_v15 = vld [vmem:[#allocation9_spill] sm:$0xff] }
 0x77e   :  { %10180 = vrcp.f32 %v5859_v19 }
 0x77f   :  { %v10171_v18 = vpop.eup %10170  ;;  %9369 = vmatprep.mubr.msk.f32.mxu1 %vm4323_vm7, %v6081_v13 }
 0x780   :  { %v10173_v56 = vpop.eup %10172  ;;  %v9217_v50 = vpop.f32.mrb[224].mxu0  ;;  %9370 = vmatmul.mubr.msk.f32.gmra.mrb[16].mxu1 %vm4323_vm7, %v6083_v24  ;;  %v6087_v42 = vmul.f32 %v10171_v18, %v16236_v39  ;;  %v16253_v18 = vld [vmem:[#allocation16_spill] sm:$0xff] }
 0x781   :  { %10182 = vrcp.f32 %v9217_v50  ;;  %v5869_v0 = vpop.f32.mrb[225].mxu0  ;;  %v6085_v14 = vmul.f32 %v10173_v56, %v16235_v52 }
 0x782   :  { %10184 = vrcp.f32 %v5869_v0  ;;  %v16254_v0 = vld [vmem:[#allocation14_spill] sm:$0xff] }
 0x783   :  { %v10175_v6 = vpop.eup %10174  ;;  %9372 = vmatprep.mubr.msk.f32.mxu1 %vm4323_vm7, %v6085_v14 }
 0x784   :  { %v10177_v41 = vpop.eup %10176  ;;  %v9220_v48 = vpop.f32.mrb[226].mxu0  ;;  %9373 = vmatmul.mubr.msk.f32.gmra.mrb[18].mxu1 %vm4323_vm7, %v6087_v42  ;;  %v6091_v17 = vmul.f32 %v10175_v6, %v16238_v54  ;;  %v16255_v42 = vld [vmem:[#allocation15_spill] sm:$0xff]  ;;  %v16257_v54 = vld [vmem:[#allocation20_spill] sm:$0xff] }
 0x785   :  { %10186 = vrcp.f32 %v9220_v48  ;;  %v5879_v3 = vpop.f32.mrb[227].mxu0  ;;  %v6089_v5 = vmul.f32 %v10177_v41, %v16237_v58  ;;  %v16256_v48 = vld [vmem:[#allocation13_spill] sm:$0xff] }
 0x786   :  { %10188 = vrcp.f32 %v5879_v3 }
 0x787   :  { %v10179_v27 = vpop.eup %10178  ;;  %9375 = vmatprep.mubr.msk.f32.mxu1 %vm4323_vm7, %v6089_v5 }
 0x788   :  { %v10181_v11 = vpop.eup %10180  ;;  %9376 = vmatmul.mubr.msk.f32.gmra.mrb[20].mxu1 %vm4323_vm7, %v6091_v17  ;;  %v6095_v9 = vmul.f32 %v10179_v27, %v16240_v28 }
 0x789   :  { %v6093_v25 = vmul.f32 %v10181_v11, %v16239_v40  ;;  %v16258_v11 = vld [vmem:[#allocation18_spill] sm:$0xff] }
 0x78b   :  { %v10183_v60 = vpop.eup %10182  ;;  %9378 = vmatprep.mubr.msk.f32.mxu1 %vm4323_vm7, %v6093_v25 }
 0x78c   :  { %v10185_v10 = vpop.eup %10184  ;;  %9379 = vmatmul.mubr.msk.f32.gmra.mrb[22].mxu1 %vm4323_vm7, %v6095_v9  ;;  %v6099_v44 = vmul.f32 %v10183_v60, %v16242_v22  ;;  %v16259_v9 = vld [vmem:[#allocation19_spill] sm:$0xff] }
 0x78d   :  { %v6097_v51 = vmul.f32 %v10185_v10, %v16241_v47  ;;  %v16260_v47 = vld [vmem:[#allocation17_spill] sm:$0xff] }
 0x78f   :  { %v10187_v61 = vpop.eup %10186  ;;  %9381 = vmatprep.mubr.msk.f32.mxu1 %vm4323_vm7, %v6097_v51 }
 0x790   :  { %v10189_v31 = vpop.eup %10188  ;;  %9382 = vmatmul.mubr.msk.f32.gmra.mrb[24].mxu1 %vm4323_vm7, %v6099_v44  ;;  %v6103_v59 = vmul.f32 %v10187_v61, %v16244_v23  ;;  %v16261_v61 = vld [vmem:[#allocation24_spill] sm:$0xff] }
 0x791   :  { %v6101_v33 = vmul.f32 %v10189_v31, %v16243_v4 }
 0x793   :  { %v9227_v1 = vpop.f32.mrb[176].mxu1  ;;  %9384 = vmatprep.mubr.msk.f32.mxu1 %vm4323_vm7, %v6101_v33  ;;  %v16262_v33 = vld [vmem:[#allocation22_spill] sm:$0xff] }
 0x794   :  { %v7039_v32 = vmul.f32 %v9227_v1, %v16245_v20  ;;  %v6499_v45 = vpop.f32.mrb[177].mxu1  ;;  %9385 = vmatmul.mubr.msk.f32.gmra.mrb[26].mxu1 %vm4323_vm7, %v6103_v59  ;;  %v16263_v20 = vld [vmem:[#allocation23_spill] sm:$0xff] }
 0x795   :  { %v7038_v35 = vmul.f32 %v6499_v45, %v16246_v37  ;;  %9432 = vmatprep.mubr.msk.bf16.mxu1 %vm10370_vm8, %v16172_v26  ;;  %v16264_v37 = vld [vmem:[#allocation21_spill] sm:$0xff] }
 0x797   :  { %v9618_v2 = vpack.c.bf16 %v7039_v32, %v7038_v35  ;;  %v9230_v62 = vpop.f32.mrb[178].mxu1 }
 0x798   :  { %v7041_v12 = vmul.f32 %v9230_v62, %v16247_v57  ;;  %v6509_v49 = vpop.f32.mrb[179].mxu1 }
 0x799   :  { %v7040_v30 = vmul.f32 %v16248_v36, %v6509_v49 }
 0x79b   :  { %v9622_v46 = vpack.c.bf16 %v7041_v12, %v7040_v30  ;;  %v9233_v63 = vpop.f32.mrb[180].mxu1  ;;  %v16265_v12 = vld [vmem:[#allocation28_spill] sm:$0xff]  ;;  %v16266_v30 = vld [vmem:[#allocation26_spill] sm:$0xff] }
 0x79c   :  { %v7043_v8 = vmul.f32 %v9233_v63, %v16249_v16  ;;  %v6519_v55 = vpop.f32.mrb[181].mxu1 }
 0x79d   :  { %v7042_v21 = vmul.f32 %v6519_v55, %v16250_v7  ;;  %v16267_v55 = vld [vmem:[#allocation27_spill] sm:$0xff] }
 0x79f   :  { %v9626_v34 = vpack.c.bf16 %v7043_v8, %v7042_v21  ;;  %v9236_v38 = vpop.f32.mrb[182].mxu1 }
 0x7a0   :  { %v7045_v29 = vmul.f32 %v9236_v38, %v16251_v43  ;;  %v6529_v19 = vpop.f32.mrb[183].mxu1  ;;  %v16268_v38 = vld [vmem:[#allocation25_spill] sm:$0xff] }
 0x7a1   :  { %v7044_v13 = vmul.f32 %v16252_v15, %v6529_v19  ;;  %v16269_v19 = vld [vmem:[#allocation32_spill] sm:$0xff] }
 0x7a3   :  { %v9630_v53 = vpack.c.bf16 %v7045_v29, %v7044_v13  ;;  %v9239_v24 = vpop.f32.mrb[184].mxu1 }
 0x7a4   :  { %v7047_v56 = vmul.f32 %v9239_v24, %v16253_v18  ;;  %v6539_v50 = vpop.f32.mrb[185].mxu1  ;;  %v16270_v24 = vld [vmem:[#allocation30_spill] sm:$0xff] }
 0x7a5   :  { %v7046_v52 = vmul.f32 %v6539_v50, %v16254_v0  ;;  %v16271_v50 = vld [vmem:[#allocation31_spill] sm:$0xff] }
 0x7a7   :  { %v9634_v14 = vpack.c.bf16 %v7047_v56, %v7046_v52  ;;  %v9242_v39 = vpop.f32.mrb[186].mxu1 }
 0x7a8   :  { %v7049_v6 = vmul.f32 %v9242_v39, %v16255_v42  ;;  %v6549_v41 = vpop.f32.mrb[187].mxu1  ;;  %v16272_v39 = vld [vmem:[#allocation29_spill] sm:$0xff] }
 0x7a9   :  { %v7048_v3 = vmul.f32 %v16256_v48, %v6549_v41  ;;  %v16273_v41 = vld [vmem:[#allocation36_spill] sm:$0xff] }
 0x7ab   :  { %v9638_v58 = vpack.c.bf16 %v7049_v6, %v7048_v3  ;;  %v9245_v5 = vpop.f32.mrb[188].mxu1 }
 0x7ac   :  { %v7051_v17 = vmul.f32 %v9245_v5, %v16257_v54  ;;  %v6559_v27 = vpop.f32.mrb[189].mxu1  ;;  %v16274_v5 = vld [vmem:[#allocation34_spill] sm:$0xff] }
 0x7ad   :  { %v7050_v40 = vmul.f32 %v6559_v27, %v16258_v11  ;;  %v16275_v27 = vld [vmem:[#allocation35_spill] sm:$0xff] }
 0x7af   :  { %v9642_v25 = vpack.c.bf16 %v7051_v17, %v7050_v40  ;;  %v9248_v28 = vpop.f32.mrb[190].mxu1 }
 0x7b0   :  { %v15012_v60 = vmul.f32 %v9248_v28, %v16259_v9  ;;  %v6569_v10 = vpop.f32.mrb[191].mxu1  ;;  %v16276_v28 = vld [vmem:[#allocation33_spill] sm:$0xff] }
 0x7b1   :  { %v7052_v51 = vmul.f32 %v16260_v47, %v6569_v10  ;;  %v16277_v10 = vld [vmem:[#allocation40_spill] sm:$0xff] }
 0x7b3   :  { %v9646_v22 = vpack.c.bf16 %v15012_v60, %v7052_v51  ;;  %v9251_v44 = vpop.f32.mrb[192].mxu1 }
 0x7b4   :  { %v7055_v31 = vmul.f32 %v9251_v44, %v16261_v61  ;;  %v6579_v4 = vpop.f32.mrb[193].mxu1  ;;  %v16278_v44 = vld [vmem:[#allocation38_spill] sm:$0xff] }
 0x7b5   :  { %v7054_v23 = vmul.f32 %v6579_v4, %v16262_v33  ;;  %v16279_v4 = vld [vmem:[#allocation39_spill] sm:$0xff] }
 0x7b7   :  { %v9616_v59 = vpack.c.bf16 %v7055_v31, %v7054_v23  ;;  %v9254_v1 = vpop.f32.mrb[194].mxu1 }
 0x7b8   :  { %v7057_v32 = vmul.f32 %v9254_v1, %v16263_v20  ;;  %v6589_v45 = vpop.f32.mrb[195].mxu1  ;;  %v10309_v1 = vld [vmem:[%s15392_s10] sm:$0xff] }
 0x7b9   :  { %v7056_v35 = vmul.f32 %v16264_v37, %v6589_v45  ;;  %9617 = vmatprep.subr.bf16.mxu0 %v9616_v59  ;;  %v16281_v45 = vld [vmem:[#allocation44_spill] sm:$0xff] }
 0x7ba   :  { %9619 = vmatpush3.bf16.msra.mxu0 %v9618_v2 }
 0x7bb   :  { %v9620_v62 = vpack.c.bf16 %v7057_v32, %v7056_v35  ;;  %v9257_v57 = vpop.f32.mrb[196].mxu1 }
 0x7bc   :  { %v7059_v49 = vmul.f32 %v9257_v57, %v16265_v12  ;;  %v6599_v36 = vpop.f32.mrb[197].mxu1  ;;  %v10311_v12 = vld [vmem:[%s15392_s10 + $0x38] sm:$0xff] }
 0x7bd   :  { %v7058_v63 = vmul.f32 %v6599_v36, %v16266_v30  ;;  %9621 = vmatprep.subr.bf16.mxu0 %v9620_v62  ;;  %v16282_v62 = vld [vmem:[#allocation42_spill] sm:$0xff] }
 0x7be   :  { %9623 = vmatpush3.bf16.msra.mxu0 %v9622_v46 }
 0x7bf   :  { %v9624_v16 = vpack.c.bf16 %v7059_v49, %v7058_v63  ;;  %v9260_v8 = vpop.f32.mrb[198].mxu1  ;;  %v10312_v49 = vld [vmem:[%s15392_s10 + $0x78] sm:$0xff]  ;;  %v16283_v63 = vld [vmem:[#allocation43_spill] sm:$0xff] }
 0x7c0   :  { %v7061_v7 = vmul.f32 %v9260_v8, %v16267_v55  ;;  %v6609_v21 = vpop.f32.mrb[199].mxu1  ;;  %v16284_v55 = vld [vmem:[#allocation41_spill] sm:$0xff] }
 0x7c1   :  { %v7060_v43 = vmul.f32 %v16268_v38, %v6609_v21  ;;  %9625 = vmatprep.subr.bf16.mxu0 %v9624_v16  ;;  %v10313_v21 = vld [vmem:[%s15392_s10 + $0x70] sm:$0xff] }
 0x7c2   :  { %9627 = vmatpush3.bf16.msra.mxu0 %v9626_v34  ;;  %v10314_v38 = vld [vmem:[%s15392_s10 + $0xb0] sm:$0xff] }
 0x7c3   :  { %v9628_v29 = vpack.c.bf16 %v7061_v7, %v7060_v43  ;;  %v9263_v2 = vpop.f32.mrb[200].mxu1 }
 0x7c4   :  { %v7063_v15 = vmul.f32 %v9263_v2, %v16269_v19  ;;  %v6619_v13 = vpop.f32.mrb[201].mxu1  ;;  %v16285_v2 = vld [vmem:[#allocation51_spill] sm:$0xff] }
 0x7c5   :  { %v7062_v18 = vmul.f32 %v6619_v13, %v16270_v24  ;;  %9629 = vmatprep.subr.bf16.mxu0 %v9628_v29  ;;  %v16286_v13 = vld [vmem:[#allocation47_spill] sm:$0xff] }
 0x7c6   :  { %9631 = vmatpush3.bf16.msra.mxu0 %v9630_v53 }
 0x7c7   :  { %v9632_v56 = vpack.c.bf16 %v7063_v15, %v7062_v18  ;;  %v9266_v46 = vpop.f32.mrb[202].mxu1  ;;  %v10315_v18 = vld [vmem:[%s15392_s10 + $0xa8] sm:$0xff] }
 0x7c8   :  { %v7065_v0 = vmul.f32 %v9266_v46, %v16271_v50  ;;  %v6629_v52 = vpop.f32.mrb[203].mxu1 }
 0x7c9   :  { %v7064_v42 = vmul.f32 %v16272_v39, %v6629_v52  ;;  %9633 = vmatprep.subr.bf16.mxu0 %v9632_v56  ;;  %v10316_v56 = vld [vmem:[%s15392_s10 + $0xe8] sm:$0xf] }
 0x7ca   :  { %9635 = vmatpush3.bf16.msra.mxu0 %v9634_v14 }
 0x7cb   :  { %v9636_v6 = vpack.c.bf16 %v7065_v0, %v7064_v42  ;;  %v9269_v34 = vpop.f32.mrb[204].mxu1  ;;  %v16287_v0 = vld [vmem:[#allocation49_spill] sm:$0xff] }
 0x7cc   :  { %v7067_v48 = vmul.f32 %v9269_v34, %v16273_v41  ;;  %v6639_v3 = vpop.f32.mrb[205].mxu1  ;;  %v16288_v42 = vld [vmem:[#allocation45_spill] sm:$0xff]  ;;  %v10317_v34 = vld [vmem:[%s15392_s10 + $0xe0] sm:$0xf]  ;;  %v10318_v41 = vld [vmem:[%s15392_s10 + $0x18] sm:$0xff] }
 0x7cd   :  { %v7066_v54 = vmul.f32 %v6639_v3, %v16274_v5  ;;  %9637 = vmatprep.subr.bf16.mxu0 %v9636_v6  ;;  %v16289_v5 = vld [vmem:[#allocation57_spill] sm:$0xff] }
 0x7ce   :  { %9639 = vmatpush3.bf16.msra.mxu0 %v9638_v58 }
 0x7cf   :  { %v9640_v17 = vpack.c.bf16 %v7067_v48, %v7066_v54  ;;  %v9272_v53 = vpop.f32.mrb[206].mxu1 }
 0x7d0   :  { %v7069_v11 = vmul.f32 %v9272_v53, %v16275_v27  ;;  %v6649_v40 = vpop.f32.mrb[207].mxu1  ;;  %v16290_v53 = vld [vmem:[#allocation55_spill] sm:$0xff] }
 0x7d1   :  { %v7068_v9 = vmul.f32 %v16276_v28, %v6649_v40  ;;  %9641 = vmatprep.subr.bf16.mxu0 %v9640_v17  ;;  %v16291_v28 = vld [vmem:[#allocation56_spill] sm:$0xff] }
 0x7d2   :  { %9643 = vmatpush3.bf16.msra.mxu0 %v9642_v25  ;;  %v16280_v25 = vld [vmem:[#allocation37_spill] sm:$0xff] }
 0x7d3   :  { %v9644_v60 = vpack.c.bf16 %v7069_v11, %v7068_v9  ;;  %v9275_v14 = vpop.f32.mrb[208].mxu1 }
 0x7d4   :  { %v15033_v47 = vmul.f32 %v9275_v14, %v16277_v10  ;;  %v6659_v51 = vpop.f32.mrb[209].mxu1  ;;  %v16292_v14 = vld [vmem:[#allocation53_spill] sm:$0xff] }
 0x7d5   :  { %v15036_v61 = vmul.f32 %v6659_v51, %v16278_v44  ;;  %9645 = vmatprep.subr.bf16.mxu0 %v9644_v60 }
 0x7d6   :  { %9647 = vmatpush3.bf16.msra.mxu0 %v9646_v22  ;;  %v10310_v22 = vld [vmem:[%s15392_s10 + $0x40] sm:$0xff] }
 0x7d7   :  { %v9650_v58 = vpack.c.bf16 %v15033_v47, %v15036_v61  ;;  %v9278_v31 = vpop.f32.mrb[210].mxu1 }
 0x7d8   :  { %v15041_v33 = vmul.f32 %v9278_v31, %v16279_v4  ;;  %v6669_v23 = vpop.f32.mrb[211].mxu1  ;;  %v16293_v31 = vld [vmem:[#allocation64_spill] sm:$0xff] }
 0x7d9   :  { %v15044_v59 = vmul.f32 %v16280_v25, %v6669_v23  ;;  %7211 = vmatmul.mubr.f32.vlgmr.msra.gmra.mrb[228].mxu0 %v10309_v1  ;;  %v16294_v25 = vld [vmem:[#allocation60_spill] sm:$0xff] }
 0x7da   :  { %7215 = vmatprep.mubr.f32.mxu0 %v10310_v22 }
 0x7db   :  { %v9654_v20 = vpack.c.bf16 %v15041_v33, %v15044_v59  ;;  %v9281_v32 = vpop.f32.mrb[212].mxu1 }
 0x7dc   :  { %v15055_v37 = vmul.f32 %v9281_v32, %v16281_v45  ;;  %v6679_v35 = vpop.f32.mrb[213].mxu1  ;;  %v16295_v45 = vld [vmem:[#allocation62_spill] sm:$0xff] }
 0x7dd   :  { %v15058_v57 = vmul.f32 %v6679_v35, %v16282_v62  ;;  %7216 = vmatmul.mubr.f32.gmra.mrb[230].mxu0 %v10311_v12  ;;  %v16296_v62 = vld [vmem:[#allocation58_spill] sm:$0xff] }
 0x7de   :  { %7220 = vmatprep.mubr.f32.mxu0 %v10312_v49 }
 0x7df   :  { %v9658_v36 = vpack.c.bf16 %v15055_v37, %v15058_v57  ;;  %v9284_v30 = vpop.f32.mrb[214].mxu1 }
 0x7e0   :  { %v15069_v16 = vmul.f32 %v9284_v30, %v16283_v63  ;;  %v6689_v8 = vpop.f32.mrb[215].mxu1  ;;  %v16297_v30 = vld [vmem:[#allocation72_spill] sm:$0xff] }
 0x7e1   :  { %v15072_v7 = vmul.f32 %v16284_v55, %v6689_v8  ;;  %7221 = vmatmul.mubr.f32.gmra.mrb[232].mxu0 %v10313_v21  ;;  %v16298_v8 = vld [vmem:[#allocation68_spill] sm:$0xff] }
 0x7e2   :  { %7225 = vmatprep.mubr.f32.mxu0 %v10314_v38  ;;  %v16299_v38 = vld [vmem:[#allocation70_spill] sm:$0xff] }
 0x7e3   :  { %v9662_v43 = vpack.c.bf16 %v15069_v16, %v15072_v7  ;;  %v9287_v29 = vpop.f32.mrb[216].mxu1 }
 0x7e4   :  { %v15083_v19 = vmul.f32 %v9287_v29, %v16285_v2  ;;  %v6699_v15 = vpop.f32.mrb[217].mxu1 }
 0x7e5   :  { %v15086_v24 = vmul.f32 %v6699_v15, %v16286_v13  ;;  %7226 = vmatmul.mubr.f32.gmra.mrb[234].mxu0 %v10315_v18  ;;  %v16301_v15 = vld [vmem:[#allocation80_spill] sm:$0xff] }
 0x7e6   :  { %7230 = vmatprep.mubr.f32.mxu0 %v10316_v56  ;;  %v16302_v18 = vld [vmem:[#allocation76_spill] sm:$0xff] }
 0x7e7   :  { %v9666_v46 = vpack.c.bf16 %v15083_v19, %v15086_v24  ;;  %v9290_v50 = vpop.f32.mrb[218].mxu1  ;;  %v16300_v19 = vld [vmem:[#allocation66_spill] sm:$0xff] }
 0x7e8   :  { %v15097_v52 = vmul.f32 %v9290_v50, %v16287_v0  ;;  %v6709_v39 = vpop.f32.mrb[219].mxu1 }
 0x7e9   :  { %v7080_v6 = vmul.f32 %v16288_v42, %v6709_v39  ;;  %7231 = vmatmul.mubr.f32.gmra.mrb[236].mxu0 %v10317_v34 }
 0x7ea   :  { %7300 = vmatprep.mubr.f32.mxu0 %v10318_v41 }
 0x7eb   :  { %v9670_v48 = vpack.c.bf16 %v15097_v52, %v7080_v6  ;;  %v9293_v3 = vpop.f32.mrb[220].mxu1  ;;  %v16304_v52 = vld [vmem:[#allocation74_spill] sm:$0xff]  ;;  %v16305_v6 = vld [vmem:[#allocation88_spill] sm:$0xff] }
 0x7ec   :  { %v7083_v54 = vmul.f32 %v9293_v3, %v16289_v5  ;;  %v6719_v17 = vpop.f32.mrb[221].mxu1  ;;  %v16306_v3 = vld [vmem:[#allocation84_spill] sm:$0xff] }
 0x7ed   :  { %v7082_v27 = vmul.f32 %v6719_v17, %v16290_v53  ;;  %v16307_v17 = vld [vmem:[#allocation86_spill] sm:$0xff] }
 0x7ef   :  { %v9674_v11 = vpack.c.bf16 %v7083_v54, %v7082_v27  ;;  %v9296_v40 = vpop.f32.mrb[222].mxu1 }
 0x7f0   :  { %v15110_v9 = vmul.f32 %v9296_v40, %v16291_v28  ;;  %v6729_v60 = vpop.f32.mrb[223].mxu1  ;;  %v16308_v40 = vld [vmem:[#allocation82_spill] sm:$0xff] }
 0x7f1   :  { %v7084_v10 = vmul.f32 %v16292_v14, %v6729_v60  ;;  %v16309_v60 = vld [vmem:[#allocation96_spill] sm:$0xff] }
 0x7f3   :  { %v9678_v51 = vpack.c.bf16 %v15110_v9, %v7084_v10  ;;  %v9299_v44 = vpop.f32.mrb[224].mxu1 }
 0x7f4   :  { %v7087_v4 = vmul.f32 %v9299_v44, %v16293_v31  ;;  %v6739_v23 = vpop.f32.mrb[225].mxu1  ;;  %v16310_v44 = vld [vmem:[#allocation92_spill] sm:$0xff] }
 0x7f5   :  { %v7086_v1 = vmul.f32 %v6739_v23, %v16294_v25  ;;  %v16311_v23 = vld [vmem:[#allocation94_spill] sm:$0xff] }
 0x7f7   :  { %v9648_v22 = vpack.c.bf16 %v7087_v4, %v7086_v1  ;;  %v9302_v32 = vpop.f32.mrb[226].mxu1 }
 0x7f8   :  { %v7089_v37 = vmul.f32 %v9302_v32, %v16295_v45  ;;  %v6749_v35 = vpop.f32.mrb[227].mxu1  ;;  %v10319_v32 = vld [vmem:[%s15392_s10 + $0x10] sm:$0xff] }
 0x7f9   :  { %v7088_v57 = vmul.f32 %v16296_v62, %v6749_v35  ;;  %9649 = vmatprep.subr.bf16.mxu0 %v9648_v22  ;;  %v16313_v35 = vld [vmem:[#allocation104_spill] sm:$0xff] }
 0x7fa   :  { %9651 = vmatpush3.bf16.msra.mxu0 %v9650_v58 }
 0x7fb   :  { %v9652_v12 = vpack.c.bf16 %v7089_v37, %v7088_v57  ;;  %v9305_v49 = vpop.f32.mrb[228].mxu1 }
 0x7fc   :  { %v7091_v63 = vmul.f32 %v9305_v49, %v16297_v30  ;;  %v6759_v16 = vpop.f32.mrb[229].mxu1  ;;  %v10321_v30 = vld [vmem:[%s15392_s10 + $0x48] sm:$0xff] }
 0x7fd   :  { %v7090_v55 = vmul.f32 %v6759_v16, %v16298_v8  ;;  %9653 = vmatprep.subr.bf16.mxu0 %v9652_v12  ;;  %v16314_v12 = vld [vmem:[#allocation100_spill] sm:$0xff] }
 0x7fe   :  { %9655 = vmatpush3.bf16.msra.mxu0 %v9654_v20  ;;  %v16303_v20 = vld [vmem:[#allocation78_spill] sm:$0xff] }
 0x7ff   :  { %v9656_v7 = vpack.c.bf16 %v7091_v63, %v7090_v55  ;;  %v9308_v21 = vpop.f32.mrb[230].mxu1  ;;  %v10322_v63 = vld [vmem:[%s15392_s10 + $0x88] sm:$0xff]  ;;  %v16315_v55 = vld [vmem:[#allocation102_spill] sm:$0xff] }
 0x800   :  { %v7093_v29 = vmul.f32 %v9308_v21, %v16299_v38  ;;  %v6769_v2 = vpop.f32.mrb[231].mxu1  ;;  %v16316_v38 = vld [vmem:[#allocation98_spill] sm:$0xff] }
 0x801   :  { %v7092_v47 = vmul.f32 %v16300_v19, %v6769_v2  ;;  %9657 = vmatprep.subr.bf16.mxu0 %v9656_v7  ;;  %v10323_v2 = vld [vmem:[%s15392_s10 + $0x80] sm:$0xff] }
 0x802   :  { %9659 = vmatpush3.bf16.msra.mxu0 %v9658_v36  ;;  %v10324_v19 = vld [vmem:[%s15392_s10 + $0xc0] sm:$0xff] }
 0x803   :  { %v9660_v61 = vpack.c.bf16 %v7093_v29, %v7092_v47  ;;  %v9311_v58 = vpop.f32.mrb[232].mxu1 }
 0x804   :  { %v7095_v13 = vmul.f32 %v9311_v58, %v16301_v15  ;;  %v6779_v24 = vpop.f32.mrb[233].mxu1  ;;  %v16317_v58 = vld [vmem:[#allocation112_spill] sm:$0xff] }
 0x805   :  { %v7094_v56 = vmul.f32 %v6779_v24, %v16302_v18  ;;  %9661 = vmatprep.subr.bf16.mxu0 %v9660_v61  ;;  %v16318_v24 = vld [vmem:[#allocation108_spill] sm:$0xff] }
 0x806   :  { %9663 = vmatpush3.bf16.msra.mxu0 %v9662_v43 }
 0x807   :  { %v9664_v33 = vpack.c.bf16 %v7095_v13, %v7094_v56  ;;  %v9314_v59 = vpop.f32.mrb[234].mxu1  ;;  %v10325_v56 = vld [vmem:[%s15392_s10 + $0xb8] sm:$0xff] }
 0x808   :  { %v7097_v50 = vmul.f32 %v9314_v59, %v16303_v20  ;;  %v6789_v0 = vpop.f32.mrb[235].mxu1 }
 0x809   :  { %v7096_v39 = vmul.f32 %v16304_v52, %v6789_v0  ;;  %9665 = vmatprep.subr.bf16.mxu0 %v9664_v33  ;;  %v10326_v33 = vld [vmem:[%s15392_s10 + $0xf8] sm:$0xf] }
 0x80a   :  { %9667 = vmatpush3.bf16.msra.mxu0 %v9666_v46 }
 0x80b   :  { %v9668_v42 = vpack.c.bf16 %v7097_v50, %v7096_v39  ;;  %v9317_v36 = vpop.f32.mrb[236].mxu1  ;;  %v16319_v50 = vld [vmem:[#allocation110_spill] sm:$0xff] }
 0x80c   :  { %v7099_v34 = vmul.f32 %v9317_v36, %v16305_v6  ;;  %v6799_v41 = vpop.f32.mrb[237].mxu1  ;;  %v16320_v39 = vld [vmem:[#allocation106_spill] sm:$0xff]  ;;  %v10327_v36 = vld [vmem:[%s15392_s10 + $0xf0] sm:$0xf]  ;;  %v10328_v6 = vld [vmem:[%s15392_s10 + $0x28] sm:$0xff] }
 0x80d   :  { %v7098_v5 = vmul.f32 %v6799_v41, %v16306_v3  ;;  %9669 = vmatprep.subr.bf16.mxu0 %v9668_v42  ;;  %v16321_v3 = vld [vmem:[#allocation120_spill] sm:$0xff] }
 0x80e   :  { %9671 = vmatpush3.bf16.msra.mxu0 %v9670_v48 }
 0x80f   :  { %v9672_v54 = vpack.c.bf16 %v7099_v34, %v7098_v5  ;;  %v9320_v43 = vpop.f32.mrb[238].mxu1 }
 0x810   :  { %v7101_v53 = vmul.f32 %v9320_v43, %v16307_v17  ;;  %v6809_v27 = vpop.f32.mrb[239].mxu1  ;;  %v16322_v43 = vld [vmem:[#allocation116_spill] sm:$0xff] }
 0x811   :  { %v7100_v28 = vmul.f32 %v16308_v40, %v6809_v27  ;;  %9673 = vmatprep.subr.bf16.mxu0 %v9672_v54  ;;  %v16323_v40 = vld [vmem:[#allocation118_spill] sm:$0xff] }
 0x812   :  { %9675 = vmatpush3.bf16.msra.mxu0 %v9674_v11  ;;  %v16312_v11 = vld [vmem:[#allocation90_spill] sm:$0xff] }
 0x813   :  { %v9676_v9 = vpack.c.bf16 %v7101_v53, %v7100_v28  ;;  %v9323_v46 = vpop.f32.mrb[240].mxu1 }
 0x814   :  { %v15137_v14 = vmul.f32 %v9323_v46, %v16309_v60  ;;  %v6819_v10 = vpop.f32.mrb[241].mxu1  ;;  %v16324_v46 = vld [vmem:[#allocation114_spill] sm:$0xff] }
 0x815   :  { %v15140_v31 = vmul.f32 %v6819_v10, %v16310_v44  ;;  %9677 = vmatprep.subr.bf16.mxu0 %v9676_v9 }
 0x816   :  { %9679 = vmatpush3.bf16.msra.mxu0 %v9678_v51  ;;  %v10320_v51 = vld [vmem:[%s15392_s10 + $0x50] sm:$0xff] }
 0x817   :  { %v9682_v48 = vpack.c.bf16 %v15137_v14, %v15140_v31  ;;  %v9326_v4 = vpop.f32.mrb[242].mxu1 }
 0x818   :  { %v15145_v25 = vmul.f32 %v9326_v4, %v16311_v23  ;;  %v6829_v1 = vpop.f32.mrb[243].mxu1  ;;  %v16325_v4 = vld [vmem:[#allocation128_spill] sm:$0xff] }
 0x819   :  { %v15148_v22 = vmul.f32 %v16312_v11, %v6829_v1  ;;  %7301 = vmatmul.mubr.f32.vlgmr.msra.gmra.mrb[238].mxu0 %v10319_v32  ;;  %v16326_v11 = vld [vmem:[#allocation124_spill] sm:$0xff] }
 0x81a   :  { %7305 = vmatprep.mubr.f32.mxu0 %v10320_v51 }
 0x81b   :  { %v9686_v45 = vpack.c.bf16 %v15145_v25, %v15148_v22  ;;  %v9329_v37 = vpop.f32.mrb[244].mxu1 }
 0x81c   :  { %v15159_v62 = vmul.f32 %v9329_v37, %v16313_v35  ;;  %v6839_v57 = vpop.f32.mrb[245].mxu1  ;;  %v16327_v35 = vld [vmem:[#allocation126_spill] sm:$0xff] }
 0x81d   :  { %v15162_v49 = vmul.f32 %v6839_v57, %v16314_v12  ;;  %7306 = vmatmul.mubr.f32.gmra.mrb[240].mxu0 %v10321_v30  ;;  %v16328_v12 = vld [vmem:[#allocation122_spill] sm:$0xff] }
 0x81e   :  { %7310 = vmatprep.mubr.f32.mxu0 %v10322_v63 }
 0x81f   :  { %v9690_v16 = vpack.c.bf16 %v15159_v62, %v15162_v49  ;;  %v9332_v8 = vpop.f32.mrb[246].mxu1 }
 0x820   :  { %v15173_v7 = vmul.f32 %v9332_v8, %v16315_v55  ;;  %v6849_v21 = vpop.f32.mrb[247].mxu1  ;;  %v16329_v8 = vld [vmem:[#allocation136_spill] sm:$0xff] }
 0x821   :  { %v15176_v29 = vmul.f32 %v16316_v38, %v6849_v21  ;;  %7311 = vmatmul.mubr.f32.gmra.mrb[242].mxu0 %v10323_v2  ;;  %v16330_v21 = vld [vmem:[#allocation132_spill] sm:$0xff] }
 0x822   :  { %7315 = vmatprep.mubr.f32.mxu0 %v10324_v19  ;;  %v16331_v19 = vld [vmem:[#allocation134_spill] sm:$0xff] }
 0x823   :  { %v9694_v47 = vpack.c.bf16 %v15173_v7, %v15176_v29  ;;  %v9335_v61 = vpop.f32.mrb[248].mxu1 }
 0x824   :  { %v15187_v15 = vmul.f32 %v9335_v61, %v16317_v58  ;;  %v6859_v13 = vpop.f32.mrb[249].mxu1 }
 0x825   :  { %v15190_v18 = vmul.f32 %v6859_v13, %v16318_v24  ;;  %7316 = vmatmul.mubr.f32.gmra.mrb[244].mxu0 %v10325_v56  ;;  %v16333_v13 = vld [vmem:[#allocation144_spill] sm:$0xff] }
 0x826   :  { %7320 = vmatprep.mubr.f32.mxu0 %v10326_v33  ;;  %v16334_v56 = vld [vmem:[#allocation140_spill] sm:$0xff] }
 0x827   :  { %v9698_v59 = vpack.c.bf16 %v15187_v15, %v15190_v18  ;;  %v9338_v20 = vpop.f32.mrb[250].mxu1  ;;  %v16332_v15 = vld [vmem:[#allocation130_spill] sm:$0xff] }
 0x828   :  { %v15201_v0 = vmul.f32 %v9338_v20, %v16319_v50  ;;  %v6869_v52 = vpop.f32.mrb[251].mxu1 }
 0x829   :  { %v7112_v42 = vmul.f32 %v16320_v39, %v6869_v52  ;;  %7321 = vmatmul.mubr.f32.gmra.mrb[246].mxu0 %v10327_v36 }
 0x82a   :  { %7390 = vmatprep.mubr.f32.mxu0 %v10328_v6 }
 0x82b   :  { %v9702_v34 = vpack.c.bf16 %v15201_v0, %v7112_v42  ;;  %v9341_v41 = vpop.f32.mrb[252].mxu1  ;;  %v16336_v0 = vld [vmem:[#allocation138_spill] sm:$0xff]  ;;  %v16337_v42 = vld [vmem:[#allocation151_spill] sm:$0xff] }
 0x82c   :  { %v7115_v5 = vmul.f32 %v9341_v41, %v16321_v3  ;;  %v6879_v54 = vpop.f32.mrb[253].mxu1  ;;  %v16338_v41 = vld [vmem:[#allocation148_spill] sm:$0xff] }
 0x82d   :  { %v7114_v17 = vmul.f32 %v6879_v54, %v16322_v43  ;;  %v16339_v54 = vld [vmem:[#allocation149_spill] sm:$0xff] }
 0x82f   :  { %v9706_v53 = vpack.c.bf16 %v7115_v5, %v7114_v17  ;;  %v9344_v27 = vpop.f32.mrb[254].mxu1 }
 0x830   :  { %v15214_v28 = vmul.f32 %v9344_v27, %v16323_v40  ;;  %v6889_v9 = vpop.f32.mrb[255].mxu1  ;;  %v16340_v27 = vld [vmem:[#allocation146_spill] sm:$0xff] }
 0x831   :  { %v7116_v60 = vmul.f32 %v16324_v46, %v6889_v9  ;;  %v16341_v9 = vld [vmem:[#allocation158_spill] sm:$0xff] }
 0x833   :  { %v9710_v10 = vpack.c.bf16 %v15214_v28, %v7116_v60  ;;  %v9347_v44 = vpop.f32.mrb[0].mxu1 }
 0x834   :  { %v7119_v23 = vmul.f32 %v9347_v44, %v16325_v4  ;;  %v6899_v1 = vpop.f32.mrb[1].mxu1  ;;  %v16342_v44 = vld [vmem:[#allocation155_spill] sm:$0xff] }
 0x835   :  { %v7118_v32 = vmul.f32 %v6899_v1, %v16326_v11  ;;  %v16343_v1 = vmov 0.0|0.0   ;;  %v16344_v11 = vld [vmem:[#allocation156_spill] sm:$0xff] }
 0x837   :  { %v9680_v51 = vpack.c.bf16 %v7119_v23, %v7118_v32  ;;  %v9350_v37 = vpop.f32.mrb[2].mxu1 }
 0x838   :  { %v7121_v62 = vmul.f32 %v9350_v37, %v16327_v35  ;;  %v6909_v57 = vpop.f32.mrb[3].mxu1  ;;  %v16345_v37 = vld [vmem:[#allocation153_spill] sm:$0xff] }
 0x839   :  { %v7120_v49 = vmul.f32 %v16328_v12, %v6909_v57  ;;  %9681 = vmatprep.subr.bf16.mxu0 %v9680_v51  ;;  %v16346_v12 = vld [vmem:[#allocation166_spill] sm:$0xff] }
 0x83a   :  { %9683 = vmatpush3.bf16.msra.mxu0 %v9682_v48 }
 0x83b   :  { %v9684_v30 = vpack.c.bf16 %v7121_v62, %v7120_v49  ;;  %v9353_v63 = vpop.f32.mrb[4].mxu1  ;;  %v10330_v62 = vld [vmem:[%s15392_s10 + $0x60] sm:$0xff] }
 0x83c   :  { %v7123_v55 = vmul.f32 %v9353_v63, %v16329_v8  ;;  %v6919_v7 = vpop.f32.mrb[5].mxu1  ;;  %v16347_v63 = vld [vmem:[#allocation162_spill] sm:$0xff] }
 0x83d   :  { %v7122_v38 = vmul.f32 %v6919_v7, %v16330_v21  ;;  %9685 = vmatprep.subr.bf16.mxu0 %v9684_v30  ;;  %v10332_v7 = vld [vmem:[%s15392_s10 + $0x98] sm:$0xff] }
 0x83e   :  { %9687 = vmatpush3.bf16.msra.mxu0 %v9686_v45  ;;  %v16335_v45 = vld [vmem:[#allocation142_spill] sm:$0xff] }
 0x83f   :  { %v9688_v29 = vpack.c.bf16 %v7123_v55, %v7122_v38  ;;  %v9356_v2 = vpop.f32.mrb[6].mxu1  ;;  %v10331_v55 = vld [vmem:[%s15392_s10 + $0x58] sm:$0xff] }
 0x840   :  { %v7125_v61 = vmul.f32 %v9356_v2, %v16331_v19  ;;  %v6929_v58 = vpop.f32.mrb[7].mxu1 }
 0x841   :  { %v7124_v14 = vmul.f32 %v16332_v15, %v6929_v58  ;;  %9689 = vmatprep.subr.bf16.mxu0 %v9688_v29  ;;  %v16348_v29 = vld [vmem:[#allocation164_spill] sm:$0xff]  ;;  %v10333_v15 = vld [vmem:[%s15392_s10 + $0x90] sm:$0xff] }
 0x842   :  { %9691 = vmatpush3.bf16.msra.mxu0 %v9690_v16 }
 0x843   :  { %v9692_v31 = vpack.c.bf16 %v7125_v61, %v7124_v14  ;;  %v9359_v48 = vpop.f32.mrb[8].mxu1  ;;  %v16349_v61 = vld [vmem:[#allocation160_spill] sm:$0xff]  ;;  %v10334_v14 = vld [vmem:[%s15392_s10 + $0xd0] sm:$0xff] }
 0x844   :  { %v7127_v24 = vmul.f32 %v9359_v48, %v16333_v13  ;;  %v6939_v18 = vpop.f32.mrb[9].mxu1  ;;  %v16350_v13 = vld [vmem:[#allocation174_spill] sm:$0xff] }
 0x845   :  { %v7126_v33 = vmul.f32 %v6939_v18, %v16334_v56  ;;  %9693 = vmatprep.subr.bf16.mxu0 %v9692_v31  ;;  %v16351_v56 = vld [vmem:[#allocation170_spill] sm:$0xff] }
 0x846   :  { %9695 = vmatpush3.bf16.msra.mxu0 %v9694_v47 }
 0x847   :  { %v9696_v25 = vpack.c.bf16 %v7127_v24, %v7126_v33  ;;  %v9362_v22 = vpop.f32.mrb[10].mxu1 }
 0x848   :  { %v7129_v20 = vmul.f32 %v9362_v22, %v16335_v45  ;;  %v6949_v50 = vpop.f32.mrb[11].mxu1  ;;  %v10336_v22 = vld [vmem:[%s15392_s10 + $0x108] sm:$0xf] }
 0x849   :  { %v7128_v52 = vmul.f32 %v16336_v0, %v6949_v50  ;;  %9697 = vmatprep.subr.bf16.mxu0 %v9696_v25  ;;  %v10335_v25 = vld [vmem:[%s15392_s10 + $0xc8] sm:$0xff] }
 0x84a   :  { %9699 = vmatpush3.bf16.msra.mxu0 %v9698_v59  ;;  %v16352_v50 = vld [vmem:[#allocation172_spill] sm:$0xff] }
 0x84b   :  { %v9700_v39 = vpack.c.bf16 %v7129_v20, %v7128_v52  ;;  %v9365_v16 = vpop.f32.mrb[12].mxu1 }
 0x84c   :  { %v7131_v36 = vmul.f32 %v9365_v16, %v16337_v42  ;;  %v6959_v6 = vpop.f32.mrb[13].mxu1  ;;  %v10337_v42 = vld [vmem:[%s15392_s10 + $0x100] sm:$0xf] }
 0x84d   :  { %v7130_v3 = vmul.f32 %v6959_v6, %v16338_v41  ;;  %9701 = vmatprep.subr.bf16.mxu0 %v9700_v39  ;;  %v16353_v39 = vld [vmem:[#allocation168_spill] sm:$0xff]  ;;  %v10338_v6 = vld [vmem:[%s15392_s10 + $0x30] sm:$0xff] }
 0x84e   :  { %9703 = vmatpush3.bf16.msra.mxu0 %v9702_v34  ;;  %v10339_v41 = vld [vmem:[%s15392_s10 + $0x68] sm:$0xff] }
 0x84f   :  { %v9704_v5 = vpack.c.bf16 %v7131_v36, %v7130_v3  ;;  %v9368_v47 = vpop.f32.mrb[14].mxu1  ;;  %v10340_v3 = vld [vmem:[%s15392_s10 + $0xa0] sm:$0xff] }
 0x850   :  { %v7133_v43 = vmul.f32 %v9368_v47, %v16339_v54  ;;  %v6969_v17 = vpop.f32.mrb[15].mxu1  ;;  %v10342_v47 = vld [vmem:[%s15392_s10 + $0x110] sm:$0xf] }
 0x851   :  { %v7132_v40 = vmul.f32 %v16340_v27, %v6969_v17  ;;  %9705 = vmatprep.subr.bf16.mxu0 %v9704_v5  ;;  %v10341_v5 = vld [vmem:[%s15392_s10 + $0xd8] sm:$0xff] }
 0x852   :  { %9707 = vmatpush3.bf16.msra.mxu0 %v9706_v53  ;;  %v10329_v53 = vld [vmem:[%s15392_s10 + $0x20] sm:$0xff] }
 0x853   :  { %v9708_v28 = vpack.c.bf16 %v7133_v43, %v7132_v40  ;;  %v9371_v59 = vpop.f32.mrb[16].mxu1 }
 0x854   :  { %v7135_v46 = vmul.f32 %v9371_v59, %v16341_v9  ;;  %v6979_v60 = vpop.f32.mrb[17].mxu1 }
 0x855   :  { %v7134_v4 = vmul.f32 %v6979_v60, %v16342_v44  ;;  %9709 = vmatprep.subr.bf16.mxu0 %v9708_v28 }
 0x856   :  { %9711 = vmatpush3.bf16.msra.mxu0 %v9710_v10 }
 0x857   :  { %v9713_v23 = vpack.c.bf16 %v7135_v46, %v7134_v4  ;;  %v9374_v34 = vpop.f32.mrb[18].mxu1  ;;  %9712 = vmatprep.subr.bf16.mxu0 %v16343_v1 }
 0x858   :  { %v7137_v32 = vmul.f32 %v9374_v34, %v16344_v11  ;;  %v6989_v51 = vpop.f32.mrb[19].mxu1  ;;  %v9755_v34 = vld [vmem:[%s15388_s6] sm:$0xff]  }
 0x859   :  { %v7136_v35 = vmul.f32 %v16345_v37, %v6989_v51  ;;  %7391 = vmatmul.mubr.f32.vlgmr.msra.gmra.mrb[248].mxu0 %v10329_v53  ;;  %9427 = vmatpush3.bf16.msra.mxu1 %v9755_v34  ;;  %v9757_v51 = vld [vmem:[%s15388_s6 + $0x10] ss:$0 sps:$4 sm:$0x33]  }
 0x85a   :  { %9714 = vmatpush3.bf16.msra.mxu0 %v9713_v23  ;;  %7395 = vmatprep.mubr.f32.mxu0 %v10330_v62  ;;  %v7549_v37 = vsel %vm1424_vm2, %v9757_v51, 0 }
 0x85b   :  { %v9716_v10 = vpack.c.bf16 %v7137_v32, %v7136_v35  ;;  %v9377_v57 = vpop.f32.mrb[20].mxu1  ;;  %9715 = vmatprep.subr.bf16.mxu0 %v16343_v1  ;;  %9428 = vmatprep.subr.bf16.mxu1 %v16172_v26  ;;  %v9756_v32 = vld [vmem:[%s15388_s6 + $0x8] sm:$0xff]  }
 0x85c   :  { %v7139_v49 = vmul.f32 %v9377_v57, %v16346_v12  ;;  %v6999_v30 = vpop.f32.mrb[21].mxu1 }
 0x85d   :  { %v7138_v8 = vmul.f32 %v6999_v30, %v16347_v63  ;;  %7396 = vmatmul.mubr.f32.gmra.mrb[250].mxu0 %v10331_v55  ;;  %9429 = vmatpush3.bf16.msra.mxu1 %v9756_v32 }
 0x85e   :  { %9717 = vmatpush3.bf16.msra.mxu0 %v9716_v10  ;;  %7400 = vmatprep.mubr.f32.mxu0 %v10332_v7 }
 0x85f   :  { %v9719_v21 = vpack.c.bf16 %v7139_v49, %v7138_v8  ;;  %v9380_v38 = vpop.f32.mrb[22].mxu1  ;;  %9718 = vmatprep.subr.bf16.mxu0 %v16343_v1  ;;  %9430 = vmatprep.subr.bf16.mxu1 %v16172_v26 }
 0x860   :  { %v7141_v2 = vmul.f32 %v9380_v38, %v16348_v29  ;;  %v7009_v19 = vpop.f32.mrb[23].mxu1 }
 0x861   :  { %v7140_v58 = vmul.f32 %v16349_v61, %v7009_v19  ;;  %7401 = vmatmul.mubr.f32.gmra.mrb[252].mxu0 %v10333_v15  ;;  %9431 = vmatpush3.bf16.msra.mxu1 %v7549_v37 }
 0x862   :  { %9720 = vmatpush3.bf16.msra.mxu0 %v9719_v21  ;;  %7405 = vmatprep.mubr.f32.mxu0 %v10334_v14 }
 0x863   :  { %v9722_v31 = vpack.c.bf16 %v7141_v2, %v7140_v58  ;;  %v9383_v48 = vpop.f32.mrb[24].mxu1  ;;  %9721 = vmatprep.subr.bf16.mxu0 %v16343_v1 }
 0x864   :  { %v7143_v24 = vmul.f32 %v9383_v48, %v16350_v13  ;;  %v7019_v18 = vpop.f32.mrb[25].mxu1 }
 0x865   :  { %v7142_v33 = vmul.f32 %v7019_v18, %v16351_v56  ;;  %7406 = vmatmul.mubr.f32.gmra.mrb[254].mxu0 %v10335_v25 }
 0x866   :  { %9723 = vmatpush3.bf16.msra.mxu0 %v9722_v31  ;;  %7410 = vmatprep.mubr.f32.mxu0 %v10336_v22 }
 0x867   :  { %v9725_v45 = vpack.c.bf16 %v7143_v24, %v7142_v33  ;;  %v9386_v20 = vpop.f32.mrb[26].mxu1  ;;  %9724 = vmatprep.subr.bf16.mxu0 %v16343_v1 }
 0x868   :  { %v7145_v0 = vmul.f32 %v9386_v20, %v16352_v50  ;;  %v7029_v52 = vpop.f32.mrb[27].mxu1 }
 0x869   :  { %v7144_v16 = vmul.f32 %v16353_v39, %v7029_v52  ;;  %7411 = vmatmul.mubr.f32.gmra.mrb[0].mxu0 %v10337_v42 }
 0x86a   :  { %9726 = vmatpush3.bf16.msra.mxu0 %v9725_v45  ;;  %9411 = vmatprep.mubr.msk.f32.mxu0 %vm10370_vm8, %v16172_v26 }
 0x86b   :  { %v9728_v36 = vpack.c.bf16 %v7145_v0, %v7144_v16  ;;  %9727 = vmatprep.subr.bf16.mxu0 %v16343_v1 }
 0x86e   :  { %9729 = vmatpush3.bf16.msra.mxu0 %v9728_v36 }
 0x871   :  { %9412 = vmatmul.mubr.msk.f32.vlgmr.msra.gmra.mrb[2].mxu0 %vm4904_vm9, %v10338_v6 }
 0x872   :  { %9414 = vmatprep.mubr.msk.f32.mxu0 %vm10370_vm8, %v16172_v26 }
 0x875   :  { %9415 = vmatmul.mubr.msk.f32.gmra.mrb[4].mxu0 %vm4904_vm9, %v10339_v41 }
 0x876   :  { %9417 = vmatprep.mubr.msk.f32.mxu0 %vm10370_vm8, %v16172_v26 }
 0x879   :  { %9418 = vmatmul.mubr.msk.f32.gmra.mrb[6].mxu0 %vm4904_vm9, %v10340_v3 }
 0x87a   :  { %9420 = vmatprep.mubr.msk.f32.mxu0 %vm10370_vm8, %v16172_v26 }
 0x87d   :  { %9421 = vmatmul.mubr.msk.f32.gmra.mrb[8].mxu0 %vm4904_vm9, %v10341_v5 }
 0x87e   :  { %9423 = vmatprep.mubr.msk.f32.mxu0 %vm10370_vm8, %v16172_v26 }
 0x881   :  { %9424 = vmatmul.mubr.msk.f32.gmra.mrb[10].mxu0 %vm4904_vm9, %v10342_v47  ;;  %v7506_v47 = vld [vmem:[%s15393_s11] sm:$0xff] }
 0x8ac   :  { %v8766_v54 = vpop.f32.mrb[228].mxu0 }
 0x8ad   :  { %v8767_v43 = vpop.f32.mrb[229].mxu0 }
 0x8ae   :  { %v8768_v17 = vadd.f32 %v8767_v43, %v8766_v54  ;;  %v7507_v43 = vld [vmem:[%s15393_s11 + $0x8] sm:$0xff] }
 0x8b0   :  { %v8769_v27 = vpop.f32.mrb[230].mxu0 }
 0x8b1   :  { %v8770_v40 = vpop.f32.mrb[231].mxu0 }
 0x8b2   :  { %v8771_v28 = vadd.f32 %v8770_v40, %v8769_v27 }
 0x8b4   :  { %v8772_v59 = vpop.f32.mrb[232].mxu0 }
 0x8b5   :  { %v8773_v9 = vpop.f32.mrb[233].mxu0 }
 0x8b6   :  { %v8774_v46 = vadd.f32 %v8773_v9, %v8772_v59 }
 0x8b8   :  { %v8775_v60 = vpop.f32.mrb[234].mxu0 }
 0x8b9   :  { %v8776_v44 = vpop.f32.mrb[235].mxu0 }
 0x8ba   :  { %v8777_v4 = vadd.f32 %v8776_v44, %v8775_v60  ;;  %v7508_v44 = vld [vmem:[%s15393_s11 + $0x10] sm:$0xff] }
 0x8bc   :  { %v8778_v23 = vpop.f32.mrb[236].mxu0 }
 0x8bd   :  { %v8779_v1 = vpop.f32.mrb[237].mxu0 }
 0x8be   :  { %v8780_v11 = vadd.f32 %v8779_v1, %v8778_v23  ;;  %v7509_v23 = vld [vmem:[%s15393_s11 + $0x18] sm:$0xff] }
 0x8ec   :  { %v8813_v35 = vpop.f32.mrb[238].mxu0 }
 0x8ed   :  { %v8814_v53 = vpop.f32.mrb[239].mxu0 }
 0x8ee   :  { %v8815_v62 = vadd.f32 %v8814_v53, %v8813_v35 }
 0x8f0   :  { %v7303_v10 = vadd.f32 %v8815_v62, %v8768_v17  ;;  %v8816_v57 = vpop.f32.mrb[240].mxu0  ;;  %v7510_v62 = vld [vmem:[%s15393_s11 + $0x20] sm:$0xf] }
 0x8f1   :  { %v8817_v12 = vpop.f32.mrb[241].mxu0 }
 0x8f2   :  { %v8818_v49 = vadd.f32 %v8817_v12, %v8816_v57 }
 0x8f4   :  { %v7308_v30 = vadd.f32 %v8818_v49, %v8771_v28  ;;  %v8819_v63 = vpop.f32.mrb[242].mxu0 }
 0x8f5   :  { %v8820_v8 = vpop.f32.mrb[243].mxu0 }
 0x8f6   :  { %v8821_v55 = vadd.f32 %v8820_v8, %v8819_v63 }
 0x8f8   :  { %v7313_v7 = vadd.f32 %v8821_v55, %v8774_v46  ;;  %v8822_v21 = vpop.f32.mrb[244].mxu0 }
 0x8f9   :  { %v8823_v38 = vpop.f32.mrb[245].mxu0 }
 0x8fa   :  { %v8824_v29 = vadd.f32 %v8823_v38, %v8822_v21 }
 0x8fc   :  { %v7318_v2 = vadd.f32 %v8824_v29, %v8777_v4  ;;  %v8825_v19 = vpop.f32.mrb[246].mxu0 }
 0x8fd   :  { %v8826_v61 = vpop.f32.mrb[247].mxu0 }
 0x8fe   :  { %v8827_v58 = vadd.f32 %v8826_v61, %v8825_v19 }
 0x900   :  { %v7323_v15 = vadd.f32 %v8827_v58, %v8780_v11 }
 0x92c   :  { %v8860_v14 = vpop.f32.mrb[248].mxu0 }
 0x92d   :  { %v8861_v31 = vpop.f32.mrb[249].mxu0 }
 0x92e   :  { %v8862_v48 = vadd.f32 %v8861_v31, %v8860_v14 }
 0x930   :  { %v8863_v13 = vpop.f32.mrb[250].mxu0  ;;  %v7393_v24 = vadd.f32 %v8862_v48, %v7303_v10 }
 0x931   :  { %v8864_v18 = vpop.f32.mrb[251].mxu0 }
 0x932   :  { %v8865_v56 = vadd.f32 %v8864_v18, %v8863_v13 }
 0x934   :  { %v8866_v33 = vpop.f32.mrb[252].mxu0  ;;  %v7398_v25 = vadd.f32 %v8865_v56, %v7308_v30 }
 0x935   :  { %v8867_v22 = vpop.f32.mrb[253].mxu0 }
 0x936   :  { %v8868_v45 = vadd.f32 %v8867_v22, %v8866_v33 }
 0x938   :  { %v8869_v20 = vpop.f32.mrb[254].mxu0  ;;  %v7403_v50 = vadd.f32 %v8868_v45, %v7313_v7 }
 0x939   :  { %v8870_v0 = vpop.f32.mrb[255].mxu0 }
 0x93a   :  { %v8871_v52 = vadd.f32 %v8870_v0, %v8869_v20 }
 0x93c   :  { %v8872_v39 = vpop.f32.mrb[0].mxu0  ;;  %v7408_v16 = vadd.f32 %v8871_v52, %v7318_v2 }
 0x93d   :  { %v8873_v42 = vpop.f32.mrb[1].mxu0 }
 0x93e   :  { %v8874_v36 = vadd.f32 %v8873_v42, %v8872_v39 }
 0x940   :  { %v7413_v6 = vadd.f32 %v8874_v36, %v7323_v15 }
 0x944   :  { %v7482_v41 = vpop.f32.mrb[2].mxu0 }
 0x945   :  { %v7483_v3 = vadd.f32 %v7482_v41, %v7393_v24  ;;  %v9413_v5 = vpop.f32.mrb[3].mxu0 }
 0x947   :  { %v7511_v40 = vmul.f32 %v7506_v47, %v7483_v3 }
 0x948   :  { %v7487_v54 = vpop.f32.mrb[4].mxu0 }
 0x949   :  { %v7488_v17 = vadd.f32 %v7487_v54, %v7398_v25  ;;  %v9416_v27 = vpop.f32.mrb[5].mxu0 }
 0x94b   :  { %v7512_v28 = vmul.f32 %v7507_v43, %v7488_v17 }
 0x94c   :  { %v7492_v59 = vpop.f32.mrb[6].mxu0 }
 0x94d   :  { %v7516_v9 = vpack.c.bf16 %v7512_v28, %v7511_v40  ;;  %v7493_v46 = vadd.f32 %v7492_v59, %v7403_v50  ;;  %v9419_v60 = vpop.f32.mrb[7].mxu0 }
 0x94f   :  { %9433 = vmatmul.mubr.msk.bf16.vlgmr.msra.gmra.mrb[28].mxu1 %vm2001_vm5, %v7516_v9  ;;  %v7513_v11 = vmul.f32 %v7508_v44, %v7493_v46 }
 0x950   :  { %v7497_v4 = vpop.f32.mrb[8].mxu0  ;;  %9436 = vmatprep.mubr.msk.bf16.mxu1 %vm10370_vm8, %v16172_v26 }
 0x951   :  { %v7498_v34 = vadd.f32 %v7497_v4, %v7408_v16  ;;  %v9422_v1 = vpop.f32.mrb[9].mxu0 }
 0x952   :  { %v8295_v1 = vld [vmem:[%s15394_s12] ss:$0 sm:$0xff]  ;;  %s10372_s12 = smov [#allocation2]  }
 0x953   :  { %v7514_v32 = vmul.f32 %v7509_v23, %v7498_v34 }
 0x954   :  { %v7502_v51 = vpop.f32.mrb[10].mxu0 }
 0x955   :  { %v7517_v37 = vpack.c.bf16 %v7514_v32, %v7513_v11  ;;  %v7503_v35 = vadd.f32 %v7502_v51, %v7413_v6  ;;  %v9425_v53 = vpop.f32.mrb[11].mxu0 }
 0x957   :  { %9437 = vmatmul.mubr.msk.bf16.gmra.mrb[32].mxu1 %vm2001_vm5, %v7517_v37  ;;  %v7515_v10 = vmul.f32 %v7510_v62, %v7503_v35  ;;  %v8296_v37 = vld [vmem:[%s15395_s13] ss:$0 sm:$0xff]  ;;  %s7708_s13 = sshll.u32 %s10372_s12, 4  ;;  %s7709_s13 = int_to_ptr.vmem [resolvable:$true] %s7708_s13 }
 0x958   :  { %9440 = vmatprep.mubr.msk.bf16.mxu1 %vm10370_vm8, %v16172_v26  ;;  %s10343_s26 = scalar_lea.vmem %s7709_s13, 640  ;;  %p10348_p1 = scmp.lt.s32.totalorder %s7709_s13, %s7709_s13 }
 0x959   :  { %v7518_v57 = vpack.c.bf16 %v7515_v10, %v7515_v10  ;;  %p10344_p0 = scmp.ne.s32.totalorder %s7709_s13, %s10343_s26  ;;  %p10349_p2 = scmp.lt.s32.totalorder %s10343_s26, %s10343_s26 }
 0x95b   :  { %p10350_p3 = por %p10349_p2, %p10348_p1 }
 0x95d   :  { %p10351_p4 = pnand %p10350_p3, %p10344_p0 }
 0x95f   :  { %9441 = vmatmul.mubr.msk.bf16.gmra.mrb[36].mxu1 %vm2001_vm5, %v7518_v57 }
 0xa22   :  { %v7585_v12 = vpop.f32.mrb[28].mxu1 }
 0xa23   :  { %v7607_v49 = vsel %vm3285_vm6, %v7585_v12, 0.0  ;;  %v9434_v30 = vpop.f32.mrb[29].mxu1 }
 0xa24   :  { %7608 = vadd.xlane.f32.xlu0 %v7607_v49  ;;  %v7588_v63 = vpop.f32.mrb[30].mxu1 }
 0xa25   :  { %v9435_v8 = vpop.f32.mrb[31].mxu1  ;;  %v7610_v55 = vsel %vm3285_vm6, %v7588_v63, 0.0 }
 0xa28   :  { %7611 = vadd.xlane.f32.xlu0 %v7610_v55 }
 0xa2a   :  { %v7593_v7 = vpop.f32.mrb[32].mxu1 }
 0xa2b   :  { %v7613_v21 = vsel %vm3285_vm6, %v7593_v7, 0.0  ;;  %v9438_v38 = vpop.f32.mrb[33].mxu1 }
 0xa2c   :  { %7614 = vadd.xlane.f32.xlu1 %v7613_v21  ;;  %v7596_v26 = vpop.f32.mrb[34].mxu1 }
 0xa2d   :  { %v9439_v29 = vpop.f32.mrb[35].mxu1  ;;  %v7616_v2 = vsel %vm3285_vm6, %v7596_v26, 0.0 }
 0xa30   :  { %7617 = vadd.xlane.f32.xlu1 %v7616_v2 }
 0xa32   :  { %v7601_v19 = vpop.f32.mrb[36].mxu1 }
 0xa33   :  { %v7620_v61 = vsel %vm7619_vm12, %v7601_v19, 0.0  ;;  %v9442_v58 = vpop.f32.mrb[37].mxu1 }
 0xa34   :  { %7621 = vadd.xlane.f32.xlu0 %v7620_v61  ;;  %v7604_v15 = vpop.f32.mrb[38].mxu1 }
 0xa35   :  { %v9443_v14 = vpop.f32.mrb[39].mxu1 }
 0xab1   :  { %v7609_v31 = vpop.xlane.xlu0 %7608 }
 0xab2   :  { %v7624_v48 = vmul.f32 0.015625, %v7609_v31 }
 0xab4   :  { %v7629_v13 = vsub.f32 %v7585_v12, %v7624_v48 }
 0xab5   :  { %v7612_v24 = vpop.xlane.xlu0 %7611 }
 0xab6   :  { %v7625_v18 = vmul.f32 0.015625, %v7612_v24  ;;  %v7634_v56 = vmul.f32 %v7629_v13, %v7629_v13 }
 0xab8   :  { %v7630_v33 = vsub.f32 %v7588_v63, %v7625_v18  ;;  %v7639_v25 = vsel %vm3285_vm6, %v7634_v56, 0.0 }
 0xab9   :  { %7640 = vadd.xlane.f32.xlu1 %v7639_v25  ;;  %v7615_v22 = vpop.xlane.xlu1 %7614 }
 0xaba   :  { %v7635_v45 = vmul.f32 %v7630_v33, %v7630_v33  ;;  %v7626_v20 = vmul.f32 0.015625, %v7615_v22 }
 0xabc   :  { %v7642_v50 = vsel %vm3285_vm6, %v7635_v45, 0.0  ;;  %v7631_v0 = vsub.f32 %v7593_v7, %v7626_v20 }
 0xabd   :  { %7643 = vadd.xlane.f32.xlu0 %v7642_v50  ;;  %v7618_v52 = vpop.xlane.xlu1 %7617 }
 0xabe   :  { %v7627_v39 = vmul.f32 0.015625, %v7618_v52  ;;  %v7636_v16 = vmul.f32 %v7631_v0, %v7631_v0 }
 0xac0   :  { %v7632_v42 = vsub.f32 %v7596_v26, %v7627_v39  ;;  %v7645_v36 = vsel %vm3285_vm6, %v7636_v16, 0.0 }
 0xac1   :  { %7646 = vadd.xlane.f32.xlu1 %v7645_v36  ;;  %v7622_v6 = vpop.xlane.xlu0 %7621 }
 0xac2   :  { %v7637_v41 = vmul.f32 %v7632_v42, %v7632_v42  ;;  %v7628_v3 = vmul.f32 0.015625, %v7622_v6 }
 0xac4   :  { %v7648_v5 = vsel %vm3285_vm6, %v7637_v41, 0.0  ;;  %v7633_v47 = vsub.f32 %v7601_v19, %v7628_v3 }
 0xac5   :  { %7649 = vadd.xlane.f32.xlu0 %v7648_v5 }
 0xac6   :  { %v7638_v54 = vmul.f32 %v7633_v47, %v7633_v47 }
 0xac8   :  { %v7651_v43 = vsel %vm7619_vm12, %v7638_v54, 0.0 }
 0xac9   :  { %7652 = vadd.xlane.f32.xlu1 %v7651_v43 }
 0xb46   :  { %v7641_v17 = vpop.xlane.xlu1 %7640 }
 0xb47   :  { %v7654_v27 = vmul.f32 0.015625, %v7641_v17 }
 0xb49   :  { %v7659_v40 = vadd.f32 1e-06, %v7654_v27 }
 0xb4a   :  { %v7644_v28 = vpop.xlane.xlu0 %7643 }
 0xb4b   :  { %10190 = vrsqrt.f32 %v7659_v40  ;;  %v7655_v59 = vmul.f32 0.015625, %v7644_v28 }
 0xb4d   :  { %v7660_v9 = vadd.f32 1e-06, %v7655_v59 }
 0xb4e   :  { %v7647_v46 = vpop.xlane.xlu1 %7646 }
 0xb4f   :  { %10192 = vrsqrt.f32 %v7660_v9  ;;  %v7656_v60 = vmul.f32 0.015625, %v7647_v46 }
 0xb51   :  { %v7661_v44 = vadd.f32 1e-06, %v7656_v60 }
 0xb52   :  { %v7650_v4 = vpop.xlane.xlu0 %7649 }
 0xb53   :  { %10194 = vrsqrt.f32 %v7661_v44  ;;  %v7657_v23 = vmul.f32 0.015625, %v7650_v4 }
 0xb55   :  { %v10191_v34 = vpop.eup %10190  ;;  %v7662_v11 = vadd.f32 1e-06, %v7657_v23 }
 0xb56   :  { %v7669_v32 = vmul.f32 %v10191_v34, %v7629_v13  ;;  %v7653_v51 = vpop.xlane.xlu1 %7652 }
 0xb57   :  { %10196 = vrsqrt.f32 %v7662_v11  ;;  %v7658_v35 = vmul.f32 0.015625, %v7653_v51 }
 0xb58   :  { %v7681_v53 = vmul.f32 %v8295_v1, %v7669_v32 }
 0xb59   :  { %v10193_v62 = vpop.eup %10192  ;;  %v7663_v10 = vadd.f32 1e-06, %v7658_v35 }
 0xb5a   :  { %v7693_v57 = vadd.f32 %v8296_v37, %v7681_v53  ;;  %v7670_v12 = vmul.f32 %v10193_v62, %v7630_v33 }
 0xb5b   :  { %10198 = vrsqrt.f32 %v7663_v10 }
 0xb5c   :  { %7698 = vst.msk [vmem:[#allocation2] sm:$0xff] %vm3285_vm6, %v7693_v57  ;;  %v7682_v49 = vmul.f32 %v8295_v1, %v7670_v12 }
 0xb5d   :  { %v10195_v30 = vpop.eup %10194 }
 0xb5e   :  { %v7694_v63 = vadd.f32 %v8296_v37, %v7682_v49  ;;  %v7671_v8 = vmul.f32 %v10195_v30, %v7631_v0 }
 0xb60   :  { %7699 = vst.msk [vmem:[#allocation2 + $0x8] sm:$0xff] %vm3285_vm6, %v7694_v63  ;;  %v7683_v55 = vmul.f32 %v8295_v1, %v7671_v8 }
 0xb61   :  { %v10197_v7 = vpop.eup %10196 }
 0xb62   :  { %v7695_v21 = vadd.f32 %v8296_v37, %v7683_v55  ;;  %v7672_v38 = vmul.f32 %v10197_v7, %v7632_v42 }
 0xb64   :  { %7700 = vst.msk [vmem:[#allocation2 + $0x10] sm:$0xff] %vm3285_vm6, %v7695_v21  ;;  %v7684_v26 = vmul.f32 %v8295_v1, %v7672_v38 }
 0xb65   :  { %v10199_v29 = vpop.eup %10198 }
 0xb66   :  { %v7696_v2 = vadd.f32 %v8296_v37, %v7684_v26  ;;  %v7673_v19 = vmul.f32 %v10199_v29, %v7633_v47 }
 0xb68   :  { %7701 = vst.msk [vmem:[#allocation2 + $0x18] sm:$0xff] %vm3285_vm6, %v7696_v2  ;;  %v7685_v61 = vmul.f32 %v8295_v1, %v7673_v19 }
 0xb6a   :  { %v7697_v58 = vadd.f32 %v8296_v37, %v7685_v61 }
 0xb6c   :  { %7702 = vst.msk [vmem:[#allocation2 + $0x20] sm:$0xf] %vm7619_vm12, %v7697_v58 }
 0xb6d   :  { %10354 = shalt.err (!%p10351_p4)
}
 0xb6e   :  { %s10355_s5 = scalar_lea.hbm %s15396_s14, 640 }
 0xb6f   :  { %p10356_p5 = scmp.ne.s32.totalorder %s15396_s14, %s10355_s5  ;;  %p10359_p6 = scmp.lt.u32.totalorder %s10355_s5, %s15396_s14 }
 0xb71   :  { %p10361_p7 = pnand %p10359_p6, %p10356_p5 }
 0xb73   :  { %10364 = shalt.err (!%p10361_p7)
}
 0xb74   :  { %s10373_s30 = smov 128   ;;  %s10374_s15 = smov 8  }
 0xb75   :  { %7714 = dma.vmem_to_hbm [thread:$0]  %s7709_s13, 640, %s15396_s14, [#allocation3], %s10373_s30, %s10373_s30, %s10374_s15  }
 0xb76   :  { %10365 = dma.done.wait [#allocation3], 640  }
 0xb77   :  { %10366 = vsyncadd [#allocation3], 4294966656 }
 0xb78   :  { %7718 = vsyncpa [#allocation3], 1 }

</bundles_post_ra>
